<compile_context>
chip_gen: v7x
topology: tpu7x:2x2x1
jax: 0.10.0
libtpu: 0.0.40
codegen_flags: <defaults>
</compile_context>

<pallas_src>
import functools

import jax
import jax.numpy as jnp
from jax.experimental import pallas as pl
from jax.experimental.pallas import tpu as pltpu

_EPS = 1e-5


def _round_up(x, m):
    return (x + m - 1) // m * m


def _pick_tile_m(m, max_tile=512):
    """Sublane (M) tile: multiple of 16, prefer a divisor of the padded M."""
    mp = _round_up(m, 16)
    if mp <= max_tile:
        return mp, mp
    for t in range(max_tile, 15, -16):
        if mp % t == 0:
            return t, mp
    return max_tile, _round_up(mp, max_tile)


def _pick_tile_128(d, max_tile=512):
    """Lane (N/K) tile: multiple of 128 dividing the 128-rounded dim."""
    dp = _round_up(d, 128)
    if dp <= max_tile:
        return dp, dp
    q = dp // 128
    for t in range(max_tile // 128, 0, -1):
        if q % t == 0:
            return t * 128, dp
    return 128, dp


# ---------------------------------------------------------------------------
# Pallas kernel: tiled matmul + fused BN bias / residual / activation / gate
# ---------------------------------------------------------------------------
def _matmul_kernel(*refs, act, has_res, has_gate):
    x_ref, w_ref, b_ref = refs[0], refs[1], refs[2]
    idx = 3
    r_ref = gb_ref = gc_ref = None
    if has_res:
        r_ref = refs[idx]
        idx += 1
    if has_gate:
        gb_ref, gc_ref = refs[idx], refs[idx + 1]
        idx += 2
    o_ref, acc_ref = refs[idx], refs[idx + 1]

    k = pl.program_id(2)

    @pl.when(k == 0)
    def _():
        acc_ref[...] = jnp.zeros_like(acc_ref)

    acc_ref[...] += jnp.dot(x_ref[...], w_ref[...],
                            preferred_element_type=jnp.float32)

    @pl.when(k == pl.num_programs(2) - 1)
    def _():
        y = acc_ref[...] + b_ref[...]
        if has_res:
            y = y + r_ref[...].astype(jnp.float32)
        if act == "relu":
            y = jnp.maximum(y, 0.0)
        elif act == "tanh":
            y = jnp.tanh(y)
        if has_gate:
            # stable sigmoid via EUP tanh: sig(x) = 0.5*(1 + tanh(x/2))
            gb = gb_ref[...].astype(jnp.float32)
            gc = gc_ref[...].astype(jnp.float32)
            y = y * (0.5 * (jnp.tanh(0.5 * gb) + 1.0))
            y = y * (0.5 * (jnp.tanh(0.5 * gc) + 1.0))
        o_ref[...] = y.astype(o_ref.dtype)


def _matmul_bias_act(x, w, bias, res, gates, *, act):
    """y = act((x @ w) + bias [+ res]) [* sig(g0) * sig(g1)]  -> bf16 [M,N]

    x:[M,K] w:[K,N] (bf16 on the MXU), bias:[N] f32, res/g*: [M,N] bf16 or None.
    """
    M, K = x.shape
    N = w.shape[1]
    TM, Mp = _pick_tile_m(M)
    TN, Np = _pick_tile_128(N)
    TK, Kp = _pick_tile_128(K)

    def pad2(a, rows, cols):
        r, c = a.shape
        if (rows, cols) == (r, c):
            return a
        return jnp.pad(a, ((0, rows - r), (0, cols - c)))

    xp = pad2(x.astype(jnp.bfloat16), Mp, Kp)
    wp = pad2(w.astype(jnp.bfloat16), Kp, Np)
    bp = pad2(bias.astype(jnp.float32).reshape(1, N), 1, Np)

    has_res = res is not None
    has_gate = gates is not None

    inputs = [xp, wp, bp]
    in_specs = [
        pl.BlockSpec((TM, TK), lambda i, j, k: (i, k)),
        pl.BlockSpec((TK, TN), lambda i, j, k: (k, j)),
        pl.BlockSpec((1, TN), lambda i, j, k: (0, j)),
    ]
    mn_spec = pl.BlockSpec((TM, TN), lambda i, j, k: (i, j))
    if has_res:
        inputs.append(pad2(res.astype(jnp.bfloat16), Mp, Np))
        in_specs.append(mn_spec)
    if has_gate:
        for g in gates:
            inputs.append(pad2(g.astype(jnp.bfloat16), Mp, Np))
            in_specs.append(mn_spec)

    out = pl.pallas_call(
        functools.partial(_matmul_kernel, act=act,
                          has_res=has_res, has_gate=has_gate),
        out_shape=jax.ShapeDtypeStruct((Mp, Np), jnp.bfloat16),
        grid=(Mp // TM, Np // TN, Kp // TK),
        in_specs=in_specs,
        out_specs=mn_spec,
        scratch_shapes=[pltpu.VMEM((TM, TN), jnp.float32)],
        compiler_params=pltpu.CompilerParams(
            dimension_semantics=("parallel", "parallel", "arbitrary"),
            vmem_limit_bytes=32 * 1024 * 1024),
    )(*inputs)
    if (Mp, Np) != (M, N):
        out = out[:M, :N]
    return out


# ---------------------------------------------------------------------------
# Conv wrappers (im2col glue in plain JAX, matmul in Pallas)
# ---------------------------------------------------------------------------
def _im2col(x, k, stride, pad):
    n, h, w, c = x.shape
    if pad:
        x = jnp.pad(x, ((0, 0), (pad, pad), (pad, pad), (0, 0)))
    ho = (h + 2 * pad - k) // stride + 1
    wo = (w + 2 * pad - k) // stride + 1
    cols = []
    for i in range(k):
        for j in range(k):
            cols.append(
                x[:, i:i + (ho - 1) * stride + 1:stride,
                  j:j + (wo - 1) * stride + 1:stride, :])
    patches = jnp.concatenate(cols, axis=-1)  # [n, ho, wo, k*k*c]
    return patches.reshape(n * ho * wo, k * k * c), (n, ho, wo)


def _conv2d(x, w_oihw, stride, pad, scale=None, bias=None, act="none",
            residual=None, gates=None):
    """x: NHWC bf16, w: PyTorch OIHW f32. BN scale folded into W, bias in epilogue."""
    o, i, kh, kw = w_oihw.shape
    patches, (n, ho, wo) = _im2col(x, kh, stride, pad)
    w_mat = jnp.transpose(w_oihw, (2, 3, 1, 0)).reshape(kh * kw * i, o)
    if scale is not None:
        w_mat = w_mat * scale[None, :]
    if bias is None:
        bias = jnp.zeros((o,), jnp.float32)
    res2 = None if residual is None else residual.reshape(-1, o)
    g2 = None if gates is None else tuple(g.reshape(-1, o) for g in gates)
    y = _matmul_bias_act(patches, w_mat, bias, res2, g2, act=act)
    return y.reshape(n, ho, wo, o)


def _conv_transpose2d(x, w_iohw, scale, bias, act):
    """ConvTranspose2d(k=4, s=2, p=1, bias=False), single fused matmul.

    Sub-pixel decomposition: all four output parities (rh, rw) are stride-1
    2x2 convs over taps inside one shared 3x3 neighborhood of the (1,1)-padded
    input.  We build a [9*C, 4*O] weight (zeros for unused taps) so one
    pallas_call produces all parities lane-densely, then pixel-shuffle.
    """
    n, h, w, c = x.shape
    o_c = w_iohw.shape[1]
    xe = jnp.pad(x, ((0, 0), (1, 1), (1, 1), (0, 0)))
    patches, _ = _im2col(xe, 3, 1, 0)                 # [n*h*w, 9*c]

    # taps[parity][patch_pos] -> weight tap index (or None => zero block)
    taps = ((3, 1, None), (None, 2, 0))
    zeros = jnp.zeros((c, o_c), w_iohw.dtype)
    par_w = []
    for rh in (0, 1):
        for rw in (0, 1):
            blocks = []
            for a in range(3):
                for b in range(3):
                    kh, kw = taps[rh][a], taps[rw][b]
                    blocks.append(zeros if (kh is None or kw is None)
                                  else w_iohw[:, :, kh, kw])
            par_w.append(jnp.concatenate(blocks, axis=0))   # [9*c, o_c]
    w_mat = jnp.concatenate(par_w, axis=1)                  # [9*c, 4*o_c]
    w_mat = w_mat * jnp.tile(scale, 4)[None, :]
    bias4 = jnp.tile(bias, 4)

    y = _matmul_bias_act(patches, w_mat, bias4, None, None, act=act)
    y = y.reshape(n, h, w, 2, 2, o_c)                       # (..., rh, rw, O)
    y = jnp.transpose(y, (0, 1, 3, 2, 4, 5)).reshape(n, 2 * h, 2 * w, o_c)
    return y


def _fold_bn(bn):
    scale = bn["gamma"] / jnp.sqrt(bn["var"] + _EPS)
    bias = bn["beta"] - bn["mean"] * scale
    return scale, bias


# ---------------------------------------------------------------------------
# Parameter init (deterministic, PyTorch shape conventions)
# ---------------------------------------------------------------------------
class _KeyGen:
    def __init__(self, key):
        self.key = key

    def __call__(self):
        self.key, k = jax.random.split(self.key)
        return k


def _init_conv(kg, out_c, in_c, k):
    return 0.1 * jax.random.normal(kg(), (out_c, in_c, k, k), jnp.float32)


def _init_convT(kg, in_c, out_c, k):
    return 0.1 * jax.random.normal(kg(), (in_c, out_c, k, k), jnp.float32)


def _init_bn(kg, c):
    return {
        "gamma": 1.0 + 0.1 * jax.random.normal(kg(), (c,), jnp.float32),
        "beta": 0.1 * jax.random.normal(kg(), (c,), jnp.float32),
        "mean": 0.1 * jax.random.normal(kg(), (c,), jnp.float32),
        "var": jnp.abs(1.0 + 0.1 * jax.random.normal(kg(), (c,), jnp.float32)),
    }


def _init_resblock(kg, c):
    return {"conv1": _init_conv(kg, c, c, 3), "bn1": _init_bn(kg, c),
            "conv2": _init_conv(kg, c, c, 3), "bn2": _init_bn(kg, c)}


def _init_inconv(kg, in_c, out_c):
    return {"conv": _init_conv(kg, out_c, in_c, 3), "bn": _init_bn(kg, out_c)}


def _init_down2x(kg, in_c, out_c):
    return {"conv": _init_conv(kg, out_c, in_c, 4), "bn": _init_bn(kg, out_c),
            "res": _init_resblock(kg, out_c)}


def _init_up2x(kg, in_c, out_c):
    return {"conv": _init_convT(kg, in_c, out_c, 4), "bn": _init_bn(kg, out_c),
            "res": _init_resblock(kg, out_c)}


def _init_outconv(kg, in_c, out_c):
    return {"res": [_init_resblock(kg, in_c) for _ in range(4)],
            "conv": _init_conv(kg, out_c, in_c, 1)}


def init_netg(key, in1_c, in2_c, in3_c, out_c, ngf):
    kg = _KeyGen(key)
    p = {}
    for name, inc in (("in1", in1_c), ("in2", in2_c), ("in3", in3_c)):
        p[f"{name}_conv1"] = _init_inconv(kg, inc, ngf)
        p[f"{name}_down1"] = _init_down2x(kg, ngf, ngf * 2)
        p[f"{name}_down2"] = _init_down2x(kg, ngf * 2, ngf * 4)
        p[f"{name}_down3"] = _init_down2x(kg, ngf * 4, ngf * 8)
        p[f"{name}_down4"] = _init_down2x(kg, ngf * 8, ngf * 16)
    p["out_up1"] = _init_up2x(kg, ngf * 16, ngf * 8)
    p["out_up2"] = _init_up2x(kg, ngf * 8, ngf * 4)
    p["out_up3"] = _init_up2x(kg, ngf * 4, ngf * 2)
    p["out_up4"] = _init_up2x(kg, ngf * 2, ngf)
    p["out_conv1"] = _init_outconv(kg, ngf, out_c)
    return p


# ---------------------------------------------------------------------------
# Module forwards
# ---------------------------------------------------------------------------
def _resblock(p, x, gates=None):
    s1, b1 = _fold_bn(p["bn1"])
    h = _conv2d(x, p["conv1"], 1, 1, s1, b1, "relu")
    s2, b2 = _fold_bn(p["bn2"])
    # conv2 + BN + residual add (+ optional fused sigmoid gating)
    return _conv2d(h, p["conv2"], 1, 1, s2, b2, "none",
                   residual=x, gates=gates)


def _inconv(p, x):
    s, b = _fold_bn(p["bn"])
    return _conv2d(x, p["conv"], 1, 1, s, b, "relu")


def _down2x(p, x, gates=None):
    s, b = _fold_bn(p["bn"])
    h = _conv2d(x, p["conv"], 2, 1, s, b, "relu")
    return _resblock(p["res"], h, gates=gates)


def _up2x(p, x, gates=None):
    s, b = _fold_bn(p["bn"])
    h = _conv_transpose2d(x, p["conv"], s, b, "relu")
    return _resblock(p["res"], h, gates=gates)


def _outconv(p, x):
    for rp in p["res"]:
        x = _resblock(rp, x)
    return _conv2d(x, p["conv"], 1, 0, None, None, "tanh")


@jax.jit
def netg_forward(p, x1, x2, x3):
    """x1, x2, x3: NCHW (PyTorch convention). Returns NCHW f32."""
    def enc(name, x, gates4=None):
        x = jnp.transpose(x, (0, 2, 3, 1)).astype(jnp.bfloat16)  # NCHW -> NHWC
        c1 = _inconv(p[f"{name}_conv1"], x)
        d1 = _down2x(p[f"{name}_down1"], c1)
        d2 = _down2x(p[f"{name}_down2"], d1)
        d3 = _down2x(p[f"{name}_down3"], d2)
        d4 = _down2x(p[f"{name}_down4"], d3, gates=gates4)
        return d1, d2, d3, d4

    x2d1, x2d2, x2d3, x2d4 = enc("in2", x2)
    x3d1, x3d2, x3d3, x3d4 = enc("in3", x3)
    # gate y = x1_d4 * sig(x2_d4) * sig(x3_d4) fused into in1_down4's resblock
    _, _, _, y = enc("in1", x1, gates4=(x2d4, x3d4))

    y = _up2x(p["out_up1"], y, gates=(x2d3, x3d3))
    y = _up2x(p["out_up2"], y, gates=(x2d2, x3d2))
    y = _up2x(p["out_up3"], y, gates=(x2d1, x3d1))
    y = _up2x(p["out_up4"], y)
    y = _outconv(p["out_conv1"], y)
    return jnp.transpose(y.astype(jnp.float32), (0, 3, 1, 2))   # NHWC -> NCHW


# ---------------------------------------------------------------------------
if __name__ == "__main__":
    key = jax.random.PRNGKey(0)
    pkey, k1, k2, k3 = jax.random.split(key, 4)

    ngf = 8                       # small synthetic config (default is 64)
    in1_c, in2_c, in3_c, out_c = 3, 1, 1, 3
    B, H, W = 2, 16, 16           # spatial must be divisible by 16

    params = init_netg(pkey, in1_c, in2_c, in3_c, out_c, ngf)
    x1 = jax.random.normal(k1, (B, in1_c, H, W), jnp.float32)
    x2 = jax.random.normal(k2, (B, in2_c, H, W), jnp.float32)
    x3 = jax.random.normal(k3, (B, in3_c, H, W), jnp.float32)

    y = netg_forward(params, x1, x2, x3)
    y = jax.block_until_ready(y)
    assert y.shape == (B, out_c, H, W), y.shape
    assert bool(jnp.all(jnp.isfinite(y)))
    print("KERNEL_OK")
</pallas_src>

<mosaic_0001>
module attributes {stable_mosaic.version = 11 : i64} {
  func.func @_matmul_kernel(%arg0: i32, %arg1: i32, %arg2: i32, %arg3: memref<512x128xbf16, #tpu.memory_space<vmem>>, %arg4: memref<128x128xbf16, #tpu.memory_space<vmem>>, %arg5: memref<1x128xf32, #tpu.memory_space<vmem>>, %arg6: memref<512x128xbf16, #tpu.memory_space<vmem>>, %arg7: memref<512x128xf32, #tpu.memory_space<vmem>>) attributes {dimension_semantics = [#tpu.dimension_semantics<parallel>, #tpu.dimension_semantics<parallel>, #tpu.dimension_semantics<arbitrary>], iteration_bounds = array<i64: 1, 1, 1>, scalar_prefetch = 0 : i64, scratch_operands = 1 : i64, tpu.core_type = #tpu.core_type<tc>, window_params = [{transform_indices = @transform_0, window_bounds = array<i64: 512, 128>}, {transform_indices = @transform_1, window_bounds = array<i64: 128, 128>}, {transform_indices = @transform_2, window_bounds = array<i64: 1, 128>}, {transform_indices = @transform_3, window_bounds = array<i64: 512, 128>}]} {
    %c0_i32 = arith.constant 0 : i32
    %0 = arith.cmpi eq, %arg2, %c0_i32 : i32
    %1 = arith.extui %0 : i1 to i32
    %c0_i32_0 = arith.constant 0 : i32
    %2 = arith.cmpi ne, %1, %c0_i32_0 : i32
    scf.if %2 {
      %cst_10 = arith.constant 0.000000e+00 : f32
      %12 = vector.broadcast %cst_10 : f32 to vector<512x128xf32>
      %c0_11 = arith.constant 0 : index
      %c0_12 = arith.constant 0 : index
      %13 = vector.load %arg7[%c0_11, %c0_12] : memref<512x128xf32, #tpu.memory_space<vmem>>, vector<512x128xf32>
      tpu.vector_store %arg7[%c0_11, %c0_12], %12 {strides = array<i32>} : memref<512x128xf32, #tpu.memory_space<vmem>>, vector<512x128xf32>,
    } else {
    }
    %c0 = arith.constant 0 : index
    %c0_1 = arith.constant 0 : index
    %3 = vector.load %arg7[%c0, %c0_1] : memref<512x128xf32, #tpu.memory_space<vmem>>, vector<512x128xf32>
    %c0_2 = arith.constant 0 : index
    %c0_3 = arith.constant 0 : index
    %4 = vector.load %arg3[%c0_2, %c0_3] : memref<512x128xbf16, #tpu.memory_space<vmem>>, vector<512x128xbf16>
    %c0_4 = arith.constant 0 : index
    %c0_5 = arith.constant 0 : index
    %5 = vector.load %arg4[%c0_4, %c0_5] : memref<128x128xbf16, #tpu.memory_space<vmem>>, vector<128x128xbf16>
    %cst = arith.constant dense<0.000000e+00> : vector<512x128xf32>
    %6 = tpu.matmul %4, %5, %cst {dimension_numbers = #tpu.dot_dimension_numbers<[1], [0], [0], [1], [0, 0, 1, 1], [], []>} : vector<512x128xbf16>, vector<128x128xbf16>, vector<512x128xf32> -> vector<512x128xf32>
    %7 = arith.addf %3, %6 : vector<512x128xf32>
    %c0_6 = arith.constant 0 : index
    %c0_7 = arith.constant 0 : index
    %8 = vector.load %arg7[%c0_6, %c0_7] : memref<512x128xf32, #tpu.memory_space<vmem>>, vector<512x128xf32>
    tpu.vector_store %arg7[%c0_6, %c0_7], %7 {strides = array<i32>} : memref<512x128xf32, #tpu.memory_space<vmem>>, vector<512x128xf32>,
    %c0_i32_8 = arith.constant 0 : i32
    %9 = arith.cmpi eq, %arg2, %c0_i32_8 : i32
    %10 = arith.extui %9 : i1 to i32
    %c0_i32_9 = arith.constant 0 : i32
    %11 = arith.cmpi ne, %10, %c0_i32_9 : i32
    scf.if %11 {
      %c0_10 = arith.constant 0 : index
      %c0_11 = arith.constant 0 : index
      %12 = vector.load %arg7[%c0_10, %c0_11] : memref<512x128xf32, #tpu.memory_space<vmem>>, vector<512x128xf32>
      %c0_12 = arith.constant 0 : index
      %c0_13 = arith.constant 0 : index
      %13 = vector.load %arg5[%c0_12, %c0_13] : memref<1x128xf32, #tpu.memory_space<vmem>>, vector<1x128xf32>
      %14 = vector.broadcast %13 : vector<1x128xf32> to vector<512x128xf32>
      %15 = arith.addf %12, %14 : vector<512x128xf32>
      %cst_14 = arith.constant 0.000000e+00 : f32
      %16 = vector.broadcast %cst_14 : f32 to vector<512x128xf32>
      %17 = arith.maximumf %15, %16 : vector<512x128xf32>
      %18 = arith.truncf %17 : vector<512x128xf32> to vector<512x128xbf16>
      %c0_15 = arith.constant 0 : index
      %c0_16 = arith.constant 0 : index
      %19 = vector.load %arg6[%c0_15, %c0_16] : memref<512x128xbf16, #tpu.memory_space<vmem>>, vector<512x128xbf16>
      tpu.vector_store %arg6[%c0_15, %c0_16], %18 {strides = array<i32>} : memref<512x128xbf16, #tpu.memory_space<vmem>>, vector<512x128xbf16>,
    } else {
    }
    return
  }
  func.func @transform_0(%arg0: i32, %arg1: i32, %arg2: i32) -> (i32, i32) {
    %c0_i32 = arith.constant 0 : i32
    return %arg0, %arg2 : i32, i32
  }
  func.func @transform_1(%arg0: i32, %arg1: i32, %arg2: i32) -> (i32, i32) {
    %c0_i32 = arith.constant 0 : i32
    return %arg2, %arg1 : i32, i32
  }
  func.func @transform_2(%arg0: i32, %arg1: i32, %arg2: i32) -> (i32, i32) {
    %c0_i32 = arith.constant 0 : i32
    %c0_i32_0 = arith.constant 0 : i32
    return %c0_i32, %arg1 : i32, i32
  }
  func.func @transform_3(%arg0: i32, %arg1: i32, %arg2: i32) -> (i32, i32) {
    %c0_i32 = arith.constant 0 : i32
    return %arg0, %arg1 : i32, i32
  }
}

module attributes {stable_mosaic.version = 11 : i64} {
  func.func @_matmul_kernel(%arg0: i32, %arg1: i32, %arg2: i32, %arg3: memref<128x128xbf16, #tpu.memory_space<vmem>>, %arg4: memref<128x128xbf16, #tpu.memory_space<vmem>>, %arg5: memref<1x128xf32, #tpu.memory_space<vmem>>, %arg6: memref<128x128xbf16, #tpu.memory_space<vmem>>, %arg7: memref<128x128xf32, #tpu.memory_space<vmem>>) attributes {dimension_semantics = [#tpu.dimension_semantics<parallel>, #tpu.dimension_semantics<parallel>, #tpu.dimension_semantics<arbitrary>], iteration_bounds = array<i64: 1, 1, 1>, scalar_prefetch = 0 : i64, scratch_operands = 1 : i64, tpu.core_type = #tpu.core_type<tc>, window_params = [{transform_indices = @transform_0, window_bounds = array<i64: 128, 128>}, {transform_indices = @transform_1, window_bounds = array<i64: 128, 128>}, {transform_indices = @transform_2, window_bounds = array<i64: 1, 128>}, {transform_indices = @transform_3, window_bounds = array<i64: 128, 128>}]} {
    %c0_i32 = arith.constant 0 : i32
    %0 = arith.cmpi eq, %arg2, %c0_i32 : i32
    %1 = arith.extui %0 : i1 to i32
    %c0_i32_0 = arith.constant 0 : i32
    %2 = arith.cmpi ne, %1, %c0_i32_0 : i32
    scf.if %2 {
      %cst_10 = arith.constant 0.000000e+00 : f32
      %12 = vector.broadcast %cst_10 : f32 to vector<128x128xf32>
      %c0_11 = arith.constant 0 : index
      %c0_12 = arith.constant 0 : index
      %13 = vector.load %arg7[%c0_11, %c0_12] : memref<128x128xf32, #tpu.memory_space<vmem>>, vector<128x128xf32>
      tpu.vector_store %arg7[%c0_11, %c0_12], %12 {strides = array<i32>} : memref<128x128xf32, #tpu.memory_space<vmem>>, vector<128x128xf32>,
    } else {
    }
    %c0 = arith.constant 0 : index
    %c0_1 = arith.constant 0 : index
    %3 = vector.load %arg7[%c0, %c0_1] : memref<128x128xf32, #tpu.memory_space<vmem>>, vector<128x128xf32>
    %c0_2 = arith.constant 0 : index
    %c0_3 = arith.constant 0 : index
    %4 = vector.load %arg3[%c0_2, %c0_3] : memref<128x128xbf16, #tpu.memory_space<vmem>>, vector<128x128xbf16>
    %c0_4 = arith.constant 0 : index
    %c0_5 = arith.constant 0 : index
    %5 = vector.load %arg4[%c0_4, %c0_5] : memref<128x128xbf16, #tpu.memory_space<vmem>>, vector<128x128xbf16>
    %cst = arith.constant dense<0.000000e+00> : vector<128x128xf32>
    %6 = tpu.matmul %4, %5, %cst {dimension_numbers = #tpu.dot_dimension_numbers<[1], [0], [0], [1], [0, 0, 1, 1], [], []>} : vector<128x128xbf16>, vector<128x128xbf16>, vector<128x128xf32> -> vector<128x128xf32>
    %7 = arith.addf %3, %6 : vector<128x128xf32>
    %c0_6 = arith.constant 0 : index
    %c0_7 = arith.constant 0 : index
    %8 = vector.load %arg7[%c0_6, %c0_7] : memref<128x128xf32, #tpu.memory_space<vmem>>, vector<128x128xf32>
    tpu.vector_store %arg7[%c0_6, %c0_7], %7 {strides = array<i32>} : memref<128x128xf32, #tpu.memory_space<vmem>>, vector<128x128xf32>,
    %c0_i32_8 = arith.constant 0 : i32
    %9 = arith.cmpi eq, %arg2, %c0_i32_8 : i32
    %10 = arith.extui %9 : i1 to i32
    %c0_i32_9 = arith.constant 0 : i32
    %11 = arith.cmpi ne, %10, %c0_i32_9 : i32
    scf.if %11 {
      %c0_10 = arith.constant 0 : index
      %c0_11 = arith.constant 0 : index
      %12 = vector.load %arg7[%c0_10, %c0_11] : memref<128x128xf32, #tpu.memory_space<vmem>>, vector<128x128xf32>
      %c0_12 = arith.constant 0 : index
      %c0_13 = arith.constant 0 : index
      %13 = vector.load %arg5[%c0_12, %c0_13] : memref<1x128xf32, #tpu.memory_space<vmem>>, vector<1x128xf32>
      %14 = vector.broadcast %13 : vector<1x128xf32> to vector<128x128xf32>
      %15 = arith.addf %12, %14 : vector<128x128xf32>
      %cst_14 = arith.constant 0.000000e+00 : f32
      %16 = vector.broadcast %cst_14 : f32 to vector<128x128xf32>
      %17 = arith.maximumf %15, %16 : vector<128x128xf32>
      %18 = arith.truncf %17 : vector<128x128xf32> to vector<128x128xbf16>
      %c0_15 = arith.constant 0 : index
      %c0_16 = arith.constant 0 : index
      %19 = vector.load %arg6[%c0_15, %c0_16] : memref<128x128xbf16, #tpu.memory_space<vmem>>, vector<128x128xbf16>
      tpu.vector_store %arg6[%c0_15, %c0_16], %18 {strides = array<i32>} : memref<128x128xbf16, #tpu.memory_space<vmem>>, vector<128x128xbf16>,
    } else {
    }
    return
  }
  func.func @transform_0(%arg0: i32, %arg1: i32, %arg2: i32) -> (i32, i32) {
    %c0_i32 = arith.constant 0 : i32
    return %arg0, %arg2 : i32, i32
  }
  func.func @transform_1(%arg0: i32, %arg1: i32, %arg2: i32) -> (i32, i32) {
    %c0_i32 = arith.constant 0 : i32
    return %arg2, %arg1 : i32, i32
  }
  func.func @transform_2(%arg0: i32, %arg1: i32, %arg2: i32) -> (i32, i32) {
    %c0_i32 = arith.constant 0 : i32
    %c0_i32_0 = arith.constant 0 : i32
    return %c0_i32, %arg1 : i32, i32
  }
  func.func @transform_3(%arg0: i32, %arg1: i32, %arg2: i32) -> (i32, i32) {
    %c0_i32 = arith.constant 0 : i32
    return %arg0, %arg1 : i32, i32
  }
}

module attributes {stable_mosaic.version = 11 : i64} {
  func.func @_matmul_kernel(%arg0: i32, %arg1: i32, %arg2: i32, %arg3: memref<128x256xbf16, #tpu.memory_space<vmem>>, %arg4: memref<256x128xbf16, #tpu.memory_space<vmem>>, %arg5: memref<1x128xf32, #tpu.memory_space<vmem>>, %arg6: memref<128x128xbf16, #tpu.memory_space<vmem>>, %arg7: memref<128x128xf32, #tpu.memory_space<vmem>>) attributes {dimension_semantics = [#tpu.dimension_semantics<parallel>, #tpu.dimension_semantics<parallel>, #tpu.dimension_semantics<arbitrary>], iteration_bounds = array<i64: 1, 1, 1>, scalar_prefetch = 0 : i64, scratch_operands = 1 : i64, tpu.core_type = #tpu.core_type<tc>, window_params = [{transform_indices = @transform_0, window_bounds = array<i64: 128, 256>}, {transform_indices = @transform_1, window_bounds = array<i64: 256, 128>}, {transform_indices = @transform_2, window_bounds = array<i64: 1, 128>}, {transform_indices = @transform_3, window_bounds = array<i64: 128, 128>}]} {
    %c0_i32 = arith.constant 0 : i32
    %0 = arith.cmpi eq, %arg2, %c0_i32 : i32
    %1 = arith.extui %0 : i1 to i32
    %c0_i32_0 = arith.constant 0 : i32
    %2 = arith.cmpi ne, %1, %c0_i32_0 : i32
    scf.if %2 {
      %cst_10 = arith.constant 0.000000e+00 : f32
      %12 = vector.broadcast %cst_10 : f32 to vector<128x128xf32>
      %c0_11 = arith.constant 0 : index
      %c0_12 = arith.constant 0 : index
      %13 = vector.load %arg7[%c0_11, %c0_12] : memref<128x128xf32, #tpu.memory_space<vmem>>, vector<128x128xf32>
      tpu.vector_store %arg7[%c0_11, %c0_12], %12 {strides = array<i32>} : memref<128x128xf32, #tpu.memory_space<vmem>>, vector<128x128xf32>,
    } else {
    }
    %c0 = arith.constant 0 : index
    %c0_1 = arith.constant 0 : index
    %3 = vector.load %arg7[%c0, %c0_1] : memref<128x128xf32, #tpu.memory_space<vmem>>, vector<128x128xf32>
    %c0_2 = arith.constant 0 : index
    %c0_3 = arith.constant 0 : index
    %4 = vector.load %arg3[%c0_2, %c0_3] : memref<128x256xbf16, #tpu.memory_space<vmem>>, vector<128x256xbf16>
    %c0_4 = arith.constant 0 : index
    %c0_5 = arith.constant 0 : index
    %5 = vector.load %arg4[%c0_4, %c0_5] : memref<256x128xbf16, #tpu.memory_space<vmem>>, vector<256x128xbf16>
    %cst = arith.constant dense<0.000000e+00> : vector<128x128xf32>
    %6 = tpu.matmul %4, %5, %cst {dimension_numbers = #tpu.dot_dimension_numbers<[1], [0], [0], [1], [0, 0, 1, 1], [], []>} : vector<128x256xbf16>, vector<256x128xbf16>, vector<128x128xf32> -> vector<128x128xf32>
    %7 = arith.addf %3, %6 : vector<128x128xf32>
    %c0_6 = arith.constant 0 : index
    %c0_7 = arith.constant 0 : index
    %8 = vector.load %arg7[%c0_6, %c0_7] : memref<128x128xf32, #tpu.memory_space<vmem>>, vector<128x128xf32>
    tpu.vector_store %arg7[%c0_6, %c0_7], %7 {strides = array<i32>} : memref<128x128xf32, #tpu.memory_space<vmem>>, vector<128x128xf32>,
    %c0_i32_8 = arith.constant 0 : i32
    %9 = arith.cmpi eq, %arg2, %c0_i32_8 : i32
    %10 = arith.extui %9 : i1 to i32
    %c0_i32_9 = arith.constant 0 : i32
    %11 = arith.cmpi ne, %10, %c0_i32_9 : i32
    scf.if %11 {
      %c0_10 = arith.constant 0 : index
      %c0_11 = arith.constant 0 : index
      %12 = vector.load %arg7[%c0_10, %c0_11] : memref<128x128xf32, #tpu.memory_space<vmem>>, vector<128x128xf32>
      %c0_12 = arith.constant 0 : index
      %c0_13 = arith.constant 0 : index
      %13 = vector.load %arg5[%c0_12, %c0_13] : memref<1x128xf32, #tpu.memory_space<vmem>>, vector<1x128xf32>
      %14 = vector.broadcast %13 : vector<1x128xf32> to vector<128x128xf32>
      %15 = arith.addf %12, %14 : vector<128x128xf32>
      %cst_14 = arith.constant 0.000000e+00 : f32
      %16 = vector.broadcast %cst_14 : f32 to vector<128x128xf32>
      %17 = arith.maximumf %15, %16 : vector<128x128xf32>
      %18 = arith.truncf %17 : vector<128x128xf32> to vector<128x128xbf16>
      %c0_15 = arith.constant 0 : index
      %c0_16 = arith.constant 0 : index
      %19 = vector.load %arg6[%c0_15, %c0_16] : memref<128x128xbf16, #tpu.memory_space<vmem>>, vector<128x128xbf16>
      tpu.vector_store %arg6[%c0_15, %c0_16], %18 {strides = array<i32>} : memref<128x128xbf16, #tpu.memory_space<vmem>>, vector<128x128xbf16>,
    } else {
    }
    return
  }
  func.func @transform_0(%arg0: i32, %arg1: i32, %arg2: i32) -> (i32, i32) {
    %c0_i32 = arith.constant 0 : i32
    return %arg0, %arg2 : i32, i32
  }
  func.func @transform_1(%arg0: i32, %arg1: i32, %arg2: i32) -> (i32, i32) {
    %c0_i32 = arith.constant 0 : i32
    return %arg2, %arg1 : i32, i32
  }
  func.func @transform_2(%arg0: i32, %arg1: i32, %arg2: i32) -> (i32, i32) {
    %c0_i32 = arith.constant 0 : i32
    %c0_i32_0 = arith.constant 0 : i32
    return %c0_i32, %arg1 : i32, i32
  }
  func.func @transform_3(%arg0: i32, %arg1: i32, %arg2: i32) -> (i32, i32) {
    %c0_i32 = arith.constant 0 : i32
    return %arg0, %arg1 : i32, i32
  }
}

module attributes {stable_mosaic.version = 11 : i64} {
  func.func @_matmul_kernel(%arg0: i32, %arg1: i32, %arg2: i32, %arg3: memref<128x256xbf16, #tpu.memory_space<vmem>>, %arg4: memref<256x128xbf16, #tpu.memory_space<vmem>>, %arg5: memref<1x128xf32, #tpu.memory_space<vmem>>, %arg6: memref<128x128xbf16, #tpu.memory_space<vmem>>, %arg7: memref<128x128xbf16, #tpu.memory_space<vmem>>, %arg8: memref<128x128xf32, #tpu.memory_space<vmem>>) attributes {dimension_semantics = [#tpu.dimension_semantics<parallel>, #tpu.dimension_semantics<parallel>, #tpu.dimension_semantics<arbitrary>], iteration_bounds = array<i64: 1, 1, 1>, scalar_prefetch = 0 : i64, scratch_operands = 1 : i64, tpu.core_type = #tpu.core_type<tc>, window_params = [{transform_indices = @transform_0, window_bounds = array<i64: 128, 256>}, {transform_indices = @transform_1, window_bounds = array<i64: 256, 128>}, {transform_indices = @transform_2, window_bounds = array<i64: 1, 128>}, {transform_indices = @transform_3, window_bounds = array<i64: 128, 128>}, {transform_indices = @transform_4, window_bounds = array<i64: 128, 128>}]} {
    %c0_i32 = arith.constant 0 : i32
    %0 = arith.cmpi eq, %arg2, %c0_i32 : i32
    %1 = arith.extui %0 : i1 to i32
    %c0_i32_0 = arith.constant 0 : i32
    %2 = arith.cmpi ne, %1, %c0_i32_0 : i32
    scf.if %2 {
      %cst_10 = arith.constant 0.000000e+00 : f32
      %12 = vector.broadcast %cst_10 : f32 to vector<128x128xf32>
      %c0_11 = arith.constant 0 : index
      %c0_12 = arith.constant 0 : index
      %13 = vector.load %arg8[%c0_11, %c0_12] : memref<128x128xf32, #tpu.memory_space<vmem>>, vector<128x128xf32>
      tpu.vector_store %arg8[%c0_11, %c0_12], %12 {strides = array<i32>} : memref<128x128xf32, #tpu.memory_space<vmem>>, vector<128x128xf32>,
    } else {
    }
    %c0 = arith.constant 0 : index
    %c0_1 = arith.constant 0 : index
    %3 = vector.load %arg8[%c0, %c0_1] : memref<128x128xf32, #tpu.memory_space<vmem>>, vector<128x128xf32>
    %c0_2 = arith.constant 0 : index
    %c0_3 = arith.constant 0 : index
    %4 = vector.load %arg3[%c0_2, %c0_3] : memref<128x256xbf16, #tpu.memory_space<vmem>>, vector<128x256xbf16>
    %c0_4 = arith.constant 0 : index
    %c0_5 = arith.constant 0 : index
    %5 = vector.load %arg4[%c0_4, %c0_5] : memref<256x128xbf16, #tpu.memory_space<vmem>>, vector<256x128xbf16>
    %cst = arith.constant dense<0.000000e+00> : vector<128x128xf32>
    %6 = tpu.matmul %4, %5, %cst {dimension_numbers = #tpu.dot_dimension_numbers<[1], [0], [0], [1], [0, 0, 1, 1], [], []>} : vector<128x256xbf16>, vector<256x128xbf16>, vector<128x128xf32> -> vector<128x128xf32>
    %7 = arith.addf %3, %6 : vector<128x128xf32>
    %c0_6 = arith.constant 0 : index
    %c0_7 = arith.constant 0 : index
    %8 = vector.load %arg8[%c0_6, %c0_7] : memref<128x128xf32, #tpu.memory_space<vmem>>, vector<128x128xf32>
    tpu.vector_store %arg8[%c0_6, %c0_7], %7 {strides = array<i32>} : memref<128x128xf32, #tpu.memory_space<vmem>>, vector<128x128xf32>,
    %c0_i32_8 = arith.constant 0 : i32
    %9 = arith.cmpi eq, %arg2, %c0_i32_8 : i32
    %10 = arith.extui %9 : i1 to i32
    %c0_i32_9 = arith.constant 0 : i32
    %11 = arith.cmpi ne, %10, %c0_i32_9 : i32
    scf.if %11 {
      %c0_10 = arith.constant 0 : index
      %c0_11 = arith.constant 0 : index
      %12 = vector.load %arg8[%c0_10, %c0_11] : memref<128x128xf32, #tpu.memory_space<vmem>>, vector<128x128xf32>
      %c0_12 = arith.constant 0 : index
      %c0_13 = arith.constant 0 : index
      %13 = vector.load %arg5[%c0_12, %c0_13] : memref<1x128xf32, #tpu.memory_space<vmem>>, vector<1x128xf32>
      %14 = vector.broadcast %13 : vector<1x128xf32> to vector<128x128xf32>
      %15 = arith.addf %12, %14 : vector<128x128xf32>
      %c0_14 = arith.constant 0 : index
      %c0_15 = arith.constant 0 : index
      %16 = vector.load %arg6[%c0_14, %c0_15] : memref<128x128xbf16, #tpu.memory_space<vmem>>, vector<128x128xbf16>
      %17 = arith.extf %16 : vector<128x128xbf16> to vector<128x128xf32>
      %18 = arith.addf %15, %17 : vector<128x128xf32>
      %19 = arith.truncf %18 : vector<128x128xf32> to vector<128x128xbf16>
      %c0_16 = arith.constant 0 : index
      %c0_17 = arith.constant 0 : index
      %20 = vector.load %arg7[%c0_16, %c0_17] : memref<128x128xbf16, #tpu.memory_space<vmem>>, vector<128x128xbf16>
      tpu.vector_store %arg7[%c0_16, %c0_17], %19 {strides = array<i32>} : memref<128x128xbf16, #tpu.memory_space<vmem>>, vector<128x128xbf16>,
    } else {
    }
    return
  }
  func.func @transform_0(%arg0: i32, %arg1: i32, %arg2: i32) -> (i32, i32) {
    %c0_i32 = arith.constant 0 : i32
    return %arg0, %arg2 : i32, i32
  }
  func.func @transform_1(%arg0: i32, %arg1: i32, %arg2: i32) -> (i32, i32) {
    %c0_i32 = arith.constant 0 : i32
    return %arg2, %arg1 : i32, i32
  }
  func.func @transform_2(%arg0: i32, %arg1: i32, %arg2: i32) -> (i32, i32) {
    %c0_i32 = arith.constant 0 : i32
    %c0_i32_0 = arith.constant 0 : i32
    return %c0_i32, %arg1 : i32, i32
  }
  func.func @transform_3(%arg0: i32, %arg1: i32, %arg2: i32) -> (i32, i32) {
    %c0_i32 = arith.constant 0 : i32
    return %arg0, %arg1 : i32, i32
  }
  func.func @transform_4(%arg0: i32, %arg1: i32, %arg2: i32) -> (i32, i32) {
    %c0_i32 = arith.constant 0 : i32
    return %arg0, %arg1 : i32, i32
  }
}

module attributes {stable_mosaic.version = 11 : i64} {
  func.func @_matmul_kernel(%arg0: i32, %arg1: i32, %arg2: i32, %arg3: memref<32x256xbf16, #tpu.memory_space<vmem>>, %arg4: memref<256x128xbf16, #tpu.memory_space<vmem>>, %arg5: memref<1x128xf32, #tpu.memory_space<vmem>>, %arg6: memref<32x128xbf16, #tpu.memory_space<vmem>>, %arg7: memref<32x128xf32, #tpu.memory_space<vmem>>) attributes {dimension_semantics = [#tpu.dimension_semantics<parallel>, #tpu.dimension_semantics<parallel>, #tpu.dimension_semantics<arbitrary>], iteration_bounds = array<i64: 1, 1, 1>, scalar_prefetch = 0 : i64, scratch_operands = 1 : i64, tpu.core_type = #tpu.core_type<tc>, window_params = [{transform_indices = @transform_0, window_bounds = array<i64: 32, 256>}, {transform_indices = @transform_1, window_bounds = array<i64: 256, 128>}, {transform_indices = @transform_2, window_bounds = array<i64: 1, 128>}, {transform_indices = @transform_3, window_bounds = array<i64: 32, 128>}]} {
    %c0_i32 = arith.constant 0 : i32
    %0 = arith.cmpi eq, %arg2, %c0_i32 : i32
    %1 = arith.extui %0 : i1 to i32
    %c0_i32_0 = arith.constant 0 : i32
    %2 = arith.cmpi ne, %1, %c0_i32_0 : i32
    scf.if %2 {
      %cst_10 = arith.constant 0.000000e+00 : f32
      %12 = vector.broadcast %cst_10 : f32 to vector<32x128xf32>
      %c0_11 = arith.constant 0 : index
      %c0_12 = arith.constant 0 : index
      %13 = vector.load %arg7[%c0_11, %c0_12] : memref<32x128xf32, #tpu.memory_space<vmem>>, vector<32x128xf32>
      tpu.vector_store %arg7[%c0_11, %c0_12], %12 {strides = array<i32>} : memref<32x128xf32, #tpu.memory_space<vmem>>, vector<32x128xf32>,
    } else {
    }
    %c0 = arith.constant 0 : index
    %c0_1 = arith.constant 0 : index
    %3 = vector.load %arg7[%c0, %c0_1] : memref<32x128xf32, #tpu.memory_space<vmem>>, vector<32x128xf32>
    %c0_2 = arith.constant 0 : index
    %c0_3 = arith.constant 0 : index
    %4 = vector.load %arg3[%c0_2, %c0_3] : memref<32x256xbf16, #tpu.memory_space<vmem>>, vector<32x256xbf16>
    %c0_4 = arith.constant 0 : index
    %c0_5 = arith.constant 0 : index
    %5 = vector.load %arg4[%c0_4, %c0_5] : memref<256x128xbf16, #tpu.memory_space<vmem>>, vector<256x128xbf16>
    %cst = arith.constant dense<0.000000e+00> : vector<32x128xf32>
    %6 = tpu.matmul %4, %5, %cst {dimension_numbers = #tpu.dot_dimension_numbers<[1], [0], [0], [1], [0, 0, 1, 1], [], []>} : vector<32x256xbf16>, vector<256x128xbf16>, vector<32x128xf32> -> vector<32x128xf32>
    %7 = arith.addf %3, %6 : vector<32x128xf32>
    %c0_6 = arith.constant 0 : index
    %c0_7 = arith.constant 0 : index
    %8 = vector.load %arg7[%c0_6, %c0_7] : memref<32x128xf32, #tpu.memory_space<vmem>>, vector<32x128xf32>
    tpu.vector_store %arg7[%c0_6, %c0_7], %7 {strides = array<i32>} : memref<32x128xf32, #tpu.memory_space<vmem>>, vector<32x128xf32>,
    %c0_i32_8 = arith.constant 0 : i32
    %9 = arith.cmpi eq, %arg2, %c0_i32_8 : i32
    %10 = arith.extui %9 : i1 to i32
    %c0_i32_9 = arith.constant 0 : i32
    %11 = arith.cmpi ne, %10, %c0_i32_9 : i32
    scf.if %11 {
      %c0_10 = arith.constant 0 : index
      %c0_11 = arith.constant 0 : index
      %12 = vector.load %arg7[%c0_10, %c0_11] : memref<32x128xf32, #tpu.memory_space<vmem>>, vector<32x128xf32>
      %c0_12 = arith.constant 0 : index
      %c0_13 = arith.constant 0 : index
      %13 = vector.load %arg5[%c0_12, %c0_13] : memref<1x128xf32, #tpu.memory_space<vmem>>, vector<1x128xf32>
      %14 = vector.broadcast %13 : vector<1x128xf32> to vector<32x128xf32>
      %15 = arith.addf %12, %14 : vector<32x128xf32>
      %cst_14 = arith.constant 0.000000e+00 : f32
      %16 = vector.broadcast %cst_14 : f32 to vector<32x128xf32>
      %17 = arith.maximumf %15, %16 : vector<32x128xf32>
      %18 = arith.truncf %17 : vector<32x128xf32> to vector<32x128xbf16>
      %c0_15 = arith.constant 0 : index
      %c0_16 = arith.constant 0 : index
      %19 = vector.load %arg6[%c0_15, %c0_16] : memref<32x128xbf16, #tpu.memory_space<vmem>>, vector<32x128xbf16>
      tpu.vector_store %arg6[%c0_15, %c0_16], %18 {strides = array<i32>} : memref<32x128xbf16, #tpu.memory_space<vmem>>, vector<32x128xbf16>,
    } else {
    }
    return
  }
  func.func @transform_0(%arg0: i32, %arg1: i32, %arg2: i32) -> (i32, i32) {
    %c0_i32 = arith.constant 0 : i32
    return %arg0, %arg2 : i32, i32
  }
  func.func @transform_1(%arg0: i32, %arg1: i32, %arg2: i32) -> (i32, i32) {
    %c0_i32 = arith.constant 0 : i32
    return %arg2, %arg1 : i32, i32
  }
  func.func @transform_2(%arg0: i32, %arg1: i32, %arg2: i32) -> (i32, i32) {
    %c0_i32 = arith.constant 0 : i32
    %c0_i32_0 = arith.constant 0 : i32
    return %c0_i32, %arg1 : i32, i32
  }
  func.func @transform_3(%arg0: i32, %arg1: i32, %arg2: i32) -> (i32, i32) {
    %c0_i32 = arith.constant 0 : i32
    return %arg0, %arg1 : i32, i32
  }
}

module attributes {stable_mosaic.version = 11 : i64} {
  func.func @_matmul_kernel(%arg0: i32, %arg1: i32, %arg2: i32, %arg3: memref<32x384xbf16, #tpu.memory_space<vmem>>, %arg4: memref<384x128xbf16, #tpu.memory_space<vmem>>, %arg5: memref<1x128xf32, #tpu.memory_space<vmem>>, %arg6: memref<32x128xbf16, #tpu.memory_space<vmem>>, %arg7: memref<32x128xbf16, #tpu.memory_space<vmem>>, %arg8: memref<32x128xf32, #tpu.memory_space<vmem>>) attributes {dimension_semantics = [#tpu.dimension_semantics<parallel>, #tpu.dimension_semantics<parallel>, #tpu.dimension_semantics<arbitrary>], iteration_bounds = array<i64: 1, 1, 1>, scalar_prefetch = 0 : i64, scratch_operands = 1 : i64, tpu.core_type = #tpu.core_type<tc>, window_params = [{transform_indices = @transform_0, window_bounds = array<i64: 32, 384>}, {transform_indices = @transform_1, window_bounds = array<i64: 384, 128>}, {transform_indices = @transform_2, window_bounds = array<i64: 1, 128>}, {transform_indices = @transform_3, window_bounds = array<i64: 32, 128>}, {transform_indices = @transform_4, window_bounds = array<i64: 32, 128>}]} {
    %c0_i32 = arith.constant 0 : i32
    %0 = arith.cmpi eq, %arg2, %c0_i32 : i32
    %1 = arith.extui %0 : i1 to i32
    %c0_i32_0 = arith.constant 0 : i32
    %2 = arith.cmpi ne, %1, %c0_i32_0 : i32
    scf.if %2 {
      %cst_10 = arith.constant 0.000000e+00 : f32
      %12 = vector.broadcast %cst_10 : f32 to vector<32x128xf32>
      %c0_11 = arith.constant 0 : index
      %c0_12 = arith.constant 0 : index
      %13 = vector.load %arg8[%c0_11, %c0_12] : memref<32x128xf32, #tpu.memory_space<vmem>>, vector<32x128xf32>
      tpu.vector_store %arg8[%c0_11, %c0_12], %12 {strides = array<i32>} : memref<32x128xf32, #tpu.memory_space<vmem>>, vector<32x128xf32>,
    } else {
    }
    %c0 = arith.constant 0 : index
    %c0_1 = arith.constant 0 : index
    %3 = vector.load %arg8[%c0, %c0_1] : memref<32x128xf32, #tpu.memory_space<vmem>>, vector<32x128xf32>
    %c0_2 = arith.constant 0 : index
    %c0_3 = arith.constant 0 : index
    %4 = vector.load %arg3[%c0_2, %c0_3] : memref<32x384xbf16, #tpu.memory_space<vmem>>, vector<32x384xbf16>
    %c0_4 = arith.constant 0 : index
    %c0_5 = arith.constant 0 : index
    %5 = vector.load %arg4[%c0_4, %c0_5] : memref<384x128xbf16, #tpu.memory_space<vmem>>, vector<384x128xbf16>
    %cst = arith.constant dense<0.000000e+00> : vector<32x128xf32>
    %6 = tpu.matmul %4, %5, %cst {dimension_numbers = #tpu.dot_dimension_numbers<[1], [0], [0], [1], [0, 0, 1, 1], [], []>} : vector<32x384xbf16>, vector<384x128xbf16>, vector<32x128xf32> -> vector<32x128xf32>
    %7 = arith.addf %3, %6 : vector<32x128xf32>
    %c0_6 = arith.constant 0 : index
    %c0_7 = arith.constant 0 : index
    %8 = vector.load %arg8[%c0_6, %c0_7] : memref<32x128xf32, #tpu.memory_space<vmem>>, vector<32x128xf32>
    tpu.vector_store %arg8[%c0_6, %c0_7], %7 {strides = array<i32>} : memref<32x128xf32, #tpu.memory_space<vmem>>, vector<32x128xf32>,
    %c0_i32_8 = arith.constant 0 : i32
    %9 = arith.cmpi eq, %arg2, %c0_i32_8 : i32
    %10 = arith.extui %9 : i1 to i32
    %c0_i32_9 = arith.constant 0 : i32
    %11 = arith.cmpi ne, %10, %c0_i32_9 : i32
    scf.if %11 {
      %c0_10 = arith.constant 0 : index
      %c0_11 = arith.constant 0 : index
      %12 = vector.load %arg8[%c0_10, %c0_11] : memref<32x128xf32, #tpu.memory_space<vmem>>, vector<32x128xf32>
      %c0_12 = arith.constant 0 : index
      %c0_13 = arith.constant 0 : index
      %13 = vector.load %arg5[%c0_12, %c0_13] : memref<1x128xf32, #tpu.memory_space<vmem>>, vector<1x128xf32>
      %14 = vector.broadcast %13 : vector<1x128xf32> to vector<32x128xf32>
      %15 = arith.addf %12, %14 : vector<32x128xf32>
      %c0_14 = arith.constant 0 : index
      %c0_15 = arith.constant 0 : index
      %16 = vector.load %arg6[%c0_14, %c0_15] : memref<32x128xbf16, #tpu.memory_space<vmem>>, vector<32x128xbf16>
      %17 = arith.extf %16 : vector<32x128xbf16> to vector<32x128xf32>
      %18 = arith.addf %15, %17 : vector<32x128xf32>
      %19 = arith.truncf %18 : vector<32x128xf32> to vector<32x128xbf16>
      %c0_16 = arith.constant 0 : index
      %c0_17 = arith.constant 0 : index
      %20 = vector.load %arg7[%c0_16, %c0_17] : memref<32x128xbf16, #tpu.memory_space<vmem>>, vector<32x128xbf16>
      tpu.vector_store %arg7[%c0_16, %c0_17], %19 {strides = array<i32>} : memref<32x128xbf16, #tpu.memory_space<vmem>>, vector<32x128xbf16>,
    } else {
    }
    return
  }
  func.func @transform_0(%arg0: i32, %arg1: i32, %arg2: i32) -> (i32, i32) {
    %c0_i32 = arith.constant 0 : i32
    return %arg0, %arg2 : i32, i32
  }
  func.func @transform_1(%arg0: i32, %arg1: i32, %arg2: i32) -> (i32, i32) {
    %c0_i32 = arith.constant 0 : i32
    return %arg2, %arg1 : i32, i32
  }
  func.func @transform_2(%arg0: i32, %arg1: i32, %arg2: i32) -> (i32, i32) {
    %c0_i32 = arith.constant 0 : i32
    %c0_i32_0 = arith.constant 0 : i32
    return %c0_i32, %arg1 : i32, i32
  }
  func.func @transform_3(%arg0: i32, %arg1: i32, %arg2: i32) -> (i32, i32) {
    %c0_i32 = arith.constant 0 : i32
    return %arg0, %arg1 : i32, i32
  }
  func.func @transform_4(%arg0: i32, %arg1: i32, %arg2: i32) -> (i32, i32) {
    %c0_i32 = arith.constant 0 : i32
    return %arg0, %arg1 : i32, i32
  }
}

module attributes {stable_mosaic.version = 11 : i64} {
  func.func @_matmul_kernel(%arg0: i32, %arg1: i32, %arg2: i32, %arg3: memref<32x384xbf16, #tpu.memory_space<vmem>>, %arg4: memref<384x128xbf16, #tpu.memory_space<vmem>>, %arg5: memref<1x128xf32, #tpu.memory_space<vmem>>, %arg6: memref<32x128xbf16, #tpu.memory_space<vmem>>, %arg7: memref<32x128xf32, #tpu.memory_space<vmem>>) attributes {dimension_semantics = [#tpu.dimension_semantics<parallel>, #tpu.dimension_semantics<parallel>, #tpu.dimension_semantics<arbitrary>], iteration_bounds = array<i64: 1, 1, 1>, scalar_prefetch = 0 : i64, scratch_operands = 1 : i64, tpu.core_type = #tpu.core_type<tc>, window_params = [{transform_indices = @transform_0, window_bounds = array<i64: 32, 384>}, {transform_indices = @transform_1, window_bounds = array<i64: 384, 128>}, {transform_indices = @transform_2, window_bounds = array<i64: 1, 128>}, {transform_indices = @transform_3, window_bounds = array<i64: 32, 128>}]} {
    %c0_i32 = arith.constant 0 : i32
    %0 = arith.cmpi eq, %arg2, %c0_i32 : i32
    %1 = arith.extui %0 : i1 to i32
    %c0_i32_0 = arith.constant 0 : i32
    %2 = arith.cmpi ne, %1, %c0_i32_0 : i32
    scf.if %2 {
      %cst_10 = arith.constant 0.000000e+00 : f32
      %12 = vector.broadcast %cst_10 : f32 to vector<32x128xf32>
      %c0_11 = arith.constant 0 : index
      %c0_12 = arith.constant 0 : index
      %13 = vector.load %arg7[%c0_11, %c0_12] : memref<32x128xf32, #tpu.memory_space<vmem>>, vector<32x128xf32>
      tpu.vector_store %arg7[%c0_11, %c0_12], %12 {strides = array<i32>} : memref<32x128xf32, #tpu.memory_space<vmem>>, vector<32x128xf32>,
    } else {
    }
    %c0 = arith.constant 0 : index
    %c0_1 = arith.constant 0 : index
    %3 = vector.load %arg7[%c0, %c0_1] : memref<32x128xf32, #tpu.memory_space<vmem>>, vector<32x128xf32>
    %c0_2 = arith.constant 0 : index
    %c0_3 = arith.constant 0 : index
    %4 = vector.load %arg3[%c0_2, %c0_3] : memref<32x384xbf16, #tpu.memory_space<vmem>>, vector<32x384xbf16>
    %c0_4 = arith.constant 0 : index
    %c0_5 = arith.constant 0 : index
    %5 = vector.load %arg4[%c0_4, %c0_5] : memref<384x128xbf16, #tpu.memory_space<vmem>>, vector<384x128xbf16>
    %cst = arith.constant dense<0.000000e+00> : vector<32x128xf32>
    %6 = tpu.matmul %4, %5, %cst {dimension_numbers = #tpu.dot_dimension_numbers<[1], [0], [0], [1], [0, 0, 1, 1], [], []>} : vector<32x384xbf16>, vector<384x128xbf16>, vector<32x128xf32> -> vector<32x128xf32>
    %7 = arith.addf %3, %6 : vector<32x128xf32>
    %c0_6 = arith.constant 0 : index
    %c0_7 = arith.constant 0 : index
    %8 = vector.load %arg7[%c0_6, %c0_7] : memref<32x128xf32, #tpu.memory_space<vmem>>, vector<32x128xf32>
    tpu.vector_store %arg7[%c0_6, %c0_7], %7 {strides = array<i32>} : memref<32x128xf32, #tpu.memory_space<vmem>>, vector<32x128xf32>,
    %c0_i32_8 = arith.constant 0 : i32
    %9 = arith.cmpi eq, %arg2, %c0_i32_8 : i32
    %10 = arith.extui %9 : i1 to i32
    %c0_i32_9 = arith.constant 0 : i32
    %11 = arith.cmpi ne, %10, %c0_i32_9 : i32
    scf.if %11 {
      %c0_10 = arith.constant 0 : index
      %c0_11 = arith.constant 0 : index
      %12 = vector.load %arg7[%c0_10, %c0_11] : memref<32x128xf32, #tpu.memory_space<vmem>>, vector<32x128xf32>
      %c0_12 = arith.constant 0 : index
      %c0_13 = arith.constant 0 : index
      %13 = vector.load %arg5[%c0_12, %c0_13] : memref<1x128xf32, #tpu.memory_space<vmem>>, vector<1x128xf32>
      %14 = vector.broadcast %13 : vector<1x128xf32> to vector<32x128xf32>
      %15 = arith.addf %12, %14 : vector<32x128xf32>
      %cst_14 = arith.constant 0.000000e+00 : f32
      %16 = vector.broadcast %cst_14 : f32 to vector<32x128xf32>
      %17 = arith.maximumf %15, %16 : vector<32x128xf32>
      %18 = arith.truncf %17 : vector<32x128xf32> to vector<32x128xbf16>
      %c0_15 = arith.constant 0 : index
      %c0_16 = arith.constant 0 : index
      %19 = vector.load %arg6[%c0_15, %c0_16] : memref<32x128xbf16, #tpu.memory_space<vmem>>, vector<32x128xbf16>
      tpu.vector_store %arg6[%c0_15, %c0_16], %18 {strides = array<i32>} : memref<32x128xbf16, #tpu.memory_space<vmem>>, vector<32x128xbf16>,
    } else {
    }
    return
  }
  func.func @transform_0(%arg0: i32, %arg1: i32, %arg2: i32) -> (i32, i32) {
    %c0_i32 = arith.constant 0 : i32
    return %arg0, %arg2 : i32, i32
  }
  func.func @transform_1(%arg0: i32, %arg1: i32, %arg2: i32) -> (i32, i32) {
    %c0_i32 = arith.constant 0 : i32
    return %arg2, %arg1 : i32, i32
  }
  func.func @transform_2(%arg0: i32, %arg1: i32, %arg2: i32) -> (i32, i32) {
    %c0_i32 = arith.constant 0 : i32
    %c0_i32_0 = arith.constant 0 : i32
    return %c0_i32, %arg1 : i32, i32
  }
  func.func @transform_3(%arg0: i32, %arg1: i32, %arg2: i32) -> (i32, i32) {
    %c0_i32 = arith.constant 0 : i32
    return %arg0, %arg1 : i32, i32
  }
}

module attributes {stable_mosaic.version = 11 : i64} {
  func.func @_matmul_kernel(%arg0: i32, %arg1: i32, %arg2: i32, %arg3: memref<16x512xbf16, #tpu.memory_space<vmem>>, %arg4: memref<512x128xbf16, #tpu.memory_space<vmem>>, %arg5: memref<1x128xf32, #tpu.memory_space<vmem>>, %arg6: memref<16x128xbf16, #tpu.memory_space<vmem>>, %arg7: memref<16x128xf32, #tpu.memory_space<vmem>>) attributes {dimension_semantics = [#tpu.dimension_semantics<parallel>, #tpu.dimension_semantics<parallel>, #tpu.dimension_semantics<arbitrary>], iteration_bounds = array<i64: 1, 1, 1>, scalar_prefetch = 0 : i64, scratch_operands = 1 : i64, tpu.core_type = #tpu.core_type<tc>, window_params = [{transform_indices = @transform_0, window_bounds = array<i64: 16, 512>}, {transform_indices = @transform_1, window_bounds = array<i64: 512, 128>}, {transform_indices = @transform_2, window_bounds = array<i64: 1, 128>}, {transform_indices = @transform_3, window_bounds = array<i64: 16, 128>}]} {
    %c0_i32 = arith.constant 0 : i32
    %0 = arith.cmpi eq, %arg2, %c0_i32 : i32
    %1 = arith.extui %0 : i1 to i32
    %c0_i32_0 = arith.constant 0 : i32
    %2 = arith.cmpi ne, %1, %c0_i32_0 : i32
    scf.if %2 {
      %cst_10 = arith.constant 0.000000e+00 : f32
      %12 = vector.broadcast %cst_10 : f32 to vector<16x128xf32>
      %c0_11 = arith.constant 0 : index
      %c0_12 = arith.constant 0 : index
      %13 = vector.load %arg7[%c0_11, %c0_12] : memref<16x128xf32, #tpu.memory_space<vmem>>, vector<16x128xf32>
      tpu.vector_store %arg7[%c0_11, %c0_12], %12 {strides = array<i32>} : memref<16x128xf32, #tpu.memory_space<vmem>>, vector<16x128xf32>,
    } else {
    }
    %c0 = arith.constant 0 : index
    %c0_1 = arith.constant 0 : index
    %3 = vector.load %arg7[%c0, %c0_1] : memref<16x128xf32, #tpu.memory_space<vmem>>, vector<16x128xf32>
    %c0_2 = arith.constant 0 : index
    %c0_3 = arith.constant 0 : index
    %4 = vector.load %arg3[%c0_2, %c0_3] : memref<16x512xbf16, #tpu.memory_space<vmem>>, vector<16x512xbf16>
    %c0_4 = arith.constant 0 : index
    %c0_5 = arith.constant 0 : index
    %5 = vector.load %arg4[%c0_4, %c0_5] : memref<512x128xbf16, #tpu.memory_space<vmem>>, vector<512x128xbf16>
    %cst = arith.constant dense<0.000000e+00> : vector<16x128xf32>
    %6 = tpu.matmul %4, %5, %cst {dimension_numbers = #tpu.dot_dimension_numbers<[1], [0], [0], [1], [0, 0, 1, 1], [], []>} : vector<16x512xbf16>, vector<512x128xbf16>, vector<16x128xf32> -> vector<16x128xf32>
    %7 = arith.addf %3, %6 : vector<16x128xf32>
    %c0_6 = arith.constant 0 : index
    %c0_7 = arith.constant 0 : index
    %8 = vector.load %arg7[%c0_6, %c0_7] : memref<16x128xf32, #tpu.memory_space<vmem>>, vector<16x128xf32>
    tpu.vector_store %arg7[%c0_6, %c0_7], %7 {strides = array<i32>} : memref<16x128xf32, #tpu.memory_space<vmem>>, vector<16x128xf32>,
    %c0_i32_8 = arith.constant 0 : i32
    %9 = arith.cmpi eq, %arg2, %c0_i32_8 : i32
    %10 = arith.extui %9 : i1 to i32
    %c0_i32_9 = arith.constant 0 : i32
    %11 = arith.cmpi ne, %10, %c0_i32_9 : i32
    scf.if %11 {
      %c0_10 = arith.constant 0 : index
      %c0_11 = arith.constant 0 : index
      %12 = vector.load %arg7[%c0_10, %c0_11] : memref<16x128xf32, #tpu.memory_space<vmem>>, vector<16x128xf32>
      %c0_12 = arith.constant 0 : index
      %c0_13 = arith.constant 0 : index
      %13 = vector.load %arg5[%c0_12, %c0_13] : memref<1x128xf32, #tpu.memory_space<vmem>>, vector<1x128xf32>
      %14 = vector.broadcast %13 : vector<1x128xf32> to vector<16x128xf32>
      %15 = arith.addf %12, %14 : vector<16x128xf32>
      %cst_14 = arith.constant 0.000000e+00 : f32
      %16 = vector.broadcast %cst_14 : f32 to vector<16x128xf32>
      %17 = arith.maximumf %15, %16 : vector<16x128xf32>
      %18 = arith.truncf %17 : vector<16x128xf32> to vector<16x128xbf16>
      %c0_15 = arith.constant 0 : index
      %c0_16 = arith.constant 0 : index
      %19 = vector.load %arg6[%c0_15, %c0_16] : memref<16x128xbf16, #tpu.memory_space<vmem>>, vector<16x128xbf16>
      tpu.vector_store %arg6[%c0_15, %c0_16], %18 {strides = array<i32>} : memref<16x128xbf16, #tpu.memory_space<vmem>>, vector<16x128xbf16>,
    } else {
    }
    return
  }
  func.func @transform_0(%arg0: i32, %arg1: i32, %arg2: i32) -> (i32, i32) {
    %c0_i32 = arith.constant 0 : i32
    return %arg0, %arg2 : i32, i32
  }
  func.func @transform_1(%arg0: i32, %arg1: i32, %arg2: i32) -> (i32, i32) {
    %c0_i32 = arith.constant 0 : i32
    return %arg2, %arg1 : i32, i32
  }
  func.func @transform_2(%arg0: i32, %arg1: i32, %arg2: i32) -> (i32, i32) {
    %c0_i32 = arith.constant 0 : i32
    %c0_i32_0 = arith.constant 0 : i32
    return %c0_i32, %arg1 : i32, i32
  }
  func.func @transform_3(%arg0: i32, %arg1: i32, %arg2: i32) -> (i32, i32) {
    %c0_i32 = arith.constant 0 : i32
    return %arg0, %arg1 : i32, i32
  }
}

module attributes {stable_mosaic.version = 11 : i64} {
  func.func @_matmul_kernel(%arg0: i32, %arg1: i32, %arg2: i32, %arg3: memref<16x128xbf16, #tpu.memory_space<vmem>>, %arg4: memref<128x128xbf16, #tpu.memory_space<vmem>>, %arg5: memref<1x128xf32, #tpu.memory_space<vmem>>, %arg6: memref<16x128xbf16, #tpu.memory_space<vmem>>, %arg7: memref<16x128xf32, #tpu.memory_space<vmem>>) attributes {dimension_semantics = [#tpu.dimension_semantics<parallel>, #tpu.dimension_semantics<parallel>, #tpu.dimension_semantics<arbitrary>], iteration_bounds = array<i64: 1, 1, 5>, scalar_prefetch = 0 : i64, scratch_operands = 1 : i64, tpu.core_type = #tpu.core_type<tc>, window_params = [{transform_indices = @transform_0, window_bounds = array<i64: 16, 128>}, {transform_indices = @transform_1, window_bounds = array<i64: 128, 128>}, {transform_indices = @transform_2, window_bounds = array<i64: 1, 128>}, {transform_indices = @transform_3, window_bounds = array<i64: 16, 128>}]} {
    %c0_i32 = arith.constant 0 : i32
    %0 = arith.cmpi eq, %arg2, %c0_i32 : i32
    %1 = arith.extui %0 : i1 to i32
    %c0_i32_0 = arith.constant 0 : i32
    %2 = arith.cmpi ne, %1, %c0_i32_0 : i32
    scf.if %2 {
      %cst_9 = arith.constant 0.000000e+00 : f32
      %12 = vector.broadcast %cst_9 : f32 to vector<16x128xf32>
      %c0_10 = arith.constant 0 : index
      %c0_11 = arith.constant 0 : index
      %13 = vector.load %arg7[%c0_10, %c0_11] : memref<16x128xf32, #tpu.memory_space<vmem>>, vector<16x128xf32>
      tpu.vector_store %arg7[%c0_10, %c0_11], %12 {strides = array<i32>} : memref<16x128xf32, #tpu.memory_space<vmem>>, vector<16x128xf32>,
    } else {
    }
    %c0 = arith.constant 0 : index
    %c0_1 = arith.constant 0 : index
    %3 = vector.load %arg7[%c0, %c0_1] : memref<16x128xf32, #tpu.memory_space<vmem>>, vector<16x128xf32>
    %c0_2 = arith.constant 0 : index
    %c0_3 = arith.constant 0 : index
    %4 = vector.load %arg3[%c0_2, %c0_3] : memref<16x128xbf16, #tpu.memory_space<vmem>>, vector<16x128xbf16>
    %c0_4 = arith.constant 0 : index
    %c0_5 = arith.constant 0 : index
    %5 = vector.load %arg4[%c0_4, %c0_5] : memref<128x128xbf16, #tpu.memory_space<vmem>>, vector<128x128xbf16>
    %cst = arith.constant dense<0.000000e+00> : vector<16x128xf32>
    %6 = tpu.matmul %4, %5, %cst {dimension_numbers = #tpu.dot_dimension_numbers<[1], [0], [0], [1], [0, 0, 1, 1], [], []>} : vector<16x128xbf16>, vector<128x128xbf16>, vector<16x128xf32> -> vector<16x128xf32>
    %7 = arith.addf %3, %6 : vector<16x128xf32>
    %c0_6 = arith.constant 0 : index
    %c0_7 = arith.constant 0 : index
    %8 = vector.load %arg7[%c0_6, %c0_7] : memref<16x128xf32, #tpu.memory_space<vmem>>, vector<16x128xf32>
    tpu.vector_store %arg7[%c0_6, %c0_7], %7 {strides = array<i32>} : memref<16x128xf32, #tpu.memory_space<vmem>>, vector<16x128xf32>,
    %c4_i32 = arith.constant 4 : i32
    %9 = arith.cmpi eq, %arg2, %c4_i32 : i32
    %10 = arith.extui %9 : i1 to i32
    %c0_i32_8 = arith.constant 0 : i32
    %11 = arith.cmpi ne, %10, %c0_i32_8 : i32
    scf.if %11 {
      %c0_9 = arith.constant 0 : index
      %c0_10 = arith.constant 0 : index
      %12 = vector.load %arg7[%c0_9, %c0_10] : memref<16x128xf32, #tpu.memory_space<vmem>>, vector<16x128xf32>
      %c0_11 = arith.constant 0 : index
      %c0_12 = arith.constant 0 : index
      %13 = vector.load %arg5[%c0_11, %c0_12] : memref<1x128xf32, #tpu.memory_space<vmem>>, vector<1x128xf32>
      %14 = vector.broadcast %13 : vector<1x128xf32> to vector<16x128xf32>
      %15 = arith.addf %12, %14 : vector<16x128xf32>
      %cst_13 = arith.constant 0.000000e+00 : f32
      %16 = vector.broadcast %cst_13 : f32 to vector<16x128xf32>
      %17 = arith.maximumf %15, %16 : vector<16x128xf32>
      %18 = arith.truncf %17 : vector<16x128xf32> to vector<16x128xbf16>
      %c0_14 = arith.constant 0 : index
      %c0_15 = arith.constant 0 : index
      %19 = vector.load %arg6[%c0_14, %c0_15] : memref<16x128xbf16, #tpu.memory_space<vmem>>, vector<16x128xbf16>
      tpu.vector_store %arg6[%c0_14, %c0_15], %18 {strides = array<i32>} : memref<16x128xbf16, #tpu.memory_space<vmem>>, vector<16x128xbf16>,
    } else {
    }
    return
  }
  func.func @transform_0(%arg0: i32, %arg1: i32, %arg2: i32) -> (i32, i32) {
    %c0_i32 = arith.constant 0 : i32
    return %arg0, %arg2 : i32, i32
  }
  func.func @transform_1(%arg0: i32, %arg1: i32, %arg2: i32) -> (i32, i32) {
    %c0_i32 = arith.constant 0 : i32
    return %arg2, %arg1 : i32, i32
  }
  func.func @transform_2(%arg0: i32, %arg1: i32, %arg2: i32) -> (i32, i32) {
    %c0_i32 = arith.constant 0 : i32
    %c0_i32_0 = arith.constant 0 : i32
    return %c0_i32, %arg1 : i32, i32
  }
  func.func @transform_3(%arg0: i32, %arg1: i32, %arg2: i32) -> (i32, i32) {
    %c0_i32 = arith.constant 0 : i32
    return %arg0, %arg1 : i32, i32
  }
}

module attributes {stable_mosaic.version = 11 : i64} {
  func.func @_matmul_kernel(%arg0: i32, %arg1: i32, %arg2: i32, %arg3: memref<16x128xbf16, #tpu.memory_space<vmem>>, %arg4: memref<128x128xbf16, #tpu.memory_space<vmem>>, %arg5: memref<1x128xf32, #tpu.memory_space<vmem>>, %arg6: memref<16x128xbf16, #tpu.memory_space<vmem>>, %arg7: memref<16x128xbf16, #tpu.memory_space<vmem>>, %arg8: memref<16x128xf32, #tpu.memory_space<vmem>>) attributes {dimension_semantics = [#tpu.dimension_semantics<parallel>, #tpu.dimension_semantics<parallel>, #tpu.dimension_semantics<arbitrary>], iteration_bounds = array<i64: 1, 1, 5>, scalar_prefetch = 0 : i64, scratch_operands = 1 : i64, tpu.core_type = #tpu.core_type<tc>, window_params = [{transform_indices = @transform_0, window_bounds = array<i64: 16, 128>}, {transform_indices = @transform_1, window_bounds = array<i64: 128, 128>}, {transform_indices = @transform_2, window_bounds = array<i64: 1, 128>}, {transform_indices = @transform_3, window_bounds = array<i64: 16, 128>}, {transform_indices = @transform_4, window_bounds = array<i64: 16, 128>}]} {
    %c0_i32 = arith.constant 0 : i32
    %0 = arith.cmpi eq, %arg2, %c0_i32 : i32
    %1 = arith.extui %0 : i1 to i32
    %c0_i32_0 = arith.constant 0 : i32
    %2 = arith.cmpi ne, %1, %c0_i32_0 : i32
    scf.if %2 {
      %cst_9 = arith.constant 0.000000e+00 : f32
      %12 = vector.broadcast %cst_9 : f32 to vector<16x128xf32>
      %c0_10 = arith.constant 0 : index
      %c0_11 = arith.constant 0 : index
      %13 = vector.load %arg8[%c0_10, %c0_11] : memref<16x128xf32, #tpu.memory_space<vmem>>, vector<16x128xf32>
      tpu.vector_store %arg8[%c0_10, %c0_11], %12 {strides = array<i32>} : memref<16x128xf32, #tpu.memory_space<vmem>>, vector<16x128xf32>,
    } else {
    }
    %c0 = arith.constant 0 : index
    %c0_1 = arith.constant 0 : index
    %3 = vector.load %arg8[%c0, %c0_1] : memref<16x128xf32, #tpu.memory_space<vmem>>, vector<16x128xf32>
    %c0_2 = arith.constant 0 : index
    %c0_3 = arith.constant 0 : index
    %4 = vector.load %arg3[%c0_2, %c0_3] : memref<16x128xbf16, #tpu.memory_space<vmem>>, vector<16x128xbf16>
    %c0_4 = arith.constant 0 : index
    %c0_5 = arith.constant 0 : index
    %5 = vector.load %arg4[%c0_4, %c0_5] : memref<128x128xbf16, #tpu.memory_space<vmem>>, vector<128x128xbf16>
    %cst = arith.constant dense<0.000000e+00> : vector<16x128xf32>
    %6 = tpu.matmul %4, %5, %cst {dimension_numbers = #tpu.dot_dimension_numbers<[1], [0], [0], [1], [0, 0, 1, 1], [], []>} : vector<16x128xbf16>, vector<128x128xbf16>, vector<16x128xf32> -> vector<16x128xf32>
    %7 = arith.addf %3, %6 : vector<16x128xf32>
    %c0_6 = arith.constant 0 : index
    %c0_7 = arith.constant 0 : index
    %8 = vector.load %arg8[%c0_6, %c0_7] : memref<16x128xf32, #tpu.memory_space<vmem>>, vector<16x128xf32>
    tpu.vector_store %arg8[%c0_6, %c0_7], %7 {strides = array<i32>} : memref<16x128xf32, #tpu.memory_space<vmem>>, vector<16x128xf32>,
    %c4_i32 = arith.constant 4 : i32
    %9 = arith.cmpi eq, %arg2, %c4_i32 : i32
    %10 = arith.extui %9 : i1 to i32
    %c0_i32_8 = arith.constant 0 : i32
    %11 = arith.cmpi ne, %10, %c0_i32_8 : i32
    scf.if %11 {
      %c0_9 = arith.constant 0 : index
      %c0_10 = arith.constant 0 : index
      %12 = vector.load %arg8[%c0_9, %c0_10] : memref<16x128xf32, #tpu.memory_space<vmem>>, vector<16x128xf32>
      %c0_11 = arith.constant 0 : index
      %c0_12 = arith.constant 0 : index
      %13 = vector.load %arg5[%c0_11, %c0_12] : memref<1x128xf32, #tpu.memory_space<vmem>>, vector<1x128xf32>
      %14 = vector.broadcast %13 : vector<1x128xf32> to vector<16x128xf32>
      %15 = arith.addf %12, %14 : vector<16x128xf32>
      %c0_13 = arith.constant 0 : index
      %c0_14 = arith.constant 0 : index
      %16 = vector.load %arg6[%c0_13, %c0_14] : memref<16x128xbf16, #tpu.memory_space<vmem>>, vector<16x128xbf16>
      %17 = arith.extf %16 : vector<16x128xbf16> to vector<16x128xf32>
      %18 = arith.addf %15, %17 : vector<16x128xf32>
      %19 = arith.truncf %18 : vector<16x128xf32> to vector<16x128xbf16>
      %c0_15 = arith.constant 0 : index
      %c0_16 = arith.constant 0 : index
      %20 = vector.load %arg7[%c0_15, %c0_16] : memref<16x128xbf16, #tpu.memory_space<vmem>>, vector<16x128xbf16>
      tpu.vector_store %arg7[%c0_15, %c0_16], %19 {strides = array<i32>} : memref<16x128xbf16, #tpu.memory_space<vmem>>, vector<16x128xbf16>,
    } else {
    }
    return
  }
  func.func @transform_0(%arg0: i32, %arg1: i32, %arg2: i32) -> (i32, i32) {
    %c0_i32 = arith.constant 0 : i32
    return %arg0, %arg2 : i32, i32
  }
  func.func @transform_1(%arg0: i32, %arg1: i32, %arg2: i32) -> (i32, i32) {
    %c0_i32 = arith.constant 0 : i32
    return %arg2, %arg1 : i32, i32
  }
  func.func @transform_2(%arg0: i32, %arg1: i32, %arg2: i32) -> (i32, i32) {
    %c0_i32 = arith.constant 0 : i32
    %c0_i32_0 = arith.constant 0 : i32
    return %c0_i32, %arg1 : i32, i32
  }
  func.func @transform_3(%arg0: i32, %arg1: i32, %arg2: i32) -> (i32, i32) {
    %c0_i32 = arith.constant 0 : i32
    return %arg0, %arg1 : i32, i32
  }
  func.func @transform_4(%arg0: i32, %arg1: i32, %arg2: i32) -> (i32, i32) {
    %c0_i32 = arith.constant 0 : i32
    return %arg0, %arg1 : i32, i32
  }
}

module attributes {stable_mosaic.version = 11 : i64} {
  func.func @_matmul_kernel(%arg0: i32, %arg1: i32, %arg2: i32, %arg3: memref<16x512xbf16, #tpu.memory_space<vmem>>, %arg4: memref<512x128xbf16, #tpu.memory_space<vmem>>, %arg5: memref<1x128xf32, #tpu.memory_space<vmem>>, %arg6: memref<16x128xbf16, #tpu.memory_space<vmem>>, %arg7: memref<16x128xf32, #tpu.memory_space<vmem>>) attributes {dimension_semantics = [#tpu.dimension_semantics<parallel>, #tpu.dimension_semantics<parallel>, #tpu.dimension_semantics<arbitrary>], iteration_bounds = array<i64: 1, 1, 2>, scalar_prefetch = 0 : i64, scratch_operands = 1 : i64, tpu.core_type = #tpu.core_type<tc>, window_params = [{transform_indices = @transform_0, window_bounds = array<i64: 16, 512>}, {transform_indices = @transform_1, window_bounds = array<i64: 512, 128>}, {transform_indices = @transform_2, window_bounds = array<i64: 1, 128>}, {transform_indices = @transform_3, window_bounds = array<i64: 16, 128>}]} {
    %c0_i32 = arith.constant 0 : i32
    %0 = arith.cmpi eq, %arg2, %c0_i32 : i32
    %1 = arith.extui %0 : i1 to i32
    %c0_i32_0 = arith.constant 0 : i32
    %2 = arith.cmpi ne, %1, %c0_i32_0 : i32
    scf.if %2 {
      %cst_9 = arith.constant 0.000000e+00 : f32
      %12 = vector.broadcast %cst_9 : f32 to vector<16x128xf32>
      %c0_10 = arith.constant 0 : index
      %c0_11 = arith.constant 0 : index
      %13 = vector.load %arg7[%c0_10, %c0_11] : memref<16x128xf32, #tpu.memory_space<vmem>>, vector<16x128xf32>
      tpu.vector_store %arg7[%c0_10, %c0_11], %12 {strides = array<i32>} : memref<16x128xf32, #tpu.memory_space<vmem>>, vector<16x128xf32>,
    } else {
    }
    %c0 = arith.constant 0 : index
    %c0_1 = arith.constant 0 : index
    %3 = vector.load %arg7[%c0, %c0_1] : memref<16x128xf32, #tpu.memory_space<vmem>>, vector<16x128xf32>
    %c0_2 = arith.constant 0 : index
    %c0_3 = arith.constant 0 : index
    %4 = vector.load %arg3[%c0_2, %c0_3] : memref<16x512xbf16, #tpu.memory_space<vmem>>, vector<16x512xbf16>
    %c0_4 = arith.constant 0 : index
    %c0_5 = arith.constant 0 : index
    %5 = vector.load %arg4[%c0_4, %c0_5] : memref<512x128xbf16, #tpu.memory_space<vmem>>, vector<512x128xbf16>
    %cst = arith.constant dense<0.000000e+00> : vector<16x128xf32>
    %6 = tpu.matmul %4, %5, %cst {dimension_numbers = #tpu.dot_dimension_numbers<[1], [0], [0], [1], [0, 0, 1, 1], [], []>} : vector<16x512xbf16>, vector<512x128xbf16>, vector<16x128xf32> -> vector<16x128xf32>
    %7 = arith.addf %3, %6 : vector<16x128xf32>
    %c0_6 = arith.constant 0 : index
    %c0_7 = arith.constant 0 : index
    %8 = vector.load %arg7[%c0_6, %c0_7] : memref<16x128xf32, #tpu.memory_space<vmem>>, vector<16x128xf32>
    tpu.vector_store %arg7[%c0_6, %c0_7], %7 {strides = array<i32>} : memref<16x128xf32, #tpu.memory_space<vmem>>, vector<16x128xf32>,
    %c1_i32 = arith.constant 1 : i32
    %9 = arith.cmpi eq, %arg2, %c1_i32 : i32
    %10 = arith.extui %9 : i1 to i32
    %c0_i32_8 = arith.constant 0 : i32
    %11 = arith.cmpi ne, %10, %c0_i32_8 : i32
    scf.if %11 {
      %c0_9 = arith.constant 0 : index
      %c0_10 = arith.constant 0 : index
      %12 = vector.load %arg7[%c0_9, %c0_10] : memref<16x128xf32, #tpu.memory_space<vmem>>, vector<16x128xf32>
      %c0_11 = arith.constant 0 : index
      %c0_12 = arith.constant 0 : index
      %13 = vector.load %arg5[%c0_11, %c0_12] : memref<1x128xf32, #tpu.memory_space<vmem>>, vector<1x128xf32>
      %14 = vector.broadcast %13 : vector<1x128xf32> to vector<16x128xf32>
      %15 = arith.addf %12, %14 : vector<16x128xf32>
      %cst_13 = arith.constant 0.000000e+00 : f32
      %16 = vector.broadcast %cst_13 : f32 to vector<16x128xf32>
      %17 = arith.maximumf %15, %16 : vector<16x128xf32>
      %18 = arith.truncf %17 : vector<16x128xf32> to vector<16x128xbf16>
      %c0_14 = arith.constant 0 : index
      %c0_15 = arith.constant 0 : index
      %19 = vector.load %arg6[%c0_14, %c0_15] : memref<16x128xbf16, #tpu.memory_space<vmem>>, vector<16x128xbf16>
      tpu.vector_store %arg6[%c0_14, %c0_15], %18 {strides = array<i32>} : memref<16x128xbf16, #tpu.memory_space<vmem>>, vector<16x128xbf16>,
    } else {
    }
    return
  }
  func.func @transform_0(%arg0: i32, %arg1: i32, %arg2: i32) -> (i32, i32) {
    %c0_i32 = arith.constant 0 : i32
    return %arg0, %arg2 : i32, i32
  }
  func.func @transform_1(%arg0: i32, %arg1: i32, %arg2: i32) -> (i32, i32) {
    %c0_i32 = arith.constant 0 : i32
    return %arg2, %arg1 : i32, i32
  }
  func.func @transform_2(%arg0: i32, %arg1: i32, %arg2: i32) -> (i32, i32) {
    %c0_i32 = arith.constant 0 : i32
    %c0_i32_0 = arith.constant 0 : i32
    return %c0_i32, %arg1 : i32, i32
  }
  func.func @transform_3(%arg0: i32, %arg1: i32, %arg2: i32) -> (i32, i32) {
    %c0_i32 = arith.constant 0 : i32
    return %arg0, %arg1 : i32, i32
  }
}

module attributes {stable_mosaic.version = 11 : i64} {
  func.func @_matmul_kernel(%arg0: i32, %arg1: i32, %arg2: i32, %arg3: memref<16x384xbf16, #tpu.memory_space<vmem>>, %arg4: memref<384x128xbf16, #tpu.memory_space<vmem>>, %arg5: memref<1x128xf32, #tpu.memory_space<vmem>>, %arg6: memref<16x128xbf16, #tpu.memory_space<vmem>>, %arg7: memref<16x128xf32, #tpu.memory_space<vmem>>) attributes {dimension_semantics = [#tpu.dimension_semantics<parallel>, #tpu.dimension_semantics<parallel>, #tpu.dimension_semantics<arbitrary>], iteration_bounds = array<i64: 1, 1, 3>, scalar_prefetch = 0 : i64, scratch_operands = 1 : i64, tpu.core_type = #tpu.core_type<tc>, window_params = [{transform_indices = @transform_0, window_bounds = array<i64: 16, 384>}, {transform_indices = @transform_1, window_bounds = array<i64: 384, 128>}, {transform_indices = @transform_2, window_bounds = array<i64: 1, 128>}, {transform_indices = @transform_3, window_bounds = array<i64: 16, 128>}]} {
    %c0_i32 = arith.constant 0 : i32
    %0 = arith.cmpi eq, %arg2, %c0_i32 : i32
    %1 = arith.extui %0 : i1 to i32
    %c0_i32_0 = arith.constant 0 : i32
    %2 = arith.cmpi ne, %1, %c0_i32_0 : i32
    scf.if %2 {
      %cst_9 = arith.constant 0.000000e+00 : f32
      %12 = vector.broadcast %cst_9 : f32 to vector<16x128xf32>
      %c0_10 = arith.constant 0 : index
      %c0_11 = arith.constant 0 : index
      %13 = vector.load %arg7[%c0_10, %c0_11] : memref<16x128xf32, #tpu.memory_space<vmem>>, vector<16x128xf32>
      tpu.vector_store %arg7[%c0_10, %c0_11], %12 {strides = array<i32>} : memref<16x128xf32, #tpu.memory_space<vmem>>, vector<16x128xf32>,
    } else {
    }
    %c0 = arith.constant 0 : index
    %c0_1 = arith.constant 0 : index
    %3 = vector.load %arg7[%c0, %c0_1] : memref<16x128xf32, #tpu.memory_space<vmem>>, vector<16x128xf32>
    %c0_2 = arith.constant 0 : index
    %c0_3 = arith.constant 0 : index
    %4 = vector.load %arg3[%c0_2, %c0_3] : memref<16x384xbf16, #tpu.memory_space<vmem>>, vector<16x384xbf16>
    %c0_4 = arith.constant 0 : index
    %c0_5 = arith.constant 0 : index
    %5 = vector.load %arg4[%c0_4, %c0_5] : memref<384x128xbf16, #tpu.memory_space<vmem>>, vector<384x128xbf16>
    %cst = arith.constant dense<0.000000e+00> : vector<16x128xf32>
    %6 = tpu.matmul %4, %5, %cst {dimension_numbers = #tpu.dot_dimension_numbers<[1], [0], [0], [1], [0, 0, 1, 1], [], []>} : vector<16x384xbf16>, vector<384x128xbf16>, vector<16x128xf32> -> vector<16x128xf32>
    %7 = arith.addf %3, %6 : vector<16x128xf32>
    %c0_6 = arith.constant 0 : index
    %c0_7 = arith.constant 0 : index
    %8 = vector.load %arg7[%c0_6, %c0_7] : memref<16x128xf32, #tpu.memory_space<vmem>>, vector<16x128xf32>
    tpu.vector_store %arg7[%c0_6, %c0_7], %7 {strides = array<i32>} : memref<16x128xf32, #tpu.memory_space<vmem>>, vector<16x128xf32>,
    %c2_i32 = arith.constant 2 : i32
    %9 = arith.cmpi eq, %arg2, %c2_i32 : i32
    %10 = arith.extui %9 : i1 to i32
    %c0_i32_8 = arith.constant 0 : i32
    %11 = arith.cmpi ne, %10, %c0_i32_8 : i32
    scf.if %11 {
      %c0_9 = arith.constant 0 : index
      %c0_10 = arith.constant 0 : index
      %12 = vector.load %arg7[%c0_9, %c0_10] : memref<16x128xf32, #tpu.memory_space<vmem>>, vector<16x128xf32>
      %c0_11 = arith.constant 0 : index
      %c0_12 = arith.constant 0 : index
      %13 = vector.load %arg5[%c0_11, %c0_12] : memref<1x128xf32, #tpu.memory_space<vmem>>, vector<1x128xf32>
      %14 = vector.broadcast %13 : vector<1x128xf32> to vector<16x128xf32>
      %15 = arith.addf %12, %14 : vector<16x128xf32>
      %cst_13 = arith.constant 0.000000e+00 : f32
      %16 = vector.broadcast %cst_13 : f32 to vector<16x128xf32>
      %17 = arith.maximumf %15, %16 : vector<16x128xf32>
      %18 = arith.truncf %17 : vector<16x128xf32> to vector<16x128xbf16>
      %c0_14 = arith.constant 0 : index
      %c0_15 = arith.constant 0 : index
      %19 = vector.load %arg6[%c0_14, %c0_15] : memref<16x128xbf16, #tpu.memory_space<vmem>>, vector<16x128xbf16>
      tpu.vector_store %arg6[%c0_14, %c0_15], %18 {strides = array<i32>} : memref<16x128xbf16, #tpu.memory_space<vmem>>, vector<16x128xbf16>,
    } else {
    }
    return
  }
  func.func @transform_0(%arg0: i32, %arg1: i32, %arg2: i32) -> (i32, i32) {
    %c0_i32 = arith.constant 0 : i32
    return %arg0, %arg2 : i32, i32
  }
  func.func @transform_1(%arg0: i32, %arg1: i32, %arg2: i32) -> (i32, i32) {
    %c0_i32 = arith.constant 0 : i32
    return %arg2, %arg1 : i32, i32
  }
  func.func @transform_2(%arg0: i32, %arg1: i32, %arg2: i32) -> (i32, i32) {
    %c0_i32 = arith.constant 0 : i32
    %c0_i32_0 = arith.constant 0 : i32
    return %c0_i32, %arg1 : i32, i32
  }
  func.func @transform_3(%arg0: i32, %arg1: i32, %arg2: i32) -> (i32, i32) {
    %c0_i32 = arith.constant 0 : i32
    return %arg0, %arg1 : i32, i32
  }
}

module attributes {stable_mosaic.version = 11 : i64} {
  func.func @_matmul_kernel(%arg0: i32, %arg1: i32, %arg2: i32, %arg3: memref<16x384xbf16, #tpu.memory_space<vmem>>, %arg4: memref<384x128xbf16, #tpu.memory_space<vmem>>, %arg5: memref<1x128xf32, #tpu.memory_space<vmem>>, %arg6: memref<16x128xbf16, #tpu.memory_space<vmem>>, %arg7: memref<16x128xbf16, #tpu.memory_space<vmem>>, %arg8: memref<16x128xf32, #tpu.memory_space<vmem>>) attributes {dimension_semantics = [#tpu.dimension_semantics<parallel>, #tpu.dimension_semantics<parallel>, #tpu.dimension_semantics<arbitrary>], iteration_bounds = array<i64: 1, 1, 3>, scalar_prefetch = 0 : i64, scratch_operands = 1 : i64, tpu.core_type = #tpu.core_type<tc>, window_params = [{transform_indices = @transform_0, window_bounds = array<i64: 16, 384>}, {transform_indices = @transform_1, window_bounds = array<i64: 384, 128>}, {transform_indices = @transform_2, window_bounds = array<i64: 1, 128>}, {transform_indices = @transform_3, window_bounds = array<i64: 16, 128>}, {transform_indices = @transform_4, window_bounds = array<i64: 16, 128>}]} {
    %c0_i32 = arith.constant 0 : i32
    %0 = arith.cmpi eq, %arg2, %c0_i32 : i32
    %1 = arith.extui %0 : i1 to i32
    %c0_i32_0 = arith.constant 0 : i32
    %2 = arith.cmpi ne, %1, %c0_i32_0 : i32
    scf.if %2 {
      %cst_9 = arith.constant 0.000000e+00 : f32
      %12 = vector.broadcast %cst_9 : f32 to vector<16x128xf32>
      %c0_10 = arith.constant 0 : index
      %c0_11 = arith.constant 0 : index
      %13 = vector.load %arg8[%c0_10, %c0_11] : memref<16x128xf32, #tpu.memory_space<vmem>>, vector<16x128xf32>
      tpu.vector_store %arg8[%c0_10, %c0_11], %12 {strides = array<i32>} : memref<16x128xf32, #tpu.memory_space<vmem>>, vector<16x128xf32>,
    } else {
    }
    %c0 = arith.constant 0 : index
    %c0_1 = arith.constant 0 : index
    %3 = vector.load %arg8[%c0, %c0_1] : memref<16x128xf32, #tpu.memory_space<vmem>>, vector<16x128xf32>
    %c0_2 = arith.constant 0 : index
    %c0_3 = arith.constant 0 : index
    %4 = vector.load %arg3[%c0_2, %c0_3] : memref<16x384xbf16, #tpu.memory_space<vmem>>, vector<16x384xbf16>
    %c0_4 = arith.constant 0 : index
    %c0_5 = arith.constant 0 : index
    %5 = vector.load %arg4[%c0_4, %c0_5] : memref<384x128xbf16, #tpu.memory_space<vmem>>, vector<384x128xbf16>
    %cst = arith.constant dense<0.000000e+00> : vector<16x128xf32>
    %6 = tpu.matmul %4, %5, %cst {dimension_numbers = #tpu.dot_dimension_numbers<[1], [0], [0], [1], [0, 0, 1, 1], [], []>} : vector<16x384xbf16>, vector<384x128xbf16>, vector<16x128xf32> -> vector<16x128xf32>
    %7 = arith.addf %3, %6 : vector<16x128xf32>
    %c0_6 = arith.constant 0 : index
    %c0_7 = arith.constant 0 : index
    %8 = vector.load %arg8[%c0_6, %c0_7] : memref<16x128xf32, #tpu.memory_space<vmem>>, vector<16x128xf32>
    tpu.vector_store %arg8[%c0_6, %c0_7], %7 {strides = array<i32>} : memref<16x128xf32, #tpu.memory_space<vmem>>, vector<16x128xf32>,
    %c2_i32 = arith.constant 2 : i32
    %9 = arith.cmpi eq, %arg2, %c2_i32 : i32
    %10 = arith.extui %9 : i1 to i32
    %c0_i32_8 = arith.constant 0 : i32
    %11 = arith.cmpi ne, %10, %c0_i32_8 : i32
    scf.if %11 {
      %c0_9 = arith.constant 0 : index
      %c0_10 = arith.constant 0 : index
      %12 = vector.load %arg8[%c0_9, %c0_10] : memref<16x128xf32, #tpu.memory_space<vmem>>, vector<16x128xf32>
      %c0_11 = arith.constant 0 : index
      %c0_12 = arith.constant 0 : index
      %13 = vector.load %arg5[%c0_11, %c0_12] : memref<1x128xf32, #tpu.memory_space<vmem>>, vector<1x128xf32>
      %14 = vector.broadcast %13 : vector<1x128xf32> to vector<16x128xf32>
      %15 = arith.addf %12, %14 : vector<16x128xf32>
      %c0_13 = arith.constant 0 : index
      %c0_14 = arith.constant 0 : index
      %16 = vector.load %arg6[%c0_13, %c0_14] : memref<16x128xbf16, #tpu.memory_space<vmem>>, vector<16x128xbf16>
      %17 = arith.extf %16 : vector<16x128xbf16> to vector<16x128xf32>
      %18 = arith.addf %15, %17 : vector<16x128xf32>
      %19 = arith.truncf %18 : vector<16x128xf32> to vector<16x128xbf16>
      %c0_15 = arith.constant 0 : index
      %c0_16 = arith.constant 0 : index
      %20 = vector.load %arg7[%c0_15, %c0_16] : memref<16x128xbf16, #tpu.memory_space<vmem>>, vector<16x128xbf16>
      tpu.vector_store %arg7[%c0_15, %c0_16], %19 {strides = array<i32>} : memref<16x128xbf16, #tpu.memory_space<vmem>>, vector<16x128xbf16>,
    } else {
    }
    return
  }
  func.func @transform_0(%arg0: i32, %arg1: i32, %arg2: i32) -> (i32, i32) {
    %c0_i32 = arith.constant 0 : i32
    return %arg0, %arg2 : i32, i32
  }
  func.func @transform_1(%arg0: i32, %arg1: i32, %arg2: i32) -> (i32, i32) {
    %c0_i32 = arith.constant 0 : i32
    return %arg2, %arg1 : i32, i32
  }
  func.func @transform_2(%arg0: i32, %arg1: i32, %arg2: i32) -> (i32, i32) {
    %c0_i32 = arith.constant 0 : i32
    %c0_i32_0 = arith.constant 0 : i32
    return %c0_i32, %arg1 : i32, i32
  }
  func.func @transform_3(%arg0: i32, %arg1: i32, %arg2: i32) -> (i32, i32) {
    %c0_i32 = arith.constant 0 : i32
    return %arg0, %arg1 : i32, i32
  }
  func.func @transform_4(%arg0: i32, %arg1: i32, %arg2: i32) -> (i32, i32) {
    %c0_i32 = arith.constant 0 : i32
    return %arg0, %arg1 : i32, i32
  }
}

module attributes {stable_mosaic.version = 11 : i64} {
  func.func @_matmul_kernel(%arg0: i32, %arg1: i32, %arg2: i32, %arg3: memref<16x384xbf16, #tpu.memory_space<vmem>>, %arg4: memref<384x128xbf16, #tpu.memory_space<vmem>>, %arg5: memref<1x128xf32, #tpu.memory_space<vmem>>, %arg6: memref<16x128xbf16, #tpu.memory_space<vmem>>, %arg7: memref<16x128xbf16, #tpu.memory_space<vmem>>, %arg8: memref<16x128xbf16, #tpu.memory_space<vmem>>, %arg9: memref<16x128xbf16, #tpu.memory_space<vmem>>, %arg10: memref<16x128xf32, #tpu.memory_space<vmem>>) attributes {dimension_semantics = [#tpu.dimension_semantics<parallel>, #tpu.dimension_semantics<parallel>, #tpu.dimension_semantics<arbitrary>], iteration_bounds = array<i64: 1, 1, 3>, scalar_prefetch = 0 : i64, scratch_operands = 1 : i64, tpu.core_type = #tpu.core_type<tc>, window_params = [{transform_indices = @transform_0, window_bounds = array<i64: 16, 384>}, {transform_indices = @transform_1, window_bounds = array<i64: 384, 128>}, {transform_indices = @transform_2, window_bounds = array<i64: 1, 128>}, {transform_indices = @transform_3, window_bounds = array<i64: 16, 128>}, {transform_indices = @transform_4, window_bounds = array<i64: 16, 128>}, {transform_indices = @transform_5, window_bounds = array<i64: 16, 128>}, {transform_indices = @transform_6, window_bounds = array<i64: 16, 128>}]} {
    %c0_i32 = arith.constant 0 : i32
    %0 = arith.cmpi eq, %arg2, %c0_i32 : i32
    %1 = arith.extui %0 : i1 to i32
    %c0_i32_0 = arith.constant 0 : i32
    %2 = arith.cmpi ne, %1, %c0_i32_0 : i32
    scf.if %2 {
      %cst_9 = arith.constant 0.000000e+00 : f32
      %12 = vector.broadcast %cst_9 : f32 to vector<16x128xf32>
      %c0_10 = arith.constant 0 : index
      %c0_11 = arith.constant 0 : index
      %13 = vector.load %arg10[%c0_10, %c0_11] : memref<16x128xf32, #tpu.memory_space<vmem>>, vector<16x128xf32>
      tpu.vector_store %arg10[%c0_10, %c0_11], %12 {strides = array<i32>} : memref<16x128xf32, #tpu.memory_space<vmem>>, vector<16x128xf32>,
    } else {
    }
    %c0 = arith.constant 0 : index
    %c0_1 = arith.constant 0 : index
    %3 = vector.load %arg10[%c0, %c0_1] : memref<16x128xf32, #tpu.memory_space<vmem>>, vector<16x128xf32>
    %c0_2 = arith.constant 0 : index
    %c0_3 = arith.constant 0 : index
    %4 = vector.load %arg3[%c0_2, %c0_3] : memref<16x384xbf16, #tpu.memory_space<vmem>>, vector<16x384xbf16>
    %c0_4 = arith.constant 0 : index
    %c0_5 = arith.constant 0 : index
    %5 = vector.load %arg4[%c0_4, %c0_5] : memref<384x128xbf16, #tpu.memory_space<vmem>>, vector<384x128xbf16>
    %cst = arith.constant dense<0.000000e+00> : vector<16x128xf32>
    %6 = tpu.matmul %4, %5, %cst {dimension_numbers = #tpu.dot_dimension_numbers<[1], [0], [0], [1], [0, 0, 1, 1], [], []>} : vector<16x384xbf16>, vector<384x128xbf16>, vector<16x128xf32> -> vector<16x128xf32>
    %7 = arith.addf %3, %6 : vector<16x128xf32>
    %c0_6 = arith.constant 0 : index
    %c0_7 = arith.constant 0 : index
    %8 = vector.load %arg10[%c0_6, %c0_7] : memref<16x128xf32, #tpu.memory_space<vmem>>, vector<16x128xf32>
    tpu.vector_store %arg10[%c0_6, %c0_7], %7 {strides = array<i32>} : memref<16x128xf32, #tpu.memory_space<vmem>>, vector<16x128xf32>,
    %c2_i32 = arith.constant 2 : i32
    %9 = arith.cmpi eq, %arg2, %c2_i32 : i32
    %10 = arith.extui %9 : i1 to i32
    %c0_i32_8 = arith.constant 0 : i32
    %11 = arith.cmpi ne, %10, %c0_i32_8 : i32
    scf.if %11 {
      %c0_9 = arith.constant 0 : index
      %c0_10 = arith.constant 0 : index
      %12 = vector.load %arg10[%c0_9, %c0_10] : memref<16x128xf32, #tpu.memory_space<vmem>>, vector<16x128xf32>
      %c0_11 = arith.constant 0 : index
      %c0_12 = arith.constant 0 : index
      %13 = vector.load %arg5[%c0_11, %c0_12] : memref<1x128xf32, #tpu.memory_space<vmem>>, vector<1x128xf32>
      %14 = vector.broadcast %13 : vector<1x128xf32> to vector<16x128xf32>
      %15 = arith.addf %12, %14 : vector<16x128xf32>
      %c0_13 = arith.constant 0 : index
      %c0_14 = arith.constant 0 : index
      %16 = vector.load %arg6[%c0_13, %c0_14] : memref<16x128xbf16, #tpu.memory_space<vmem>>, vector<16x128xbf16>
      %17 = arith.extf %16 : vector<16x128xbf16> to vector<16x128xf32>
      %18 = arith.addf %15, %17 : vector<16x128xf32>
      %c0_15 = arith.constant 0 : index
      %c0_16 = arith.constant 0 : index
      %19 = vector.load %arg7[%c0_15, %c0_16] : memref<16x128xbf16, #tpu.memory_space<vmem>>, vector<16x128xbf16>
      %20 = arith.extf %19 : vector<16x128xbf16> to vector<16x128xf32>
      %c0_17 = arith.constant 0 : index
      %c0_18 = arith.constant 0 : index
      %21 = vector.load %arg8[%c0_17, %c0_18] : memref<16x128xbf16, #tpu.memory_space<vmem>>, vector<16x128xbf16>
      %22 = arith.extf %21 : vector<16x128xbf16> to vector<16x128xf32>
      %cst_19 = arith.constant 5.000000e-01 : f32
      %23 = vector.broadcast %cst_19 : f32 to vector<16x128xf32>
      %24 = arith.mulf %23, %20 : vector<16x128xf32>
      %25 = math.tanh %24 : vector<16x128xf32>
      %cst_20 = arith.constant 1.000000e+00 : f32
      %26 = vector.broadcast %cst_20 : f32 to vector<16x128xf32>
      %27 = arith.addf %25, %26 : vector<16x128xf32>
      %cst_21 = arith.constant 5.000000e-01 : f32
      %28 = vector.broadcast %cst_21 : f32 to vector<16x128xf32>
      %29 = arith.mulf %28, %27 : vector<16x128xf32>
      %30 = arith.mulf %18, %29 : vector<16x128xf32>
      %cst_22 = arith.constant 5.000000e-01 : f32
      %31 = vector.broadcast %cst_22 : f32 to vector<16x128xf32>
      %32 = arith.mulf %31, %22 : vector<16x128xf32>
      %33 = math.tanh %32 : vector<16x128xf32>
      %cst_23 = arith.constant 1.000000e+00 : f32
      %34 = vector.broadcast %cst_23 : f32 to vector<16x128xf32>
      %35 = arith.addf %33, %34 : vector<16x128xf32>
      %cst_24 = arith.constant 5.000000e-01 : f32
      %36 = vector.broadcast %cst_24 : f32 to vector<16x128xf32>
      %37 = arith.mulf %36, %35 : vector<16x128xf32>
      %38 = arith.mulf %30, %37 : vector<16x128xf32>
      %39 = arith.truncf %38 : vector<16x128xf32> to vector<16x128xbf16>
      %c0_25 = arith.constant 0 : index
      %c0_26 = arith.constant 0 : index
      %40 = vector.load %arg9[%c0_25, %c0_26] : memref<16x128xbf16, #tpu.memory_space<vmem>>, vector<16x128xbf16>
      tpu.vector_store %arg9[%c0_25, %c0_26], %39 {strides = array<i32>} : memref<16x128xbf16, #tpu.memory_space<vmem>>, vector<16x128xbf16>,
    } else {
    }
    return
  }
  func.func @transform_0(%arg0: i32, %arg1: i32, %arg2: i32) -> (i32, i32) {
    %c0_i32 = arith.constant 0 : i32
    return %arg0, %arg2 : i32, i32
  }
  func.func @transform_1(%arg0: i32, %arg1: i32, %arg2: i32) -> (i32, i32) {
    %c0_i32 = arith.constant 0 : i32
    return %arg2, %arg1 : i32, i32
  }
  func.func @transform_2(%arg0: i32, %arg1: i32, %arg2: i32) -> (i32, i32) {
    %c0_i32 = arith.constant 0 : i32
    %c0_i32_0 = arith.constant 0 : i32
    return %c0_i32, %arg1 : i32, i32
  }
  func.func @transform_3(%arg0: i32, %arg1: i32, %arg2: i32) -> (i32, i32) {
    %c0_i32 = arith.constant 0 : i32
    return %arg0, %arg1 : i32, i32
  }
  func.func @transform_4(%arg0: i32, %arg1: i32, %arg2: i32) -> (i32, i32) {
    %c0_i32 = arith.constant 0 : i32
    return %arg0, %arg1 : i32, i32
  }
  func.func @transform_5(%arg0: i32, %arg1: i32, %arg2: i32) -> (i32, i32) {
    %c0_i32 = arith.constant 0 : i32
    return %arg0, %arg1 : i32, i32
  }
  func.func @transform_6(%arg0: i32, %arg1: i32, %arg2: i32) -> (i32, i32) {
    %c0_i32 = arith.constant 0 : i32
    return %arg0, %arg1 : i32, i32
  }
}

module attributes {stable_mosaic.version = 11 : i64} {
  func.func @_matmul_kernel(%arg0: i32, %arg1: i32, %arg2: i32, %arg3: memref<16x384xbf16, #tpu.memory_space<vmem>>, %arg4: memref<384x256xbf16, #tpu.memory_space<vmem>>, %arg5: memref<1x256xf32, #tpu.memory_space<vmem>>, %arg6: memref<16x256xbf16, #tpu.memory_space<vmem>>, %arg7: memref<16x256xf32, #tpu.memory_space<vmem>>) attributes {dimension_semantics = [#tpu.dimension_semantics<parallel>, #tpu.dimension_semantics<parallel>, #tpu.dimension_semantics<arbitrary>], iteration_bounds = array<i64: 1, 1, 3>, scalar_prefetch = 0 : i64, scratch_operands = 1 : i64, tpu.core_type = #tpu.core_type<tc>, window_params = [{transform_indices = @transform_0, window_bounds = array<i64: 16, 384>}, {transform_indices = @transform_1, window_bounds = array<i64: 384, 256>}, {transform_indices = @transform_2, window_bounds = array<i64: 1, 256>}, {transform_indices = @transform_3, window_bounds = array<i64: 16, 256>}]} {
    %c0_i32 = arith.constant 0 : i32
    %0 = arith.cmpi eq, %arg2, %c0_i32 : i32
    %1 = arith.extui %0 : i1 to i32
    %c0_i32_0 = arith.constant 0 : i32
    %2 = arith.cmpi ne, %1, %c0_i32_0 : i32
    scf.if %2 {
      %cst_9 = arith.constant 0.000000e+00 : f32
      %12 = vector.broadcast %cst_9 : f32 to vector<16x256xf32>
      %c0_10 = arith.constant 0 : index
      %c0_11 = arith.constant 0 : index
      %13 = vector.load %arg7[%c0_10, %c0_11] : memref<16x256xf32, #tpu.memory_space<vmem>>, vector<16x256xf32>
      tpu.vector_store %arg7[%c0_10, %c0_11], %12 {strides = array<i32>} : memref<16x256xf32, #tpu.memory_space<vmem>>, vector<16x256xf32>,
    } else {
    }
    %c0 = arith.constant 0 : index
    %c0_1 = arith.constant 0 : index
    %3 = vector.load %arg7[%c0, %c0_1] : memref<16x256xf32, #tpu.memory_space<vmem>>, vector<16x256xf32>
    %c0_2 = arith.constant 0 : index
    %c0_3 = arith.constant 0 : index
    %4 = vector.load %arg3[%c0_2, %c0_3] : memref<16x384xbf16, #tpu.memory_space<vmem>>, vector<16x384xbf16>
    %c0_4 = arith.constant 0 : index
    %c0_5 = arith.constant 0 : index
    %5 = vector.load %arg4[%c0_4, %c0_5] : memref<384x256xbf16, #tpu.memory_space<vmem>>, vector<384x256xbf16>
    %cst = arith.constant dense<0.000000e+00> : vector<16x256xf32>
    %6 = tpu.matmul %4, %5, %cst {dimension_numbers = #tpu.dot_dimension_numbers<[1], [0], [0], [1], [0, 0, 1, 1], [], []>} : vector<16x384xbf16>, vector<384x256xbf16>, vector<16x256xf32> -> vector<16x256xf32>
    %7 = arith.addf %3, %6 : vector<16x256xf32>
    %c0_6 = arith.constant 0 : index
    %c0_7 = arith.constant 0 : index
    %8 = vector.load %arg7[%c0_6, %c0_7] : memref<16x256xf32, #tpu.memory_space<vmem>>, vector<16x256xf32>
    tpu.vector_store %arg7[%c0_6, %c0_7], %7 {strides = array<i32>} : memref<16x256xf32, #tpu.memory_space<vmem>>, vector<16x256xf32>,
    %c2_i32 = arith.constant 2 : i32
    %9 = arith.cmpi eq, %arg2, %c2_i32 : i32
    %10 = arith.extui %9 : i1 to i32
    %c0_i32_8 = arith.constant 0 : i32
    %11 = arith.cmpi ne, %10, %c0_i32_8 : i32
    scf.if %11 {
      %c0_9 = arith.constant 0 : index
      %c0_10 = arith.constant 0 : index
      %12 = vector.load %arg7[%c0_9, %c0_10] : memref<16x256xf32, #tpu.memory_space<vmem>>, vector<16x256xf32>
      %c0_11 = arith.constant 0 : index
      %c0_12 = arith.constant 0 : index
      %13 = vector.load %arg5[%c0_11, %c0_12] : memref<1x256xf32, #tpu.memory_space<vmem>>, vector<1x256xf32>
      %14 = vector.broadcast %13 : vector<1x256xf32> to vector<16x256xf32>
      %15 = arith.addf %12, %14 : vector<16x256xf32>
      %cst_13 = arith.constant 0.000000e+00 : f32
      %16 = vector.broadcast %cst_13 : f32 to vector<16x256xf32>
      %17 = arith.maximumf %15, %16 : vector<16x256xf32>
      %18 = arith.truncf %17 : vector<16x256xf32> to vector<16x256xbf16>
      %c0_14 = arith.constant 0 : index
      %c0_15 = arith.constant 0 : index
      %19 = vector.load %arg6[%c0_14, %c0_15] : memref<16x256xbf16, #tpu.memory_space<vmem>>, vector<16x256xbf16>
      tpu.vector_store %arg6[%c0_14, %c0_15], %18 {strides = array<i32>} : memref<16x256xbf16, #tpu.memory_space<vmem>>, vector<16x256xbf16>,
    } else {
    }
    return
  }
  func.func @transform_0(%arg0: i32, %arg1: i32, %arg2: i32) -> (i32, i32) {
    %c0_i32 = arith.constant 0 : i32
    return %arg0, %arg2 : i32, i32
  }
  func.func @transform_1(%arg0: i32, %arg1: i32, %arg2: i32) -> (i32, i32) {
    %c0_i32 = arith.constant 0 : i32
    return %arg2, %arg1 : i32, i32
  }
  func.func @transform_2(%arg0: i32, %arg1: i32, %arg2: i32) -> (i32, i32) {
    %c0_i32 = arith.constant 0 : i32
    %c0_i32_0 = arith.constant 0 : i32
    return %c0_i32, %arg1 : i32, i32
  }
  func.func @transform_3(%arg0: i32, %arg1: i32, %arg2: i32) -> (i32, i32) {
    %c0_i32 = arith.constant 0 : i32
    return %arg0, %arg1 : i32, i32
  }
}

module attributes {stable_mosaic.version = 11 : i64} {
  func.func @_matmul_kernel(%arg0: i32, %arg1: i32, %arg2: i32, %arg3: memref<16x128xbf16, #tpu.memory_space<vmem>>, %arg4: memref<128x128xbf16, #tpu.memory_space<vmem>>, %arg5: memref<1x128xf32, #tpu.memory_space<vmem>>, %arg6: memref<16x128xbf16, #tpu.memory_space<vmem>>, %arg7: memref<16x128xbf16, #tpu.memory_space<vmem>>, %arg8: memref<16x128xbf16, #tpu.memory_space<vmem>>, %arg9: memref<16x128xbf16, #tpu.memory_space<vmem>>, %arg10: memref<16x128xf32, #tpu.memory_space<vmem>>) attributes {dimension_semantics = [#tpu.dimension_semantics<parallel>, #tpu.dimension_semantics<parallel>, #tpu.dimension_semantics<arbitrary>], iteration_bounds = array<i64: 1, 1, 5>, scalar_prefetch = 0 : i64, scratch_operands = 1 : i64, tpu.core_type = #tpu.core_type<tc>, window_params = [{transform_indices = @transform_0, window_bounds = array<i64: 16, 128>}, {transform_indices = @transform_1, window_bounds = array<i64: 128, 128>}, {transform_indices = @transform_2, window_bounds = array<i64: 1, 128>}, {transform_indices = @transform_3, window_bounds = array<i64: 16, 128>}, {transform_indices = @transform_4, window_bounds = array<i64: 16, 128>}, {transform_indices = @transform_5, window_bounds = array<i64: 16, 128>}, {transform_indices = @transform_6, window_bounds = array<i64: 16, 128>}]} {
    %c0_i32 = arith.constant 0 : i32
    %0 = arith.cmpi eq, %arg2, %c0_i32 : i32
    %1 = arith.extui %0 : i1 to i32
    %c0_i32_0 = arith.constant 0 : i32
    %2 = arith.cmpi ne, %1, %c0_i32_0 : i32
    scf.if %2 {
      %cst_9 = arith.constant 0.000000e+00 : f32
      %12 = vector.broadcast %cst_9 : f32 to vector<16x128xf32>
      %c0_10 = arith.constant 0 : index
      %c0_11 = arith.constant 0 : index
      %13 = vector.load %arg10[%c0_10, %c0_11] : memref<16x128xf32, #tpu.memory_space<vmem>>, vector<16x128xf32>
      tpu.vector_store %arg10[%c0_10, %c0_11], %12 {strides = array<i32>} : memref<16x128xf32, #tpu.memory_space<vmem>>, vector<16x128xf32>,
    } else {
    }
    %c0 = arith.constant 0 : index
    %c0_1 = arith.constant 0 : index
    %3 = vector.load %arg10[%c0, %c0_1] : memref<16x128xf32, #tpu.memory_space<vmem>>, vector<16x128xf32>
    %c0_2 = arith.constant 0 : index
    %c0_3 = arith.constant 0 : index
    %4 = vector.load %arg3[%c0_2, %c0_3] : memref<16x128xbf16, #tpu.memory_space<vmem>>, vector<16x128xbf16>
    %c0_4 = arith.constant 0 : index
    %c0_5 = arith.constant 0 : index
    %5 = vector.load %arg4[%c0_4, %c0_5] : memref<128x128xbf16, #tpu.memory_space<vmem>>, vector<128x128xbf16>
    %cst = arith.constant dense<0.000000e+00> : vector<16x128xf32>
    %6 = tpu.matmul %4, %5, %cst {dimension_numbers = #tpu.dot_dimension_numbers<[1], [0], [0], [1], [0, 0, 1, 1], [], []>} : vector<16x128xbf16>, vector<128x128xbf16>, vector<16x128xf32> -> vector<16x128xf32>
    %7 = arith.addf %3, %6 : vector<16x128xf32>
    %c0_6 = arith.constant 0 : index
    %c0_7 = arith.constant 0 : index
    %8 = vector.load %arg10[%c0_6, %c0_7] : memref<16x128xf32, #tpu.memory_space<vmem>>, vector<16x128xf32>
    tpu.vector_store %arg10[%c0_6, %c0_7], %7 {strides = array<i32>} : memref<16x128xf32, #tpu.memory_space<vmem>>, vector<16x128xf32>,
    %c4_i32 = arith.constant 4 : i32
    %9 = arith.cmpi eq, %arg2, %c4_i32 : i32
    %10 = arith.extui %9 : i1 to i32
    %c0_i32_8 = arith.constant 0 : i32
    %11 = arith.cmpi ne, %10, %c0_i32_8 : i32
    scf.if %11 {
      %c0_9 = arith.constant 0 : index
      %c0_10 = arith.constant 0 : index
      %12 = vector.load %arg10[%c0_9, %c0_10] : memref<16x128xf32, #tpu.memory_space<vmem>>, vector<16x128xf32>
      %c0_11 = arith.constant 0 : index
      %c0_12 = arith.constant 0 : index
      %13 = vector.load %arg5[%c0_11, %c0_12] : memref<1x128xf32, #tpu.memory_space<vmem>>, vector<1x128xf32>
      %14 = vector.broadcast %13 : vector<1x128xf32> to vector<16x128xf32>
      %15 = arith.addf %12, %14 : vector<16x128xf32>
      %c0_13 = arith.constant 0 : index
      %c0_14 = arith.constant 0 : index
      %16 = vector.load %arg6[%c0_13, %c0_14] : memref<16x128xbf16, #tpu.memory_space<vmem>>, vector<16x128xbf16>
      %17 = arith.extf %16 : vector<16x128xbf16> to vector<16x128xf32>
      %18 = arith.addf %15, %17 : vector<16x128xf32>
      %c0_15 = arith.constant 0 : index
      %c0_16 = arith.constant 0 : index
      %19 = vector.load %arg7[%c0_15, %c0_16] : memref<16x128xbf16, #tpu.memory_space<vmem>>, vector<16x128xbf16>
      %20 = arith.extf %19 : vector<16x128xbf16> to vector<16x128xf32>
      %c0_17 = arith.constant 0 : index
      %c0_18 = arith.constant 0 : index
      %21 = vector.load %arg8[%c0_17, %c0_18] : memref<16x128xbf16, #tpu.memory_space<vmem>>, vector<16x128xbf16>
      %22 = arith.extf %21 : vector<16x128xbf16> to vector<16x128xf32>
      %cst_19 = arith.constant 5.000000e-01 : f32
      %23 = vector.broadcast %cst_19 : f32 to vector<16x128xf32>
      %24 = arith.mulf %23, %20 : vector<16x128xf32>
      %25 = math.tanh %24 : vector<16x128xf32>
      %cst_20 = arith.constant 1.000000e+00 : f32
      %26 = vector.broadcast %cst_20 : f32 to vector<16x128xf32>
      %27 = arith.addf %25, %26 : vector<16x128xf32>
      %cst_21 = arith.constant 5.000000e-01 : f32
      %28 = vector.broadcast %cst_21 : f32 to vector<16x128xf32>
      %29 = arith.mulf %28, %27 : vector<16x128xf32>
      %30 = arith.mulf %18, %29 : vector<16x128xf32>
      %cst_22 = arith.constant 5.000000e-01 : f32
      %31 = vector.broadcast %cst_22 : f32 to vector<16x128xf32>
      %32 = arith.mulf %31, %22 : vector<16x128xf32>
      %33 = math.tanh %32 : vector<16x128xf32>
      %cst_23 = arith.constant 1.000000e+00 : f32
      %34 = vector.broadcast %cst_23 : f32 to vector<16x128xf32>
      %35 = arith.addf %33, %34 : vector<16x128xf32>
      %cst_24 = arith.constant 5.000000e-01 : f32
      %36 = vector.broadcast %cst_24 : f32 to vector<16x128xf32>
      %37 = arith.mulf %36, %35 : vector<16x128xf32>
      %38 = arith.mulf %30, %37 : vector<16x128xf32>
      %39 = arith.truncf %38 : vector<16x128xf32> to vector<16x128xbf16>
      %c0_25 = arith.constant 0 : index
      %c0_26 = arith.constant 0 : index
      %40 = vector.load %arg9[%c0_25, %c0_26] : memref<16x128xbf16, #tpu.memory_space<vmem>>, vector<16x128xbf16>
      tpu.vector_store %arg9[%c0_25, %c0_26], %39 {strides = array<i32>} : memref<16x128xbf16, #tpu.memory_space<vmem>>, vector<16x128xbf16>,
    } else {
    }
    return
  }
  func.func @transform_0(%arg0: i32, %arg1: i32, %arg2: i32) -> (i32, i32) {
    %c0_i32 = arith.constant 0 : i32
    return %arg0, %arg2 : i32, i32
  }
  func.func @transform_1(%arg0: i32, %arg1: i32, %arg2: i32) -> (i32, i32) {
    %c0_i32 = arith.constant 0 : i32
    return %arg2, %arg1 : i32, i32
  }
  func.func @transform_2(%arg0: i32, %arg1: i32, %arg2: i32) -> (i32, i32) {
    %c0_i32 = arith.constant 0 : i32
    %c0_i32_0 = arith.constant 0 : i32
    return %c0_i32, %arg1 : i32, i32
  }
  func.func @transform_3(%arg0: i32, %arg1: i32, %arg2: i32) -> (i32, i32) {
    %c0_i32 = arith.constant 0 : i32
    return %arg0, %arg1 : i32, i32
  }
  func.func @transform_4(%arg0: i32, %arg1: i32, %arg2: i32) -> (i32, i32) {
    %c0_i32 = arith.constant 0 : i32
    return %arg0, %arg1 : i32, i32
  }
  func.func @transform_5(%arg0: i32, %arg1: i32, %arg2: i32) -> (i32, i32) {
    %c0_i32 = arith.constant 0 : i32
    return %arg0, %arg1 : i32, i32
  }
  func.func @transform_6(%arg0: i32, %arg1: i32, %arg2: i32) -> (i32, i32) {
    %c0_i32 = arith.constant 0 : i32
    return %arg0, %arg1 : i32, i32
  }
}

module attributes {stable_mosaic.version = 11 : i64} {
  func.func @_matmul_kernel(%arg0: i32, %arg1: i32, %arg2: i32, %arg3: memref<32x384xbf16, #tpu.memory_space<vmem>>, %arg4: memref<384x128xbf16, #tpu.memory_space<vmem>>, %arg5: memref<1x128xf32, #tpu.memory_space<vmem>>, %arg6: memref<32x128xbf16, #tpu.memory_space<vmem>>, %arg7: memref<32x128xbf16, #tpu.memory_space<vmem>>, %arg8: memref<32x128xbf16, #tpu.memory_space<vmem>>, %arg9: memref<32x128xbf16, #tpu.memory_space<vmem>>, %arg10: memref<32x128xf32, #tpu.memory_space<vmem>>) attributes {dimension_semantics = [#tpu.dimension_semantics<parallel>, #tpu.dimension_semantics<parallel>, #tpu.dimension_semantics<arbitrary>], iteration_bounds = array<i64: 1, 1, 1>, scalar_prefetch = 0 : i64, scratch_operands = 1 : i64, tpu.core_type = #tpu.core_type<tc>, window_params = [{transform_indices = @transform_0, window_bounds = array<i64: 32, 384>}, {transform_indices = @transform_1, window_bounds = array<i64: 384, 128>}, {transform_indices = @transform_2, window_bounds = array<i64: 1, 128>}, {transform_indices = @transform_3, window_bounds = array<i64: 32, 128>}, {transform_indices = @transform_4, window_bounds = array<i64: 32, 128>}, {transform_indices = @transform_5, window_bounds = array<i64: 32, 128>}, {transform_indices = @transform_6, window_bounds = array<i64: 32, 128>}]} {
    %c0_i32 = arith.constant 0 : i32
    %0 = arith.cmpi eq, %arg2, %c0_i32 : i32
    %1 = arith.extui %0 : i1 to i32
    %c0_i32_0 = arith.constant 0 : i32
    %2 = arith.cmpi ne, %1, %c0_i32_0 : i32
    scf.if %2 {
      %cst_10 = arith.constant 0.000000e+00 : f32
      %12 = vector.broadcast %cst_10 : f32 to vector<32x128xf32>
      %c0_11 = arith.constant 0 : index
      %c0_12 = arith.constant 0 : index
      %13 = vector.load %arg10[%c0_11, %c0_12] : memref<32x128xf32, #tpu.memory_space<vmem>>, vector<32x128xf32>
      tpu.vector_store %arg10[%c0_11, %c0_12], %12 {strides = array<i32>} : memref<32x128xf32, #tpu.memory_space<vmem>>, vector<32x128xf32>,
    } else {
    }
    %c0 = arith.constant 0 : index
    %c0_1 = arith.constant 0 : index
    %3 = vector.load %arg10[%c0, %c0_1] : memref<32x128xf32, #tpu.memory_space<vmem>>, vector<32x128xf32>
    %c0_2 = arith.constant 0 : index
    %c0_3 = arith.constant 0 : index
    %4 = vector.load %arg3[%c0_2, %c0_3] : memref<32x384xbf16, #tpu.memory_space<vmem>>, vector<32x384xbf16>
    %c0_4 = arith.constant 0 : index
    %c0_5 = arith.constant 0 : index
    %5 = vector.load %arg4[%c0_4, %c0_5] : memref<384x128xbf16, #tpu.memory_space<vmem>>, vector<384x128xbf16>
    %cst = arith.constant dense<0.000000e+00> : vector<32x128xf32>
    %6 = tpu.matmul %4, %5, %cst {dimension_numbers = #tpu.dot_dimension_numbers<[1], [0], [0], [1], [0, 0, 1, 1], [], []>} : vector<32x384xbf16>, vector<384x128xbf16>, vector<32x128xf32> -> vector<32x128xf32>
    %7 = arith.addf %3, %6 : vector<32x128xf32>
    %c0_6 = arith.constant 0 : index
    %c0_7 = arith.constant 0 : index
    %8 = vector.load %arg10[%c0_6, %c0_7] : memref<32x128xf32, #tpu.memory_space<vmem>>, vector<32x128xf32>
    tpu.vector_store %arg10[%c0_6, %c0_7], %7 {strides = array<i32>} : memref<32x128xf32, #tpu.memory_space<vmem>>, vector<32x128xf32>,
    %c0_i32_8 = arith.constant 0 : i32
    %9 = arith.cmpi eq, %arg2, %c0_i32_8 : i32
    %10 = arith.extui %9 : i1 to i32
    %c0_i32_9 = arith.constant 0 : i32
    %11 = arith.cmpi ne, %10, %c0_i32_9 : i32
    scf.if %11 {
      %c0_10 = arith.constant 0 : index
      %c0_11 = arith.constant 0 : index
      %12 = vector.load %arg10[%c0_10, %c0_11] : memref<32x128xf32, #tpu.memory_space<vmem>>, vector<32x128xf32>
      %c0_12 = arith.constant 0 : index
      %c0_13 = arith.constant 0 : index
      %13 = vector.load %arg5[%c0_12, %c0_13] : memref<1x128xf32, #tpu.memory_space<vmem>>, vector<1x128xf32>
      %14 = vector.broadcast %13 : vector<1x128xf32> to vector<32x128xf32>
      %15 = arith.addf %12, %14 : vector<32x128xf32>
      %c0_14 = arith.constant 0 : index
      %c0_15 = arith.constant 0 : index
      %16 = vector.load %arg6[%c0_14, %c0_15] : memref<32x128xbf16, #tpu.memory_space<vmem>>, vector<32x128xbf16>
      %17 = arith.extf %16 : vector<32x128xbf16> to vector<32x128xf32>
      %18 = arith.addf %15, %17 : vector<32x128xf32>
      %c0_16 = arith.constant 0 : index
      %c0_17 = arith.constant 0 : index
      %19 = vector.load %arg7[%c0_16, %c0_17] : memref<32x128xbf16, #tpu.memory_space<vmem>>, vector<32x128xbf16>
      %20 = arith.extf %19 : vector<32x128xbf16> to vector<32x128xf32>
      %c0_18 = arith.constant 0 : index
      %c0_19 = arith.constant 0 : index
      %21 = vector.load %arg8[%c0_18, %c0_19] : memref<32x128xbf16, #tpu.memory_space<vmem>>, vector<32x128xbf16>
      %22 = arith.extf %21 : vector<32x128xbf16> to vector<32x128xf32>
      %cst_20 = arith.constant 5.000000e-01 : f32
      %23 = vector.broadcast %cst_20 : f32 to vector<32x128xf32>
      %24 = arith.mulf %23, %20 : vector<32x128xf32>
      %25 = math.tanh %24 : vector<32x128xf32>
      %cst_21 = arith.constant 1.000000e+00 : f32
      %26 = vector.broadcast %cst_21 : f32 to vector<32x128xf32>
      %27 = arith.addf %25, %26 : vector<32x128xf32>
      %cst_22 = arith.constant 5.000000e-01 : f32
      %28 = vector.broadcast %cst_22 : f32 to vector<32x128xf32>
      %29 = arith.mulf %28, %27 : vector<32x128xf32>
      %30 = arith.mulf %18, %29 : vector<32x128xf32>
      %cst_23 = arith.constant 5.000000e-01 : f32
      %31 = vector.broadcast %cst_23 : f32 to vector<32x128xf32>
      %32 = arith.mulf %31, %22 : vector<32x128xf32>
      %33 = math.tanh %32 : vector<32x128xf32>
      %cst_24 = arith.constant 1.000000e+00 : f32
      %34 = vector.broadcast %cst_24 : f32 to vector<32x128xf32>
      %35 = arith.addf %33, %34 : vector<32x128xf32>
      %cst_25 = arith.constant 5.000000e-01 : f32
      %36 = vector.broadcast %cst_25 : f32 to vector<32x128xf32>
      %37 = arith.mulf %36, %35 : vector<32x128xf32>
      %38 = arith.mulf %30, %37 : vector<32x128xf32>
      %39 = arith.truncf %38 : vector<32x128xf32> to vector<32x128xbf16>
      %c0_26 = arith.constant 0 : index
      %c0_27 = arith.constant 0 : index
      %40 = vector.load %arg9[%c0_26, %c0_27] : memref<32x128xbf16, #tpu.memory_space<vmem>>, vector<32x128xbf16>
      tpu.vector_store %arg9[%c0_26, %c0_27], %39 {strides = array<i32>} : memref<32x128xbf16, #tpu.memory_space<vmem>>, vector<32x128xbf16>,
    } else {
    }
    return
  }
  func.func @transform_0(%arg0: i32, %arg1: i32, %arg2: i32) -> (i32, i32) {
    %c0_i32 = arith.constant 0 : i32
    return %arg0, %arg2 : i32, i32
  }
  func.func @transform_1(%arg0: i32, %arg1: i32, %arg2: i32) -> (i32, i32) {
    %c0_i32 = arith.constant 0 : i32
    return %arg2, %arg1 : i32, i32
  }
  func.func @transform_2(%arg0: i32, %arg1: i32, %arg2: i32) -> (i32, i32) {
    %c0_i32 = arith.constant 0 : i32
    %c0_i32_0 = arith.constant 0 : i32
    return %c0_i32, %arg1 : i32, i32
  }
  func.func @transform_3(%arg0: i32, %arg1: i32, %arg2: i32) -> (i32, i32) {
    %c0_i32 = arith.constant 0 : i32
    return %arg0, %arg1 : i32, i32
  }
  func.func @transform_4(%arg0: i32, %arg1: i32, %arg2: i32) -> (i32, i32) {
    %c0_i32 = arith.constant 0 : i32
    return %arg0, %arg1 : i32, i32
  }
  func.func @transform_5(%arg0: i32, %arg1: i32, %arg2: i32) -> (i32, i32) {
    %c0_i32 = arith.constant 0 : i32
    return %arg0, %arg1 : i32, i32
  }
  func.func @transform_6(%arg0: i32, %arg1: i32, %arg2: i32) -> (i32, i32) {
    %c0_i32 = arith.constant 0 : i32
    return %arg0, %arg1 : i32, i32
  }
}

module attributes {stable_mosaic.version = 11 : i64} {
  func.func @_matmul_kernel(%arg0: i32, %arg1: i32, %arg2: i32, %arg3: memref<128x256xbf16, #tpu.memory_space<vmem>>, %arg4: memref<256x128xbf16, #tpu.memory_space<vmem>>, %arg5: memref<1x128xf32, #tpu.memory_space<vmem>>, %arg6: memref<128x128xbf16, #tpu.memory_space<vmem>>, %arg7: memref<128x128xbf16, #tpu.memory_space<vmem>>, %arg8: memref<128x128xbf16, #tpu.memory_space<vmem>>, %arg9: memref<128x128xbf16, #tpu.memory_space<vmem>>, %arg10: memref<128x128xf32, #tpu.memory_space<vmem>>) attributes {dimension_semantics = [#tpu.dimension_semantics<parallel>, #tpu.dimension_semantics<parallel>, #tpu.dimension_semantics<arbitrary>], iteration_bounds = array<i64: 1, 1, 1>, scalar_prefetch = 0 : i64, scratch_operands = 1 : i64, tpu.core_type = #tpu.core_type<tc>, window_params = [{transform_indices = @transform_0, window_bounds = array<i64: 128, 256>}, {transform_indices = @transform_1, window_bounds = array<i64: 256, 128>}, {transform_indices = @transform_2, window_bounds = array<i64: 1, 128>}, {transform_indices = @transform_3, window_bounds = array<i64: 128, 128>}, {transform_indices = @transform_4, window_bounds = array<i64: 128, 128>}, {transform_indices = @transform_5, window_bounds = array<i64: 128, 128>}, {transform_indices = @transform_6, window_bounds = array<i64: 128, 128>}]} {
    %c0_i32 = arith.constant 0 : i32
    %0 = arith.cmpi eq, %arg2, %c0_i32 : i32
    %1 = arith.extui %0 : i1 to i32
    %c0_i32_0 = arith.constant 0 : i32
    %2 = arith.cmpi ne, %1, %c0_i32_0 : i32
    scf.if %2 {
      %cst_10 = arith.constant 0.000000e+00 : f32
      %12 = vector.broadcast %cst_10 : f32 to vector<128x128xf32>
      %c0_11 = arith.constant 0 : index
      %c0_12 = arith.constant 0 : index
      %13 = vector.load %arg10[%c0_11, %c0_12] : memref<128x128xf32, #tpu.memory_space<vmem>>, vector<128x128xf32>
      tpu.vector_store %arg10[%c0_11, %c0_12], %12 {strides = array<i32>} : memref<128x128xf32, #tpu.memory_space<vmem>>, vector<128x128xf32>,
    } else {
    }
    %c0 = arith.constant 0 : index
    %c0_1 = arith.constant 0 : index
    %3 = vector.load %arg10[%c0, %c0_1] : memref<128x128xf32, #tpu.memory_space<vmem>>, vector<128x128xf32>
    %c0_2 = arith.constant 0 : index
    %c0_3 = arith.constant 0 : index
    %4 = vector.load %arg3[%c0_2, %c0_3] : memref<128x256xbf16, #tpu.memory_space<vmem>>, vector<128x256xbf16>
    %c0_4 = arith.constant 0 : index
    %c0_5 = arith.constant 0 : index
    %5 = vector.load %arg4[%c0_4, %c0_5] : memref<256x128xbf16, #tpu.memory_space<vmem>>, vector<256x128xbf16>
    %cst = arith.constant dense<0.000000e+00> : vector<128x128xf32>
    %6 = tpu.matmul %4, %5, %cst {dimension_numbers = #tpu.dot_dimension_numbers<[1], [0], [0], [1], [0, 0, 1, 1], [], []>} : vector<128x256xbf16>, vector<256x128xbf16>, vector<128x128xf32> -> vector<128x128xf32>
    %7 = arith.addf %3, %6 : vector<128x128xf32>
    %c0_6 = arith.constant 0 : index
    %c0_7 = arith.constant 0 : index
    %8 = vector.load %arg10[%c0_6, %c0_7] : memref<128x128xf32, #tpu.memory_space<vmem>>, vector<128x128xf32>
    tpu.vector_store %arg10[%c0_6, %c0_7], %7 {strides = array<i32>} : memref<128x128xf32, #tpu.memory_space<vmem>>, vector<128x128xf32>,
    %c0_i32_8 = arith.constant 0 : i32
    %9 = arith.cmpi eq, %arg2, %c0_i32_8 : i32
    %10 = arith.extui %9 : i1 to i32
    %c0_i32_9 = arith.constant 0 : i32
    %11 = arith.cmpi ne, %10, %c0_i32_9 : i32
    scf.if %11 {
      %c0_10 = arith.constant 0 : index
      %c0_11 = arith.constant 0 : index
      %12 = vector.load %arg10[%c0_10, %c0_11] : memref<128x128xf32, #tpu.memory_space<vmem>>, vector<128x128xf32>
      %c0_12 = arith.constant 0 : index
      %c0_13 = arith.constant 0 : index
      %13 = vector.load %arg5[%c0_12, %c0_13] : memref<1x128xf32, #tpu.memory_space<vmem>>, vector<1x128xf32>
      %14 = vector.broadcast %13 : vector<1x128xf32> to vector<128x128xf32>
      %15 = arith.addf %12, %14 : vector<128x128xf32>
      %c0_14 = arith.constant 0 : index
      %c0_15 = arith.constant 0 : index
      %16 = vector.load %arg6[%c0_14, %c0_15] : memref<128x128xbf16, #tpu.memory_space<vmem>>, vector<128x128xbf16>
      %17 = arith.extf %16 : vector<128x128xbf16> to vector<128x128xf32>
      %18 = arith.addf %15, %17 : vector<128x128xf32>
      %c0_16 = arith.constant 0 : index
      %c0_17 = arith.constant 0 : index
      %19 = vector.load %arg7[%c0_16, %c0_17] : memref<128x128xbf16, #tpu.memory_space<vmem>>, vector<128x128xbf16>
      %20 = arith.extf %19 : vector<128x128xbf16> to vector<128x128xf32>
      %c0_18 = arith.constant 0 : index
      %c0_19 = arith.constant 0 : index
      %21 = vector.load %arg8[%c0_18, %c0_19] : memref<128x128xbf16, #tpu.memory_space<vmem>>, vector<128x128xbf16>
      %22 = arith.extf %21 : vector<128x128xbf16> to vector<128x128xf32>
      %cst_20 = arith.constant 5.000000e-01 : f32
      %23 = vector.broadcast %cst_20 : f32 to vector<128x128xf32>
      %24 = arith.mulf %23, %20 : vector<128x128xf32>
      %25 = math.tanh %24 : vector<128x128xf32>
      %cst_21 = arith.constant 1.000000e+00 : f32
      %26 = vector.broadcast %cst_21 : f32 to vector<128x128xf32>
      %27 = arith.addf %25, %26 : vector<128x128xf32>
      %cst_22 = arith.constant 5.000000e-01 : f32
      %28 = vector.broadcast %cst_22 : f32 to vector<128x128xf32>
      %29 = arith.mulf %28, %27 : vector<128x128xf32>
      %30 = arith.mulf %18, %29 : vector<128x128xf32>
      %cst_23 = arith.constant 5.000000e-01 : f32
      %31 = vector.broadcast %cst_23 : f32 to vector<128x128xf32>
      %32 = arith.mulf %31, %22 : vector<128x128xf32>
      %33 = math.tanh %32 : vector<128x128xf32>
      %cst_24 = arith.constant 1.000000e+00 : f32
      %34 = vector.broadcast %cst_24 : f32 to vector<128x128xf32>
      %35 = arith.addf %33, %34 : vector<128x128xf32>
      %cst_25 = arith.constant 5.000000e-01 : f32
      %36 = vector.broadcast %cst_25 : f32 to vector<128x128xf32>
      %37 = arith.mulf %36, %35 : vector<128x128xf32>
      %38 = arith.mulf %30, %37 : vector<128x128xf32>
      %39 = arith.truncf %38 : vector<128x128xf32> to vector<128x128xbf16>
      %c0_26 = arith.constant 0 : index
      %c0_27 = arith.constant 0 : index
      %40 = vector.load %arg9[%c0_26, %c0_27] : memref<128x128xbf16, #tpu.memory_space<vmem>>, vector<128x128xbf16>
      tpu.vector_store %arg9[%c0_26, %c0_27], %39 {strides = array<i32>} : memref<128x128xbf16, #tpu.memory_space<vmem>>, vector<128x128xbf16>,
    } else {
    }
    return
  }
  func.func @transform_0(%arg0: i32, %arg1: i32, %arg2: i32) -> (i32, i32) {
    %c0_i32 = arith.constant 0 : i32
    return %arg0, %arg2 : i32, i32
  }
  func.func @transform_1(%arg0: i32, %arg1: i32, %arg2: i32) -> (i32, i32) {
    %c0_i32 = arith.constant 0 : i32
    return %arg2, %arg1 : i32, i32
  }
  func.func @transform_2(%arg0: i32, %arg1: i32, %arg2: i32) -> (i32, i32) {
    %c0_i32 = arith.constant 0 : i32
    %c0_i32_0 = arith.constant 0 : i32
    return %c0_i32, %arg1 : i32, i32
  }
  func.func @transform_3(%arg0: i32, %arg1: i32, %arg2: i32) -> (i32, i32) {
    %c0_i32 = arith.constant 0 : i32
    return %arg0, %arg1 : i32, i32
  }
  func.func @transform_4(%arg0: i32, %arg1: i32, %arg2: i32) -> (i32, i32) {
    %c0_i32 = arith.constant 0 : i32
    return %arg0, %arg1 : i32, i32
  }
  func.func @transform_5(%arg0: i32, %arg1: i32, %arg2: i32) -> (i32, i32) {
    %c0_i32 = arith.constant 0 : i32
    return %arg0, %arg1 : i32, i32
  }
  func.func @transform_6(%arg0: i32, %arg1: i32, %arg2: i32) -> (i32, i32) {
    %c0_i32 = arith.constant 0 : i32
    return %arg0, %arg1 : i32, i32
  }
}

module attributes {stable_mosaic.version = 11 : i64} {
  func.func @_matmul_kernel(%arg0: i32, %arg1: i32, %arg2: i32, %arg3: memref<512x128xbf16, #tpu.memory_space<vmem>>, %arg4: memref<128x128xbf16, #tpu.memory_space<vmem>>, %arg5: memref<1x128xf32, #tpu.memory_space<vmem>>, %arg6: memref<512x128xbf16, #tpu.memory_space<vmem>>, %arg7: memref<512x128xbf16, #tpu.memory_space<vmem>>, %arg8: memref<512x128xf32, #tpu.memory_space<vmem>>) attributes {dimension_semantics = [#tpu.dimension_semantics<parallel>, #tpu.dimension_semantics<parallel>, #tpu.dimension_semantics<arbitrary>], iteration_bounds = array<i64: 1, 1, 1>, scalar_prefetch = 0 : i64, scratch_operands = 1 : i64, tpu.core_type = #tpu.core_type<tc>, window_params = [{transform_indices = @transform_0, window_bounds = array<i64: 512, 128>}, {transform_indices = @transform_1, window_bounds = array<i64: 128, 128>}, {transform_indices = @transform_2, window_bounds = array<i64: 1, 128>}, {transform_indices = @transform_3, window_bounds = array<i64: 512, 128>}, {transform_indices = @transform_4, window_bounds = array<i64: 512, 128>}]} {
    %c0_i32 = arith.constant 0 : i32
    %0 = arith.cmpi eq, %arg2, %c0_i32 : i32
    %1 = arith.extui %0 : i1 to i32
    %c0_i32_0 = arith.constant 0 : i32
    %2 = arith.cmpi ne, %1, %c0_i32_0 : i32
    scf.if %2 {
      %cst_10 = arith.constant 0.000000e+00 : f32
      %12 = vector.broadcast %cst_10 : f32 to vector<512x128xf32>
      %c0_11 = arith.constant 0 : index
      %c0_12 = arith.constant 0 : index
      %13 = vector.load %arg8[%c0_11, %c0_12] : memref<512x128xf32, #tpu.memory_space<vmem>>, vector<512x128xf32>
      tpu.vector_store %arg8[%c0_11, %c0_12], %12 {strides = array<i32>} : memref<512x128xf32, #tpu.memory_space<vmem>>, vector<512x128xf32>,
    } else {
    }
    %c0 = arith.constant 0 : index
    %c0_1 = arith.constant 0 : index
    %3 = vector.load %arg8[%c0, %c0_1] : memref<512x128xf32, #tpu.memory_space<vmem>>, vector<512x128xf32>
    %c0_2 = arith.constant 0 : index
    %c0_3 = arith.constant 0 : index
    %4 = vector.load %arg3[%c0_2, %c0_3] : memref<512x128xbf16, #tpu.memory_space<vmem>>, vector<512x128xbf16>
    %c0_4 = arith.constant 0 : index
    %c0_5 = arith.constant 0 : index
    %5 = vector.load %arg4[%c0_4, %c0_5] : memref<128x128xbf16, #tpu.memory_space<vmem>>, vector<128x128xbf16>
    %cst = arith.constant dense<0.000000e+00> : vector<512x128xf32>
    %6 = tpu.matmul %4, %5, %cst {dimension_numbers = #tpu.dot_dimension_numbers<[1], [0], [0], [1], [0, 0, 1, 1], [], []>} : vector<512x128xbf16>, vector<128x128xbf16>, vector<512x128xf32> -> vector<512x128xf32>
    %7 = arith.addf %3, %6 : vector<512x128xf32>
    %c0_6 = arith.constant 0 : index
    %c0_7 = arith.constant 0 : index
    %8 = vector.load %arg8[%c0_6, %c0_7] : memref<512x128xf32, #tpu.memory_space<vmem>>, vector<512x128xf32>
    tpu.vector_store %arg8[%c0_6, %c0_7], %7 {strides = array<i32>} : memref<512x128xf32, #tpu.memory_space<vmem>>, vector<512x128xf32>,
    %c0_i32_8 = arith.constant 0 : i32
    %9 = arith.cmpi eq, %arg2, %c0_i32_8 : i32
    %10 = arith.extui %9 : i1 to i32
    %c0_i32_9 = arith.constant 0 : i32
    %11 = arith.cmpi ne, %10, %c0_i32_9 : i32
    scf.if %11 {
      %c0_10 = arith.constant 0 : index
      %c0_11 = arith.constant 0 : index
      %12 = vector.load %arg8[%c0_10, %c0_11] : memref<512x128xf32, #tpu.memory_space<vmem>>, vector<512x128xf32>
      %c0_12 = arith.constant 0 : index
      %c0_13 = arith.constant 0 : index
      %13 = vector.load %arg5[%c0_12, %c0_13] : memref<1x128xf32, #tpu.memory_space<vmem>>, vector<1x128xf32>
      %14 = vector.broadcast %13 : vector<1x128xf32> to vector<512x128xf32>
      %15 = arith.addf %12, %14 : vector<512x128xf32>
      %c0_14 = arith.constant 0 : index
      %c0_15 = arith.constant 0 : index
      %16 = vector.load %arg6[%c0_14, %c0_15] : memref<512x128xbf16, #tpu.memory_space<vmem>>, vector<512x128xbf16>
      %17 = arith.extf %16 : vector<512x128xbf16> to vector<512x128xf32>
      %18 = arith.addf %15, %17 : vector<512x128xf32>
      %19 = arith.truncf %18 : vector<512x128xf32> to vector<512x128xbf16>
      %c0_16 = arith.constant 0 : index
      %c0_17 = arith.constant 0 : index
      %20 = vector.load %arg7[%c0_16, %c0_17] : memref<512x128xbf16, #tpu.memory_space<vmem>>, vector<512x128xbf16>
      tpu.vector_store %arg7[%c0_16, %c0_17], %19 {strides = array<i32>} : memref<512x128xbf16, #tpu.memory_space<vmem>>, vector<512x128xbf16>,
    } else {
    }
    return
  }
  func.func @transform_0(%arg0: i32, %arg1: i32, %arg2: i32) -> (i32, i32) {
    %c0_i32 = arith.constant 0 : i32
    return %arg0, %arg2 : i32, i32
  }
  func.func @transform_1(%arg0: i32, %arg1: i32, %arg2: i32) -> (i32, i32) {
    %c0_i32 = arith.constant 0 : i32
    return %arg2, %arg1 : i32, i32
  }
  func.func @transform_2(%arg0: i32, %arg1: i32, %arg2: i32) -> (i32, i32) {
    %c0_i32 = arith.constant 0 : i32
    %c0_i32_0 = arith.constant 0 : i32
    return %c0_i32, %arg1 : i32, i32
  }
  func.func @transform_3(%arg0: i32, %arg1: i32, %arg2: i32) -> (i32, i32) {
    %c0_i32 = arith.constant 0 : i32
    return %arg0, %arg1 : i32, i32
  }
  func.func @transform_4(%arg0: i32, %arg1: i32, %arg2: i32) -> (i32, i32) {
    %c0_i32 = arith.constant 0 : i32
    return %arg0, %arg1 : i32, i32
  }
}

module attributes {stable_mosaic.version = 11 : i64} {
  func.func @_matmul_kernel(%arg0: i32, %arg1: i32, %arg2: i32, %arg3: memref<512x128xbf16, #tpu.memory_space<vmem>>, %arg4: memref<128x128xbf16, #tpu.memory_space<vmem>>, %arg5: memref<1x128xf32, #tpu.memory_space<vmem>>, %arg6: memref<512x128xbf16, #tpu.memory_space<vmem>>, %arg7: memref<512x128xf32, #tpu.memory_space<vmem>>) attributes {dimension_semantics = [#tpu.dimension_semantics<parallel>, #tpu.dimension_semantics<parallel>, #tpu.dimension_semantics<arbitrary>], iteration_bounds = array<i64: 1, 1, 1>, scalar_prefetch = 0 : i64, scratch_operands = 1 : i64, tpu.core_type = #tpu.core_type<tc>, window_params = [{transform_indices = @transform_0, window_bounds = array<i64: 512, 128>}, {transform_indices = @transform_1, window_bounds = array<i64: 128, 128>}, {transform_indices = @transform_2, window_bounds = array<i64: 1, 128>}, {transform_indices = @transform_3, window_bounds = array<i64: 512, 128>}]} {
    %c0_i32 = arith.constant 0 : i32
    %0 = arith.cmpi eq, %arg2, %c0_i32 : i32
    %1 = arith.extui %0 : i1 to i32
    %c0_i32_0 = arith.constant 0 : i32
    %2 = arith.cmpi ne, %1, %c0_i32_0 : i32
    scf.if %2 {
      %cst_10 = arith.constant 0.000000e+00 : f32
      %12 = vector.broadcast %cst_10 : f32 to vector<512x128xf32>
      %c0_11 = arith.constant 0 : index
      %c0_12 = arith.constant 0 : index
      %13 = vector.load %arg7[%c0_11, %c0_12] : memref<512x128xf32, #tpu.memory_space<vmem>>, vector<512x128xf32>
      tpu.vector_store %arg7[%c0_11, %c0_12], %12 {strides = array<i32>} : memref<512x128xf32, #tpu.memory_space<vmem>>, vector<512x128xf32>,
    } else {
    }
    %c0 = arith.constant 0 : index
    %c0_1 = arith.constant 0 : index
    %3 = vector.load %arg7[%c0, %c0_1] : memref<512x128xf32, #tpu.memory_space<vmem>>, vector<512x128xf32>
    %c0_2 = arith.constant 0 : index
    %c0_3 = arith.constant 0 : index
    %4 = vector.load %arg3[%c0_2, %c0_3] : memref<512x128xbf16, #tpu.memory_space<vmem>>, vector<512x128xbf16>
    %c0_4 = arith.constant 0 : index
    %c0_5 = arith.constant 0 : index
    %5 = vector.load %arg4[%c0_4, %c0_5] : memref<128x128xbf16, #tpu.memory_space<vmem>>, vector<128x128xbf16>
    %cst = arith.constant dense<0.000000e+00> : vector<512x128xf32>
    %6 = tpu.matmul %4, %5, %cst {dimension_numbers = #tpu.dot_dimension_numbers<[1], [0], [0], [1], [0, 0, 1, 1], [], []>} : vector<512x128xbf16>, vector<128x128xbf16>, vector<512x128xf32> -> vector<512x128xf32>
    %7 = arith.addf %3, %6 : vector<512x128xf32>
    %c0_6 = arith.constant 0 : index
    %c0_7 = arith.constant 0 : index
    %8 = vector.load %arg7[%c0_6, %c0_7] : memref<512x128xf32, #tpu.memory_space<vmem>>, vector<512x128xf32>
    tpu.vector_store %arg7[%c0_6, %c0_7], %7 {strides = array<i32>} : memref<512x128xf32, #tpu.memory_space<vmem>>, vector<512x128xf32>,
    %c0_i32_8 = arith.constant 0 : i32
    %9 = arith.cmpi eq, %arg2, %c0_i32_8 : i32
    %10 = arith.extui %9 : i1 to i32
    %c0_i32_9 = arith.constant 0 : i32
    %11 = arith.cmpi ne, %10, %c0_i32_9 : i32
    scf.if %11 {
      %c0_10 = arith.constant 0 : index
      %c0_11 = arith.constant 0 : index
      %12 = vector.load %arg7[%c0_10, %c0_11] : memref<512x128xf32, #tpu.memory_space<vmem>>, vector<512x128xf32>
      %c0_12 = arith.constant 0 : index
      %c0_13 = arith.constant 0 : index
      %13 = vector.load %arg5[%c0_12, %c0_13] : memref<1x128xf32, #tpu.memory_space<vmem>>, vector<1x128xf32>
      %14 = vector.broadcast %13 : vector<1x128xf32> to vector<512x128xf32>
      %15 = arith.addf %12, %14 : vector<512x128xf32>
      %16 = math.tanh %15 : vector<512x128xf32>
      %17 = arith.truncf %16 : vector<512x128xf32> to vector<512x128xbf16>
      %c0_14 = arith.constant 0 : index
      %c0_15 = arith.constant 0 : index
      %18 = vector.load %arg6[%c0_14, %c0_15] : memref<512x128xbf16, #tpu.memory_space<vmem>>, vector<512x128xbf16>
      tpu.vector_store %arg6[%c0_14, %c0_15], %17 {strides = array<i32>} : memref<512x128xbf16, #tpu.memory_space<vmem>>, vector<512x128xbf16>,
    } else {
    }
    return
  }
  func.func @transform_0(%arg0: i32, %arg1: i32, %arg2: i32) -> (i32, i32) {
    %c0_i32 = arith.constant 0 : i32
    return %arg0, %arg2 : i32, i32
  }
  func.func @transform_1(%arg0: i32, %arg1: i32, %arg2: i32) -> (i32, i32) {
    %c0_i32 = arith.constant 0 : i32
    return %arg2, %arg1 : i32, i32
  }
  func.func @transform_2(%arg0: i32, %arg1: i32, %arg2: i32) -> (i32, i32) {
    %c0_i32 = arith.constant 0 : i32
    %c0_i32_0 = arith.constant 0 : i32
    return %c0_i32, %arg1 : i32, i32
  }
  func.func @transform_3(%arg0: i32, %arg1: i32, %arg2: i32) -> (i32, i32) {
    %c0_i32 = arith.constant 0 : i32
    return %arg0, %arg1 : i32, i32
  }
}

</mosaic_0001>

<bundles_post_ra>
// kernel: netg_forward.60
= control target key start
LH: loop header
LB: loop body
LE: loop exit
PB: predicated region body
PF: predicated region fallthrough
CT: control target
= control target key end

     0   :  { %s2251_s1 = inlined_call_operand.vmem [shape: bf16[128,128], index: 1, kind: input, shape index: {}]   ;;  %s2252_s0 = inlined_call_operand.vmem [shape: bf16[512,128], index: 0, kind: input, shape index: {}]   ;;  %s2253_s2 = inlined_call_operand.vmem [shape: f32[1,128], index: 2, kind: input, shape index: {}]   ;;  %s2254_s3 = inlined_call_operand.vmem [shape: bf16[512,128], index: 3, kind: output, shape index: {}]  }
   0x1   :  { %v1906_v0 = vld [vmem:[%s2251_s1] sm:$0xff]   ;;  %v1907_v1 = vld [vmem:[%s2251_s1 + $0x8] sm:$0xff]   ;;  %v1908_v2 = vld [vmem:[%s2251_s1 + $0x10] sm:$0xff]  }
   0x2   :  { %1810 = vmatprep.subr.bf16.mxu0 %v1906_v0  ;;  %1890 = vmatprep.subr.bf16.mxu1 %v1906_v0  ;;  %v1909_v3 = vld [vmem:[%s2251_s1 + $0x18] sm:$0xff]   ;;  %v1914_v4 = vld [vmem:[%s2252_s0] sm:$0xff]   ;;  %v1911_v7 = vld [vmem:[%s2251_s1 + $0x28] sm:$0xff]  }
   0x3   :  { %1811 = vmatpush3.bf16.msra.mxu0 %v1906_v0  ;;  %1898 = vmatpush3.bf16.msra.mxu1 %v1906_v0  ;;  %v1915_v5 = vld [vmem:[%s2252_s0 + $0x80] sm:$0xff]   ;;  %v1912_v8 = vld [vmem:[%s2251_s1 + $0x30] sm:$0xff]   ;;  %v1913_v9 = vld [vmem:[%s2251_s1 + $0x38] sm:$0xff]  }
   0x4   :  { %1812 = vmatprep.subr.bf16.mxu0 %v1907_v1  ;;  %1891 = vmatprep.subr.bf16.mxu1 %v1907_v1  ;;  %v1910_v6 = vld [vmem:[%s2251_s1 + $0x20] sm:$0xff]   ;;  %v1916_v10 = vld [vmem:[%s2252_s0 + $0x8] sm:$0xff]   ;;  %v1918_v12 = vld [vmem:[%s2252_s0 + $0x10] sm:$0xff]  }
   0x5   :  { %1826 = vmatprep.mubr.bf16.mxu0 %v1914_v4  ;;  %1858 = vmatprep.mubr.bf16.mxu1 %v1915_v5  ;;  %v1917_v11 = vld [vmem:[%s2252_s0 + $0x88] sm:$0xff]   ;;  %v1919_v13 = vld [vmem:[%s2252_s0 + $0x90] sm:$0xff]   ;;  %v1920_v14 = vld [vmem:[%s2252_s0 + $0x18] sm:$0xff]  }
   0x6   :  { %v1921_v15 = vld [vmem:[%s2252_s0 + $0x98] sm:$0xff]   ;;  %v1922_v16 = vld [vmem:[%s2252_s0 + $0x20] sm:$0xff]   ;;  %v1924_v18 = vld [vmem:[%s2252_s0 + $0x28] sm:$0xff]  }
   0x7   :  { %1813 = vmatpush3.bf16.msra.mxu0 %v1907_v1  ;;  %1899 = vmatpush3.bf16.msra.mxu1 %v1907_v1  ;;  %v1923_v17 = vld [vmem:[%s2252_s0 + $0xa0] sm:$0xff]   ;;  %v1925_v19 = vld [vmem:[%s2252_s0 + $0xa8] sm:$0xff]   ;;  %v1926_v20 = vld [vmem:[%s2252_s0 + $0x30] sm:$0xff]  }
   0x8   :  { %1814 = vmatprep.subr.bf16.mxu0 %v1908_v2  ;;  %1892 = vmatprep.subr.bf16.mxu1 %v1908_v2  ;;  %v1927_v21 = vld [vmem:[%s2252_s0 + $0xb0] sm:$0xff]   ;;  %v1928_v22 = vld [vmem:[%s2252_s0 + $0x38] sm:$0xff]   ;;  %v1930_v24 = vld [vmem:[%s2252_s0 + $0x40] sm:$0xff]  }
   0x9   :  { %v1929_v23 = vld [vmem:[%s2252_s0 + $0xb8] sm:$0xff]   ;;  %v1931_v25 = vld [vmem:[%s2252_s0 + $0xc0] sm:$0xff]   ;;  %v1932_v26 = vld [vmem:[%s2252_s0 + $0x48] sm:$0xff]  }
   0xa   :  { %v1933_v27 = vld [vmem:[%s2252_s0 + $0xc8] sm:$0xff]   ;;  %v1934_v28 = vld [vmem:[%s2252_s0 + $0x50] sm:$0xff]   ;;  %v1936_v30 = vld [vmem:[%s2252_s0 + $0x58] sm:$0xff]  }
   0xb   :  { %1815 = vmatpush3.bf16.msra.mxu0 %v1908_v2  ;;  %1900 = vmatpush3.bf16.msra.mxu1 %v1908_v2  ;;  %v1935_v29 = vld [vmem:[%s2252_s0 + $0xd0] sm:$0xff]   ;;  %v1937_v31 = vld [vmem:[%s2252_s0 + $0xd8] sm:$0xff]   ;;  %v1938_v32 = vld [vmem:[%s2252_s0 + $0x60] sm:$0xff]  }
   0xc   :  { %1816 = vmatprep.subr.bf16.mxu0 %v1909_v3  ;;  %1893 = vmatprep.subr.bf16.mxu1 %v1909_v3  ;;  %v1939_v33 = vld [vmem:[%s2252_s0 + $0xe0] sm:$0xff]   ;;  %v1940_v34 = vld [vmem:[%s2252_s0 + $0x68] sm:$0xff]   ;;  %v1942_v36 = vld [vmem:[%s2252_s0 + $0x70] sm:$0xff]  }
   0xd   :  { %v1941_v35 = vld [vmem:[%s2252_s0 + $0xe8] sm:$0xff]   ;;  %v1943_v37 = vld [vmem:[%s2252_s0 + $0xf0] sm:$0xff]   ;;  %v1944_v38 = vld [vmem:[%s2252_s0 + $0x78] sm:$0xff]  }
   0xe   :  { %v1945_v39 = vld [vmem:[%s2252_s0 + $0xf8] sm:$0xff]   ;;  %v2089_v40 = vld [vmem:[%s2253_s2] ss:$0 sm:$0xff] }
   0xf   :  { %1817 = vmatpush3.bf16.msra.mxu0 %v1909_v3  ;;  %1901 = vmatpush3.bf16.msra.mxu1 %v1909_v3 }
  0x10   :  { %1818 = vmatprep.subr.bf16.mxu0 %v1910_v6  ;;  %1894 = vmatprep.subr.bf16.mxu1 %v1910_v6 }
  0x13   :  { %1819 = vmatpush3.bf16.msra.mxu0 %v1910_v6  ;;  %1902 = vmatpush3.bf16.msra.mxu1 %v1910_v6 }
  0x14   :  { %1820 = vmatprep.subr.bf16.mxu0 %v1911_v7  ;;  %1895 = vmatprep.subr.bf16.mxu1 %v1911_v7 }
  0x17   :  { %1821 = vmatpush3.bf16.msra.mxu0 %v1911_v7  ;;  %1903 = vmatpush3.bf16.msra.mxu1 %v1911_v7 }
  0x18   :  { %1822 = vmatprep.subr.bf16.mxu0 %v1912_v8  ;;  %1896 = vmatprep.subr.bf16.mxu1 %v1912_v8 }
  0x1b   :  { %1823 = vmatpush3.bf16.msra.mxu0 %v1912_v8  ;;  %1904 = vmatpush3.bf16.msra.mxu1 %v1912_v8 }
  0x1c   :  { %1824 = vmatprep.subr.bf16.mxu0 %v1913_v9  ;;  %1897 = vmatprep.subr.bf16.mxu1 %v1913_v9 }
  0x1f   :  { %1825 = vmatpush3.bf16.msra.mxu0 %v1913_v9  ;;  %1905 = vmatpush3.bf16.msra.mxu1 %v1913_v9 }
  0x22   :  { %1827 = vmatmul.mubr.bf16.vlgmr.msra.gmra.mrb[0].mxu0 %v1916_v10  ;;  %1859 = vmatmul.mubr.bf16.vlgmr.msra.gmra.mrb[0].mxu1 %v1917_v11 }
  0x23   :  { %1830 = vmatprep.mubr.bf16.mxu0 %v1918_v12  ;;  %1862 = vmatprep.mubr.bf16.mxu1 %v1919_v13 }
  0x2a   :  { %1831 = vmatmul.mubr.bf16.gmra.mrb[4].mxu0 %v1920_v14  ;;  %1863 = vmatmul.mubr.bf16.gmra.mrb[4].mxu1 %v1921_v15 }
  0x2b   :  { %1834 = vmatprep.mubr.bf16.mxu0 %v1922_v16  ;;  %1866 = vmatprep.mubr.bf16.mxu1 %v1923_v17 }
  0x32   :  { %1835 = vmatmul.mubr.bf16.gmra.mrb[8].mxu0 %v1924_v18  ;;  %1867 = vmatmul.mubr.bf16.gmra.mrb[8].mxu1 %v1925_v19 }
  0x33   :  { %1838 = vmatprep.mubr.bf16.mxu0 %v1926_v20  ;;  %1870 = vmatprep.mubr.bf16.mxu1 %v1927_v21 }
  0x3a   :  { %1839 = vmatmul.mubr.bf16.gmra.mrb[12].mxu0 %v1928_v22  ;;  %1871 = vmatmul.mubr.bf16.gmra.mrb[12].mxu1 %v1929_v23 }
  0x3b   :  { %1842 = vmatprep.mubr.bf16.mxu0 %v1930_v24  ;;  %1874 = vmatprep.mubr.bf16.mxu1 %v1931_v25 }
  0x42   :  { %1843 = vmatmul.mubr.bf16.gmra.mrb[16].mxu0 %v1932_v26  ;;  %1875 = vmatmul.mubr.bf16.gmra.mrb[16].mxu1 %v1933_v27 }
  0x43   :  { %1846 = vmatprep.mubr.bf16.mxu0 %v1934_v28  ;;  %1878 = vmatprep.mubr.bf16.mxu1 %v1935_v29 }
  0x4a   :  { %1847 = vmatmul.mubr.bf16.gmra.mrb[20].mxu0 %v1936_v30  ;;  %1879 = vmatmul.mubr.bf16.gmra.mrb[20].mxu1 %v1937_v31 }
  0x4b   :  { %1850 = vmatprep.mubr.bf16.mxu0 %v1938_v32  ;;  %1882 = vmatprep.mubr.bf16.mxu1 %v1939_v33 }
  0x52   :  { %1851 = vmatmul.mubr.bf16.gmra.mrb[24].mxu0 %v1940_v34  ;;  %1883 = vmatmul.mubr.bf16.gmra.mrb[24].mxu1 %v1941_v35 }
  0x53   :  { %1854 = vmatprep.mubr.bf16.mxu0 %v1942_v36  ;;  %1886 = vmatprep.mubr.bf16.mxu1 %v1943_v37 }
  0x5a   :  { %1855 = vmatmul.mubr.bf16.gmra.mrb[28].mxu0 %v1944_v38  ;;  %1887 = vmatmul.mubr.bf16.gmra.mrb[28].mxu1 %v1945_v39 }
  0xf5   :  { %v1828_v41 = vpop.f32.mrb[0].mxu0  ;;  %v1860_v42 = vpop.f32.mrb[0].mxu1 }
  0xf6   :  { %v960_v43 = vadd.f32 %v1828_v41, %v2089_v40  ;;  %v992_v44 = vadd.f32 %v1860_v42, %v2089_v40  ;;  %v501_v45 = vpop.f32.mrb[1].mxu0  ;;  %v629_v46 = vpop.f32.mrb[1].mxu1 }
  0xf7   :  { %v958_v47 = vadd.f32 %v2089_v40, %v501_v45  ;;  %v990_v48 = vadd.f32 %v2089_v40, %v629_v46  ;;  %v1829_v49 = vpop.f32.mrb[2].mxu0  ;;  %v1861_v50 = vpop.f32.mrb[2].mxu1 }
  0xf8   :  { %v961_v51 = vadd.f32 %v1829_v49, %v2089_v40  ;;  %v993_v52 = vadd.f32 %v1861_v50, %v2089_v40  ;;  %v504_v53 = vpop.f32.mrb[3].mxu0  ;;  %v632_v54 = vpop.f32.mrb[3].mxu1  ;;  %v1024_v57 = vmax.f32 %v960_v43, 0.0  ;;  %v1056_v58 = vmax.f32 %v992_v44, 0.0 }
  0xf9   :  { %v959_v55 = vadd.f32 %v2089_v40, %v504_v53  ;;  %v991_v56 = vadd.f32 %v2089_v40, %v632_v54  ;;  %v1022_v61 = vmax.f32 %v958_v47, 0.0  ;;  %v1054_v62 = vmax.f32 %v990_v48, 0.0 }
  0xfa   :  { %v1025_v59 = vmax.f32 %v961_v51, 0.0  ;;  %v1057_v60 = vmax.f32 %v993_v52, 0.0 }
  0xfb   :  { %v1023_v63 = vmax.f32 %v959_v55, 0.0  ;;  %v1055_v0 = vmax.f32 %v991_v56, 0.0 }
  0xfc   :  { %v1587_v1 = vpack.c.bf16 %v1025_v59, %v1024_v57  ;;  %v1667_v2 = vpack.c.bf16 %v1057_v60, %v1056_v58 }
  0xfd   :  { %v1582_v3 = vpack.c.bf16 %v1023_v63, %v1022_v61  ;;  %v1662_v4 = vpack.c.bf16 %v1055_v0, %v1054_v62  ;;  %v1832_v5 = vpop.f32.mrb[4].mxu0  ;;  %v1864_v6 = vpop.f32.mrb[4].mxu1 }
  0xfe   :  { %1739 = vst [vmem:[%s2254_s3 + $0x8] sm:$0xff] %v1587_v1   ;;  %1755 = vst [vmem:[%s2254_s3 + $0x88] sm:$0xff] %v1667_v2   ;;  %v964_v7 = vadd.f32 %v1832_v5, %v2089_v40  ;;  %v996_v8 = vadd.f32 %v1864_v6, %v2089_v40  ;;  %v517_v9 = vpop.f32.mrb[5].mxu0  ;;  %v645_v10 = vpop.f32.mrb[5].mxu1 }
  0xff   :  { %1583 = vst [vmem:[%s2254_s3] sm:$0xff] %v1582_v3   ;;  %1754 = vst [vmem:[%s2254_s3 + $0x80] sm:$0xff] %v1662_v4   ;;  %v962_v11 = vadd.f32 %v2089_v40, %v517_v9  ;;  %v994_v12 = vadd.f32 %v2089_v40, %v645_v10  ;;  %v1833_v13 = vpop.f32.mrb[6].mxu0  ;;  %v1865_v14 = vpop.f32.mrb[6].mxu1 }
 0x100   :  { %v965_v15 = vadd.f32 %v1833_v13, %v2089_v40  ;;  %v997_v16 = vadd.f32 %v1865_v14, %v2089_v40  ;;  %v520_v17 = vpop.f32.mrb[7].mxu0  ;;  %v648_v18 = vpop.f32.mrb[7].mxu1  ;;  %v1028_v21 = vmax.f32 %v964_v7, 0.0  ;;  %v1060_v22 = vmax.f32 %v996_v8, 0.0 }
 0x101   :  { %v963_v19 = vadd.f32 %v2089_v40, %v520_v17  ;;  %v995_v20 = vadd.f32 %v2089_v40, %v648_v18  ;;  %v1026_v25 = vmax.f32 %v962_v11, 0.0  ;;  %v1058_v26 = vmax.f32 %v994_v12, 0.0 }
 0x102   :  { %v1029_v23 = vmax.f32 %v965_v15, 0.0  ;;  %v1061_v24 = vmax.f32 %v997_v16, 0.0 }
 0x103   :  { %v1027_v27 = vmax.f32 %v963_v19, 0.0  ;;  %v1059_v28 = vmax.f32 %v995_v20, 0.0 }
 0x104   :  { %v1597_v29 = vpack.c.bf16 %v1029_v23, %v1028_v21  ;;  %v1677_v30 = vpack.c.bf16 %v1061_v24, %v1060_v22 }
 0x105   :  { %v1592_v31 = vpack.c.bf16 %v1027_v27, %v1026_v25  ;;  %v1672_v32 = vpack.c.bf16 %v1059_v28, %v1058_v26  ;;  %v1836_v33 = vpop.f32.mrb[8].mxu0  ;;  %v1868_v34 = vpop.f32.mrb[8].mxu1 }
 0x106   :  { %1741 = vst [vmem:[%s2254_s3 + $0x18] sm:$0xff] %v1597_v29   ;;  %1757 = vst [vmem:[%s2254_s3 + $0x98] sm:$0xff] %v1677_v30   ;;  %v968_v35 = vadd.f32 %v1836_v33, %v2089_v40  ;;  %v1000_v36 = vadd.f32 %v1868_v34, %v2089_v40  ;;  %v533_v37 = vpop.f32.mrb[9].mxu0  ;;  %v661_v38 = vpop.f32.mrb[9].mxu1 }
 0x107   :  { %1740 = vst [vmem:[%s2254_s3 + $0x10] sm:$0xff] %v1592_v31   ;;  %1756 = vst [vmem:[%s2254_s3 + $0x90] sm:$0xff] %v1672_v32   ;;  %v966_v39 = vadd.f32 %v2089_v40, %v533_v37  ;;  %v998_v41 = vadd.f32 %v2089_v40, %v661_v38  ;;  %v1837_v42 = vpop.f32.mrb[10].mxu0  ;;  %v1869_v43 = vpop.f32.mrb[10].mxu1 }
 0x108   :  { %v969_v44 = vadd.f32 %v1837_v42, %v2089_v40  ;;  %v1001_v45 = vadd.f32 %v1869_v43, %v2089_v40  ;;  %v536_v46 = vpop.f32.mrb[11].mxu0  ;;  %v664_v47 = vpop.f32.mrb[11].mxu1  ;;  %v1032_v50 = vmax.f32 %v968_v35, 0.0  ;;  %v1064_v51 = vmax.f32 %v1000_v36, 0.0 }
 0x109   :  { %v967_v48 = vadd.f32 %v2089_v40, %v536_v46  ;;  %v999_v49 = vadd.f32 %v2089_v40, %v664_v47  ;;  %v1030_v54 = vmax.f32 %v966_v39, 0.0  ;;  %v1062_v55 = vmax.f32 %v998_v41, 0.0 }
 0x10a   :  { %v1033_v52 = vmax.f32 %v969_v44, 0.0  ;;  %v1065_v53 = vmax.f32 %v1001_v45, 0.0 }
 0x10b   :  { %v1031_v56 = vmax.f32 %v967_v48, 0.0  ;;  %v1063_v57 = vmax.f32 %v999_v49, 0.0 }
 0x10c   :  { %v1607_v58 = vpack.c.bf16 %v1033_v52, %v1032_v50  ;;  %v1687_v59 = vpack.c.bf16 %v1065_v53, %v1064_v51 }
 0x10d   :  { %v1602_v60 = vpack.c.bf16 %v1031_v56, %v1030_v54  ;;  %v1682_v61 = vpack.c.bf16 %v1063_v57, %v1062_v55  ;;  %v1840_v62 = vpop.f32.mrb[12].mxu0  ;;  %v1872_v63 = vpop.f32.mrb[12].mxu1 }
 0x10e   :  { %1743 = vst [vmem:[%s2254_s3 + $0x28] sm:$0xff] %v1607_v58   ;;  %1759 = vst [vmem:[%s2254_s3 + $0xa8] sm:$0xff] %v1687_v59   ;;  %v972_v0 = vadd.f32 %v1840_v62, %v2089_v40  ;;  %v1004_v1 = vadd.f32 %v1872_v63, %v2089_v40  ;;  %v549_v2 = vpop.f32.mrb[13].mxu0  ;;  %v677_v3 = vpop.f32.mrb[13].mxu1 }
 0x10f   :  { %1742 = vst [vmem:[%s2254_s3 + $0x20] sm:$0xff] %v1602_v60   ;;  %1758 = vst [vmem:[%s2254_s3 + $0xa0] sm:$0xff] %v1682_v61   ;;  %v970_v4 = vadd.f32 %v2089_v40, %v549_v2  ;;  %v1002_v5 = vadd.f32 %v2089_v40, %v677_v3  ;;  %v1841_v6 = vpop.f32.mrb[14].mxu0  ;;  %v1873_v7 = vpop.f32.mrb[14].mxu1 }
 0x110   :  { %v973_v8 = vadd.f32 %v1841_v6, %v2089_v40  ;;  %v1005_v9 = vadd.f32 %v1873_v7, %v2089_v40  ;;  %v552_v10 = vpop.f32.mrb[15].mxu0  ;;  %v680_v11 = vpop.f32.mrb[15].mxu1  ;;  %v1036_v14 = vmax.f32 %v972_v0, 0.0  ;;  %v1068_v15 = vmax.f32 %v1004_v1, 0.0 }
 0x111   :  { %v971_v12 = vadd.f32 %v2089_v40, %v552_v10  ;;  %v1003_v13 = vadd.f32 %v2089_v40, %v680_v11  ;;  %v1034_v18 = vmax.f32 %v970_v4, 0.0  ;;  %v1066_v19 = vmax.f32 %v1002_v5, 0.0 }
 0x112   :  { %v1037_v16 = vmax.f32 %v973_v8, 0.0  ;;  %v1069_v17 = vmax.f32 %v1005_v9, 0.0 }
 0x113   :  { %v1035_v20 = vmax.f32 %v971_v12, 0.0  ;;  %v1067_v21 = vmax.f32 %v1003_v13, 0.0 }
 0x114   :  { %v1617_v22 = vpack.c.bf16 %v1037_v16, %v1036_v14  ;;  %v1697_v23 = vpack.c.bf16 %v1069_v17, %v1068_v15 }
 0x115   :  { %v1612_v24 = vpack.c.bf16 %v1035_v20, %v1034_v18  ;;  %v1692_v25 = vpack.c.bf16 %v1067_v21, %v1066_v19  ;;  %v1844_v26 = vpop.f32.mrb[16].mxu0  ;;  %v1876_v27 = vpop.f32.mrb[16].mxu1 }
 0x116   :  { %1745 = vst [vmem:[%s2254_s3 + $0x38] sm:$0xff] %v1617_v22   ;;  %1761 = vst [vmem:[%s2254_s3 + $0xb8] sm:$0xff] %v1697_v23   ;;  %v976_v28 = vadd.f32 %v1844_v26, %v2089_v40  ;;  %v1008_v29 = vadd.f32 %v1876_v27, %v2089_v40  ;;  %v565_v30 = vpop.f32.mrb[17].mxu0  ;;  %v693_v31 = vpop.f32.mrb[17].mxu1 }
 0x117   :  { %1744 = vst [vmem:[%s2254_s3 + $0x30] sm:$0xff] %v1612_v24   ;;  %1760 = vst [vmem:[%s2254_s3 + $0xb0] sm:$0xff] %v1692_v25   ;;  %v974_v32 = vadd.f32 %v2089_v40, %v565_v30  ;;  %v1006_v33 = vadd.f32 %v2089_v40, %v693_v31  ;;  %v1845_v34 = vpop.f32.mrb[18].mxu0  ;;  %v1877_v35 = vpop.f32.mrb[18].mxu1 }
 0x118   :  { %v977_v36 = vadd.f32 %v1845_v34, %v2089_v40  ;;  %v1009_v37 = vadd.f32 %v1877_v35, %v2089_v40  ;;  %v568_v38 = vpop.f32.mrb[19].mxu0  ;;  %v696_v39 = vpop.f32.mrb[19].mxu1  ;;  %v1040_v43 = vmax.f32 %v976_v28, 0.0  ;;  %v1072_v44 = vmax.f32 %v1008_v29, 0.0 }
 0x119   :  { %v975_v41 = vadd.f32 %v2089_v40, %v568_v38  ;;  %v1007_v42 = vadd.f32 %v2089_v40, %v696_v39  ;;  %v1038_v47 = vmax.f32 %v974_v32, 0.0  ;;  %v1070_v48 = vmax.f32 %v1006_v33, 0.0 }
 0x11a   :  { %v1041_v45 = vmax.f32 %v977_v36, 0.0  ;;  %v1073_v46 = vmax.f32 %v1009_v37, 0.0 }
 0x11b   :  { %v1039_v49 = vmax.f32 %v975_v41, 0.0  ;;  %v1071_v50 = vmax.f32 %v1007_v42, 0.0 }
 0x11c   :  { %v1627_v51 = vpack.c.bf16 %v1041_v45, %v1040_v43  ;;  %v1707_v52 = vpack.c.bf16 %v1073_v46, %v1072_v44 }
 0x11d   :  { %v1622_v53 = vpack.c.bf16 %v1039_v49, %v1038_v47  ;;  %v1702_v54 = vpack.c.bf16 %v1071_v50, %v1070_v48  ;;  %v1848_v55 = vpop.f32.mrb[20].mxu0  ;;  %v1880_v56 = vpop.f32.mrb[20].mxu1 }
 0x11e   :  { %1747 = vst [vmem:[%s2254_s3 + $0x48] sm:$0xff] %v1627_v51   ;;  %1763 = vst [vmem:[%s2254_s3 + $0xc8] sm:$0xff] %v1707_v52   ;;  %v980_v57 = vadd.f32 %v1848_v55, %v2089_v40  ;;  %v1012_v58 = vadd.f32 %v1880_v56, %v2089_v40  ;;  %v581_v59 = vpop.f32.mrb[21].mxu0  ;;  %v709_v60 = vpop.f32.mrb[21].mxu1 }
 0x11f   :  { %1746 = vst [vmem:[%s2254_s3 + $0x40] sm:$0xff] %v1622_v53   ;;  %1762 = vst [vmem:[%s2254_s3 + $0xc0] sm:$0xff] %v1702_v54   ;;  %v978_v61 = vadd.f32 %v2089_v40, %v581_v59  ;;  %v1010_v62 = vadd.f32 %v2089_v40, %v709_v60  ;;  %v1849_v63 = vpop.f32.mrb[22].mxu0  ;;  %v1881_v0 = vpop.f32.mrb[22].mxu1 }
 0x120   :  { %v981_v1 = vadd.f32 %v1849_v63, %v2089_v40  ;;  %v1013_v2 = vadd.f32 %v1881_v0, %v2089_v40  ;;  %v584_v3 = vpop.f32.mrb[23].mxu0  ;;  %v712_v4 = vpop.f32.mrb[23].mxu1  ;;  %v1044_v7 = vmax.f32 %v980_v57, 0.0  ;;  %v1076_v8 = vmax.f32 %v1012_v58, 0.0 }
 0x121   :  { %v979_v5 = vadd.f32 %v2089_v40, %v584_v3  ;;  %v1011_v6 = vadd.f32 %v2089_v40, %v712_v4  ;;  %v1042_v11 = vmax.f32 %v978_v61, 0.0  ;;  %v1074_v12 = vmax.f32 %v1010_v62, 0.0 }
 0x122   :  { %v1045_v9 = vmax.f32 %v981_v1, 0.0  ;;  %v1077_v10 = vmax.f32 %v1013_v2, 0.0 }
 0x123   :  { %v1043_v13 = vmax.f32 %v979_v5, 0.0  ;;  %v1075_v14 = vmax.f32 %v1011_v6, 0.0 }
 0x124   :  { %v1637_v15 = vpack.c.bf16 %v1045_v9, %v1044_v7  ;;  %v1717_v16 = vpack.c.bf16 %v1077_v10, %v1076_v8 }
 0x125   :  { %v1632_v17 = vpack.c.bf16 %v1043_v13, %v1042_v11  ;;  %v1712_v18 = vpack.c.bf16 %v1075_v14, %v1074_v12  ;;  %v1852_v19 = vpop.f32.mrb[24].mxu0  ;;  %v1884_v20 = vpop.f32.mrb[24].mxu1 }
 0x126   :  { %1749 = vst [vmem:[%s2254_s3 + $0x58] sm:$0xff] %v1637_v15   ;;  %1765 = vst [vmem:[%s2254_s3 + $0xd8] sm:$0xff] %v1717_v16   ;;  %v984_v21 = vadd.f32 %v1852_v19, %v2089_v40  ;;  %v1016_v22 = vadd.f32 %v1884_v20, %v2089_v40  ;;  %v597_v23 = vpop.f32.mrb[25].mxu0  ;;  %v725_v24 = vpop.f32.mrb[25].mxu1 }
 0x127   :  { %1748 = vst [vmem:[%s2254_s3 + $0x50] sm:$0xff] %v1632_v17   ;;  %1764 = vst [vmem:[%s2254_s3 + $0xd0] sm:$0xff] %v1712_v18   ;;  %v982_v25 = vadd.f32 %v2089_v40, %v597_v23  ;;  %v1014_v26 = vadd.f32 %v2089_v40, %v725_v24  ;;  %v1853_v27 = vpop.f32.mrb[26].mxu0  ;;  %v1885_v28 = vpop.f32.mrb[26].mxu1 }
 0x128   :  { %v985_v29 = vadd.f32 %v1853_v27, %v2089_v40  ;;  %v1017_v30 = vadd.f32 %v1885_v28, %v2089_v40  ;;  %v600_v31 = vpop.f32.mrb[27].mxu0  ;;  %v728_v32 = vpop.f32.mrb[27].mxu1  ;;  %v1048_v35 = vmax.f32 %v984_v21, 0.0  ;;  %v1080_v36 = vmax.f32 %v1016_v22, 0.0 }
 0x129   :  { %v983_v33 = vadd.f32 %v2089_v40, %v600_v31  ;;  %v1015_v34 = vadd.f32 %v2089_v40, %v728_v32  ;;  %v1046_v39 = vmax.f32 %v982_v25, 0.0  ;;  %v1078_v41 = vmax.f32 %v1014_v26, 0.0 }
 0x12a   :  { %v1049_v37 = vmax.f32 %v985_v29, 0.0  ;;  %v1081_v38 = vmax.f32 %v1017_v30, 0.0 }
 0x12b   :  { %v1047_v42 = vmax.f32 %v983_v33, 0.0  ;;  %v1079_v43 = vmax.f32 %v1015_v34, 0.0 }
 0x12c   :  { %v1647_v44 = vpack.c.bf16 %v1049_v37, %v1048_v35  ;;  %v1727_v45 = vpack.c.bf16 %v1081_v38, %v1080_v36 }
 0x12d   :  { %v1642_v46 = vpack.c.bf16 %v1047_v42, %v1046_v39  ;;  %v1722_v47 = vpack.c.bf16 %v1079_v43, %v1078_v41  ;;  %v1856_v48 = vpop.f32.mrb[28].mxu0  ;;  %v1888_v49 = vpop.f32.mrb[28].mxu1 }
 0x12e   :  { %1751 = vst [vmem:[%s2254_s3 + $0x68] sm:$0xff] %v1647_v44   ;;  %1767 = vst [vmem:[%s2254_s3 + $0xe8] sm:$0xff] %v1727_v45   ;;  %v988_v50 = vadd.f32 %v1856_v48, %v2089_v40  ;;  %v1020_v51 = vadd.f32 %v1888_v49, %v2089_v40  ;;  %v613_v52 = vpop.f32.mrb[29].mxu0  ;;  %v741_v53 = vpop.f32.mrb[29].mxu1 }
 0x12f   :  { %1750 = vst [vmem:[%s2254_s3 + $0x60] sm:$0xff] %v1642_v46   ;;  %1766 = vst [vmem:[%s2254_s3 + $0xe0] sm:$0xff] %v1722_v47   ;;  %v986_v54 = vadd.f32 %v2089_v40, %v613_v52  ;;  %v1018_v55 = vadd.f32 %v2089_v40, %v741_v53  ;;  %v1857_v56 = vpop.f32.mrb[30].mxu0  ;;  %v1889_v57 = vpop.f32.mrb[30].mxu1 }
 0x130   :  { %v989_v58 = vadd.f32 %v1857_v56, %v2089_v40  ;;  %v1021_v59 = vadd.f32 %v1889_v57, %v2089_v40  ;;  %v616_v60 = vpop.f32.mrb[31].mxu0  ;;  %v744_v61 = vpop.f32.mrb[31].mxu1  ;;  %v1052_v0 = vmax.f32 %v988_v50, 0.0  ;;  %v1084_v1 = vmax.f32 %v1020_v51, 0.0 }
 0x131   :  { %v987_v62 = vadd.f32 %v2089_v40, %v616_v60  ;;  %v1019_v63 = vadd.f32 %v2089_v40, %v744_v61  ;;  %v1050_v4 = vmax.f32 %v986_v54, 0.0  ;;  %v1082_v5 = vmax.f32 %v1018_v55, 0.0 }
 0x132   :  { %v1053_v2 = vmax.f32 %v989_v58, 0.0  ;;  %v1085_v3 = vmax.f32 %v1021_v59, 0.0 }
 0x133   :  { %v1051_v6 = vmax.f32 %v987_v62, 0.0  ;;  %v1083_v7 = vmax.f32 %v1019_v63, 0.0 }
 0x134   :  { %v1657_v8 = vpack.c.bf16 %v1053_v2, %v1052_v0  ;;  %v1737_v9 = vpack.c.bf16 %v1085_v3, %v1084_v1 }
 0x135   :  { %v1652_v10 = vpack.c.bf16 %v1051_v6, %v1050_v4  ;;  %v1732_v11 = vpack.c.bf16 %v1083_v7, %v1082_v5 }
 0x136   :  { %1753 = vst [vmem:[%s2254_s3 + $0x78] sm:$0xff] %v1657_v8   ;;  %1769 = vst [vmem:[%s2254_s3 + $0xf8] sm:$0xff] %v1737_v9  }
 0x137   :  { %1752 = vst [vmem:[%s2254_s3 + $0x70] sm:$0xff] %v1652_v10   ;;  %1768 = vst [vmem:[%s2254_s3 + $0xf0] sm:$0xff] %v1732_v11  }

// kernel: netg_forward.61
= control target key start
LH: loop header
LB: loop body
LE: loop exit
PB: predicated region body
PF: predicated region fallthrough
CT: control target
= control target key end

     0   :  { %s721_s1 = inlined_call_operand.vmem [shape: bf16[128,128], index: 1, kind: input, shape index: {}]   ;;  %s722_s0 = inlined_call_operand.vmem [shape: bf16[128,128], index: 0, kind: input, shape index: {}]   ;;  %s723_s2 = inlined_call_operand.vmem [shape: f32[1,128], index: 2, kind: input, shape index: {}]   ;;  %s724_s3 = inlined_call_operand.vmem [shape: bf16[128,128], index: 3, kind: output, shape index: {}]  }
   0x1   :  { %v610_v0 = vld [vmem:[%s721_s1] sm:$0xff]   ;;  %v611_v1 = vld [vmem:[%s721_s1 + $0x8] sm:$0xff]   ;;  %v612_v2 = vld [vmem:[%s721_s1 + $0x10] sm:$0xff]  }
   0x2   :  { %562 = vmatprep.subr.bf16.mxu0 %v610_v0  ;;  %594 = vmatprep.subr.bf16.mxu1 %v610_v0  ;;  %v613_v3 = vld [vmem:[%s721_s1 + $0x18] sm:$0xff]   ;;  %v618_v4 = vld [vmem:[%s722_s0] sm:$0xff]   ;;  %v615_v7 = vld [vmem:[%s721_s1 + $0x28] sm:$0xff]  }
   0x3   :  { %563 = vmatpush3.bf16.msra.mxu0 %v610_v0  ;;  %602 = vmatpush3.bf16.msra.mxu1 %v610_v0  ;;  %v619_v5 = vld [vmem:[%s722_s0 + $0x20] sm:$0xff]   ;;  %v616_v8 = vld [vmem:[%s721_s1 + $0x30] sm:$0xff]   ;;  %v617_v9 = vld [vmem:[%s721_s1 + $0x38] sm:$0xff]  }
   0x4   :  { %564 = vmatprep.subr.bf16.mxu0 %v611_v1  ;;  %595 = vmatprep.subr.bf16.mxu1 %v611_v1  ;;  %v614_v6 = vld [vmem:[%s721_s1 + $0x20] sm:$0xff]   ;;  %v620_v10 = vld [vmem:[%s722_s0 + $0x8] sm:$0xff]   ;;  %v622_v12 = vld [vmem:[%s722_s0 + $0x10] sm:$0xff]  }
   0x5   :  { %578 = vmatprep.mubr.bf16.mxu0 %v618_v4  ;;  %586 = vmatprep.mubr.bf16.mxu1 %v619_v5  ;;  %v621_v11 = vld [vmem:[%s722_s0 + $0x28] sm:$0xff]   ;;  %v623_v13 = vld [vmem:[%s722_s0 + $0x30] sm:$0xff]   ;;  %v624_v14 = vld [vmem:[%s722_s0 + $0x18] sm:$0xff]  }
   0x6   :  { %v625_v15 = vld [vmem:[%s722_s0 + $0x38] sm:$0xff]   ;;  %v466_v16 = vld [vmem:[%s723_s2] ss:$0 sm:$0xff] }
   0x7   :  { %565 = vmatpush3.bf16.msra.mxu0 %v611_v1  ;;  %603 = vmatpush3.bf16.msra.mxu1 %v611_v1 }
   0x8   :  { %566 = vmatprep.subr.bf16.mxu0 %v612_v2  ;;  %596 = vmatprep.subr.bf16.mxu1 %v612_v2 }
   0xb   :  { %567 = vmatpush3.bf16.msra.mxu0 %v612_v2  ;;  %604 = vmatpush3.bf16.msra.mxu1 %v612_v2 }
   0xc   :  { %568 = vmatprep.subr.bf16.mxu0 %v613_v3  ;;  %597 = vmatprep.subr.bf16.mxu1 %v613_v3 }
   0xf   :  { %569 = vmatpush3.bf16.msra.mxu0 %v613_v3  ;;  %605 = vmatpush3.bf16.msra.mxu1 %v613_v3 }
  0x10   :  { %570 = vmatprep.subr.bf16.mxu0 %v614_v6  ;;  %598 = vmatprep.subr.bf16.mxu1 %v614_v6 }
  0x13   :  { %571 = vmatpush3.bf16.msra.mxu0 %v614_v6  ;;  %606 = vmatpush3.bf16.msra.mxu1 %v614_v6 }
  0x14   :  { %572 = vmatprep.subr.bf16.mxu0 %v615_v7  ;;  %599 = vmatprep.subr.bf16.mxu1 %v615_v7 }
  0x17   :  { %573 = vmatpush3.bf16.msra.mxu0 %v615_v7  ;;  %607 = vmatpush3.bf16.msra.mxu1 %v615_v7 }
  0x18   :  { %574 = vmatprep.subr.bf16.mxu0 %v616_v8  ;;  %600 = vmatprep.subr.bf16.mxu1 %v616_v8 }
  0x1b   :  { %575 = vmatpush3.bf16.msra.mxu0 %v616_v8  ;;  %608 = vmatpush3.bf16.msra.mxu1 %v616_v8 }
  0x1c   :  { %576 = vmatprep.subr.bf16.mxu0 %v617_v9  ;;  %601 = vmatprep.subr.bf16.mxu1 %v617_v9 }
  0x1f   :  { %577 = vmatpush3.bf16.msra.mxu0 %v617_v9  ;;  %609 = vmatpush3.bf16.msra.mxu1 %v617_v9 }
  0x22   :  { %579 = vmatmul.mubr.bf16.vlgmr.msra.gmra.mrb[0].mxu0 %v620_v10  ;;  %587 = vmatmul.mubr.bf16.vlgmr.msra.gmra.mrb[0].mxu1 %v621_v11 }
  0x23   :  { %582 = vmatprep.mubr.bf16.mxu0 %v622_v12  ;;  %590 = vmatprep.mubr.bf16.mxu1 %v623_v13 }
  0x2a   :  { %583 = vmatmul.mubr.bf16.gmra.mrb[4].mxu0 %v624_v14  ;;  %591 = vmatmul.mubr.bf16.gmra.mrb[4].mxu1 %v625_v15 }
  0xf5   :  { %v580_v17 = vpop.f32.mrb[0].mxu0  ;;  %v588_v18 = vpop.f32.mrb[0].mxu1 }
  0xf6   :  { %v336_v19 = vadd.f32 %v580_v17, %v466_v16  ;;  %v344_v20 = vadd.f32 %v588_v18, %v466_v16  ;;  %v213_v21 = vpop.f32.mrb[1].mxu0  ;;  %v245_v22 = vpop.f32.mrb[1].mxu1 }
  0xf7   :  { %v334_v23 = vadd.f32 %v466_v16, %v213_v21  ;;  %v342_v24 = vadd.f32 %v466_v16, %v245_v22  ;;  %v581_v25 = vpop.f32.mrb[2].mxu0  ;;  %v589_v26 = vpop.f32.mrb[2].mxu1 }
  0xf8   :  { %v337_v27 = vadd.f32 %v581_v25, %v466_v16  ;;  %v345_v28 = vadd.f32 %v589_v26, %v466_v16  ;;  %v216_v29 = vpop.f32.mrb[3].mxu0  ;;  %v248_v30 = vpop.f32.mrb[3].mxu1  ;;  %v352_v33 = vmax.f32 %v336_v19, 0.0  ;;  %v360_v34 = vmax.f32 %v344_v20, 0.0 }
  0xf9   :  { %v335_v31 = vadd.f32 %v466_v16, %v216_v29  ;;  %v343_v32 = vadd.f32 %v466_v16, %v248_v30  ;;  %v350_v37 = vmax.f32 %v334_v23, 0.0  ;;  %v358_v38 = vmax.f32 %v342_v24, 0.0 }
  0xfa   :  { %v353_v35 = vmax.f32 %v337_v27, 0.0  ;;  %v361_v36 = vmax.f32 %v345_v28, 0.0 }
  0xfb   :  { %v351_v39 = vmax.f32 %v335_v31, 0.0  ;;  %v359_v40 = vmax.f32 %v343_v32, 0.0 }
  0xfc   :  { %v507_v41 = vpack.c.bf16 %v353_v35, %v352_v33  ;;  %v527_v42 = vpack.c.bf16 %v361_v36, %v360_v34 }
  0xfd   :  { %v502_v43 = vpack.c.bf16 %v351_v39, %v350_v37  ;;  %v522_v44 = vpack.c.bf16 %v359_v40, %v358_v38  ;;  %v584_v45 = vpop.f32.mrb[4].mxu0  ;;  %v592_v46 = vpop.f32.mrb[4].mxu1 }
  0xfe   :  { %539 = vst [vmem:[%s724_s3 + $0x8] sm:$0xff] %v507_v41   ;;  %543 = vst [vmem:[%s724_s3 + $0x28] sm:$0xff] %v527_v42   ;;  %v340_v47 = vadd.f32 %v584_v45, %v466_v16  ;;  %v348_v48 = vadd.f32 %v592_v46, %v466_v16  ;;  %v229_v49 = vpop.f32.mrb[5].mxu0  ;;  %v261_v50 = vpop.f32.mrb[5].mxu1 }
  0xff   :  { %503 = vst [vmem:[%s724_s3] sm:$0xff] %v502_v43   ;;  %542 = vst [vmem:[%s724_s3 + $0x20] sm:$0xff] %v522_v44   ;;  %v338_v51 = vadd.f32 %v466_v16, %v229_v49  ;;  %v346_v52 = vadd.f32 %v466_v16, %v261_v50  ;;  %v585_v53 = vpop.f32.mrb[6].mxu0  ;;  %v593_v54 = vpop.f32.mrb[6].mxu1 }
 0x100   :  { %v341_v55 = vadd.f32 %v585_v53, %v466_v16  ;;  %v349_v56 = vadd.f32 %v593_v54, %v466_v16  ;;  %v232_v57 = vpop.f32.mrb[7].mxu0  ;;  %v264_v58 = vpop.f32.mrb[7].mxu1  ;;  %v356_v61 = vmax.f32 %v340_v47, 0.0  ;;  %v364_v62 = vmax.f32 %v348_v48, 0.0 }
 0x101   :  { %v339_v59 = vadd.f32 %v466_v16, %v232_v57  ;;  %v347_v60 = vadd.f32 %v466_v16, %v264_v58  ;;  %v354_v1 = vmax.f32 %v338_v51, 0.0  ;;  %v362_v2 = vmax.f32 %v346_v52, 0.0 }
 0x102   :  { %v357_v63 = vmax.f32 %v341_v55, 0.0  ;;  %v365_v0 = vmax.f32 %v349_v56, 0.0 }
 0x103   :  { %v355_v3 = vmax.f32 %v339_v59, 0.0  ;;  %v363_v4 = vmax.f32 %v347_v60, 0.0 }
 0x104   :  { %v517_v5 = vpack.c.bf16 %v357_v63, %v356_v61  ;;  %v537_v6 = vpack.c.bf16 %v365_v0, %v364_v62 }
 0x105   :  { %v512_v7 = vpack.c.bf16 %v355_v3, %v354_v1  ;;  %v532_v8 = vpack.c.bf16 %v363_v4, %v362_v2 }
 0x106   :  { %541 = vst [vmem:[%s724_s3 + $0x18] sm:$0xff] %v517_v5   ;;  %545 = vst [vmem:[%s724_s3 + $0x38] sm:$0xff] %v537_v6  }
 0x107   :  { %540 = vst [vmem:[%s724_s3 + $0x10] sm:$0xff] %v512_v7   ;;  %544 = vst [vmem:[%s724_s3 + $0x30] sm:$0xff] %v532_v8  }

// kernel: netg_forward.62
= control target key start
LH: loop header
LB: loop body
LE: loop exit
PB: predicated region body
PF: predicated region fallthrough
CT: control target
= control target key end

     0   :  { %s939_s1 = inlined_call_operand.vmem [shape: bf16[256,128], index: 1, kind: input, shape index: {}]   ;;  %s940_s0 = inlined_call_operand.vmem [shape: bf16[128,256], index: 0, kind: input, shape index: {}]   ;;  %s941_s2 = inlined_call_operand.vmem [shape: f32[1,128], index: 2, kind: input, shape index: {}]   ;;  %s942_s3 = inlined_call_operand.vmem [shape: bf16[128,128], index: 3, kind: output, shape index: {}]  }
   0x1   :  { %v738_v0 = vld [vmem:[%s939_s1 + $0x40] sm:$0xff]   ;;  %v740_v2 = vld [vmem:[%s939_s1 + $0x48] sm:$0xff]   ;;  %v742_v4 = vld [vmem:[%s939_s1 + $0x50] sm:$0xff]  }
   0x2   :  { %v739_v1 = vld [vmem:[%s939_s1] sm:$0xff]   ;;  %658 = vmatprep.subr.bf16.mxu0 %v738_v0  ;;  %722 = vmatprep.subr.bf16.mxu1 %v738_v0  ;;  %v741_v3 = vld [vmem:[%s939_s1 + $0x8] sm:$0xff]   ;;  %v743_v5 = vld [vmem:[%s939_s1 + $0x10] sm:$0xff]  }
   0x3   :  { %659 = vmatpush3.bf16.msra.mxu0 %v739_v1  ;;  %730 = vmatpush3.bf16.msra.mxu1 %v739_v1  ;;  %v744_v6 = vld [vmem:[%s939_s1 + $0x58] sm:$0xff]   ;;  %v746_v8 = vld [vmem:[%s939_s1 + $0x60] sm:$0xff]   ;;  %v748_v10 = vld [vmem:[%s939_s1 + $0x68] sm:$0xff]  }
   0x4   :  { %660 = vmatprep.subr.bf16.mxu0 %v740_v2  ;;  %723 = vmatprep.subr.bf16.mxu1 %v740_v2  ;;  %v745_v7 = vld [vmem:[%s939_s1 + $0x18] sm:$0xff]   ;;  %v747_v9 = vld [vmem:[%s939_s1 + $0x20] sm:$0xff]   ;;  %v749_v13 = vld [vmem:[%s939_s1 + $0x28] sm:$0xff]  }
   0x5   :  { %v756_v11 = vld [vmem:[%s940_s0 + $0x4] ss:$8 sps:$4 sm:$0xff]   ;;  %v750_v14 = vld [vmem:[%s939_s1 + $0x70] sm:$0xff]   ;;  %v752_v16 = vld [vmem:[%s939_s1 + $0x78] sm:$0xff]  }
   0x6   :  { %v759_v12 = vld [vmem:[%s940_s0 + $0x44] ss:$8 sps:$4 sm:$0xff]   ;;  %307 = vmatprep.mubr.bf16.mxu0 %v756_v11  ;;  %v751_v15 = vld [vmem:[%s939_s1 + $0x30] sm:$0xff]   ;;  %v753_v17 = vld [vmem:[%s939_s1 + $0x38] sm:$0xff]  }
   0x7   :  { %661 = vmatpush3.bf16.msra.mxu0 %v741_v3  ;;  %731 = vmatpush3.bf16.msra.mxu1 %v741_v3  ;;  %v754_v18 = vld [vmem:[%s940_s0] ss:$8 sps:$4 sm:$0xff]   ;;  %v760_v20 = vld [vmem:[%s940_s0 + $0x14] ss:$8 sps:$4 sm:$0xff]   ;;  %v764_v22 = vld [vmem:[%s940_s0 + $0x10] ss:$8 sps:$4 sm:$0xff]  }
   0x8   :  { %662 = vmatprep.subr.bf16.mxu0 %v742_v4  ;;  %724 = vmatprep.subr.bf16.mxu1 %v742_v4  ;;  %v757_v19 = vld [vmem:[%s940_s0 + $0x40] ss:$8 sps:$4 sm:$0xff]   ;;  %v762_v21 = vld [vmem:[%s940_s0 + $0x54] ss:$8 sps:$4 sm:$0xff]   ;;  %v765_v23 = vld [vmem:[%s940_s0 + $0x50] ss:$8 sps:$4 sm:$0xff]  }
   0x9   :  { %339 = vmatprep.mubr.bf16.mxu1 %v759_v12  ;;  %v766_v24 = vld [vmem:[%s940_s0 + $0x24] ss:$8 sps:$4 sm:$0xff]   ;;  %v770_v26 = vld [vmem:[%s940_s0 + $0x20] ss:$8 sps:$4 sm:$0xff]   ;;  %v772_v28 = vld [vmem:[%s940_s0 + $0x34] ss:$8 sps:$4 sm:$0xff]  }
   0xa   :  { %v768_v25 = vld [vmem:[%s940_s0 + $0x64] ss:$8 sps:$4 sm:$0xff]   ;;  %v771_v27 = vld [vmem:[%s940_s0 + $0x60] ss:$8 sps:$4 sm:$0xff]   ;;  %v774_v29 = vld [vmem:[%s940_s0 + $0x74] ss:$8 sps:$4 sm:$0xff]  }
   0xb   :  { %663 = vmatpush3.bf16.msra.mxu0 %v743_v5  ;;  %732 = vmatpush3.bf16.msra.mxu1 %v743_v5  ;;  %v776_v30 = vld [vmem:[%s940_s0 + $0x30] ss:$8 sps:$4 sm:$0xff]   ;;  %v897_v35 = vld [vmem:[%s941_s2] ss:$0 sm:$0xff] }
   0xc   :  { %664 = vmatprep.subr.bf16.mxu0 %v744_v6  ;;  %725 = vmatprep.subr.bf16.mxu1 %v744_v6  ;;  %v777_v31 = vld [vmem:[%s940_s0 + $0x70] ss:$8 sps:$4 sm:$0xff]  }
   0xf   :  { %665 = vmatpush3.bf16.msra.mxu0 %v745_v7  ;;  %733 = vmatpush3.bf16.msra.mxu1 %v745_v7 }
  0x10   :  { %666 = vmatprep.subr.bf16.mxu0 %v746_v8  ;;  %726 = vmatprep.subr.bf16.mxu1 %v746_v8 }
  0x13   :  { %667 = vmatpush3.bf16.msra.mxu0 %v747_v9  ;;  %734 = vmatpush3.bf16.msra.mxu1 %v747_v9 }
  0x14   :  { %668 = vmatprep.subr.bf16.mxu0 %v748_v10  ;;  %727 = vmatprep.subr.bf16.mxu1 %v748_v10 }
  0x17   :  { %669 = vmatpush3.bf16.msra.mxu0 %v749_v13  ;;  %735 = vmatpush3.bf16.msra.mxu1 %v749_v13 }
  0x18   :  { %670 = vmatprep.subr.bf16.mxu0 %v750_v14  ;;  %728 = vmatprep.subr.bf16.mxu1 %v750_v14 }
  0x1b   :  { %671 = vmatpush3.bf16.msra.mxu0 %v751_v15  ;;  %736 = vmatpush3.bf16.msra.mxu1 %v751_v15 }
  0x1c   :  { %672 = vmatprep.subr.bf16.mxu0 %v752_v16  ;;  %729 = vmatprep.subr.bf16.mxu1 %v752_v16 }
  0x1f   :  { %673 = vmatpush3.bf16.msra.mxu0 %v753_v17  ;;  %737 = vmatpush3.bf16.msra.mxu1 %v753_v17 }
  0x22   :  { %308 = vmatmul.mubr.bf16.vlgmr.msra.gmra.mrb[0].mxu0 %v754_v18  ;;  %340 = vmatmul.mubr.bf16.vlgmr.msra.gmra.mrb[0].mxu1 %v757_v19 }
  0x23   :  { %315 = vmatprep.mubr.bf16.mxu0 %v760_v20  ;;  %347 = vmatprep.mubr.bf16.mxu1 %v762_v21 }
  0x2a   :  { %316 = vmatmul.mubr.bf16.gmra.mrb[4].mxu0 %v764_v22  ;;  %348 = vmatmul.mubr.bf16.gmra.mrb[4].mxu1 %v765_v23 }
  0x2b   :  { %323 = vmatprep.mubr.bf16.mxu0 %v766_v24  ;;  %355 = vmatprep.mubr.bf16.mxu1 %v768_v25 }
  0x32   :  { %324 = vmatmul.mubr.bf16.gmra.mrb[8].mxu0 %v770_v26  ;;  %356 = vmatmul.mubr.bf16.gmra.mrb[8].mxu1 %v771_v27 }
  0x33   :  { %331 = vmatprep.mubr.bf16.mxu0 %v772_v28  ;;  %363 = vmatprep.mubr.bf16.mxu1 %v774_v29 }
  0x3a   :  { %332 = vmatmul.mubr.bf16.gmra.mrb[12].mxu0 %v776_v30  ;;  %364 = vmatmul.mubr.bf16.gmra.mrb[12].mxu1 %v777_v31 }
  0xf5   :  { %v674_v32 = vpop.f32.mrb[0].mxu0  ;;  %v698_v33 = vpop.f32.mrb[0].mxu1 }
  0xf6   :  { %v675_v34 = vpop.f32.mrb[1].mxu0  ;;  %v699_v36 = vpop.f32.mrb[1].mxu1 }
  0xf7   :  { %v676_v37 = vadd.f32 %v675_v34, %v674_v32  ;;  %v700_v38 = vadd.f32 %v699_v36, %v698_v33  ;;  %v677_v39 = vpop.f32.mrb[2].mxu0  ;;  %v701_v40 = vpop.f32.mrb[2].mxu1 }
  0xf8   :  { %v678_v41 = vpop.f32.mrb[3].mxu0  ;;  %v702_v42 = vpop.f32.mrb[3].mxu1 }
  0xf9   :  { %v430_v43 = vadd.f32 %v676_v37, %v897_v35  ;;  %v438_v44 = vadd.f32 %v700_v38, %v897_v35  ;;  %v679_v45 = vadd.f32 %v678_v41, %v677_v39  ;;  %v703_v46 = vadd.f32 %v702_v42, %v701_v40 }
  0xfb   :  { %v431_v47 = vadd.f32 %v679_v45, %v897_v35  ;;  %v439_v48 = vadd.f32 %v703_v46, %v897_v35  ;;  %v446_v49 = vmax.f32 %v430_v43, 0.0  ;;  %v454_v50 = vmax.f32 %v438_v44, 0.0 }
  0xfd   :  { %v447_v51 = vmax.f32 %v431_v47, 0.0  ;;  %v455_v52 = vmax.f32 %v439_v48, 0.0  ;;  %v680_v53 = vpop.f32.mrb[4].mxu0  ;;  %v704_v54 = vpop.f32.mrb[4].mxu1 }
  0xfe   :  { %v681_v55 = vpop.f32.mrb[5].mxu0  ;;  %v705_v56 = vpop.f32.mrb[5].mxu1 }
  0xff   :  { %v614_v57 = vpack.c.bf16 %v447_v51, %v446_v49  ;;  %v634_v58 = vpack.c.bf16 %v455_v52, %v454_v50  ;;  %v682_v59 = vadd.f32 %v681_v55, %v680_v53  ;;  %v706_v60 = vadd.f32 %v705_v56, %v704_v54  ;;  %v683_v61 = vpop.f32.mrb[6].mxu0  ;;  %v707_v62 = vpop.f32.mrb[6].mxu1 }
 0x100   :  { %v684_v63 = vpop.f32.mrb[7].mxu0  ;;  %v708_v0 = vpop.f32.mrb[7].mxu1 }
 0x101   :  { %615 = vst [vmem:[%s942_s3] sm:$0xff] %v614_v57   ;;  %654 = vst [vmem:[%s942_s3 + $0x20] sm:$0xff] %v634_v58   ;;  %v432_v1 = vadd.f32 %v682_v59, %v897_v35  ;;  %v440_v2 = vadd.f32 %v706_v60, %v897_v35  ;;  %v685_v3 = vadd.f32 %v684_v63, %v683_v61 }
 0x102   :  { %v709_v4 = vadd.f32 %v708_v0, %v707_v62 }
 0x103   :  { %v433_v5 = vadd.f32 %v685_v3, %v897_v35  ;;  %v448_v7 = vmax.f32 %v432_v1, 0.0  ;;  %v456_v8 = vmax.f32 %v440_v2, 0.0 }
 0x104   :  { %v441_v6 = vadd.f32 %v709_v4, %v897_v35 }
 0x105   :  { %v449_v9 = vmax.f32 %v433_v5, 0.0  ;;  %v686_v11 = vpop.f32.mrb[8].mxu0  ;;  %v710_v12 = vpop.f32.mrb[8].mxu1 }
 0x106   :  { %v457_v10 = vmax.f32 %v441_v6, 0.0  ;;  %v687_v13 = vpop.f32.mrb[9].mxu0  ;;  %v711_v14 = vpop.f32.mrb[9].mxu1 }
 0x107   :  { %v619_v15 = vpack.c.bf16 %v449_v9, %v448_v7  ;;  %v688_v17 = vadd.f32 %v687_v13, %v686_v11  ;;  %v712_v18 = vadd.f32 %v711_v14, %v710_v12  ;;  %v689_v19 = vpop.f32.mrb[10].mxu0  ;;  %v713_v20 = vpop.f32.mrb[10].mxu1 }
 0x108   :  { %v639_v16 = vpack.c.bf16 %v457_v10, %v456_v8  ;;  %v690_v21 = vpop.f32.mrb[11].mxu0  ;;  %v714_v22 = vpop.f32.mrb[11].mxu1 }
 0x109   :  { %651 = vst [vmem:[%s942_s3 + $0x8] sm:$0xff] %v619_v15   ;;  %v434_v23 = vadd.f32 %v688_v17, %v897_v35  ;;  %v442_v24 = vadd.f32 %v712_v18, %v897_v35  ;;  %v691_v25 = vadd.f32 %v690_v21, %v689_v19  ;;  %v715_v26 = vadd.f32 %v714_v22, %v713_v20 }
 0x10a   :  { %655 = vst [vmem:[%s942_s3 + $0x28] sm:$0xff] %v639_v16  }
 0x10b   :  { %v435_v27 = vadd.f32 %v691_v25, %v897_v35  ;;  %v443_v28 = vadd.f32 %v715_v26, %v897_v35  ;;  %v450_v29 = vmax.f32 %v434_v23, 0.0  ;;  %v458_v30 = vmax.f32 %v442_v24, 0.0 }
 0x10d   :  { %v451_v31 = vmax.f32 %v435_v27, 0.0  ;;  %v459_v32 = vmax.f32 %v443_v28, 0.0  ;;  %v692_v33 = vpop.f32.mrb[12].mxu0  ;;  %v716_v34 = vpop.f32.mrb[12].mxu1 }
 0x10e   :  { %v693_v36 = vpop.f32.mrb[13].mxu0  ;;  %v717_v37 = vpop.f32.mrb[13].mxu1 }
 0x10f   :  { %v624_v38 = vpack.c.bf16 %v451_v31, %v450_v29  ;;  %v644_v39 = vpack.c.bf16 %v459_v32, %v458_v30  ;;  %v694_v40 = vadd.f32 %v693_v36, %v692_v33  ;;  %v718_v41 = vadd.f32 %v717_v37, %v716_v34  ;;  %v695_v42 = vpop.f32.mrb[14].mxu0  ;;  %v719_v43 = vpop.f32.mrb[14].mxu1 }
 0x110   :  { %v696_v44 = vpop.f32.mrb[15].mxu0  ;;  %v720_v45 = vpop.f32.mrb[15].mxu1 }
 0x111   :  { %652 = vst [vmem:[%s942_s3 + $0x10] sm:$0xff] %v624_v38   ;;  %656 = vst [vmem:[%s942_s3 + $0x30] sm:$0xff] %v644_v39   ;;  %v436_v46 = vadd.f32 %v694_v40, %v897_v35  ;;  %v444_v47 = vadd.f32 %v718_v41, %v897_v35  ;;  %v697_v48 = vadd.f32 %v696_v44, %v695_v42 }
 0x112   :  { %v721_v49 = vadd.f32 %v720_v45, %v719_v43 }
 0x113   :  { %v437_v50 = vadd.f32 %v697_v48, %v897_v35  ;;  %v452_v52 = vmax.f32 %v436_v46, 0.0  ;;  %v460_v53 = vmax.f32 %v444_v47, 0.0 }
 0x114   :  { %v445_v51 = vadd.f32 %v721_v49, %v897_v35 }
 0x115   :  { %v453_v54 = vmax.f32 %v437_v50, 0.0 }
 0x116   :  { %v461_v55 = vmax.f32 %v445_v51, 0.0 }
 0x117   :  { %v629_v56 = vpack.c.bf16 %v453_v54, %v452_v52 }
 0x118   :  { %v649_v57 = vpack.c.bf16 %v461_v55, %v460_v53 }
 0x119   :  { %653 = vst [vmem:[%s942_s3 + $0x18] sm:$0xff] %v629_v56  }
 0x11a   :  { %657 = vst [vmem:[%s942_s3 + $0x38] sm:$0xff] %v649_v57  }

// kernel: netg_forward.76
= control target key start
LH: loop header
LB: loop body
LE: loop exit
PB: predicated region body
PF: predicated region fallthrough
CT: control target
= control target key end

     0   :  { %s1042_s1 = inlined_call_operand.vmem [shape: bf16[256,128], index: 1, kind: input, shape index: {}]   ;;  %s1043_s0 = inlined_call_operand.vmem [shape: bf16[128,256], index: 0, kind: input, shape index: {}]   ;;  %s1044_s3 = inlined_call_operand.vmem [shape: bf16[128,128], index: 3, kind: input, shape index: {}]   ;;  %s1045_s2 = inlined_call_operand.vmem [shape: f32[1,128], index: 2, kind: input, shape index: {}]   ;;  %s1046_s4 = inlined_call_operand.vmem [shape: bf16[128,128], index: 4, kind: output, shape index: {}]  }
   0x1   :  { %v812_v0 = vld [vmem:[%s1042_s1 + $0x40] sm:$0xff]   ;;  %v814_v2 = vld [vmem:[%s1042_s1 + $0x48] sm:$0xff]   ;;  %v816_v4 = vld [vmem:[%s1042_s1 + $0x50] sm:$0xff]  }
   0x2   :  { %v813_v1 = vld [vmem:[%s1042_s1] sm:$0xff]   ;;  %732 = vmatprep.subr.bf16.mxu0 %v812_v0  ;;  %796 = vmatprep.subr.bf16.mxu1 %v812_v0  ;;  %v815_v3 = vld [vmem:[%s1042_s1 + $0x8] sm:$0xff]   ;;  %v817_v5 = vld [vmem:[%s1042_s1 + $0x10] sm:$0xff]  }
   0x3   :  { %733 = vmatpush3.bf16.msra.mxu0 %v813_v1  ;;  %804 = vmatpush3.bf16.msra.mxu1 %v813_v1  ;;  %v818_v6 = vld [vmem:[%s1042_s1 + $0x58] sm:$0xff]   ;;  %v820_v8 = vld [vmem:[%s1042_s1 + $0x60] sm:$0xff]   ;;  %v822_v10 = vld [vmem:[%s1042_s1 + $0x68] sm:$0xff]  }
   0x4   :  { %734 = vmatprep.subr.bf16.mxu0 %v814_v2  ;;  %797 = vmatprep.subr.bf16.mxu1 %v814_v2  ;;  %v819_v7 = vld [vmem:[%s1042_s1 + $0x18] sm:$0xff]   ;;  %v821_v9 = vld [vmem:[%s1042_s1 + $0x20] sm:$0xff]   ;;  %v823_v13 = vld [vmem:[%s1042_s1 + $0x28] sm:$0xff]  }
   0x5   :  { %v830_v11 = vld [vmem:[%s1043_s0 + $0x4] ss:$8 sps:$4 sm:$0xff]   ;;  %v824_v14 = vld [vmem:[%s1042_s1 + $0x70] sm:$0xff]   ;;  %v826_v16 = vld [vmem:[%s1042_s1 + $0x78] sm:$0xff]  }
   0x6   :  { %v833_v12 = vld [vmem:[%s1043_s0 + $0x44] ss:$8 sps:$4 sm:$0xff]   ;;  %310 = vmatprep.mubr.bf16.mxu0 %v830_v11  ;;  %v825_v15 = vld [vmem:[%s1042_s1 + $0x30] sm:$0xff]   ;;  %v827_v17 = vld [vmem:[%s1042_s1 + $0x38] sm:$0xff]  }
   0x7   :  { %735 = vmatpush3.bf16.msra.mxu0 %v815_v3  ;;  %805 = vmatpush3.bf16.msra.mxu1 %v815_v3  ;;  %v828_v18 = vld [vmem:[%s1043_s0] ss:$8 sps:$4 sm:$0xff]   ;;  %v834_v20 = vld [vmem:[%s1043_s0 + $0x14] ss:$8 sps:$4 sm:$0xff]   ;;  %v838_v22 = vld [vmem:[%s1043_s0 + $0x10] ss:$8 sps:$4 sm:$0xff]  }
   0x8   :  { %736 = vmatprep.subr.bf16.mxu0 %v816_v4  ;;  %798 = vmatprep.subr.bf16.mxu1 %v816_v4  ;;  %v831_v19 = vld [vmem:[%s1043_s0 + $0x40] ss:$8 sps:$4 sm:$0xff]   ;;  %v836_v21 = vld [vmem:[%s1043_s0 + $0x54] ss:$8 sps:$4 sm:$0xff]   ;;  %v839_v23 = vld [vmem:[%s1043_s0 + $0x50] ss:$8 sps:$4 sm:$0xff]  }
   0x9   :  { %342 = vmatprep.mubr.bf16.mxu1 %v833_v12  ;;  %v840_v24 = vld [vmem:[%s1043_s0 + $0x24] ss:$8 sps:$4 sm:$0xff]   ;;  %v844_v26 = vld [vmem:[%s1043_s0 + $0x20] ss:$8 sps:$4 sm:$0xff]   ;;  %v846_v28 = vld [vmem:[%s1043_s0 + $0x34] ss:$8 sps:$4 sm:$0xff]  }
   0xa   :  { %v842_v25 = vld [vmem:[%s1043_s0 + $0x64] ss:$8 sps:$4 sm:$0xff]   ;;  %v845_v27 = vld [vmem:[%s1043_s0 + $0x60] ss:$8 sps:$4 sm:$0xff]   ;;  %v848_v29 = vld [vmem:[%s1043_s0 + $0x74] ss:$8 sps:$4 sm:$0xff]  }
   0xb   :  { %737 = vmatpush3.bf16.msra.mxu0 %v817_v5  ;;  %806 = vmatpush3.bf16.msra.mxu1 %v817_v5  ;;  %v850_v30 = vld [vmem:[%s1043_s0 + $0x30] ss:$8 sps:$4 sm:$0xff]   ;;  %v647_v34 = vld [vmem:[%s1044_s3] sm:$0xff]   ;;  %v718_v61 = vld [vmem:[%s1044_s3 + $0x8] sm:$0xff]  }
   0xc   :  { %738 = vmatprep.subr.bf16.mxu0 %v818_v6  ;;  %799 = vmatprep.subr.bf16.mxu1 %v818_v6  ;;  %v851_v31 = vld [vmem:[%s1043_s0 + $0x70] ss:$8 sps:$4 sm:$0xff]   ;;  %v721_v35 = vld [vmem:[%s1044_s3 + $0x20] sm:$0xff]   ;;  %v648_v43 = vunpack.c.l.bf16 %v647_v34  ;;  %v649_v46 = vunpack.c.h.bf16 %v647_v34  ;;  %v722_v62 = vld [vmem:[%s1044_s3 + $0x28] sm:$0xff]  }
   0xd   :  { %v982_v37 = vld [vmem:[%s1045_s2] ss:$0 sm:$0xff]  ;;  %v664_v44 = vunpack.c.l.bf16 %v721_v35  ;;  %v665_v48 = vunpack.c.h.bf16 %v721_v35  ;;  %v669_v12 = vunpack.c.h.bf16 %v722_v62 }
   0xf   :  { %739 = vmatpush3.bf16.msra.mxu0 %v819_v7  ;;  %807 = vmatpush3.bf16.msra.mxu1 %v819_v7  ;;  %v652_v7 = vunpack.c.l.bf16 %v718_v61 }
  0x10   :  { %740 = vmatprep.subr.bf16.mxu0 %v820_v8  ;;  %800 = vmatprep.subr.bf16.mxu1 %v820_v8  ;;  %v668_v8 = vunpack.c.l.bf16 %v722_v62 }
  0x13   :  { %741 = vmatpush3.bf16.msra.mxu0 %v821_v9  ;;  %808 = vmatpush3.bf16.msra.mxu1 %v821_v9 }
  0x14   :  { %742 = vmatprep.subr.bf16.mxu0 %v822_v10  ;;  %801 = vmatprep.subr.bf16.mxu1 %v822_v10  ;;  %v653_v10 = vunpack.c.h.bf16 %v718_v61 }
  0x17   :  { %743 = vmatpush3.bf16.msra.mxu0 %v823_v13  ;;  %809 = vmatpush3.bf16.msra.mxu1 %v823_v13 }
  0x18   :  { %744 = vmatprep.subr.bf16.mxu0 %v824_v14  ;;  %802 = vmatprep.subr.bf16.mxu1 %v824_v14 }
  0x1b   :  { %745 = vmatpush3.bf16.msra.mxu0 %v825_v15  ;;  %810 = vmatpush3.bf16.msra.mxu1 %v825_v15 }
  0x1c   :  { %746 = vmatprep.subr.bf16.mxu0 %v826_v16  ;;  %803 = vmatprep.subr.bf16.mxu1 %v826_v16 }
  0x1f   :  { %747 = vmatpush3.bf16.msra.mxu0 %v827_v17  ;;  %811 = vmatpush3.bf16.msra.mxu1 %v827_v17 }
  0x22   :  { %311 = vmatmul.mubr.bf16.vlgmr.msra.gmra.mrb[0].mxu0 %v828_v18  ;;  %343 = vmatmul.mubr.bf16.vlgmr.msra.gmra.mrb[0].mxu1 %v831_v19 }
  0x23   :  { %318 = vmatprep.mubr.bf16.mxu0 %v834_v20  ;;  %350 = vmatprep.mubr.bf16.mxu1 %v836_v21 }
  0x2a   :  { %319 = vmatmul.mubr.bf16.gmra.mrb[4].mxu0 %v838_v22  ;;  %351 = vmatmul.mubr.bf16.gmra.mrb[4].mxu1 %v839_v23 }
  0x2b   :  { %326 = vmatprep.mubr.bf16.mxu0 %v840_v24  ;;  %358 = vmatprep.mubr.bf16.mxu1 %v842_v25  ;;  %v719_v25 = vld [vmem:[%s1044_s3 + $0x10] sm:$0xff]  }
  0x2c   :  { %v656_v35 = vunpack.c.l.bf16 %v719_v25 }
  0x32   :  { %327 = vmatmul.mubr.bf16.gmra.mrb[8].mxu0 %v844_v26  ;;  %359 = vmatmul.mubr.bf16.gmra.mrb[8].mxu1 %v845_v27  ;;  %v723_v26 = vld [vmem:[%s1044_s3 + $0x30] sm:$0xff]  }
  0x33   :  { %334 = vmatprep.mubr.bf16.mxu0 %v846_v28  ;;  %366 = vmatprep.mubr.bf16.mxu1 %v848_v29 }
  0x3a   :  { %335 = vmatmul.mubr.bf16.gmra.mrb[12].mxu0 %v850_v30  ;;  %367 = vmatmul.mubr.bf16.gmra.mrb[12].mxu1 %v851_v31 }
  0xf5   :  { %v748_v32 = vpop.f32.mrb[0].mxu0  ;;  %v772_v33 = vpop.f32.mrb[0].mxu1 }
  0xf6   :  { %v749_v36 = vpop.f32.mrb[1].mxu0  ;;  %v773_v38 = vpop.f32.mrb[1].mxu1 }
  0xf7   :  { %v750_v39 = vadd.f32 %v749_v36, %v748_v32  ;;  %v774_v40 = vadd.f32 %v773_v38, %v772_v33  ;;  %v751_v41 = vpop.f32.mrb[2].mxu0  ;;  %v775_v42 = vpop.f32.mrb[2].mxu1  ;;  %v672_v36 = vunpack.c.l.bf16 %v723_v26 }
  0xf8   :  { %v752_v45 = vpop.f32.mrb[3].mxu0  ;;  %v776_v47 = vpop.f32.mrb[3].mxu1 }
  0xf9   :  { %v433_v49 = vadd.f32 %v750_v39, %v982_v37  ;;  %v441_v50 = vadd.f32 %v774_v40, %v982_v37  ;;  %v753_v51 = vadd.f32 %v752_v45, %v751_v41  ;;  %v777_v52 = vadd.f32 %v776_v47, %v775_v42 }
  0xfa   :  { %v657_v39 = vunpack.c.h.bf16 %v719_v25  ;;  %v673_v41 = vunpack.c.h.bf16 %v723_v26 }
  0xfb   :  { %v434_v53 = vadd.f32 %v753_v51, %v982_v37  ;;  %v442_v54 = vadd.f32 %v777_v52, %v982_v37  ;;  %v481_v55 = vadd.f32 %v648_v43, %v433_v49  ;;  %v489_v56 = vadd.f32 %v664_v44, %v441_v50 }
  0xfd   :  { %v482_v57 = vadd.f32 %v649_v46, %v434_v53  ;;  %v490_v58 = vadd.f32 %v665_v48, %v442_v54  ;;  %v754_v59 = vpop.f32.mrb[4].mxu0  ;;  %v778_v60 = vpop.f32.mrb[4].mxu1  ;;  %v720_v54 = vld [vmem:[%s1044_s3 + $0x18] sm:$0xff]  }
  0xfe   :  { %v755_v63 = vpop.f32.mrb[5].mxu0  ;;  %v779_v0 = vpop.f32.mrb[5].mxu1 }
  0xff   :  { %v681_v1 = vpack.c.bf16 %v482_v57, %v481_v55  ;;  %v701_v2 = vpack.c.bf16 %v490_v58, %v489_v56  ;;  %v756_v3 = vadd.f32 %v755_v63, %v754_v59  ;;  %v780_v4 = vadd.f32 %v779_v0, %v778_v60  ;;  %v757_v5 = vpop.f32.mrb[6].mxu0  ;;  %v781_v6 = vpop.f32.mrb[6].mxu1  ;;  %v724_v55 = vld [vmem:[%s1044_s3 + $0x38] sm:$0xff]  }
 0x100   :  { %v758_v9 = vpop.f32.mrb[7].mxu0  ;;  %v782_v11 = vpop.f32.mrb[7].mxu1  ;;  %v660_v0 = vunpack.c.l.bf16 %v720_v54 }
 0x101   :  { %682 = vst [vmem:[%s1046_s4] sm:$0xff] %v681_v1   ;;  %728 = vst [vmem:[%s1046_s4 + $0x20] sm:$0xff] %v701_v2   ;;  %v435_v13 = vadd.f32 %v756_v3, %v982_v37  ;;  %v443_v14 = vadd.f32 %v780_v4, %v982_v37  ;;  %v759_v15 = vadd.f32 %v758_v9, %v757_v5  ;;  %v676_v1 = vunpack.c.l.bf16 %v724_v55 }
 0x102   :  { %v783_v16 = vadd.f32 %v782_v11, %v781_v6  ;;  %v661_v3 = vunpack.c.h.bf16 %v720_v54  ;;  %v677_v5 = vunpack.c.h.bf16 %v724_v55 }
 0x103   :  { %v436_v17 = vadd.f32 %v759_v15, %v982_v37  ;;  %v483_v19 = vadd.f32 %v652_v7, %v435_v13  ;;  %v491_v20 = vadd.f32 %v668_v8, %v443_v14 }
 0x104   :  { %v444_v18 = vadd.f32 %v783_v16, %v982_v37 }
 0x105   :  { %v484_v21 = vadd.f32 %v653_v10, %v436_v17  ;;  %v760_v23 = vpop.f32.mrb[8].mxu0  ;;  %v784_v24 = vpop.f32.mrb[8].mxu1 }
 0x106   :  { %v492_v22 = vadd.f32 %v669_v12, %v444_v18  ;;  %v761_v27 = vpop.f32.mrb[9].mxu0  ;;  %v785_v28 = vpop.f32.mrb[9].mxu1 }
 0x107   :  { %v686_v29 = vpack.c.bf16 %v484_v21, %v483_v19  ;;  %v762_v31 = vadd.f32 %v761_v27, %v760_v23  ;;  %v786_v32 = vadd.f32 %v785_v28, %v784_v24  ;;  %v763_v33 = vpop.f32.mrb[10].mxu0  ;;  %v787_v34 = vpop.f32.mrb[10].mxu1 }
 0x108   :  { %v706_v30 = vpack.c.bf16 %v492_v22, %v491_v20  ;;  %v764_v38 = vpop.f32.mrb[11].mxu0  ;;  %v788_v40 = vpop.f32.mrb[11].mxu1 }
 0x109   :  { %725 = vst [vmem:[%s1046_s4 + $0x8] sm:$0xff] %v686_v29   ;;  %v437_v42 = vadd.f32 %v762_v31, %v982_v37  ;;  %v445_v43 = vadd.f32 %v786_v32, %v982_v37  ;;  %v765_v44 = vadd.f32 %v764_v38, %v763_v33  ;;  %v789_v45 = vadd.f32 %v788_v40, %v787_v34 }
 0x10a   :  { %729 = vst [vmem:[%s1046_s4 + $0x28] sm:$0xff] %v706_v30  }
 0x10b   :  { %v438_v46 = vadd.f32 %v765_v44, %v982_v37  ;;  %v446_v47 = vadd.f32 %v789_v45, %v982_v37  ;;  %v485_v48 = vadd.f32 %v656_v35, %v437_v42  ;;  %v493_v49 = vadd.f32 %v672_v36, %v445_v43 }
 0x10d   :  { %v486_v50 = vadd.f32 %v657_v39, %v438_v46  ;;  %v494_v51 = vadd.f32 %v673_v41, %v446_v47  ;;  %v766_v52 = vpop.f32.mrb[12].mxu0  ;;  %v790_v53 = vpop.f32.mrb[12].mxu1 }
 0x10e   :  { %v767_v56 = vpop.f32.mrb[13].mxu0  ;;  %v791_v57 = vpop.f32.mrb[13].mxu1 }
 0x10f   :  { %v691_v58 = vpack.c.bf16 %v486_v50, %v485_v48  ;;  %v711_v59 = vpack.c.bf16 %v494_v51, %v493_v49  ;;  %v768_v60 = vadd.f32 %v767_v56, %v766_v52  ;;  %v792_v61 = vadd.f32 %v791_v57, %v790_v53  ;;  %v769_v62 = vpop.f32.mrb[14].mxu0  ;;  %v793_v63 = vpop.f32.mrb[14].mxu1 }
 0x110   :  { %v770_v2 = vpop.f32.mrb[15].mxu0  ;;  %v794_v4 = vpop.f32.mrb[15].mxu1 }
 0x111   :  { %726 = vst [vmem:[%s1046_s4 + $0x10] sm:$0xff] %v691_v58   ;;  %730 = vst [vmem:[%s1046_s4 + $0x30] sm:$0xff] %v711_v59   ;;  %v439_v6 = vadd.f32 %v768_v60, %v982_v37  ;;  %v447_v7 = vadd.f32 %v792_v61, %v982_v37  ;;  %v771_v8 = vadd.f32 %v770_v2, %v769_v62 }
 0x112   :  { %v795_v9 = vadd.f32 %v794_v4, %v793_v63 }
 0x113   :  { %v440_v10 = vadd.f32 %v771_v8, %v982_v37  ;;  %v487_v12 = vadd.f32 %v660_v0, %v439_v6  ;;  %v495_v13 = vadd.f32 %v676_v1, %v447_v7 }
 0x114   :  { %v448_v11 = vadd.f32 %v795_v9, %v982_v37 }
 0x115   :  { %v488_v14 = vadd.f32 %v661_v3, %v440_v10 }
 0x116   :  { %v496_v15 = vadd.f32 %v677_v5, %v448_v11 }
 0x117   :  { %v696_v16 = vpack.c.bf16 %v488_v14, %v487_v12 }
 0x118   :  { %v716_v17 = vpack.c.bf16 %v496_v15, %v495_v13 }
 0x119   :  { %727 = vst [vmem:[%s1046_s4 + $0x18] sm:$0xff] %v696_v16  }
 0x11a   :  { %731 = vst [vmem:[%s1046_s4 + $0x38] sm:$0xff] %v716_v17  }

// kernel: netg_forward.64
= control target key start
LH: loop header
LB: loop body
LE: loop exit
PB: predicated region body
PF: predicated region fallthrough
CT: control target
= control target key end

     0   :  { %s477_s1 = inlined_call_operand.vmem [shape: bf16[256,128], index: 1, kind: input, shape index: {}]   ;;  %s478_s0 = inlined_call_operand.vmem [shape: bf16[32,256], index: 0, kind: input, shape index: {}]   ;;  %s479_s2 = inlined_call_operand.vmem [shape: f32[1,128], index: 2, kind: input, shape index: {}]   ;;  %s480_s3 = inlined_call_operand.vmem [shape: bf16[32,128], index: 3, kind: output, shape index: {}]  }
   0x1   :  { %v366_v0 = vld [vmem:[%s477_s1 + $0x40] sm:$0xff]   ;;  %v368_v2 = vld [vmem:[%s477_s1 + $0x48] sm:$0xff]   ;;  %v370_v4 = vld [vmem:[%s477_s1 + $0x50] sm:$0xff]  }
   0x2   :  { %v367_v1 = vld [vmem:[%s477_s1] sm:$0xff]   ;;  %322 = vmatprep.subr.bf16.mxu0 %v366_v0  ;;  %350 = vmatprep.subr.bf16.mxu1 %v366_v0  ;;  %v369_v3 = vld [vmem:[%s477_s1 + $0x8] sm:$0xff]   ;;  %v371_v5 = vld [vmem:[%s477_s1 + $0x10] sm:$0xff]  }
   0x3   :  { %323 = vmatpush3.bf16.msra.mxu0 %v367_v1  ;;  %358 = vmatpush3.bf16.msra.mxu1 %v367_v1  ;;  %v372_v6 = vld [vmem:[%s477_s1 + $0x58] sm:$0xff]   ;;  %v374_v8 = vld [vmem:[%s477_s1 + $0x60] sm:$0xff]   ;;  %v376_v10 = vld [vmem:[%s477_s1 + $0x68] sm:$0xff]  }
   0x4   :  { %324 = vmatprep.subr.bf16.mxu0 %v368_v2  ;;  %351 = vmatprep.subr.bf16.mxu1 %v368_v2  ;;  %v373_v7 = vld [vmem:[%s477_s1 + $0x18] sm:$0xff]   ;;  %v375_v9 = vld [vmem:[%s477_s1 + $0x20] sm:$0xff]   ;;  %v377_v13 = vld [vmem:[%s477_s1 + $0x28] sm:$0xff]  }
   0x5   :  { %v384_v11 = vld [vmem:[%s478_s0 + $0x4] ss:$8 sps:$4 sm:$0xff]   ;;  %v387_v12 = vld [vmem:[%s478_s0 + $0x14] ss:$8 sps:$4 sm:$0xff]   ;;  %v382_v18 = vld [vmem:[%s478_s0] ss:$8 sps:$4 sm:$0xff]  }
   0x6   :  { %v378_v14 = vld [vmem:[%s477_s1 + $0x70] sm:$0xff]   ;;  %211 = vmatprep.mubr.bf16.mxu0 %v384_v11  ;;  %219 = vmatprep.mubr.bf16.mxu1 %v387_v12  ;;  %v380_v16 = vld [vmem:[%s477_s1 + $0x78] sm:$0xff]   ;;  %v302_v23 = vld [vmem:[%s479_s2] ss:$0 sm:$0xff] }
   0x7   :  { %325 = vmatpush3.bf16.msra.mxu0 %v369_v3  ;;  %359 = vmatpush3.bf16.msra.mxu1 %v369_v3  ;;  %v379_v15 = vld [vmem:[%s477_s1 + $0x30] sm:$0xff]   ;;  %v381_v17 = vld [vmem:[%s477_s1 + $0x38] sm:$0xff]  }
   0x8   :  { %326 = vmatprep.subr.bf16.mxu0 %v370_v4  ;;  %352 = vmatprep.subr.bf16.mxu1 %v370_v4  ;;  %v385_v19 = vld [vmem:[%s478_s0 + $0x10] ss:$8 sps:$4 sm:$0xff]  }
   0xb   :  { %327 = vmatpush3.bf16.msra.mxu0 %v371_v5  ;;  %360 = vmatpush3.bf16.msra.mxu1 %v371_v5 }
   0xc   :  { %328 = vmatprep.subr.bf16.mxu0 %v372_v6  ;;  %353 = vmatprep.subr.bf16.mxu1 %v372_v6 }
   0xf   :  { %329 = vmatpush3.bf16.msra.mxu0 %v373_v7  ;;  %361 = vmatpush3.bf16.msra.mxu1 %v373_v7 }
  0x10   :  { %330 = vmatprep.subr.bf16.mxu0 %v374_v8  ;;  %354 = vmatprep.subr.bf16.mxu1 %v374_v8 }
  0x13   :  { %331 = vmatpush3.bf16.msra.mxu0 %v375_v9  ;;  %362 = vmatpush3.bf16.msra.mxu1 %v375_v9 }
  0x14   :  { %332 = vmatprep.subr.bf16.mxu0 %v376_v10  ;;  %355 = vmatprep.subr.bf16.mxu1 %v376_v10 }
  0x17   :  { %333 = vmatpush3.bf16.msra.mxu0 %v377_v13  ;;  %363 = vmatpush3.bf16.msra.mxu1 %v377_v13 }
  0x18   :  { %334 = vmatprep.subr.bf16.mxu0 %v378_v14  ;;  %356 = vmatprep.subr.bf16.mxu1 %v378_v14 }
  0x1b   :  { %335 = vmatpush3.bf16.msra.mxu0 %v379_v15  ;;  %364 = vmatpush3.bf16.msra.mxu1 %v379_v15 }
  0x1c   :  { %336 = vmatprep.subr.bf16.mxu0 %v380_v16  ;;  %357 = vmatprep.subr.bf16.mxu1 %v380_v16 }
  0x1f   :  { %337 = vmatpush3.bf16.msra.mxu0 %v381_v17  ;;  %365 = vmatpush3.bf16.msra.mxu1 %v381_v17 }
  0x22   :  { %212 = vmatmul.mubr.bf16.vlgmr.msra.gmra.mrb[0].mxu0 %v382_v18  ;;  %220 = vmatmul.mubr.bf16.vlgmr.msra.gmra.mrb[0].mxu1 %v385_v19 }
  0xf5   :  { %v338_v20 = vpop.f32.mrb[0].mxu0  ;;  %v344_v21 = vpop.f32.mrb[0].mxu1 }
  0xf6   :  { %v339_v22 = vpop.f32.mrb[1].mxu0  ;;  %v345_v24 = vpop.f32.mrb[1].mxu1 }
  0xf7   :  { %v340_v25 = vadd.f32 %v339_v22, %v338_v20  ;;  %v346_v26 = vadd.f32 %v345_v24, %v344_v21  ;;  %v341_v27 = vpop.f32.mrb[2].mxu0  ;;  %v347_v28 = vpop.f32.mrb[2].mxu1 }
  0xf8   :  { %v342_v29 = vpop.f32.mrb[3].mxu0  ;;  %v348_v30 = vpop.f32.mrb[3].mxu1 }
  0xf9   :  { %v250_v31 = vadd.f32 %v340_v25, %v302_v23  ;;  %v252_v32 = vadd.f32 %v346_v26, %v302_v23  ;;  %v343_v33 = vadd.f32 %v342_v29, %v341_v27  ;;  %v349_v34 = vadd.f32 %v348_v30, %v347_v28 }
  0xfb   :  { %v251_v35 = vadd.f32 %v343_v33, %v302_v23  ;;  %v253_v36 = vadd.f32 %v349_v34, %v302_v23  ;;  %v254_v37 = vmax.f32 %v250_v31, 0.0  ;;  %v256_v38 = vmax.f32 %v252_v32, 0.0 }
  0xfd   :  { %v255_v39 = vmax.f32 %v251_v35, 0.0  ;;  %v257_v40 = vmax.f32 %v253_v36, 0.0 }
  0xff   :  { %v314_v41 = vpack.c.bf16 %v255_v39, %v254_v37  ;;  %v319_v42 = vpack.c.bf16 %v257_v40, %v256_v38 }
 0x101   :  { %315 = vst [vmem:[%s480_s3] sm:$0xff] %v314_v41   ;;  %321 = vst [vmem:[%s480_s3 + $0x8] sm:$0xff] %v319_v42  }

// kernel: netg_forward.79
= control target key start
LH: loop header
LB: loop body
LE: loop exit
PB: predicated region body
PF: predicated region fallthrough
CT: control target
= control target key end

     0   :  { %s701_s1 = inlined_call_operand.vmem [shape: bf16[384,128], index: 1, kind: input, shape index: {}]   ;;  %s702_s0 = inlined_call_operand.vmem [shape: bf16[32,384], index: 0, kind: input, shape index: {}]   ;;  %s703_s2 = inlined_call_operand.vmem [shape: f32[1,128], index: 2, kind: input, shape index: {}]   ;;  %s704_s3 = inlined_call_operand.vmem [shape: bf16[32,128], index: 3, kind: input, shape index: {}]   ;;  %s705_s4 = inlined_call_operand.vmem [shape: bf16[32,128], index: 4, kind: output, shape index: {}]  }
   0x1   :  { %v539_v0 = vld [vmem:[%s701_s1 + $0x40] sm:$0xff]   ;;  %v542_v3 = vld [vmem:[%s701_s1 + $0x48] sm:$0xff]   ;;  %v545_v6 = vld [vmem:[%s701_s1 + $0x50] sm:$0xff]  }
   0x2   :  { %v540_v1 = vld [vmem:[%s701_s1] sm:$0xff]   ;;  %481 = vmatprep.subr.bf16.mxu0 %v539_v0  ;;  %v543_v4 = vld [vmem:[%s701_s1 + $0x8] sm:$0xff]   ;;  %v546_v7 = vld [vmem:[%s701_s1 + $0x10] sm:$0xff]  }
   0x3   :  { %v541_v2 = vld [vmem:[%s701_s1 + $0x80] sm:$0xff]   ;;  %482 = vmatpush3.bf16.msra.mxu0 %v540_v1  ;;  %v544_v5 = vld [vmem:[%s701_s1 + $0x88] sm:$0xff]   ;;  %v547_v8 = vld [vmem:[%s701_s1 + $0x90] sm:$0xff]  }
   0x4   :  { %519 = vmatprep.subr.bf16.mxu1 %v541_v2  ;;  %483 = vmatprep.subr.bf16.mxu0 %v542_v3  ;;  %v548_v9 = vld [vmem:[%s701_s1 + $0x58] sm:$0xff]   ;;  %v551_v12 = vld [vmem:[%s701_s1 + $0x60] sm:$0xff]   ;;  %v554_v15 = vld [vmem:[%s701_s1 + $0x68] sm:$0xff]  }
   0x5   :  { %520 = vmatpush3.bf16.msra.mxu1 %v541_v2  ;;  %v549_v10 = vld [vmem:[%s701_s1 + $0x18] sm:$0xff]   ;;  %v553_v13 = vld [vmem:[%s701_s1 + $0xa0] sm:$0xff]   ;;  %v556_v16 = vld [vmem:[%s701_s1 + $0xa8] sm:$0xff]  }
   0x6   :  { %521 = vmatprep.subr.bf16.mxu1 %v544_v5  ;;  %v550_v11 = vld [vmem:[%s701_s1 + $0x98] sm:$0xff]   ;;  %v552_v14 = vld [vmem:[%s701_s1 + $0x20] sm:$0xff]   ;;  %v555_v17 = vld [vmem:[%s701_s1 + $0x28] sm:$0xff]  }
   0x7   :  { %484 = vmatpush3.bf16.msra.mxu0 %v543_v4  ;;  %v557_v18 = vld [vmem:[%s701_s1 + $0x70] sm:$0xff]   ;;  %v560_v21 = vld [vmem:[%s701_s1 + $0x78] sm:$0xff]   ;;  %v563_v26 = vld [vmem:[%s702_s0] ss:$12 sps:$4 sm:$0xff]  }
   0x8   :  { %485 = vmatprep.subr.bf16.mxu0 %v545_v6  ;;  %v558_v19 = vld [vmem:[%s701_s1 + $0x30] sm:$0xff]   ;;  %v562_v22 = vld [vmem:[%s701_s1 + $0xb8] sm:$0xff]   ;;  %v567_v28 = vld [vmem:[%s702_s0 + $0x20] ss:$12 sps:$4 sm:$0xff]  }
   0x9   :  { %522 = vmatpush3.bf16.msra.mxu1 %v544_v5  ;;  %v559_v20 = vld [vmem:[%s701_s1 + $0xb0] sm:$0xff]   ;;  %v561_v25 = vld [vmem:[%s701_s1 + $0x38] sm:$0xff]   ;;  %v452_v37 = vld [vmem:[%s703_s2] ss:$0 sm:$0xff] }
   0xa   :  { %523 = vmatprep.subr.bf16.mxu1 %v547_v8  ;;  %v565_v23 = vld [vmem:[%s702_s0 + $0x4] ss:$12 sps:$4 sm:$0xff]   ;;  %v566_v24 = vld [vmem:[%s702_s0 + $0x8] ss:$12 sps:$4 sm:$0xff]  }
   0xb   :  { %486 = vmatpush3.bf16.msra.mxu0 %v546_v7  ;;  %294 = vmatprep.mubr.bf16.mxu0 %v565_v23  ;;  %v568_v27 = vld [vmem:[%s702_s0 + $0x1c] ss:$12 sps:$4 sm:$0xff]   ;;  %v570_v29 = vld [vmem:[%s702_s0 + $0x18] ss:$12 sps:$4 sm:$0xff]  }
   0xc   :  { %487 = vmatprep.subr.bf16.mxu0 %v548_v9  ;;  %535 = vmatprep.mubr.bf16.mxu1 %v566_v24  ;;  %v462_v38 = vld [vmem:[%s704_s3] sm:$0xff]   ;;  %v479_v54 = vld [vmem:[%s704_s3 + $0x8] sm:$0xff]  }
   0xd   :  { %524 = vmatpush3.bf16.msra.mxu1 %v547_v8  ;;  %v463_v44 = vunpack.c.l.bf16 %v462_v38  ;;  %v464_v46 = vunpack.c.h.bf16 %v462_v38  ;;  %v467_v60 = vunpack.c.l.bf16 %v479_v54  ;;  %v468_v62 = vunpack.c.h.bf16 %v479_v54 }
   0xe   :  { %525 = vmatprep.subr.bf16.mxu1 %v550_v11 }
   0xf   :  { %488 = vmatpush3.bf16.msra.mxu0 %v549_v10 }
  0x10   :  { %489 = vmatprep.subr.bf16.mxu0 %v551_v12 }
  0x11   :  { %526 = vmatpush3.bf16.msra.mxu1 %v550_v11 }
  0x12   :  { %527 = vmatprep.subr.bf16.mxu1 %v553_v13 }
  0x13   :  { %490 = vmatpush3.bf16.msra.mxu0 %v552_v14 }
  0x14   :  { %491 = vmatprep.subr.bf16.mxu0 %v554_v15 }
  0x15   :  { %528 = vmatpush3.bf16.msra.mxu1 %v553_v13 }
  0x16   :  { %529 = vmatprep.subr.bf16.mxu1 %v556_v16 }
  0x17   :  { %492 = vmatpush3.bf16.msra.mxu0 %v555_v17 }
  0x18   :  { %493 = vmatprep.subr.bf16.mxu0 %v557_v18 }
  0x19   :  { %530 = vmatpush3.bf16.msra.mxu1 %v556_v16 }
  0x1a   :  { %531 = vmatprep.subr.bf16.mxu1 %v559_v20 }
  0x1b   :  { %494 = vmatpush3.bf16.msra.mxu0 %v558_v19 }
  0x1c   :  { %495 = vmatprep.subr.bf16.mxu0 %v560_v21 }
  0x1d   :  { %532 = vmatpush3.bf16.msra.mxu1 %v559_v20 }
  0x1e   :  { %533 = vmatprep.subr.bf16.mxu1 %v562_v22 }
  0x1f   :  { %496 = vmatpush3.bf16.msra.mxu0 %v561_v25 }
  0x21   :  { %534 = vmatpush3.bf16.msra.mxu1 %v562_v22 }
  0x22   :  { %295 = vmatmul.mubr.bf16.vlgmr.msra.gmra.mrb[0].mxu0 %v563_v26 }
  0x23   :  { %302 = vmatprep.mubr.bf16.mxu0 %v568_v27 }
  0x24   :  { %536 = vmatmul.mubr.bf16.vlgmr.msra.gmra.mrb[0].mxu1 %v567_v28 }
  0x2a   :  { %303 = vmatmul.mubr.bf16.gmra.mrb[4].mxu0 %v570_v29 }
  0xf5   :  { %v497_v30 = vpop.f32.mrb[0].mxu0 }
  0xf6   :  { %v498_v31 = vpop.f32.mrb[1].mxu0 }
  0xf7   :  { %v499_v32 = vadd.f32 %v498_v31, %v497_v30  ;;  %v500_v33 = vpop.f32.mrb[2].mxu0  ;;  %v537_v34 = vpop.f32.mrb[0].mxu1 }
  0xf8   :  { %v501_v35 = vpop.f32.mrb[3].mxu0  ;;  %v345_v36 = vpop.f32.mrb[1].mxu1 }
  0xf9   :  { %v502_v39 = vadd.f32 %v501_v35, %v500_v33  ;;  %v346_v40 = vadd.f32 %v499_v32, %v345_v36  ;;  %v538_v41 = vpop.f32.mrb[2].mxu1 }
  0xfa   :  { %v348_v42 = vpop.f32.mrb[3].mxu1 }
  0xfb   :  { %v382_v43 = vadd.f32 %v452_v37, %v346_v40  ;;  %v349_v45 = vadd.f32 %v502_v39, %v348_v42 }
  0xfd   :  { %v383_v47 = vadd.f32 %v452_v37, %v349_v45  ;;  %v503_v48 = vpop.f32.mrb[4].mxu0  ;;  %v394_v50 = vadd.f32 %v463_v44, %v382_v43 }
  0xfe   :  { %v504_v49 = vpop.f32.mrb[5].mxu0 }
  0xff   :  { %v395_v51 = vadd.f32 %v464_v46, %v383_v47  ;;  %v505_v52 = vadd.f32 %v504_v49, %v503_v48  ;;  %v506_v53 = vpop.f32.mrb[6].mxu0 }
 0x100   :  { %v507_v55 = vpop.f32.mrb[7].mxu0 }
 0x101   :  { %v472_v56 = vpack.c.bf16 %v395_v51, %v394_v50  ;;  %v354_v57 = vadd.f32 %v537_v34, %v505_v52  ;;  %v508_v58 = vadd.f32 %v507_v55, %v506_v53 }
 0x103   :  { %473 = vst [vmem:[%s705_s4] sm:$0xff] %v472_v56   ;;  %v384_v59 = vadd.f32 %v452_v37, %v354_v57  ;;  %v357_v61 = vadd.f32 %v538_v41, %v508_v58 }
 0x105   :  { %v385_v63 = vadd.f32 %v452_v37, %v357_v61  ;;  %v396_v0 = vadd.f32 %v467_v60, %v384_v59 }
 0x107   :  { %v397_v1 = vadd.f32 %v468_v62, %v385_v63 }
 0x109   :  { %v477_v2 = vpack.c.bf16 %v397_v1, %v396_v0 }
 0x10b   :  { %480 = vst [vmem:[%s705_s4 + $0x8] sm:$0xff] %v477_v2  }

// kernel: netg_forward.65
= control target key start
LH: loop header
LB: loop body
LE: loop exit
PB: predicated region body
PF: predicated region fallthrough
CT: control target
= control target key end

     0   :  { %s670_s1 = inlined_call_operand.vmem [shape: bf16[384,128], index: 1, kind: input, shape index: {}]   ;;  %s671_s0 = inlined_call_operand.vmem [shape: bf16[32,384], index: 0, kind: input, shape index: {}]   ;;  %s672_s2 = inlined_call_operand.vmem [shape: f32[1,128], index: 2, kind: input, shape index: {}]   ;;  %s673_s3 = inlined_call_operand.vmem [shape: bf16[32,128], index: 3, kind: output, shape index: {}]  }
   0x1   :  { %v519_v0 = vld [vmem:[%s670_s1 + $0x40] sm:$0xff]   ;;  %v522_v3 = vld [vmem:[%s670_s1 + $0x48] sm:$0xff]   ;;  %v525_v6 = vld [vmem:[%s670_s1 + $0x50] sm:$0xff]  }
   0x2   :  { %v520_v1 = vld [vmem:[%s670_s1] sm:$0xff]   ;;  %461 = vmatprep.subr.bf16.mxu0 %v519_v0  ;;  %v523_v4 = vld [vmem:[%s670_s1 + $0x8] sm:$0xff]   ;;  %v526_v7 = vld [vmem:[%s670_s1 + $0x10] sm:$0xff]  }
   0x3   :  { %v521_v2 = vld [vmem:[%s670_s1 + $0x80] sm:$0xff]   ;;  %462 = vmatpush3.bf16.msra.mxu0 %v520_v1  ;;  %v524_v5 = vld [vmem:[%s670_s1 + $0x88] sm:$0xff]   ;;  %v527_v8 = vld [vmem:[%s670_s1 + $0x90] sm:$0xff]  }
   0x4   :  { %499 = vmatprep.subr.bf16.mxu1 %v521_v2  ;;  %463 = vmatprep.subr.bf16.mxu0 %v522_v3  ;;  %v528_v9 = vld [vmem:[%s670_s1 + $0x58] sm:$0xff]   ;;  %v531_v12 = vld [vmem:[%s670_s1 + $0x60] sm:$0xff]   ;;  %v534_v15 = vld [vmem:[%s670_s1 + $0x68] sm:$0xff]  }
   0x5   :  { %500 = vmatpush3.bf16.msra.mxu1 %v521_v2  ;;  %v529_v10 = vld [vmem:[%s670_s1 + $0x18] sm:$0xff]   ;;  %v533_v13 = vld [vmem:[%s670_s1 + $0xa0] sm:$0xff]   ;;  %v536_v16 = vld [vmem:[%s670_s1 + $0xa8] sm:$0xff]  }
   0x6   :  { %501 = vmatprep.subr.bf16.mxu1 %v524_v5  ;;  %v530_v11 = vld [vmem:[%s670_s1 + $0x98] sm:$0xff]   ;;  %v532_v14 = vld [vmem:[%s670_s1 + $0x20] sm:$0xff]   ;;  %v535_v17 = vld [vmem:[%s670_s1 + $0x28] sm:$0xff]  }
   0x7   :  { %464 = vmatpush3.bf16.msra.mxu0 %v523_v4  ;;  %v537_v18 = vld [vmem:[%s670_s1 + $0x70] sm:$0xff]   ;;  %v540_v21 = vld [vmem:[%s670_s1 + $0x78] sm:$0xff]   ;;  %v543_v26 = vld [vmem:[%s671_s0] ss:$12 sps:$4 sm:$0xff]  }
   0x8   :  { %465 = vmatprep.subr.bf16.mxu0 %v525_v6  ;;  %v538_v19 = vld [vmem:[%s670_s1 + $0x30] sm:$0xff]   ;;  %v542_v22 = vld [vmem:[%s670_s1 + $0xb8] sm:$0xff]   ;;  %v547_v28 = vld [vmem:[%s671_s0 + $0x20] ss:$12 sps:$4 sm:$0xff]  }
   0x9   :  { %502 = vmatpush3.bf16.msra.mxu1 %v524_v5  ;;  %v539_v20 = vld [vmem:[%s670_s1 + $0xb0] sm:$0xff]   ;;  %v541_v25 = vld [vmem:[%s670_s1 + $0x38] sm:$0xff]   ;;  %v441_v37 = vld [vmem:[%s672_s2] ss:$0 sm:$0xff] }
   0xa   :  { %503 = vmatprep.subr.bf16.mxu1 %v527_v8  ;;  %v545_v23 = vld [vmem:[%s671_s0 + $0x4] ss:$12 sps:$4 sm:$0xff]   ;;  %v546_v24 = vld [vmem:[%s671_s0 + $0x8] ss:$12 sps:$4 sm:$0xff]  }
   0xb   :  { %466 = vmatpush3.bf16.msra.mxu0 %v526_v7  ;;  %291 = vmatprep.mubr.bf16.mxu0 %v545_v23  ;;  %v548_v27 = vld [vmem:[%s671_s0 + $0x1c] ss:$12 sps:$4 sm:$0xff]   ;;  %v550_v29 = vld [vmem:[%s671_s0 + $0x18] ss:$12 sps:$4 sm:$0xff]  }
   0xc   :  { %467 = vmatprep.subr.bf16.mxu0 %v528_v9  ;;  %515 = vmatprep.mubr.bf16.mxu1 %v546_v24 }
   0xd   :  { %504 = vmatpush3.bf16.msra.mxu1 %v527_v8 }
   0xe   :  { %505 = vmatprep.subr.bf16.mxu1 %v530_v11 }
   0xf   :  { %468 = vmatpush3.bf16.msra.mxu0 %v529_v10 }
  0x10   :  { %469 = vmatprep.subr.bf16.mxu0 %v531_v12 }
  0x11   :  { %506 = vmatpush3.bf16.msra.mxu1 %v530_v11 }
  0x12   :  { %507 = vmatprep.subr.bf16.mxu1 %v533_v13 }
  0x13   :  { %470 = vmatpush3.bf16.msra.mxu0 %v532_v14 }
  0x14   :  { %471 = vmatprep.subr.bf16.mxu0 %v534_v15 }
  0x15   :  { %508 = vmatpush3.bf16.msra.mxu1 %v533_v13 }
  0x16   :  { %509 = vmatprep.subr.bf16.mxu1 %v536_v16 }
  0x17   :  { %472 = vmatpush3.bf16.msra.mxu0 %v535_v17 }
  0x18   :  { %473 = vmatprep.subr.bf16.mxu0 %v537_v18 }
  0x19   :  { %510 = vmatpush3.bf16.msra.mxu1 %v536_v16 }
  0x1a   :  { %511 = vmatprep.subr.bf16.mxu1 %v539_v20 }
  0x1b   :  { %474 = vmatpush3.bf16.msra.mxu0 %v538_v19 }
  0x1c   :  { %475 = vmatprep.subr.bf16.mxu0 %v540_v21 }
  0x1d   :  { %512 = vmatpush3.bf16.msra.mxu1 %v539_v20 }
  0x1e   :  { %513 = vmatprep.subr.bf16.mxu1 %v542_v22 }
  0x1f   :  { %476 = vmatpush3.bf16.msra.mxu0 %v541_v25 }
  0x21   :  { %514 = vmatpush3.bf16.msra.mxu1 %v542_v22 }
  0x22   :  { %292 = vmatmul.mubr.bf16.vlgmr.msra.gmra.mrb[0].mxu0 %v543_v26 }
  0x23   :  { %299 = vmatprep.mubr.bf16.mxu0 %v548_v27 }
  0x24   :  { %516 = vmatmul.mubr.bf16.vlgmr.msra.gmra.mrb[0].mxu1 %v547_v28 }
  0x2a   :  { %300 = vmatmul.mubr.bf16.gmra.mrb[4].mxu0 %v550_v29 }
  0xf5   :  { %v477_v30 = vpop.f32.mrb[0].mxu0 }
  0xf6   :  { %v478_v31 = vpop.f32.mrb[1].mxu0 }
  0xf7   :  { %v479_v32 = vadd.f32 %v478_v31, %v477_v30  ;;  %v480_v33 = vpop.f32.mrb[2].mxu0  ;;  %v517_v34 = vpop.f32.mrb[0].mxu1 }
  0xf8   :  { %v481_v35 = vpop.f32.mrb[3].mxu0  ;;  %v342_v36 = vpop.f32.mrb[1].mxu1 }
  0xf9   :  { %v482_v38 = vadd.f32 %v481_v35, %v480_v33  ;;  %v343_v39 = vadd.f32 %v479_v32, %v342_v36  ;;  %v518_v40 = vpop.f32.mrb[2].mxu1 }
  0xfa   :  { %v345_v41 = vpop.f32.mrb[3].mxu1 }
  0xfb   :  { %v379_v42 = vadd.f32 %v441_v37, %v343_v39  ;;  %v346_v43 = vadd.f32 %v482_v38, %v345_v41 }
  0xfd   :  { %v380_v44 = vadd.f32 %v441_v37, %v346_v43  ;;  %v483_v45 = vpop.f32.mrb[4].mxu0  ;;  %v383_v47 = vmax.f32 %v379_v42, 0.0 }
  0xfe   :  { %v484_v46 = vpop.f32.mrb[5].mxu0 }
  0xff   :  { %v384_v48 = vmax.f32 %v380_v44, 0.0  ;;  %v485_v49 = vadd.f32 %v484_v46, %v483_v45  ;;  %v486_v50 = vpop.f32.mrb[6].mxu0 }
 0x100   :  { %v487_v51 = vpop.f32.mrb[7].mxu0 }
 0x101   :  { %v453_v52 = vpack.c.bf16 %v384_v48, %v383_v47  ;;  %v351_v53 = vadd.f32 %v517_v34, %v485_v49  ;;  %v488_v54 = vadd.f32 %v487_v51, %v486_v50 }
 0x103   :  { %454 = vst [vmem:[%s673_s3] sm:$0xff] %v453_v52   ;;  %v381_v55 = vadd.f32 %v441_v37, %v351_v53  ;;  %v354_v56 = vadd.f32 %v518_v40, %v488_v54 }
 0x105   :  { %v382_v57 = vadd.f32 %v441_v37, %v354_v56  ;;  %v385_v58 = vmax.f32 %v381_v55, 0.0 }
 0x107   :  { %v386_v59 = vmax.f32 %v382_v57, 0.0 }
 0x109   :  { %v458_v60 = vpack.c.bf16 %v386_v59, %v385_v58 }
 0x10b   :  { %460 = vst [vmem:[%s673_s3 + $0x8] sm:$0xff] %v458_v60  }

// kernel: netg_forward.67
= control target key start
LH: loop header
LB: loop body
LE: loop exit
PB: predicated region body
PF: predicated region fallthrough
CT: control target
= control target key end

     0   :  { %s681_s1 = inlined_call_operand.vmem [shape: bf16[512,128], index: 1, kind: input, shape index: {}]   ;;  %s682_s0 = inlined_call_operand.vmem [shape: bf16[16,512], index: 0, kind: input, shape index: {}]   ;;  %s683_s2 = inlined_call_operand.vmem [shape: f32[1,128], index: 2, kind: input, shape index: {}]   ;;  %s684_s3 = inlined_call_operand.vmem [shape: bf16[16,128], index: 3, kind: output, shape index: {}]  }
   0x1   :  { %v509_v0 = vld [vmem:[%s681_s1 + $0x40] sm:$0xff]   ;;  %v513_v4 = vld [vmem:[%s681_s1 + $0x48] sm:$0xff]   ;;  %v517_v8 = vld [vmem:[%s681_s1 + $0x50] sm:$0xff]  }
   0x2   :  { %v510_v1 = vld [vmem:[%s681_s1 + $0xc0] sm:$0xff]   ;;  %465 = vmatprep.subr.bf16.mxu0 %v509_v0  ;;  %v514_v5 = vld [vmem:[%s681_s1 + $0xc8] sm:$0xff]   ;;  %v518_v9 = vld [vmem:[%s681_s1 + $0xd0] sm:$0xff]  }
   0x3   :  { %v511_v2 = vld [vmem:[%s681_s1] sm:$0xff]   ;;  %487 = vmatprep.subr.bf16.mxu1 %v510_v1  ;;  %v515_v6 = vld [vmem:[%s681_s1 + $0x8] sm:$0xff]   ;;  %v519_v10 = vld [vmem:[%s681_s1 + $0x10] sm:$0xff]  }
   0x4   :  { %v512_v3 = vld [vmem:[%s681_s1 + $0x80] sm:$0xff]   ;;  %466 = vmatpush3.bf16.msra.mxu0 %v511_v2  ;;  %v516_v7 = vld [vmem:[%s681_s1 + $0x88] sm:$0xff]   ;;  %v520_v11 = vld [vmem:[%s681_s1 + $0x90] sm:$0xff]  }
   0x5   :  { %488 = vmatpush3.bf16.msra.mxu1 %v512_v3  ;;  %467 = vmatprep.subr.bf16.mxu0 %v513_v4  ;;  %v521_v12 = vld [vmem:[%s681_s1 + $0x58] sm:$0xff]   ;;  %v525_v16 = vld [vmem:[%s681_s1 + $0x60] sm:$0xff]   ;;  %v529_v20 = vld [vmem:[%s681_s1 + $0x68] sm:$0xff]  }
   0x6   :  { %489 = vmatprep.subr.bf16.mxu1 %v514_v5  ;;  %v522_v13 = vld [vmem:[%s681_s1 + $0xd8] sm:$0xff]   ;;  %v526_v17 = vld [vmem:[%s681_s1 + $0xe0] sm:$0xff]   ;;  %v530_v21 = vld [vmem:[%s681_s1 + $0xe8] sm:$0xff]  }
   0x7   :  { %v523_v14 = vld [vmem:[%s681_s1 + $0x18] sm:$0xff]   ;;  %v527_v18 = vld [vmem:[%s681_s1 + $0x20] sm:$0xff]   ;;  %v531_v22 = vld [vmem:[%s681_s1 + $0x28] sm:$0xff]  }
   0x8   :  { %468 = vmatpush3.bf16.msra.mxu0 %v515_v6  ;;  %v524_v15 = vld [vmem:[%s681_s1 + $0x98] sm:$0xff]   ;;  %v528_v19 = vld [vmem:[%s681_s1 + $0xa0] sm:$0xff]   ;;  %v532_v23 = vld [vmem:[%s681_s1 + $0xa8] sm:$0xff]  }
   0x9   :  { %490 = vmatpush3.bf16.msra.mxu1 %v516_v7  ;;  %469 = vmatprep.subr.bf16.mxu0 %v517_v8  ;;  %v533_v24 = vld [vmem:[%s681_s1 + $0x70] sm:$0xff]   ;;  %v537_v28 = vld [vmem:[%s681_s1 + $0x78] sm:$0xff]   ;;  %v455_v45 = vld [vmem:[%s683_s2] ss:$0 sm:$0xff] }
   0xa   :  { %491 = vmatprep.subr.bf16.mxu1 %v518_v9  ;;  %v534_v25 = vld [vmem:[%s681_s1 + $0xf0] sm:$0xff]   ;;  %v538_v29 = vld [vmem:[%s681_s1 + $0xf8] sm:$0xff]  }
   0xb   :  { %v535_v26 = vld [vmem:[%s681_s1 + $0x30] sm:$0xff]   ;;  %v539_v30 = vld [vmem:[%s681_s1 + $0x38] sm:$0xff]  }
   0xc   :  { %470 = vmatpush3.bf16.msra.mxu0 %v519_v10  ;;  %v536_v27 = vld [vmem:[%s681_s1 + $0xb0] sm:$0xff]   ;;  %v540_v31 = vld [vmem:[%s681_s1 + $0xb8] sm:$0xff]  }
   0xd   :  { %492 = vmatpush3.bf16.msra.mxu1 %v520_v11  ;;  %471 = vmatprep.subr.bf16.mxu0 %v521_v12  ;;  %v541_v32 = vld [vmem:[%s682_s0] ss:$16 sps:$4 sm:$0xff]   ;;  %v543_v33 = vld [vmem:[%s682_s0 + $0x4] ss:$16 sps:$4 sm:$0xff]   ;;  %v544_v34 = vld [vmem:[%s682_s0 + $0x8] ss:$16 sps:$4 sm:$0xff]  }
   0xe   :  { %493 = vmatprep.subr.bf16.mxu1 %v522_v13  ;;  %v546_v35 = vld [vmem:[%s682_s0 + $0xc] ss:$16 sps:$4 sm:$0xff]   ;;  %335 = vmatprep.mubr.bf16.mxu0 %v543_v33 }
   0xf   :  { %376 = vmatprep.mubr.bf16.mxu1 %v546_v35 }
  0x10   :  { %472 = vmatpush3.bf16.msra.mxu0 %v523_v14 }
  0x11   :  { %494 = vmatpush3.bf16.msra.mxu1 %v524_v15  ;;  %473 = vmatprep.subr.bf16.mxu0 %v525_v16 }
  0x12   :  { %495 = vmatprep.subr.bf16.mxu1 %v526_v17 }
  0x14   :  { %474 = vmatpush3.bf16.msra.mxu0 %v527_v18 }
  0x15   :  { %496 = vmatpush3.bf16.msra.mxu1 %v528_v19  ;;  %475 = vmatprep.subr.bf16.mxu0 %v529_v20 }
  0x16   :  { %497 = vmatprep.subr.bf16.mxu1 %v530_v21 }
  0x18   :  { %476 = vmatpush3.bf16.msra.mxu0 %v531_v22 }
  0x19   :  { %498 = vmatpush3.bf16.msra.mxu1 %v532_v23  ;;  %477 = vmatprep.subr.bf16.mxu0 %v533_v24 }
  0x1a   :  { %499 = vmatprep.subr.bf16.mxu1 %v534_v25 }
  0x1c   :  { %478 = vmatpush3.bf16.msra.mxu0 %v535_v26 }
  0x1d   :  { %500 = vmatpush3.bf16.msra.mxu1 %v536_v27  ;;  %479 = vmatprep.subr.bf16.mxu0 %v537_v28 }
  0x1e   :  { %501 = vmatprep.subr.bf16.mxu1 %v538_v29 }
  0x20   :  { %480 = vmatpush3.bf16.msra.mxu0 %v539_v30 }
  0x21   :  { %502 = vmatpush3.bf16.msra.mxu1 %v540_v31 }
  0x23   :  { %336 = vmatmul.mubr.bf16.vlgmr.msra.gmra.mrb[0].mxu0 %v541_v32 }
  0x24   :  { %377 = vmatmul.mubr.bf16.vlgmr.msra.gmra.mrb[0].mxu1 %v544_v34 }
  0xf6   :  { %v481_v36 = vpop.f32.mrb[0].mxu0 }
  0xf7   :  { %v503_v37 = vpop.f32.mrb[0].mxu1  ;;  %v482_v38 = vpop.f32.mrb[1].mxu0 }
  0xf8   :  { %v483_v39 = vadd.f32 %v482_v38, %v481_v36  ;;  %v504_v40 = vpop.f32.mrb[1].mxu1  ;;  %v484_v41 = vpop.f32.mrb[2].mxu0 }
  0xf9   :  { %v505_v42 = vadd.f32 %v504_v40, %v503_v37  ;;  %v506_v43 = vpop.f32.mrb[2].mxu1  ;;  %v485_v44 = vpop.f32.mrb[3].mxu0 }
  0xfa   :  { %v486_v46 = vadd.f32 %v485_v44, %v484_v41  ;;  %v507_v47 = vpop.f32.mrb[3].mxu1 }
  0xfb   :  { %v379_v48 = vadd.f32 %v505_v42, %v483_v39  ;;  %v508_v49 = vadd.f32 %v507_v47, %v506_v43 }
  0xfd   :  { %v401_v50 = vadd.f32 %v455_v45, %v379_v48  ;;  %v382_v51 = vadd.f32 %v508_v49, %v486_v46 }
  0xff   :  { %v402_v52 = vadd.f32 %v455_v45, %v382_v51  ;;  %v403_v53 = vmax.f32 %v401_v50, 0.0 }
 0x101   :  { %v404_v54 = vmax.f32 %v402_v52, 0.0 }
 0x103   :  { %v463_v55 = vpack.c.bf16 %v404_v54, %v403_v53 }
 0x105   :  { %464 = vst [vmem:[%s684_s3] sm:$0xff] %v463_v55  }

// kernel: netg_forward.68
= control target key start
LH: loop header
LB: loop body
LE: loop exit
PB: predicated region body
PF: predicated region fallthrough
CT: control target
= control target key end

     0   :  { %s739_s12 = smov 0   ;;  %s741_s13 = smov 0   ;;  %s827_s0 = inlined_call_operand.vmem [shape: bf16[16,640], index: 0, kind: input, shape index: {}]   ;;  %s828_s1 = inlined_call_operand.vmem [shape: bf16[640,128], index: 1, kind: input, shape index: {}]   ;;  %s829_s2 = inlined_call_operand.vmem [shape: f32[1,128], index: 2, kind: input, shape index: {}]   ;;  %s830_s3 = inlined_call_operand.vmem [shape: bf16[16,128], index: 3, kind: output, shape index: {}]  }
   0x1   :  { %s743_s14 = smov 0   ;;  %s745_s15 = smov 0  }
   0x2   :  { %s747_s16 = smov 0  }
   0x3 LB: > { %s25_s17 = sadd.s32 1, %s710_s15  ;;  %p48_p1 = scmp.ne.s32.totalorder %s702_s13, %s698_s12  ;;  %s714_s16 = sphi %s747_s16, %s13_s16   ;;  %s710_s15 = sphi %s745_s15, %s834_s15   ;;  %s706_s14 = sphi %s743_s14, %s833_s14   ;;  %s702_s13 = sphi %s741_s13, %s832_s13   ;;  %s698_s12 = sphi %s739_s12, %s831_s12  }
   0x4   : > { %p26_p0 = scmp.ge.s32.totalorder %s25_s17, 5  ;;  %p49_p2 = scmp.eq.s32.totalorder %s714_s16, 0 }
   0x5   : > { %s41_s19 = sadd.s32 1, %s702_s13  ;;  %p563_p5 = scmp.ge.s32.totalorder %s714_s16, 5 }
   0x6   : > { %s836_s17 = smov (%p26_p0, %s25_s17), 0  ;;  %p50_p3 = por %p49_p2, %p48_p1 }
   0x7   : > { %s37_s18 = ssub.s32 %s710_s15, %s836_s17  ;;  %162 = sbr.rel (%p563_p5) target bundleno = 21 (0x15), region = 20 }
   0x8   : > { %p39_p4 = scmp.eq.s32.totalorder %s37_s18, 0 }
   0xa   : > { %s774_s20 = scalar_select %p39_p4, %s702_s13, %s41_s19  }
   0xe   : > { %165 = sbr.rel (!%p50_p3) target bundleno = 21 (0x15), region = 24  ;;  %s167_s21 = sand.u32 (%p50_p3), 1, %s702_s13  }
   0xf   : > { %s565_s22 = sshll.u32 (%p50_p3), %s710_s15, 2  ;;  %s564_s23 = sshll.u32 (%p50_p3), %s167_s21, 3 }
  0x10   : > { %s174_s26 = scalar_lea.vmem (%p50_p3), %s827_s0, %s565_s22  ;;  %s169_s27 = scalar_lea.vmem (%p50_p3), [#allocation3], %s564_s23 }
  0x11   : > { %v190_v0 = vld [vmem:[%s174_s26] sm:$0xf] (%p50_p3)  ;;  %v192_v1 = vld [vmem:[%s174_s26 + $0x14] sm:$0xf] (%p50_p3) }
  0x12   : > { %191 = vst [vmem:[%s169_s27] sm:$0xf] (%p50_p3), %v190_v0  ;;  %193 = vst [vmem:[%s169_s27 + $0x4] sm:$0xf] (%p50_p3), %v192_v1 }
  0x15 PF: > { %p566_p6 = scmp.ge.s32.totalorder %s714_s16, 1  ;;  %p231_p7 = scmp.lt.s32.totalorder %s714_s16, 6 }
  0x17   : > { %p232_p8 = pnand %p566_p6, %p231_p7 }
  0x18   : > { %s238_s28 = sand.u32 (!%p232_p8), 1, %s698_s12   ;;  %s568_s29 = sshll.u32 (!%p232_p8), %s706_s14, 4 }
  0x19   : > { %235 = sbr.rel (%p232_p8) target bundleno = 303 (0x12f), region = 69  ;;  %s786_s30 = sshll.u32 (!%p232_p8), %s238_s28, 3 }
  0x1a   : > { %p277_p9 = scmp.lt.s32.totalorder (!%p232_p8), %s568_s29, 79  ;;  %s240_s8 = scalar_lea.vmem (!%p232_p8), [#allocation3], %s786_s30 }
  0x1b   : > { %p570_p10 = scmp.ne.s32.totalorder (!%p232_p8), %s706_s14, 0 }
  0x20   : > { %s838_s29 = smov (!%p277_p9, %s568_s29), 79  ;;  %301 = sbr.rel (%p570_p10) target bundleno = 39 (0x27), region = 77 }
  0x21   : > { %s569_s4 = sshll.u32 %s838_s29, 2  ;;  %v716_v2 = vmov (!%p570_p10), 0.0  }
  0x22   : > { %s791_s7 = scalar_lea.vmem %s828_s1, %s569_s4  ;;  %302 = vst [vmem:[#allocation2] sm:$0xff] (!%p570_p10), %v716_v2  ;;  %303 = vst [vmem:[#allocation2 + $0x8] sm:$0xff] (!%p570_p10), %v716_v2 }
  0x27 PF: > { %v667_v3 = vld [vmem:[%s791_s7] sm:$0xff]   ;;  %v717_v4 = vmov 0.0   ;;  %v668_v5 = vld [vmem:[%s791_s7 + $0x8] sm:$0xff]   ;;  %vm718_vm0 = vmmov 0   ;;  %v669_v6 = vld [vmem:[%s791_s7 + $0x10] sm:$0xff]   ;;  %p580_p11 = scmp.ne.s32.totalorder %s706_s14, 4 }
  0x28   : > { %604 = vmatprep.subr.bf16.mxu0 %v717_v4  ;;  %620 = vmatprep.mubr.msk.bf16.mxu0 %vm718_vm0, %v717_v4  ;;  %v670_v7 = vld [vmem:[%s791_s7 + $0x18] sm:$0xff]   ;;  %v671_v8 = vld [vmem:[%s791_s7 + $0x20] sm:$0xff]   ;;  %v672_v9 = vld [vmem:[%s791_s7 + $0x28] sm:$0xff]  }
  0x29   : > { %605 = vmatpush3.bf16.msra.mxu0 %v667_v3  ;;  %v673_v10 = vld [vmem:[%s791_s7 + $0x30] sm:$0xff]   ;;  %v674_v11 = vld [vmem:[%s791_s7 + $0x38] sm:$0xff]   ;;  %v304_v13 = vld [vmem:[#allocation2] sm:$0xff] }
  0x2a   : > { %606 = vmatprep.subr.bf16.mxu0 %v717_v4  ;;  %v675_v12 = vld [vmem:[%s240_s8] sm:$0xff]   ;;  %v305_v15 = vld [vmem:[#allocation2 + $0x8] sm:$0xff]  ;;  %v581_v23 = vld [vmem:[%s829_s2] ss:$0 sm:$0xff] (!%p580_p11) }
  0x2d   : > { %607 = vmatpush3.bf16.msra.mxu0 %v668_v5 }
  0x2e   : > { %608 = vmatprep.subr.bf16.mxu0 %v717_v4 }
  0x31   : > { %609 = vmatpush3.bf16.msra.mxu0 %v669_v6 }
  0x32   : > { %610 = vmatprep.subr.bf16.mxu0 %v717_v4 }
  0x35   : > { %611 = vmatpush3.bf16.msra.mxu0 %v670_v7 }
  0x36   : > { %612 = vmatprep.subr.bf16.mxu0 %v717_v4 }
  0x39   : > { %613 = vmatpush3.bf16.msra.mxu0 %v671_v8 }
  0x3a   : > { %614 = vmatprep.subr.bf16.mxu0 %v717_v4 }
  0x3d   : > { %615 = vmatpush3.bf16.msra.mxu0 %v672_v9 }
  0x3e   : > { %616 = vmatprep.subr.bf16.mxu0 %v717_v4 }
  0x41   : > { %617 = vmatpush3.bf16.msra.mxu0 %v673_v10 }
  0x42   : > { %618 = vmatprep.subr.bf16.mxu0 %v717_v4 }
  0x45   : > { %619 = vmatpush3.bf16.msra.mxu0 %v674_v11 }
  0x48   : > { %621 = vmatmul.mubr.bf16.vlgmr.msra.gmra.mrb[0].mxu0 %v675_v12 }
 0x11a   : > { %426 = sbr.rel (%p580_p11) target bundleno = 303 (0x12f), region = 81 }
 0x11b   : > { %v412_v14 = vpop.f32.mrb[0].mxu0 }
 0x11c   : > { %v419_v16 = vadd.f32 %v412_v14, %v304_v13  ;;  %v622_v17 = vpop.f32.mrb[1].mxu0 }
 0x11d   : > { %v415_v18 = vpop.f32.mrb[2].mxu0 }
 0x11e   : > { %421 = vst [vmem:[#allocation2] sm:$0xff] %v419_v16  ;;  %v420_v19 = vadd.f32 %v415_v18, %v305_v15  ;;  %v623_v20 = vpop.f32.mrb[3].mxu0 }
 0x120   : > { %422 = vst [vmem:[#allocation2 + $0x8] sm:$0xff] %v420_v19 }
 0x125   : > { %v427_v21 = vld [vmem:[#allocation2] sm:$0xff] }
 0x126   : > { %v436_v24 = vadd.f32 %v581_v23, %v427_v21 }
 0x127   : > { %v428_v22 = vld [vmem:[#allocation2 + $0x8] sm:$0xff] }
 0x128   : > { %v437_v25 = vadd.f32 %v581_v23, %v428_v22  ;;  %v438_v26 = vmax.f32 %v436_v24, 0.0 }
 0x12a   : > { %v439_v27 = vmax.f32 %v437_v25, 0.0 }
 0x12c   : > { %v593_v28 = vpack.c.bf16 %v439_v27, %v438_v26 }
 0x12e   : > { %594 = vst [vmem:[%s830_s3] sm:$0xff] %v593_v28  }
 0x12f PF: > { %s13_s16 = sadd.s32 1, %s714_s16   ;;  %s831_s12 = smov %s702_s13 }
 0x130   : > { %p10_p12 = scmp.ge.s32.totalorder %s13_s16, 7   ;;  %s832_s13 = smov %s774_s20 }
 0x131   : > { %s833_s14 = smov %s710_s15  ;;  %s834_s15 = smov %s836_s17 }
 0x132   :  { %12 = sbr.rel (!%p10_p12) target bundleno = 3 (0x3), region = 122 }

// kernel: netg_forward.69
= control target key start
LH: loop header
LB: loop body
LE: loop exit
PB: predicated region body
PF: predicated region fallthrough
CT: control target
= control target key end

     0   :  { %s831_s15 = smov 0   ;;  %s833_s16 = smov 0   ;;  %s922_s0 = inlined_call_operand.vmem [shape: bf16[16,640], index: 0, kind: input, shape index: {}]   ;;  %s923_s1 = inlined_call_operand.vmem [shape: bf16[640,128], index: 1, kind: input, shape index: {}]   ;;  %s924_s2 = inlined_call_operand.vmem [shape: f32[1,128], index: 2, kind: input, shape index: {}]   ;;  %s925_s3 = inlined_call_operand.vmem [shape: bf16[16,128], index: 3, kind: input, shape index: {}]   ;;  %s926_s4 = inlined_call_operand.vmem [shape: bf16[16,128], index: 4, kind: output, shape index: {}]  }
   0x1   :  { %s835_s17 = smov 0   ;;  %s837_s18 = smov 0  }
   0x2   :  { %s839_s19 = smov 0  }
   0x3 LB: > { %s26_s20 = sadd.s32 1, %s797_s18  ;;  %p49_p1 = scmp.ne.s32.totalorder %s789_s16, %s785_s15  ;;  %s801_s19 = sphi %s839_s19, %s14_s19   ;;  %s797_s18 = sphi %s837_s18, %s930_s18   ;;  %s793_s17 = sphi %s835_s17, %s929_s17   ;;  %s789_s16 = sphi %s833_s16, %s928_s16   ;;  %s785_s15 = sphi %s831_s15, %s927_s15  }
   0x4   : > { %p27_p0 = scmp.ge.s32.totalorder %s26_s20, 5  ;;  %p50_p2 = scmp.eq.s32.totalorder %s801_s19, 0 }
   0x5   : > { %s42_s22 = sadd.s32 1, %s789_s16  ;;  %p646_p5 = scmp.ge.s32.totalorder %s801_s19, 5 }
   0x6   : > { %s932_s20 = smov (%p27_p0, %s26_s20), 0  ;;  %p51_p3 = por %p50_p2, %p49_p1 }
   0x7   : > { %s38_s21 = ssub.s32 %s797_s18, %s932_s20  ;;  %203 = sbr.rel (%p646_p5) target bundleno = 21 (0x15), region = 24 }
   0x8   : > { %p40_p4 = scmp.eq.s32.totalorder %s38_s21, 0 }
   0xa   : > { %s866_s23 = scalar_select %p40_p4, %s789_s16, %s42_s22  }
   0xe   : > { %206 = sbr.rel (!%p51_p3) target bundleno = 21 (0x15), region = 28  ;;  %s208_s24 = sand.u32 (%p51_p3), 1, %s789_s16  }
   0xf   : > { %s648_s25 = sshll.u32 (%p51_p3), %s797_s18, 2  ;;  %s647_s26 = sshll.u32 (%p51_p3), %s208_s24, 3 }
  0x10   : > { %s215_s29 = scalar_lea.vmem (%p51_p3), %s922_s0, %s648_s25  ;;  %s210_s30 = scalar_lea.vmem (%p51_p3), [#allocation3], %s647_s26 }
  0x11   : > { %v231_v0 = vld [vmem:[%s215_s29] sm:$0xf] (%p51_p3)  ;;  %v233_v1 = vld [vmem:[%s215_s29 + $0x14] sm:$0xf] (%p51_p3) }
  0x12   : > { %232 = vst [vmem:[%s210_s30] sm:$0xf] (%p51_p3), %v231_v0  ;;  %234 = vst [vmem:[%s210_s30 + $0x4] sm:$0xf] (%p51_p3), %v233_v1 }
  0x15 PF: > { %p649_p6 = scmp.ge.s32.totalorder %s801_s19, 1  ;;  %p272_p7 = scmp.lt.s32.totalorder %s801_s19, 6 }
  0x17   : > { %p273_p8 = pnand %p649_p6, %p272_p7 }
  0x18   : > { %s279_s5 = sand.u32 (!%p273_p8), 1, %s785_s15   ;;  %s651_s6 = sshll.u32 (!%p273_p8), %s793_s17, 4 }
  0x19   : > { %276 = sbr.rel (%p273_p8) target bundleno = 303 (0x12f), region = 73  ;;  %s878_s7 = sshll.u32 (!%p273_p8), %s279_s5, 3 }
  0x1a   : > { %p328_p9 = scmp.lt.s32.totalorder (!%p273_p8), %s651_s6, 79  ;;  %s281_s12 = scalar_lea.vmem (!%p273_p8), [#allocation3], %s878_s7 }
  0x1b   : > { %p653_p10 = scmp.ne.s32.totalorder (!%p273_p8), %s793_s17, 0 }
  0x20   : > { %s934_s6 = smov (!%p328_p9, %s651_s6), 79  ;;  %361 = sbr.rel (%p653_p10) target bundleno = 39 (0x27), region = 81 }
  0x21   : > { %s652_s8 = sshll.u32 %s934_s6, 2  ;;  %v803_v2 = vmov (!%p653_p10), 0.0  }
  0x22   : > { %s883_s11 = scalar_lea.vmem %s923_s1, %s652_s8  ;;  %362 = vst [vmem:[#allocation2] sm:$0xff] (!%p653_p10), %v803_v2  ;;  %363 = vst [vmem:[#allocation2 + $0x8] sm:$0xff] (!%p653_p10), %v803_v2 }
  0x27 PF: > { %v754_v3 = vld [vmem:[%s883_s11] sm:$0xff]   ;;  %v804_v4 = vmov 0.0   ;;  %v755_v5 = vld [vmem:[%s883_s11 + $0x8] sm:$0xff]   ;;  %vm805_vm0 = vmmov 0   ;;  %v756_v6 = vld [vmem:[%s883_s11 + $0x10] sm:$0xff]   ;;  %p663_p11 = scmp.ne.s32.totalorder %s793_s17, 4 }
  0x28   : > { %691 = vmatprep.subr.bf16.mxu0 %v804_v4  ;;  %707 = vmatprep.mubr.msk.bf16.mxu0 %vm805_vm0, %v804_v4  ;;  %v757_v7 = vld [vmem:[%s883_s11 + $0x18] sm:$0xff]   ;;  %v758_v8 = vld [vmem:[%s883_s11 + $0x20] sm:$0xff]   ;;  %v759_v9 = vld [vmem:[%s883_s11 + $0x28] sm:$0xff]  }
  0x29   : > { %692 = vmatpush3.bf16.msra.mxu0 %v754_v3  ;;  %v760_v10 = vld [vmem:[%s883_s11 + $0x30] sm:$0xff]   ;;  %v761_v11 = vld [vmem:[%s883_s11 + $0x38] sm:$0xff]   ;;  %v364_v13 = vld [vmem:[#allocation2] sm:$0xff] }
  0x2a   : > { %693 = vmatprep.subr.bf16.mxu0 %v804_v4  ;;  %v762_v12 = vld [vmem:[%s281_s12] sm:$0xff]   ;;  %v365_v15 = vld [vmem:[#allocation2 + $0x8] sm:$0xff]  ;;  %v664_v23 = vld [vmem:[%s924_s2] ss:$0 sm:$0xff] (!%p663_p11) }
  0x2b   : > { %v674_v26 = vld [vmem:[%s925_s3] sm:$0xff] (!%p663_p11)  }
  0x2c   : > { %v675_v27 = vunpack.c.l.bf16 (!%p663_p11), %v674_v26  ;;  %v676_v28 = vunpack.c.h.bf16 (!%p663_p11), %v674_v26 }
  0x2d   : > { %694 = vmatpush3.bf16.msra.mxu0 %v755_v5 }
  0x2e   : > { %695 = vmatprep.subr.bf16.mxu0 %v804_v4 }
  0x31   : > { %696 = vmatpush3.bf16.msra.mxu0 %v756_v6 }
  0x32   : > { %697 = vmatprep.subr.bf16.mxu0 %v804_v4 }
  0x35   : > { %698 = vmatpush3.bf16.msra.mxu0 %v757_v7 }
  0x36   : > { %699 = vmatprep.subr.bf16.mxu0 %v804_v4 }
  0x39   : > { %700 = vmatpush3.bf16.msra.mxu0 %v758_v8 }
  0x3a   : > { %701 = vmatprep.subr.bf16.mxu0 %v804_v4 }
  0x3d   : > { %702 = vmatpush3.bf16.msra.mxu0 %v759_v9 }
  0x3e   : > { %703 = vmatprep.subr.bf16.mxu0 %v804_v4 }
  0x41   : > { %704 = vmatpush3.bf16.msra.mxu0 %v760_v10 }
  0x42   : > { %705 = vmatprep.subr.bf16.mxu0 %v804_v4 }
  0x45   : > { %706 = vmatpush3.bf16.msra.mxu0 %v761_v11 }
  0x48   : > { %708 = vmatmul.mubr.bf16.vlgmr.msra.gmra.mrb[0].mxu0 %v762_v12 }
 0x11a   : > { %486 = sbr.rel (%p663_p11) target bundleno = 303 (0x12f), region = 85 }
 0x11b   : > { %v472_v14 = vpop.f32.mrb[0].mxu0 }
 0x11c   : > { %v479_v16 = vadd.f32 %v472_v14, %v364_v13  ;;  %v709_v17 = vpop.f32.mrb[1].mxu0 }
 0x11d   : > { %v475_v18 = vpop.f32.mrb[2].mxu0 }
 0x11e   : > { %481 = vst [vmem:[#allocation2] sm:$0xff] %v479_v16  ;;  %v480_v19 = vadd.f32 %v475_v18, %v365_v15  ;;  %v710_v20 = vpop.f32.mrb[3].mxu0 }
 0x120   : > { %482 = vst [vmem:[#allocation2 + $0x8] sm:$0xff] %v480_v19 }
 0x125   : > { %v487_v21 = vld [vmem:[#allocation2] sm:$0xff] }
 0x126   : > { %v496_v24 = vadd.f32 %v664_v23, %v487_v21 }
 0x127   : > { %v488_v22 = vld [vmem:[#allocation2 + $0x8] sm:$0xff] }
 0x128   : > { %v497_v25 = vadd.f32 %v664_v23, %v488_v22  ;;  %v502_v29 = vadd.f32 %v675_v27, %v496_v24 }
 0x12a   : > { %v503_v30 = vadd.f32 %v676_v28, %v497_v25 }
 0x12c   : > { %v680_v31 = vpack.c.bf16 %v503_v30, %v502_v29 }
 0x12e   : > { %681 = vst [vmem:[%s926_s4] sm:$0xff] %v680_v31  }
 0x12f PF: > { %s14_s19 = sadd.s32 1, %s801_s19   ;;  %s927_s15 = smov %s789_s16 }
 0x130   : > { %p11_p12 = scmp.ge.s32.totalorder %s14_s19, 7   ;;  %s928_s16 = smov %s866_s23 }
 0x131   : > { %s929_s17 = smov %s797_s18  ;;  %s930_s18 = smov %s932_s20 }
 0x132   :  { %13 = sbr.rel (!%p11_p12) target bundleno = 3 (0x3), region = 129 }

// kernel: netg_forward.70
= control target key start
LH: loop header
LB: loop body
LE: loop exit
PB: predicated region body
PF: predicated region fallthrough
CT: control target
= control target key end

     0   :  { %s1040_s12 = smov 0   ;;  %s1042_s13 = smov 0   ;;  %s1153_s0 = inlined_call_operand.vmem [shape: bf16[16,1024], index: 0, kind: input, shape index: {}]   ;;  %s1154_s1 = inlined_call_operand.vmem [shape: bf16[1024,128], index: 1, kind: input, shape index: {}]   ;;  %s1155_s2 = inlined_call_operand.vmem [shape: f32[1,128], index: 2, kind: input, shape index: {}]   ;;  %s1156_s3 = inlined_call_operand.vmem [shape: bf16[16,128], index: 3, kind: output, shape index: {}]  }
   0x1   :  { %s1044_s14 = smov 0   ;;  %s1046_s15 = smov 0  }
   0x2   :  { %s1048_s16 = smov 0  }
   0x3 LB: > { %s25_s17 = sadd.s32 1, %s1013_s15  ;;  %p48_p1 = scmp.ne.s32.totalorder %s1005_s13, %s1001_s12  ;;  %s1017_s16 = sphi %s1048_s16, %s13_s16   ;;  %s1013_s15 = sphi %s1046_s15, %s1160_s15   ;;  %s1009_s14 = sphi %s1044_s14, %s1159_s14   ;;  %s1005_s13 = sphi %s1042_s13, %s1158_s13   ;;  %s1001_s12 = sphi %s1040_s12, %s1157_s12  }
   0x4   : > { %p26_p0 = scmp.ge.s32.totalorder %s25_s17, 2  ;;  %p49_p2 = scmp.eq.s32.totalorder %s1017_s16, 0 }
   0x5   : > { %s41_s19 = sadd.s32 1, %s1005_s13  ;;  %p795_p5 = scmp.ge.s32.totalorder %s1017_s16, 2 }
   0x6   : > { %s1162_s17 = smov (%p26_p0, %s25_s17), 0  ;;  %p50_p3 = por %p49_p2, %p48_p1 }
   0x7   : > { %s37_s18 = ssub.s32 %s1013_s15, %s1162_s17  ;;  %162 = sbr.rel (%p795_p5) target bundleno = 21 (0x15), region = 20 }
   0x8   : > { %p39_p4 = scmp.eq.s32.totalorder %s37_s18, 0 }
   0xa   : > { %s1075_s20 = scalar_select %p39_p4, %s1005_s13, %s41_s19  }
   0xe   : > { %165 = sbr.rel (!%p50_p3) target bundleno = 21 (0x15), region = 24  ;;  %s167_s21 = sand.u32 (%p50_p3), 1, %s1005_s13  }
   0xf   : > { %s848_s22 = sshll.u32 (%p50_p3), %s1013_s15, 4  ;;  %s796_s23 = sshll.u32 (%p50_p3), %s167_s21, 5 }
  0x10   : > { %s175_s26 = scalar_lea.vmem (%p50_p3), %s1153_s0, %s848_s22  ;;  %s169_s27 = scalar_lea.vmem (%p50_p3), [#allocation3], %s796_s23 }
  0x11   : > { %v188_v0 = vld [vmem:[%s175_s26] sm:$0xff] (%p50_p3)  ;;  %v190_v1 = vld [vmem:[%s175_s26 + $0x8] sm:$0xff] (%p50_p3) }
  0x12   : > { %v192_v2 = vld [vmem:[%s175_s26 + $0x20] sm:$0xff] (%p50_p3)  ;;  %189 = vst [vmem:[%s169_s27] sm:$0xff] (%p50_p3), %v188_v0  ;;  %191 = vst [vmem:[%s169_s27 + $0x8] sm:$0xff] (%p50_p3), %v190_v1  ;;  %v194_v3 = vld [vmem:[%s175_s26 + $0x28] sm:$0xff] (%p50_p3) }
  0x13   : > { %193 = vst [vmem:[%s169_s27 + $0x10] sm:$0xff] (%p50_p3), %v192_v2  ;;  %195 = vst [vmem:[%s169_s27 + $0x18] sm:$0xff] (%p50_p3), %v194_v3 }
  0x15 PF: > { %p799_p6 = scmp.ge.s32.totalorder %s1017_s16, 1  ;;  %p212_p7 = scmp.lt.s32.totalorder %s1017_s16, 3 }
  0x17   : > { %p213_p8 = pnand %p799_p6, %p212_p7 }
  0x18   : > { %s219_s28 = sand.u32 (!%p213_p8), 1, %s1001_s12   ;;  %s801_s29 = sshll.u32 (!%p213_p8), %s1009_s14, 6 }
  0x19   : > { %216 = sbr.rel (%p213_p8) target bundleno = 310 (0x136), region = 51  ;;  %s800_s30 = sshll.u32 (!%p213_p8), %s219_s28, 5 }
  0x1a   : > { %p259_p9 = scmp.lt.s32.totalorder (!%p213_p8), %s801_s29, 127  ;;  %s1092_s8 = scalar_lea.vmem (!%p213_p8), [#allocation3], %s800_s30 }
  0x1b   : > { %p803_p10 = scmp.ne.s32.totalorder (!%p213_p8), %s1009_s14, 0 }
  0x20   : > { %s1164_s29 = smov (!%p259_p9, %s801_s29), 127  ;;  %283 = sbr.rel (%p803_p10) target bundleno = 39 (0x27), region = 59 }
  0x21   : > { %s802_s4 = sshll.u32 %s1164_s29, 2  ;;  %v1019_v4 = vmov (!%p803_p10), 0.0  }
  0x22   : > { %s1090_s7 = scalar_lea.vmem %s1154_s1, %s802_s4  ;;  %284 = vst [vmem:[#allocation2] sm:$0xff] (!%p803_p10), %v1019_v4  ;;  %285 = vst [vmem:[#allocation2 + $0x8] sm:$0xff] (!%p803_p10), %v1019_v4 }
  0x27 PF: > { %v941_v5 = vld [vmem:[%s1090_s7 + $0x40] sm:$0xff]   ;;  %v945_v9 = vld [vmem:[%s1090_s7 + $0x48] sm:$0xff]   ;;  %v949_v13 = vld [vmem:[%s1090_s7 + $0x50] sm:$0xff]   ;;  %p840_p11 = scmp.ne.s32.totalorder %s1009_s14, 1 }
  0x28   : > { %v942_v6 = vld [vmem:[%s1090_s7 + $0xc0] sm:$0xff]   ;;  %856 = vmatprep.subr.bf16.mxu0 %v941_v5  ;;  %v946_v10 = vld [vmem:[%s1090_s7 + $0xc8] sm:$0xff]   ;;  %v950_v14 = vld [vmem:[%s1090_s7 + $0xd0] sm:$0xff]  }
  0x29   : > { %v943_v7 = vld [vmem:[%s1090_s7] sm:$0xff]   ;;  %878 = vmatprep.subr.bf16.mxu1 %v942_v6  ;;  %v947_v11 = vld [vmem:[%s1090_s7 + $0x8] sm:$0xff]   ;;  %v951_v15 = vld [vmem:[%s1090_s7 + $0x10] sm:$0xff]  }
  0x2a   : > { %v944_v8 = vld [vmem:[%s1090_s7 + $0x80] sm:$0xff]   ;;  %857 = vmatpush3.bf16.msra.mxu0 %v943_v7  ;;  %v948_v12 = vld [vmem:[%s1090_s7 + $0x88] sm:$0xff]   ;;  %v952_v16 = vld [vmem:[%s1090_s7 + $0x90] sm:$0xff]  }
  0x2b   : > { %879 = vmatpush3.bf16.msra.mxu1 %v944_v8  ;;  %858 = vmatprep.subr.bf16.mxu0 %v945_v9  ;;  %v953_v17 = vld [vmem:[%s1090_s7 + $0x58] sm:$0xff]   ;;  %v957_v21 = vld [vmem:[%s1090_s7 + $0x60] sm:$0xff]   ;;  %v961_v25 = vld [vmem:[%s1090_s7 + $0x68] sm:$0xff]  }
  0x2c   : > { %880 = vmatprep.subr.bf16.mxu1 %v946_v10  ;;  %v954_v18 = vld [vmem:[%s1090_s7 + $0xd8] sm:$0xff]   ;;  %v958_v22 = vld [vmem:[%s1090_s7 + $0xe0] sm:$0xff]   ;;  %v962_v26 = vld [vmem:[%s1090_s7 + $0xe8] sm:$0xff]  }
  0x2d   : > { %v955_v19 = vld [vmem:[%s1090_s7 + $0x18] sm:$0xff]   ;;  %v959_v23 = vld [vmem:[%s1090_s7 + $0x20] sm:$0xff]   ;;  %v963_v27 = vld [vmem:[%s1090_s7 + $0x28] sm:$0xff]  }
  0x2e   : > { %859 = vmatpush3.bf16.msra.mxu0 %v947_v11  ;;  %v956_v20 = vld [vmem:[%s1090_s7 + $0x98] sm:$0xff]   ;;  %v960_v24 = vld [vmem:[%s1090_s7 + $0xa0] sm:$0xff]   ;;  %v964_v28 = vld [vmem:[%s1090_s7 + $0xa8] sm:$0xff]  }
  0x2f   : > { %881 = vmatpush3.bf16.msra.mxu1 %v948_v12  ;;  %860 = vmatprep.subr.bf16.mxu0 %v949_v13  ;;  %v965_v29 = vld [vmem:[%s1090_s7 + $0x70] sm:$0xff]   ;;  %v969_v33 = vld [vmem:[%s1090_s7 + $0x78] sm:$0xff]   ;;  %v286_v50 = vld [vmem:[#allocation2] sm:$0xff] }
  0x30   : > { %882 = vmatprep.subr.bf16.mxu1 %v950_v14  ;;  %v966_v30 = vld [vmem:[%s1090_s7 + $0xf0] sm:$0xff]   ;;  %v970_v34 = vld [vmem:[%s1090_s7 + $0xf8] sm:$0xff]   ;;  %v287_v55 = vld [vmem:[#allocation2 + $0x8] sm:$0xff] }
  0x31   : > { %v967_v31 = vld [vmem:[%s1090_s7 + $0x30] sm:$0xff]   ;;  %v971_v35 = vld [vmem:[%s1090_s7 + $0x38] sm:$0xff]   ;;  %v841_v61 = vld [vmem:[%s1155_s2] ss:$0 sm:$0xff] (!%p840_p11) }
  0x32   : > { %861 = vmatpush3.bf16.msra.mxu0 %v951_v15  ;;  %v968_v32 = vld [vmem:[%s1090_s7 + $0xb0] sm:$0xff]   ;;  %v972_v36 = vld [vmem:[%s1090_s7 + $0xb8] sm:$0xff]  }
  0x33   : > { %883 = vmatpush3.bf16.msra.mxu1 %v952_v16  ;;  %862 = vmatprep.subr.bf16.mxu0 %v953_v17  ;;  %v973_v37 = vld [vmem:[%s1092_s8] ss:$16 sps:$4 sm:$0xff]   ;;  %v975_v38 = vld [vmem:[%s1092_s8 + $0x4] ss:$16 sps:$4 sm:$0xff]   ;;  %v976_v39 = vld [vmem:[%s1092_s8 + $0x8] ss:$16 sps:$4 sm:$0xff]  }
  0x34   : > { %884 = vmatprep.subr.bf16.mxu1 %v954_v18  ;;  %v978_v40 = vld [vmem:[%s1092_s8 + $0xc] ss:$16 sps:$4 sm:$0xff]   ;;  %600 = vmatprep.mubr.bf16.mxu0 %v975_v38 }
  0x35   : > { %641 = vmatprep.mubr.bf16.mxu1 %v978_v40 }
  0x36   : > { %863 = vmatpush3.bf16.msra.mxu0 %v955_v19 }
  0x37   : > { %885 = vmatpush3.bf16.msra.mxu1 %v956_v20  ;;  %864 = vmatprep.subr.bf16.mxu0 %v957_v21 }
  0x38   : > { %886 = vmatprep.subr.bf16.mxu1 %v958_v22 }
  0x3a   : > { %865 = vmatpush3.bf16.msra.mxu0 %v959_v23 }
  0x3b   : > { %887 = vmatpush3.bf16.msra.mxu1 %v960_v24  ;;  %866 = vmatprep.subr.bf16.mxu0 %v961_v25 }
  0x3c   : > { %888 = vmatprep.subr.bf16.mxu1 %v962_v26 }
  0x3e   : > { %867 = vmatpush3.bf16.msra.mxu0 %v963_v27 }
  0x3f   : > { %889 = vmatpush3.bf16.msra.mxu1 %v964_v28  ;;  %868 = vmatprep.subr.bf16.mxu0 %v965_v29 }
  0x40   : > { %890 = vmatprep.subr.bf16.mxu1 %v966_v30 }
  0x42   : > { %869 = vmatpush3.bf16.msra.mxu0 %v967_v31 }
  0x43   : > { %891 = vmatpush3.bf16.msra.mxu1 %v968_v32  ;;  %870 = vmatprep.subr.bf16.mxu0 %v969_v33 }
  0x44   : > { %892 = vmatprep.subr.bf16.mxu1 %v970_v34 }
  0x46   : > { %871 = vmatpush3.bf16.msra.mxu0 %v971_v35 }
  0x47   : > { %893 = vmatpush3.bf16.msra.mxu1 %v972_v36 }
  0x49   : > { %601 = vmatmul.mubr.bf16.vlgmr.msra.gmra.mrb[0].mxu0 %v973_v37 }
  0x4a   : > { %642 = vmatmul.mubr.bf16.vlgmr.msra.gmra.mrb[0].mxu1 %v976_v39 }
 0x11c   : > { %v872_v41 = vpop.f32.mrb[0].mxu0 }
 0x11d   : > { %v894_v42 = vpop.f32.mrb[0].mxu1  ;;  %v873_v43 = vpop.f32.mrb[1].mxu0 }
 0x11e   : > { %v874_v44 = vadd.f32 %v873_v43, %v872_v41  ;;  %v895_v45 = vpop.f32.mrb[1].mxu1  ;;  %v875_v46 = vpop.f32.mrb[2].mxu0 }
 0x11f   : > { %v896_v47 = vadd.f32 %v895_v45, %v894_v42  ;;  %v897_v48 = vpop.f32.mrb[2].mxu1  ;;  %v876_v49 = vpop.f32.mrb[3].mxu0 }
 0x120   : > { %v877_v51 = vadd.f32 %v876_v49, %v875_v46  ;;  %v898_v52 = vpop.f32.mrb[3].mxu1 }
 0x121   : > { %v644_v53 = vadd.f32 %v896_v47, %v874_v44  ;;  %v899_v54 = vadd.f32 %v898_v52, %v897_v48  ;;  %657 = sbr.rel (%p840_p11) target bundleno = 310 (0x136), region = 63 }
 0x123   : > { %v650_v56 = vadd.f32 %v644_v53, %v286_v50  ;;  %v647_v57 = vadd.f32 %v899_v54, %v877_v51 }
 0x125   : > { %652 = vst [vmem:[#allocation2] sm:$0xff] %v650_v56  ;;  %v651_v58 = vadd.f32 %v647_v57, %v287_v55 }
 0x127   : > { %653 = vst [vmem:[#allocation2 + $0x8] sm:$0xff] %v651_v58 }
 0x12c   : > { %v658_v59 = vld [vmem:[#allocation2] sm:$0xff] }
 0x12d   : > { %v667_v62 = vadd.f32 %v841_v61, %v658_v59 }
 0x12e   : > { %v659_v60 = vld [vmem:[#allocation2 + $0x8] sm:$0xff] }
 0x12f   : > { %v668_v63 = vadd.f32 %v841_v61, %v659_v60  ;;  %v669_v0 = vmax.f32 %v667_v62, 0.0 }
 0x131   : > { %v670_v1 = vmax.f32 %v668_v63, 0.0 }
 0x133   : > { %v854_v2 = vpack.c.bf16 %v670_v1, %v669_v0 }
 0x135   : > { %855 = vst [vmem:[%s1156_s3] sm:$0xff] %v854_v2  }
 0x136 PF: > { %s13_s16 = sadd.s32 1, %s1017_s16   ;;  %s1157_s12 = smov %s1005_s13 }
 0x137   : > { %p10_p12 = scmp.ge.s32.totalorder %s13_s16, 4   ;;  %s1158_s13 = smov %s1075_s20 }
 0x138   : > { %s1159_s14 = smov %s1013_s15  ;;  %s1160_s15 = smov %s1162_s17 }
 0x139   :  { %12 = sbr.rel (!%p10_p12) target bundleno = 3 (0x3), region = 104 }

// kernel: netg_forward.71
= control target key start
LH: loop header
LB: loop body
LE: loop exit
PB: predicated region body
PF: predicated region fallthrough
CT: control target
= control target key end

     0   :  { %s979_s12 = smov 0   ;;  %s981_s13 = smov 0   ;;  %s1083_s0 = inlined_call_operand.vmem [shape: bf16[16,1152], index: 0, kind: input, shape index: {}]   ;;  %s1084_s1 = inlined_call_operand.vmem [shape: bf16[1152,128], index: 1, kind: input, shape index: {}]   ;;  %s1085_s2 = inlined_call_operand.vmem [shape: f32[1,128], index: 2, kind: input, shape index: {}]   ;;  %s1086_s3 = inlined_call_operand.vmem [shape: bf16[16,128], index: 3, kind: output, shape index: {}]  }
   0x1   :  { %s983_s14 = smov 0   ;;  %s985_s15 = smov 0  }
   0x2   :  { %s987_s16 = smov 0  }
   0x3 LB: > { %s25_s17 = sadd.s32 1, %s950_s15  ;;  %p48_p1 = scmp.ne.s32.totalorder %s942_s13, %s938_s12  ;;  %s954_s16 = sphi %s987_s16, %s13_s16   ;;  %s950_s15 = sphi %s985_s15, %s1090_s15   ;;  %s946_s14 = sphi %s983_s14, %s1089_s14   ;;  %s942_s13 = sphi %s981_s13, %s1088_s13   ;;  %s938_s12 = sphi %s979_s12, %s1087_s12  }
   0x4   : > { %p26_p0 = scmp.ge.s32.totalorder %s25_s17, 3  ;;  %p49_p2 = scmp.eq.s32.totalorder %s954_s16, 0 }
   0x5   : > { %s41_s19 = sadd.s32 1, %s942_s13  ;;  %p740_p5 = scmp.ge.s32.totalorder %s954_s16, 3 }
   0x6   : > { %s1092_s17 = smov (%p26_p0, %s25_s17), 0  ;;  %p50_p3 = por %p49_p2, %p48_p1 }
   0x7   : > { %s37_s18 = ssub.s32 %s950_s15, %s1092_s17  ;;  %162 = sbr.rel (%p740_p5) target bundleno = 21 (0x15), region = 20 }
   0x8   : > { %p39_p4 = scmp.eq.s32.totalorder %s37_s18, 0 }
   0xa   : > { %s1014_s20 = scalar_select %p39_p4, %s942_s13, %s41_s19  }
   0xe   : > { %165 = sbr.rel (!%p50_p3) target bundleno = 21 (0x15), region = 24  ;;  %s167_s21 = sand.u32 (%p50_p3), 1, %s942_s13  }
   0xf   : > { %s784_s22 = smul.u32 (%p50_p3), 12, %s950_s15 }
  0x10   : > { %s843_s23 = smul.u32 (%p50_p3), 24, %s167_s21 }
  0x11   : > { %s175_s26 = scalar_lea.vmem (%p50_p3), %s1083_s0, %s784_s22 }
  0x12   : > { %v190_v0 = vld [vmem:[%s175_s26] sm:$0xff] (%p50_p3)  ;;  %v742_v2 = vld [vmem:[%s175_s26 + $0x8] sm:$0xf] (%p50_p3)  ;;  %s169_s27 = scalar_lea.vmem (%p50_p3), [#allocation3], %s843_s23  ;;  %v744_v3 = vld [vmem:[%s175_s26 + $0x2c] sm:$0xf] (%p50_p3) }
  0x13   : > { %v192_v1 = vld [vmem:[%s175_s26 + $0x24] sm:$0xff] (%p50_p3)  ;;  %191 = vst [vmem:[%s169_s27] sm:$0xff] (%p50_p3), %v190_v0  ;;  %743 = vst [vmem:[%s169_s27 + $0x8] sm:$0xf] (%p50_p3), %v742_v2 }
  0x14   : > { %193 = vst [vmem:[%s169_s27 + $0xc] sm:$0xff] (%p50_p3), %v192_v1  ;;  %745 = vst [vmem:[%s169_s27 + $0x14] sm:$0xf] (%p50_p3), %v744_v3 }
  0x15 PF: > { %p746_p6 = scmp.ge.s32.totalorder %s954_s16, 1  ;;  %p221_p7 = scmp.lt.s32.totalorder %s954_s16, 4 }
  0x17   : > { %p222_p8 = pnand %p746_p6, %p221_p7 }
  0x18   : > { %s228_s28 = sand.u32 (!%p222_p8), 1, %s938_s12   ;;  %s267_s29 = smul.u32 (!%p222_p8), 48, %s946_s14 }
  0x19   : > { %225 = sbr.rel (%p222_p8) target bundleno = 308 (0x134), region = 54  ;;  %p748_p10 = scmp.ne.s32.totalorder (!%p222_p8), %s946_s14, 0 }
  0x1a   : > { %s844_s30 = smul.u32 (!%p222_p8), 24, %s228_s28  ;;  %p268_p9 = scmp.lt.s32.totalorder (!%p222_p8), %s267_s29, 143 }
  0x1c   : > { %s1031_s8 = scalar_lea.vmem (!%p222_p8), [#allocation3], %s844_s30 }
  0x20   : > { %s1094_s29 = smov (!%p268_p9, %s267_s29), 143  ;;  %292 = sbr.rel (%p748_p10) target bundleno = 39 (0x27), region = 62 }
  0x21   : > { %s747_s4 = sshll.u32 %s1094_s29, 2  ;;  %v956_v4 = vmov (!%p748_p10), 0.0  }
  0x22   : > { %s1029_s7 = scalar_lea.vmem %s1084_s1, %s747_s4  ;;  %293 = vst [vmem:[#allocation2] sm:$0xff] (!%p748_p10), %v956_v4  ;;  %294 = vst [vmem:[#allocation2 + $0x8] sm:$0xff] (!%p748_p10), %v956_v4 }
  0x27 PF: > { %v888_v5 = vld [vmem:[%s1029_s7 + $0x40] sm:$0xff]   ;;  %v957_v6 = vmov 0.0   ;;  %vm958_vm0 = vmmov 0   ;;  %v891_v9 = vld [vmem:[%s1029_s7 + $0x48] sm:$0xff]   ;;  %v894_v12 = vld [vmem:[%s1029_s7 + $0x50] sm:$0xff]   ;;  %p776_p11 = scmp.ne.s32.totalorder %s946_s14, 2 }
  0x28   : > { %823 = vmatprep.subr.bf16.mxu1 %v957_v6  ;;  %v889_v7 = vld [vmem:[%s1029_s7] sm:$0xff]   ;;  %792 = vmatprep.subr.bf16.mxu0 %v888_v5  ;;  %v892_v10 = vld [vmem:[%s1029_s7 + $0x8] sm:$0xff]   ;;  %v895_v13 = vld [vmem:[%s1029_s7 + $0x10] sm:$0xff]  }
  0x29   : > { %v890_v8 = vld [vmem:[%s1029_s7 + $0x80] sm:$0xff]   ;;  %839 = vmatprep.mubr.msk.bf16.mxu1 %vm958_vm0, %v957_v6  ;;  %793 = vmatpush3.bf16.msra.mxu0 %v889_v7  ;;  %v893_v11 = vld [vmem:[%s1029_s7 + $0x88] sm:$0xff]   ;;  %v896_v14 = vld [vmem:[%s1029_s7 + $0x90] sm:$0xff]  }
  0x2a   : > { %824 = vmatpush3.bf16.msra.mxu1 %v890_v8  ;;  %794 = vmatprep.subr.bf16.mxu0 %v891_v9  ;;  %v897_v15 = vld [vmem:[%s1029_s7 + $0x58] sm:$0xff]   ;;  %v900_v18 = vld [vmem:[%s1029_s7 + $0x60] sm:$0xff]   ;;  %v903_v21 = vld [vmem:[%s1029_s7 + $0x68] sm:$0xff]  }
  0x2b   : > { %825 = vmatprep.subr.bf16.mxu1 %v957_v6  ;;  %v898_v16 = vld [vmem:[%s1029_s7 + $0x18] sm:$0xff]   ;;  %v901_v19 = vld [vmem:[%s1029_s7 + $0x20] sm:$0xff]   ;;  %v904_v22 = vld [vmem:[%s1029_s7 + $0x28] sm:$0xff]  }
  0x2c   : > { %v899_v17 = vld [vmem:[%s1029_s7 + $0x98] sm:$0xff]   ;;  %v902_v20 = vld [vmem:[%s1029_s7 + $0xa0] sm:$0xff]   ;;  %v905_v23 = vld [vmem:[%s1029_s7 + $0xa8] sm:$0xff]  }
  0x2d   : > { %795 = vmatpush3.bf16.msra.mxu0 %v892_v10  ;;  %v906_v24 = vld [vmem:[%s1029_s7 + $0x70] sm:$0xff]   ;;  %v909_v27 = vld [vmem:[%s1029_s7 + $0x78] sm:$0xff]   ;;  %v295_v39 = vld [vmem:[#allocation2] sm:$0xff] }
  0x2e   : > { %826 = vmatpush3.bf16.msra.mxu1 %v893_v11  ;;  %796 = vmatprep.subr.bf16.mxu0 %v894_v12  ;;  %v907_v25 = vld [vmem:[%s1029_s7 + $0x30] sm:$0xff]   ;;  %v910_v29 = vld [vmem:[%s1029_s7 + $0x38] sm:$0xff]   ;;  %v296_v45 = vld [vmem:[#allocation2 + $0x8] sm:$0xff] }
  0x2f   : > { %827 = vmatprep.subr.bf16.mxu1 %v957_v6  ;;  %v908_v26 = vld [vmem:[%s1029_s7 + $0xb0] sm:$0xff]   ;;  %v911_v30 = vld [vmem:[%s1029_s7 + $0xb8] sm:$0xff]   ;;  %v777_v51 = vld [vmem:[%s1085_s2] ss:$0 sm:$0xff] (!%p776_p11) }
  0x30   : > { %v914_v28 = vld [vmem:[%s1031_s8 + $0x4] ss:$12 sps:$4 sm:$0xff]   ;;  %v912_v31 = vld [vmem:[%s1031_s8] ss:$12 sps:$4 sm:$0xff]   ;;  %v915_v32 = vld [vmem:[%s1031_s8 + $0x8] ss:$12 sps:$4 sm:$0xff]  }
  0x31   : > { %797 = vmatpush3.bf16.msra.mxu0 %v895_v13  ;;  %541 = vmatprep.mubr.bf16.mxu0 %v914_v28 }
  0x32   : > { %828 = vmatpush3.bf16.msra.mxu1 %v896_v14  ;;  %798 = vmatprep.subr.bf16.mxu0 %v897_v15 }
  0x33   : > { %829 = vmatprep.subr.bf16.mxu1 %v957_v6 }
  0x35   : > { %799 = vmatpush3.bf16.msra.mxu0 %v898_v16 }
  0x36   : > { %830 = vmatpush3.bf16.msra.mxu1 %v899_v17  ;;  %800 = vmatprep.subr.bf16.mxu0 %v900_v18 }
  0x37   : > { %831 = vmatprep.subr.bf16.mxu1 %v957_v6 }
  0x39   : > { %801 = vmatpush3.bf16.msra.mxu0 %v901_v19 }
  0x3a   : > { %832 = vmatpush3.bf16.msra.mxu1 %v902_v20  ;;  %802 = vmatprep.subr.bf16.mxu0 %v903_v21 }
  0x3b   : > { %833 = vmatprep.subr.bf16.mxu1 %v957_v6 }
  0x3d   : > { %803 = vmatpush3.bf16.msra.mxu0 %v904_v22 }
  0x3e   : > { %834 = vmatpush3.bf16.msra.mxu1 %v905_v23  ;;  %804 = vmatprep.subr.bf16.mxu0 %v906_v24 }
  0x3f   : > { %835 = vmatprep.subr.bf16.mxu1 %v957_v6 }
  0x41   : > { %805 = vmatpush3.bf16.msra.mxu0 %v907_v25 }
  0x42   : > { %836 = vmatpush3.bf16.msra.mxu1 %v908_v26  ;;  %806 = vmatprep.subr.bf16.mxu0 %v909_v27 }
  0x43   : > { %837 = vmatprep.subr.bf16.mxu1 %v957_v6 }
  0x45   : > { %807 = vmatpush3.bf16.msra.mxu0 %v910_v29 }
  0x46   : > { %838 = vmatpush3.bf16.msra.mxu1 %v911_v30 }
  0x48   : > { %542 = vmatmul.mubr.bf16.vlgmr.msra.gmra.mrb[0].mxu0 %v912_v31 }
  0x49   : > { %840 = vmatmul.mubr.bf16.vlgmr.msra.gmra.mrb[0].mxu1 %v915_v32 }
 0x11b   : > { %v808_v33 = vpop.f32.mrb[0].mxu0 }
 0x11c   : > { %v584_v34 = vpop.f32.mrb[0].mxu1  ;;  %v809_v35 = vpop.f32.mrb[1].mxu0 }
 0x11d   : > { %v810_v36 = vadd.f32 %v809_v35, %v808_v33  ;;  %v841_v37 = vpop.f32.mrb[1].mxu1  ;;  %v811_v38 = vpop.f32.mrb[2].mxu0 }
 0x11e   : > { %v587_v40 = vpop.f32.mrb[2].mxu1  ;;  %v812_v41 = vpop.f32.mrb[3].mxu0 }
 0x11f   : > { %v585_v42 = vadd.f32 %v810_v36, %v584_v34  ;;  %v813_v43 = vadd.f32 %v812_v41, %v811_v38  ;;  %v842_v44 = vpop.f32.mrb[3].mxu1  ;;  %598 = sbr.rel (%p776_p11) target bundleno = 308 (0x134), region = 66 }
 0x121   : > { %v591_v46 = vadd.f32 %v585_v42, %v295_v39  ;;  %v588_v47 = vadd.f32 %v813_v43, %v587_v40 }
 0x123   : > { %593 = vst [vmem:[#allocation2] sm:$0xff] %v591_v46  ;;  %v592_v48 = vadd.f32 %v588_v47, %v296_v45 }
 0x125   : > { %594 = vst [vmem:[#allocation2 + $0x8] sm:$0xff] %v592_v48 }
 0x12a   : > { %v599_v49 = vld [vmem:[#allocation2] sm:$0xff] }
 0x12b   : > { %v608_v52 = vadd.f32 %v777_v51, %v599_v49 }
 0x12c   : > { %v600_v50 = vld [vmem:[#allocation2 + $0x8] sm:$0xff] }
 0x12d   : > { %v609_v53 = vadd.f32 %v777_v51, %v600_v50  ;;  %v610_v54 = vmax.f32 %v608_v52, 0.0 }
 0x12f   : > { %v611_v55 = vmax.f32 %v609_v53, 0.0 }
 0x131   : > { %v790_v56 = vpack.c.bf16 %v611_v55, %v610_v54 }
 0x133   : > { %791 = vst [vmem:[%s1086_s3] sm:$0xff] %v790_v56  }
 0x134 PF: > { %s13_s16 = sadd.s32 1, %s954_s16   ;;  %s1087_s12 = smov %s942_s13 }
 0x135   : > { %p10_p12 = scmp.ge.s32.totalorder %s13_s16, 5   ;;  %s1088_s13 = smov %s1014_s20 }
 0x136   : > { %s1089_s14 = smov %s950_s15  ;;  %s1090_s15 = smov %s1092_s17 }
 0x137   :  { %12 = sbr.rel (!%p10_p12) target bundleno = 3 (0x3), region = 113 }

// kernel: netg_forward.72
= control target key start
LH: loop header
LB: loop body
LE: loop exit
PB: predicated region body
PF: predicated region fallthrough
CT: control target
= control target key end

     0   :  { %s1071_s15 = smov 0   ;;  %s1073_s16 = smov 0   ;;  %s1178_s0 = inlined_call_operand.vmem [shape: bf16[16,1152], index: 0, kind: input, shape index: {}]   ;;  %s1179_s1 = inlined_call_operand.vmem [shape: bf16[1152,128], index: 1, kind: input, shape index: {}]   ;;  %s1180_s2 = inlined_call_operand.vmem [shape: f32[1,128], index: 2, kind: input, shape index: {}]   ;;  %s1181_s3 = inlined_call_operand.vmem [shape: bf16[16,128], index: 3, kind: input, shape index: {}]   ;;  %s1182_s4 = inlined_call_operand.vmem [shape: bf16[16,128], index: 4, kind: output, shape index: {}]  }
   0x1   :  { %s1075_s17 = smov 0   ;;  %s1077_s18 = smov 0  }
   0x2   :  { %s1079_s19 = smov 0  }
   0x3 LB: > { %s26_s20 = sadd.s32 1, %s1037_s18  ;;  %p49_p1 = scmp.ne.s32.totalorder %s1029_s16, %s1025_s15  ;;  %s1041_s19 = sphi %s1079_s19, %s14_s19   ;;  %s1037_s18 = sphi %s1077_s18, %s1186_s18   ;;  %s1033_s17 = sphi %s1075_s17, %s1185_s17   ;;  %s1029_s16 = sphi %s1073_s16, %s1184_s16   ;;  %s1025_s15 = sphi %s1071_s15, %s1183_s15  }
   0x4   : > { %p27_p0 = scmp.ge.s32.totalorder %s26_s20, 3  ;;  %p50_p2 = scmp.eq.s32.totalorder %s1041_s19, 0 }
   0x5   : > { %s42_s22 = sadd.s32 1, %s1029_s16  ;;  %p823_p5 = scmp.ge.s32.totalorder %s1041_s19, 3 }
   0x6   : > { %s1188_s20 = smov (%p27_p0, %s26_s20), 0  ;;  %p51_p3 = por %p50_p2, %p49_p1 }
   0x7   : > { %s38_s21 = ssub.s32 %s1037_s18, %s1188_s20  ;;  %203 = sbr.rel (%p823_p5) target bundleno = 21 (0x15), region = 24 }
   0x8   : > { %p40_p4 = scmp.eq.s32.totalorder %s38_s21, 0 }
   0xa   : > { %s1106_s23 = scalar_select %p40_p4, %s1029_s16, %s42_s22  }
   0xe   : > { %206 = sbr.rel (!%p51_p3) target bundleno = 21 (0x15), region = 28  ;;  %s208_s24 = sand.u32 (%p51_p3), 1, %s1029_s16  }
   0xf   : > { %s867_s25 = smul.u32 (%p51_p3), 12, %s1037_s18 }
  0x10   : > { %s930_s26 = smul.u32 (%p51_p3), 24, %s208_s24 }
  0x11   : > { %s216_s29 = scalar_lea.vmem (%p51_p3), %s1178_s0, %s867_s25 }
  0x12   : > { %v231_v0 = vld [vmem:[%s216_s29] sm:$0xff] (%p51_p3)  ;;  %v825_v2 = vld [vmem:[%s216_s29 + $0x8] sm:$0xf] (%p51_p3)  ;;  %s210_s30 = scalar_lea.vmem (%p51_p3), [#allocation3], %s930_s26  ;;  %v827_v3 = vld [vmem:[%s216_s29 + $0x2c] sm:$0xf] (%p51_p3) }
  0x13   : > { %v233_v1 = vld [vmem:[%s216_s29 + $0x24] sm:$0xff] (%p51_p3)  ;;  %232 = vst [vmem:[%s210_s30] sm:$0xff] (%p51_p3), %v231_v0  ;;  %826 = vst [vmem:[%s210_s30 + $0x8] sm:$0xf] (%p51_p3), %v825_v2 }
  0x14   : > { %234 = vst [vmem:[%s210_s30 + $0xc] sm:$0xff] (%p51_p3), %v233_v1  ;;  %828 = vst [vmem:[%s210_s30 + $0x14] sm:$0xf] (%p51_p3), %v827_v3 }
  0x15 PF: > { %p829_p6 = scmp.ge.s32.totalorder %s1041_s19, 1  ;;  %p262_p7 = scmp.lt.s32.totalorder %s1041_s19, 4 }
  0x17   : > { %p263_p8 = pnand %p829_p6, %p262_p7 }
  0x18   : > { %s269_s5 = sand.u32 (!%p263_p8), 1, %s1025_s15   ;;  %s318_s6 = smul.u32 (!%p263_p8), 48, %s1033_s17 }
  0x19   : > { %266 = sbr.rel (%p263_p8) target bundleno = 308 (0x134), region = 58  ;;  %p831_p10 = scmp.ne.s32.totalorder (!%p263_p8), %s1033_s17, 0 }
  0x1a   : > { %s931_s7 = smul.u32 (!%p263_p8), 24, %s269_s5  ;;  %p319_p9 = scmp.lt.s32.totalorder (!%p263_p8), %s318_s6, 143 }
  0x1c   : > { %s1123_s12 = scalar_lea.vmem (!%p263_p8), [#allocation3], %s931_s7 }
  0x20   : > { %s1190_s6 = smov (!%p319_p9, %s318_s6), 143  ;;  %352 = sbr.rel (%p831_p10) target bundleno = 39 (0x27), region = 66 }
  0x21   : > { %s830_s8 = sshll.u32 %s1190_s6, 2  ;;  %v1043_v4 = vmov (!%p831_p10), 0.0  }
  0x22   : > { %s1121_s11 = scalar_lea.vmem %s1179_s1, %s830_s8  ;;  %353 = vst [vmem:[#allocation2] sm:$0xff] (!%p831_p10), %v1043_v4  ;;  %354 = vst [vmem:[#allocation2 + $0x8] sm:$0xff] (!%p831_p10), %v1043_v4 }
  0x27 PF: > { %v975_v5 = vld [vmem:[%s1121_s11 + $0x40] sm:$0xff]   ;;  %v1044_v6 = vmov 0.0   ;;  %vm1045_vm0 = vmmov 0   ;;  %v978_v9 = vld [vmem:[%s1121_s11 + $0x48] sm:$0xff]   ;;  %v981_v12 = vld [vmem:[%s1121_s11 + $0x50] sm:$0xff]   ;;  %p859_p11 = scmp.ne.s32.totalorder %s1033_s17, 2 }
  0x28   : > { %910 = vmatprep.subr.bf16.mxu1 %v1044_v6  ;;  %v976_v7 = vld [vmem:[%s1121_s11] sm:$0xff]   ;;  %879 = vmatprep.subr.bf16.mxu0 %v975_v5  ;;  %v979_v10 = vld [vmem:[%s1121_s11 + $0x8] sm:$0xff]   ;;  %v982_v13 = vld [vmem:[%s1121_s11 + $0x10] sm:$0xff]  }
  0x29   : > { %v977_v8 = vld [vmem:[%s1121_s11 + $0x80] sm:$0xff]   ;;  %926 = vmatprep.mubr.msk.bf16.mxu1 %vm1045_vm0, %v1044_v6  ;;  %880 = vmatpush3.bf16.msra.mxu0 %v976_v7  ;;  %v980_v11 = vld [vmem:[%s1121_s11 + $0x88] sm:$0xff]   ;;  %v983_v14 = vld [vmem:[%s1121_s11 + $0x90] sm:$0xff]  }
  0x2a   : > { %911 = vmatpush3.bf16.msra.mxu1 %v977_v8  ;;  %881 = vmatprep.subr.bf16.mxu0 %v978_v9  ;;  %v984_v15 = vld [vmem:[%s1121_s11 + $0x58] sm:$0xff]   ;;  %v987_v18 = vld [vmem:[%s1121_s11 + $0x60] sm:$0xff]   ;;  %v990_v21 = vld [vmem:[%s1121_s11 + $0x68] sm:$0xff]  }
  0x2b   : > { %912 = vmatprep.subr.bf16.mxu1 %v1044_v6  ;;  %v985_v16 = vld [vmem:[%s1121_s11 + $0x18] sm:$0xff]   ;;  %v988_v19 = vld [vmem:[%s1121_s11 + $0x20] sm:$0xff]   ;;  %v991_v22 = vld [vmem:[%s1121_s11 + $0x28] sm:$0xff]  }
  0x2c   : > { %v986_v17 = vld [vmem:[%s1121_s11 + $0x98] sm:$0xff]   ;;  %v989_v20 = vld [vmem:[%s1121_s11 + $0xa0] sm:$0xff]   ;;  %v992_v23 = vld [vmem:[%s1121_s11 + $0xa8] sm:$0xff]  }
  0x2d   : > { %882 = vmatpush3.bf16.msra.mxu0 %v979_v10  ;;  %v993_v24 = vld [vmem:[%s1121_s11 + $0x70] sm:$0xff]   ;;  %v996_v27 = vld [vmem:[%s1121_s11 + $0x78] sm:$0xff]   ;;  %v355_v39 = vld [vmem:[#allocation2] sm:$0xff] }
  0x2e   : > { %913 = vmatpush3.bf16.msra.mxu1 %v980_v11  ;;  %883 = vmatprep.subr.bf16.mxu0 %v981_v12  ;;  %v994_v25 = vld [vmem:[%s1121_s11 + $0x30] sm:$0xff]   ;;  %v997_v29 = vld [vmem:[%s1121_s11 + $0x38] sm:$0xff]   ;;  %v356_v45 = vld [vmem:[#allocation2 + $0x8] sm:$0xff] }
  0x2f   : > { %914 = vmatprep.subr.bf16.mxu1 %v1044_v6  ;;  %v995_v26 = vld [vmem:[%s1121_s11 + $0xb0] sm:$0xff]   ;;  %v998_v30 = vld [vmem:[%s1121_s11 + $0xb8] sm:$0xff]   ;;  %v860_v51 = vld [vmem:[%s1180_s2] ss:$0 sm:$0xff] (!%p859_p11) }
  0x30   : > { %v1001_v28 = vld [vmem:[%s1123_s12 + $0x4] ss:$12 sps:$4 sm:$0xff]   ;;  %v999_v31 = vld [vmem:[%s1123_s12] ss:$12 sps:$4 sm:$0xff]   ;;  %v1002_v32 = vld [vmem:[%s1123_s12 + $0x8] ss:$12 sps:$4 sm:$0xff]  }
  0x31   : > { %884 = vmatpush3.bf16.msra.mxu0 %v982_v13  ;;  %601 = vmatprep.mubr.bf16.mxu0 %v1001_v28  ;;  %v871_v54 = vld [vmem:[%s1181_s3] sm:$0xff] (!%p859_p11)  }
  0x32   : > { %915 = vmatpush3.bf16.msra.mxu1 %v983_v14  ;;  %885 = vmatprep.subr.bf16.mxu0 %v984_v15  ;;  %v872_v55 = vunpack.c.l.bf16 (!%p859_p11), %v871_v54  ;;  %v873_v56 = vunpack.c.h.bf16 (!%p859_p11), %v871_v54 }
  0x33   : > { %916 = vmatprep.subr.bf16.mxu1 %v1044_v6 }
  0x35   : > { %886 = vmatpush3.bf16.msra.mxu0 %v985_v16 }
  0x36   : > { %917 = vmatpush3.bf16.msra.mxu1 %v986_v17  ;;  %887 = vmatprep.subr.bf16.mxu0 %v987_v18 }
  0x37   : > { %918 = vmatprep.subr.bf16.mxu1 %v1044_v6 }
  0x39   : > { %888 = vmatpush3.bf16.msra.mxu0 %v988_v19 }
  0x3a   : > { %919 = vmatpush3.bf16.msra.mxu1 %v989_v20  ;;  %889 = vmatprep.subr.bf16.mxu0 %v990_v21 }
  0x3b   : > { %920 = vmatprep.subr.bf16.mxu1 %v1044_v6 }
  0x3d   : > { %890 = vmatpush3.bf16.msra.mxu0 %v991_v22 }
  0x3e   : > { %921 = vmatpush3.bf16.msra.mxu1 %v992_v23  ;;  %891 = vmatprep.subr.bf16.mxu0 %v993_v24 }
  0x3f   : > { %922 = vmatprep.subr.bf16.mxu1 %v1044_v6 }
  0x41   : > { %892 = vmatpush3.bf16.msra.mxu0 %v994_v25 }
  0x42   : > { %923 = vmatpush3.bf16.msra.mxu1 %v995_v26  ;;  %893 = vmatprep.subr.bf16.mxu0 %v996_v27 }
  0x43   : > { %924 = vmatprep.subr.bf16.mxu1 %v1044_v6 }
  0x45   : > { %894 = vmatpush3.bf16.msra.mxu0 %v997_v29 }
  0x46   : > { %925 = vmatpush3.bf16.msra.mxu1 %v998_v30 }
  0x48   : > { %602 = vmatmul.mubr.bf16.vlgmr.msra.gmra.mrb[0].mxu0 %v999_v31 }
  0x49   : > { %927 = vmatmul.mubr.bf16.vlgmr.msra.gmra.mrb[0].mxu1 %v1002_v32 }
 0x11b   : > { %v895_v33 = vpop.f32.mrb[0].mxu0 }
 0x11c   : > { %v644_v34 = vpop.f32.mrb[0].mxu1  ;;  %v896_v35 = vpop.f32.mrb[1].mxu0 }
 0x11d   : > { %v897_v36 = vadd.f32 %v896_v35, %v895_v33  ;;  %v928_v37 = vpop.f32.mrb[1].mxu1  ;;  %v898_v38 = vpop.f32.mrb[2].mxu0 }
 0x11e   : > { %v647_v40 = vpop.f32.mrb[2].mxu1  ;;  %v899_v41 = vpop.f32.mrb[3].mxu0 }
 0x11f   : > { %v645_v42 = vadd.f32 %v897_v36, %v644_v34  ;;  %v900_v43 = vadd.f32 %v899_v41, %v898_v38  ;;  %v929_v44 = vpop.f32.mrb[3].mxu1  ;;  %658 = sbr.rel (%p859_p11) target bundleno = 308 (0x134), region = 70 }
 0x121   : > { %v651_v46 = vadd.f32 %v645_v42, %v355_v39  ;;  %v648_v47 = vadd.f32 %v900_v43, %v647_v40 }
 0x123   : > { %653 = vst [vmem:[#allocation2] sm:$0xff] %v651_v46  ;;  %v652_v48 = vadd.f32 %v648_v47, %v356_v45 }
 0x125   : > { %654 = vst [vmem:[#allocation2 + $0x8] sm:$0xff] %v652_v48 }
 0x12a   : > { %v659_v49 = vld [vmem:[#allocation2] sm:$0xff] }
 0x12b   : > { %v668_v52 = vadd.f32 %v860_v51, %v659_v49 }
 0x12c   : > { %v660_v50 = vld [vmem:[#allocation2 + $0x8] sm:$0xff] }
 0x12d   : > { %v669_v53 = vadd.f32 %v860_v51, %v660_v50  ;;  %v674_v57 = vadd.f32 %v872_v55, %v668_v52 }
 0x12f   : > { %v675_v58 = vadd.f32 %v873_v56, %v669_v53 }
 0x131   : > { %v877_v59 = vpack.c.bf16 %v675_v58, %v674_v57 }
 0x133   : > { %878 = vst [vmem:[%s1182_s4] sm:$0xff] %v877_v59  }
 0x134 PF: > { %s14_s19 = sadd.s32 1, %s1041_s19   ;;  %s1183_s15 = smov %s1029_s16 }
 0x135   : > { %p11_p12 = scmp.ge.s32.totalorder %s14_s19, 5   ;;  %s1184_s16 = smov %s1106_s23 }
 0x136   : > { %s1185_s17 = smov %s1037_s18  ;;  %s1186_s18 = smov %s1188_s20 }
 0x137   :  { %13 = sbr.rel (!%p11_p12) target bundleno = 3 (0x3), region = 120 }

// kernel: netg_forward.98
= control target key start
LH: loop header
LB: loop body
LE: loop exit
PB: predicated region body
PF: predicated region fallthrough
CT: control target
= control target key end

     0   :  { %s1283_s21 = smov 0   ;;  %s1285_s22 = smov 0   ;;  %s1396_s0 = inlined_call_operand.vmem [shape: bf16[16,1152], index: 0, kind: input, shape index: {}]   ;;  %s1397_s1 = inlined_call_operand.vmem [shape: bf16[1152,128], index: 1, kind: input, shape index: {}]   ;;  %s1398_s2 = inlined_call_operand.vmem [shape: f32[1,128], index: 2, kind: input, shape index: {}]   ;;  %s1399_s3 = inlined_call_operand.vmem [shape: bf16[16,128], index: 3, kind: input, shape index: {}]   ;;  %s1400_s4 = inlined_call_operand.vmem [shape: bf16[16,128], index: 4, kind: input, shape index: {}]   ;;  %s1401_s5 = inlined_call_operand.vmem [shape: bf16[16,128], index: 5, kind: input, shape index: {}]   ;;  %s1402_s6 = inlined_call_operand.vmem [shape: bf16[16,128], index: 6, kind: output, shape index: {}]  }
   0x1   :  { %s1287_s23 = smov 0   ;;  %s1289_s24 = smov 0  }
   0x2   :  { %s1291_s25 = smov 0  }
   0x3 LB: > { %s28_s26 = sadd.s32 1, %s1239_s24  ;;  %p51_p1 = scmp.ne.s32.totalorder %s1231_s22, %s1227_s21  ;;  %s1243_s25 = sphi %s1291_s25, %s16_s25   ;;  %s1239_s24 = sphi %s1289_s24, %s1406_s24   ;;  %s1235_s23 = sphi %s1287_s23, %s1405_s23   ;;  %s1231_s22 = sphi %s1285_s22, %s1404_s22   ;;  %s1227_s21 = sphi %s1283_s21, %s1403_s21  }
   0x4   : > { %p29_p0 = scmp.ge.s32.totalorder %s28_s26, 3  ;;  %p52_p2 = scmp.eq.s32.totalorder %s1243_s25, 0 }
   0x5   : > { %s44_s28 = sadd.s32 1, %s1231_s22  ;;  %p1009_p5 = scmp.ge.s32.totalorder %s1243_s25, 3 }
   0x6   : > { %s1408_s26 = smov (%p29_p0, %s28_s26), 0  ;;  %p53_p3 = por %p52_p2, %p51_p1 }
   0x7   : > { %s40_s27 = ssub.s32 %s1239_s24, %s1408_s26  ;;  %285 = sbr.rel (%p1009_p5) target bundleno = 21 (0x15), region = 32 }
   0x8   : > { %p42_p4 = scmp.eq.s32.totalorder %s40_s27, 0 }
   0xa   : > { %s1318_s29 = scalar_select %p42_p4, %s1231_s22, %s44_s28  }
   0xe   : > { %288 = sbr.rel (!%p53_p3) target bundleno = 21 (0x15), region = 36  ;;  %s290_s30 = sand.u32 (%p53_p3), 1, %s1231_s22  }
   0xf   : > { %s1053_s7 = smul.u32 (%p53_p3), 12, %s1239_s24 }
  0x10   : > { %s1124_s8 = smul.u32 (%p53_p3), 24, %s290_s30 }
  0x11   : > { %s298_s11 = scalar_lea.vmem (%p53_p3), %s1396_s0, %s1053_s7 }
  0x12   : > { %v313_v0 = vld [vmem:[%s298_s11] sm:$0xff] (%p53_p3)  ;;  %v1011_v2 = vld [vmem:[%s298_s11 + $0x8] sm:$0xf] (%p53_p3)  ;;  %s292_s12 = scalar_lea.vmem (%p53_p3), [#allocation3], %s1124_s8  ;;  %v1013_v3 = vld [vmem:[%s298_s11 + $0x2c] sm:$0xf] (%p53_p3) }
  0x13   : > { %v315_v1 = vld [vmem:[%s298_s11 + $0x24] sm:$0xff] (%p53_p3)  ;;  %314 = vst [vmem:[%s292_s12] sm:$0xff] (%p53_p3), %v313_v0  ;;  %1012 = vst [vmem:[%s292_s12 + $0x8] sm:$0xf] (%p53_p3), %v1011_v2 }
  0x14   : > { %316 = vst [vmem:[%s292_s12 + $0xc] sm:$0xff] (%p53_p3), %v315_v1  ;;  %1014 = vst [vmem:[%s292_s12 + $0x14] sm:$0xf] (%p53_p3), %v1013_v3 }
  0x15 PF: > { %p1015_p6 = scmp.ge.s32.totalorder %s1243_s25, 1  ;;  %p344_p7 = scmp.lt.s32.totalorder %s1243_s25, 4 }
  0x17   : > { %p345_p8 = pnand %p1015_p6, %p344_p7 }
  0x18   : > { %s351_s13 = sand.u32 (!%p345_p8), 1, %s1227_s21   ;;  %s420_s14 = smul.u32 (!%p345_p8), 48, %s1235_s23 }
  0x19   : > { %348 = sbr.rel (%p345_p8) target bundleno = 312 (0x138), region = 66  ;;  %p1017_p10 = scmp.ne.s32.totalorder (!%p345_p8), %s1235_s23, 0 }
  0x1a   : > { %s1125_s15 = smul.u32 (!%p345_p8), 24, %s351_s13  ;;  %p421_p9 = scmp.lt.s32.totalorder (!%p345_p8), %s420_s14, 143 }
  0x1c   : > { %s1335_s20 = scalar_lea.vmem (!%p345_p8), [#allocation3], %s1125_s15 }
  0x20   : > { %s1410_s14 = smov (!%p421_p9, %s420_s14), 143  ;;  %472 = sbr.rel (%p1017_p10) target bundleno = 39 (0x27), region = 74 }
  0x21   : > { %s1016_s16 = sshll.u32 %s1410_s14, 2  ;;  %v1245_v4 = vmov (!%p1017_p10), 0.0  }
  0x22   : > { %s1333_s19 = scalar_lea.vmem %s1397_s1, %s1016_s16  ;;  %473 = vst [vmem:[#allocation2] sm:$0xff] (!%p1017_p10), %v1245_v4  ;;  %474 = vst [vmem:[#allocation2 + $0x8] sm:$0xff] (!%p1017_p10), %v1245_v4 }
  0x27 PF: > { %v1169_v5 = vld [vmem:[%s1333_s19 + $0x40] sm:$0xff]   ;;  %v1246_v6 = vmov 0.0   ;;  %vm1247_vm0 = vmmov 0   ;;  %v1172_v9 = vld [vmem:[%s1333_s19 + $0x48] sm:$0xff]   ;;  %v1175_v12 = vld [vmem:[%s1333_s19 + $0x50] sm:$0xff]   ;;  %p1045_p11 = scmp.ne.s32.totalorder %s1235_s23, 2 }
  0x28   : > { %1104 = vmatprep.subr.bf16.mxu1 %v1246_v6  ;;  %v1170_v7 = vld [vmem:[%s1333_s19] sm:$0xff]   ;;  %1073 = vmatprep.subr.bf16.mxu0 %v1169_v5  ;;  %v1173_v10 = vld [vmem:[%s1333_s19 + $0x8] sm:$0xff]   ;;  %v1176_v13 = vld [vmem:[%s1333_s19 + $0x10] sm:$0xff]  }
  0x29   : > { %v1171_v8 = vld [vmem:[%s1333_s19 + $0x80] sm:$0xff]   ;;  %1120 = vmatprep.mubr.msk.bf16.mxu1 %vm1247_vm0, %v1246_v6  ;;  %1074 = vmatpush3.bf16.msra.mxu0 %v1170_v7  ;;  %v1174_v11 = vld [vmem:[%s1333_s19 + $0x88] sm:$0xff]   ;;  %v1177_v14 = vld [vmem:[%s1333_s19 + $0x90] sm:$0xff]  }
  0x2a   : > { %1105 = vmatpush3.bf16.msra.mxu1 %v1171_v8  ;;  %1075 = vmatprep.subr.bf16.mxu0 %v1172_v9  ;;  %v1178_v15 = vld [vmem:[%s1333_s19 + $0x58] sm:$0xff]   ;;  %v1181_v18 = vld [vmem:[%s1333_s19 + $0x60] sm:$0xff]   ;;  %v1184_v21 = vld [vmem:[%s1333_s19 + $0x68] sm:$0xff]  }
  0x2b   : > { %1106 = vmatprep.subr.bf16.mxu1 %v1246_v6  ;;  %v1179_v16 = vld [vmem:[%s1333_s19 + $0x18] sm:$0xff]   ;;  %v1182_v19 = vld [vmem:[%s1333_s19 + $0x20] sm:$0xff]   ;;  %v1185_v22 = vld [vmem:[%s1333_s19 + $0x28] sm:$0xff]  }
  0x2c   : > { %v1180_v17 = vld [vmem:[%s1333_s19 + $0x98] sm:$0xff]   ;;  %v1183_v20 = vld [vmem:[%s1333_s19 + $0xa0] sm:$0xff]   ;;  %v1186_v23 = vld [vmem:[%s1333_s19 + $0xa8] sm:$0xff]  }
  0x2d   : > { %1076 = vmatpush3.bf16.msra.mxu0 %v1173_v10  ;;  %v1187_v24 = vld [vmem:[%s1333_s19 + $0x70] sm:$0xff]   ;;  %v1190_v27 = vld [vmem:[%s1333_s19 + $0x78] sm:$0xff]   ;;  %v475_v39 = vld [vmem:[#allocation2] sm:$0xff] }
  0x2e   : > { %1107 = vmatpush3.bf16.msra.mxu1 %v1174_v11  ;;  %1077 = vmatprep.subr.bf16.mxu0 %v1175_v12  ;;  %v1188_v25 = vld [vmem:[%s1333_s19 + $0x30] sm:$0xff]   ;;  %v1191_v29 = vld [vmem:[%s1333_s19 + $0x38] sm:$0xff]   ;;  %v476_v45 = vld [vmem:[#allocation2 + $0x8] sm:$0xff] }
  0x2f   : > { %1108 = vmatprep.subr.bf16.mxu1 %v1246_v6  ;;  %v1189_v26 = vld [vmem:[%s1333_s19 + $0xb0] sm:$0xff]   ;;  %v1192_v30 = vld [vmem:[%s1333_s19 + $0xb8] sm:$0xff]   ;;  %v1061_v49 = vld [vmem:[%s1400_s4] sm:$0xff] (!%p1045_p11)  }
  0x30   : > { %v1195_v28 = vld [vmem:[%s1335_s20 + $0x4] ss:$12 sps:$4 sm:$0xff]   ;;  %v1193_v31 = vld [vmem:[%s1335_s20] ss:$12 sps:$4 sm:$0xff]   ;;  %v1196_v32 = vld [vmem:[%s1335_s20 + $0x8] ss:$12 sps:$4 sm:$0xff]   ;;  %v1062_v51 = vunpack.c.l.bf16 (!%p1045_p11), %v1061_v49  ;;  %v1063_v52 = vunpack.c.h.bf16 (!%p1045_p11), %v1061_v49 }
  0x31   : > { %1078 = vmatpush3.bf16.msra.mxu0 %v1176_v13  ;;  %721 = vmatprep.mubr.bf16.mxu0 %v1195_v28  ;;  %v1065_v50 = vld [vmem:[%s1401_s5] sm:$0xff] (!%p1045_p11)  }
  0x32   : > { %1109 = vmatpush3.bf16.msra.mxu1 %v1177_v14  ;;  %1079 = vmatprep.subr.bf16.mxu0 %v1178_v15  ;;  %v1066_v53 = vunpack.c.l.bf16 (!%p1045_p11), %v1065_v50  ;;  %v1067_v54 = vunpack.c.h.bf16 (!%p1045_p11), %v1065_v50  ;;  %v804_v55 = vmul.f32 (!%p1045_p11), 0.5, %v1062_v51  ;;  %v805_v56 = vmul.f32 (!%p1045_p11), 0.5, %v1063_v52  ;;  %v1046_v60 = vld [vmem:[%s1398_s2] ss:$0 sm:$0xff] (!%p1045_p11) }
  0x33   : > { %1110 = vmatprep.subr.bf16.mxu1 %v1246_v6  ;;  %v1057_v61 = vld [vmem:[%s1399_s3] sm:$0xff] (!%p1045_p11)  }
  0x34   : > { %v814_v57 = vmul.f32 (!%p1045_p11), 0.5, %v1066_v53  ;;  %v815_v58 = vmul.f32 (!%p1045_p11), 0.5, %v1067_v54  ;;  %1197 = vtanh.f32 (!%p1045_p11), %v804_v55  ;;  %v1058_v0 = vunpack.c.l.bf16 (!%p1045_p11), %v1057_v61 }
  0x35   : > { %1080 = vmatpush3.bf16.msra.mxu0 %v1179_v16  ;;  %1199 = vtanh.f32 (!%p1045_p11), %v805_v56  ;;  %v1059_v2 = vunpack.c.h.bf16 (!%p1045_p11), %v1057_v61 }
  0x36   : > { %1111 = vmatpush3.bf16.msra.mxu1 %v1180_v17  ;;  %1081 = vmatprep.subr.bf16.mxu0 %v1181_v18  ;;  %1201 = vtanh.f32 (!%p1045_p11), %v814_v57 }
  0x37   : > { %1112 = vmatprep.subr.bf16.mxu1 %v1246_v6  ;;  %1203 = vtanh.f32 (!%p1045_p11), %v815_v58 }
  0x39   : > { %1082 = vmatpush3.bf16.msra.mxu0 %v1182_v19 }
  0x3a   : > { %1113 = vmatpush3.bf16.msra.mxu1 %v1183_v20  ;;  %1083 = vmatprep.subr.bf16.mxu0 %v1184_v21 }
  0x3b   : > { %1114 = vmatprep.subr.bf16.mxu1 %v1246_v6 }
  0x3d   : > { %1084 = vmatpush3.bf16.msra.mxu0 %v1185_v22 }
  0x3e   : > { %1115 = vmatpush3.bf16.msra.mxu1 %v1186_v23  ;;  %1085 = vmatprep.subr.bf16.mxu0 %v1187_v24  ;;  %v1198_v3 = vpop.eup (!%p1045_p11), %1197 }
  0x3f   : > { %1116 = vmatprep.subr.bf16.mxu1 %v1246_v6  ;;  %v1200_v4 = vpop.eup (!%p1045_p11), %1199 }
  0x40   : > { %v1202_v7 = vpop.eup (!%p1045_p11), %1201  ;;  %v809_v9 = vadd.f32 (!%p1045_p11), 1.0, %v1200_v4 }
  0x41   : > { %1086 = vmatpush3.bf16.msra.mxu0 %v1188_v25  ;;  %v1204_v10 = vpop.eup (!%p1045_p11), %1203  ;;  %v818_v12 = vadd.f32 (!%p1045_p11), 1.0, %v1202_v7 }
  0x42   : > { %1117 = vmatpush3.bf16.msra.mxu1 %v1189_v26  ;;  %1087 = vmatprep.subr.bf16.mxu0 %v1190_v27  ;;  %v811_v13 = vmul.f32 (!%p1045_p11), 0.5, %v809_v9  ;;  %v819_v14 = vadd.f32 (!%p1045_p11), 1.0, %v1204_v10 }
  0x43   : > { %1118 = vmatprep.subr.bf16.mxu1 %v1246_v6  ;;  %v808_v6 = vadd.f32 (!%p1045_p11), 1.0, %v1198_v3  ;;  %v820_v16 = vmul.f32 (!%p1045_p11), 0.5, %v818_v12 }
  0x44   : > { %v821_v18 = vmul.f32 (!%p1045_p11), 0.5, %v819_v14 }
  0x45   : > { %1088 = vmatpush3.bf16.msra.mxu0 %v1191_v29  ;;  %v810_v11 = vmul.f32 (!%p1045_p11), 0.5, %v808_v6 }
  0x46   : > { %1119 = vmatpush3.bf16.msra.mxu1 %v1192_v30 }
  0x48   : > { %722 = vmatmul.mubr.bf16.vlgmr.msra.gmra.mrb[0].mxu0 %v1193_v31 }
  0x49   : > { %1121 = vmatmul.mubr.bf16.vlgmr.msra.gmra.mrb[0].mxu1 %v1196_v32 }
 0x11b   : > { %v1089_v33 = vpop.f32.mrb[0].mxu0 }
 0x11c   : > { %v764_v34 = vpop.f32.mrb[0].mxu1  ;;  %v1090_v35 = vpop.f32.mrb[1].mxu0 }
 0x11d   : > { %v1091_v36 = vadd.f32 %v1090_v35, %v1089_v33  ;;  %v1122_v37 = vpop.f32.mrb[1].mxu1  ;;  %v1092_v38 = vpop.f32.mrb[2].mxu0 }
 0x11e   : > { %v767_v40 = vpop.f32.mrb[2].mxu1  ;;  %v1093_v41 = vpop.f32.mrb[3].mxu0 }
 0x11f   : > { %v765_v42 = vadd.f32 %v1091_v36, %v764_v34  ;;  %v1094_v43 = vadd.f32 %v1093_v41, %v1092_v38  ;;  %v1123_v44 = vpop.f32.mrb[3].mxu1  ;;  %778 = sbr.rel (%p1045_p11) target bundleno = 312 (0x138), region = 78 }
 0x121   : > { %v771_v46 = vadd.f32 %v765_v42, %v475_v39  ;;  %v768_v47 = vadd.f32 %v1094_v43, %v767_v40 }
 0x123   : > { %773 = vst [vmem:[#allocation2] sm:$0xff] %v771_v46  ;;  %v772_v48 = vadd.f32 %v768_v47, %v476_v45 }
 0x125   : > { %774 = vst [vmem:[#allocation2 + $0x8] sm:$0xff] %v772_v48 }
 0x12a   : > { %v779_v59 = vld [vmem:[#allocation2] sm:$0xff] }
 0x12b   : > { %v788_v63 = vadd.f32 %v1046_v60, %v779_v59 }
 0x12c   : > { %v780_v62 = vld [vmem:[#allocation2 + $0x8] sm:$0xff] }
 0x12d   : > { %v789_v1 = vadd.f32 %v1046_v60, %v780_v62  ;;  %v794_v5 = vadd.f32 %v1058_v0, %v788_v63 }
 0x12f   : > { %v795_v8 = vadd.f32 %v1059_v2, %v789_v1  ;;  %v812_v15 = vmul.f32 %v810_v11, %v794_v5 }
 0x131   : > { %v813_v17 = vmul.f32 %v811_v13, %v795_v8  ;;  %v822_v19 = vmul.f32 %v820_v16, %v812_v15 }
 0x133   : > { %v823_v20 = vmul.f32 %v821_v18, %v813_v17 }
 0x135   : > { %v1071_v21 = vpack.c.bf16 %v823_v20, %v822_v19 }
 0x137   : > { %1072 = vst [vmem:[%s1402_s6] sm:$0xff] %v1071_v21  }
 0x138 PF: > { %s16_s25 = sadd.s32 1, %s1243_s25   ;;  %s1403_s21 = smov %s1231_s22 }
 0x139   : > { %p13_p12 = scmp.ge.s32.totalorder %s16_s25, 5   ;;  %s1404_s22 = smov %s1318_s29 }
 0x13a   : > { %s1405_s23 = smov %s1239_s24  ;;  %s1406_s24 = smov %s1408_s26 }
 0x13b   :  { %15 = sbr.rel (!%p13_p12) target bundleno = 3 (0x3), region = 134 }

// kernel: mul.492
= control target key start
LH: loop header
LB: loop body
LE: loop exit
PB: predicated region body
PF: predicated region fallthrough
CT: control target
= control target key end

     0   :  { %s6_s8 = smov 3  ;;  %vm8_vm0 = vcmask 523264   ;;  %s24_s9 = smov 64   ;;  %vm15_vm1 = vcmask 1048064   ;;  %s41_s0 = inlined_call_operand.vmem [shape: f32[4,64], index: 0, kind: input, shape index: {}]   ;;  %s42_s1 = inlined_call_operand.vmem [shape: f32[256], index: 1, kind: output, shape index: {}]  }
   0x1   :  { %v4_v0 = vld [vmem:[%s41_s0] sm:$0xf]  ;;  %s11_s0 = smov 3 }
   0x2   :  { %5 = vst [vmem:[#allocation1] sm:$0xf] %v4_v0 }
   0x9   :  { %v12_v1 = vld [vmem:[#allocation1 + $0x1] ss:$2 sm:%s11_s0]   ;;  %v7_v2 = vld [vmem:[#allocation1] ss:$2 sm:%s6_s8]  }
   0xa   :  { %13 = vrot.lane.b32.xlu0 %v12_v1, %s24_s9  ;;  %9 = vst.msk [vmem:[#allocation0] sm:$0x3] %vm8_vm0, %v7_v2  }
  0x7c   :  { %v14_v3 = vpop.permute.xlu0 %13  }
  0x7d   :  { %16 = vst.msk [vmem:[#allocation0] sm:$0x3] %vm15_vm1, %v14_v3  }
  0x84   :  { %v20_v4 = vld [vmem:[#allocation0] sm:$0x3] }
  0x85   :  { %22 = vst [vmem:[%s42_s1] sm:$0x3] %v20_v4 }

// kernel: tile.43
= control target key start
LH: loop header
LB: loop body
LE: loop exit
PB: predicated region body
PF: predicated region fallthrough
CT: control target
= control target key end

     0   :  { %s22_s0 = inlined_call_operand.vmem [shape: f32[64], index: 0, kind: input, shape index: {}]   ;;  %s23_s1 = inlined_call_operand.vmem [shape: f32[4,64], index: 1, kind: output, shape index: {}]  }
   0x1   :  { %v4_v0 = vld [vmem:[%s22_s0] ss:$0 sm:$0xff] }
   0x2   :  { %5 = vst [vmem:[%s23_s1] sm:$0xf] %v4_v0 }

// kernel: tile.49
= control target key start
LH: loop header
LB: loop body
LE: loop exit
PB: predicated region body
PF: predicated region fallthrough
CT: control target
= control target key end

     0   :  { %s6_s8 = smov 3  ;;  %vm8_vm0 = vcmask 523264   ;;  %s30_s9 = smov 64   ;;  %vm15_vm1 = vcmask 1048064   ;;  %s50_s0 = inlined_call_operand.vmem [shape: f32[4,64], index: 0, kind: input, shape index: {}]   ;;  %s51_s1 = inlined_call_operand.vmem [shape: f32[1,256], index: 1, kind: output, shape index: {}]  }
   0x1   :  { %v4_v0 = vld [vmem:[%s50_s0] sm:$0xf]  ;;  %s11_s0 = smov 3 }
   0x2   :  { %5 = vst [vmem:[#allocation1] sm:$0xf] %v4_v0 }
   0x9   :  { %v12_v1 = vld [vmem:[#allocation1 + $0x1] ss:$2 sm:%s11_s0]   ;;  %v7_v2 = vld [vmem:[#allocation1] ss:$2 sm:%s6_s8]  }
   0xa   :  { %13 = vrot.lane.b32.xlu0 %v12_v1, %s30_s9  ;;  %9 = vst.msk [vmem:[#allocation0] ss:$8 sm:$0x3] %vm8_vm0, %v7_v2  }
  0x7c   :  { %v14_v3 = vpop.permute.xlu0 %13  }
  0x7d   :  { %16 = vst.msk [vmem:[#allocation0] ss:$8 sm:$0x3] %vm15_vm1, %v14_v3  }
  0x84   :  { %v20_v4 = vld [vmem:[#allocation0] sm:$0x1]  ;;  %v24_v5 = vld [vmem:[#allocation0 + $0x8] sm:$0x1] }
  0x85   :  { %22 = vst [vmem:[%s51_s1] sm:$0x1] %v20_v4  ;;  %28 = vst [vmem:[%s51_s1 + $0x1] sm:$0x1] %v24_v5 }

// kernel: netg_forward.99
= control target key start
LH: loop header
LB: loop body
LE: loop exit
PB: predicated region body
PF: predicated region fallthrough
CT: control target
= control target key end

     0   :  { %s1151_s12 = smov 0   ;;  %s1153_s13 = smov 0   ;;  %s1282_s0 = inlined_call_operand.vmem [shape: bf16[16,1152], index: 0, kind: input, shape index: {}]   ;;  %s1283_s1 = inlined_call_operand.vmem [shape: bf16[1152,256], index: 1, kind: input, shape index: {}]   ;;  %s1284_s2 = inlined_call_operand.vmem [shape: f32[1,256], index: 2, kind: input, shape index: {}]   ;;  %s1285_s3 = inlined_call_operand.vmem [shape: bf16[16,256], index: 3, kind: output, shape index: {}]  }
   0x1   :  { %s1155_s14 = smov 0   ;;  %s1157_s15 = smov 0  }
   0x2   :  { %s1159_s16 = smov 0  }
   0x3 LB: > { %s25_s17 = sadd.s32 1, %s1123_s15  ;;  %p48_p1 = scmp.ne.s32.totalorder %s1115_s13, %s1111_s12  ;;  %s1127_s16 = sphi %s1159_s16, %s13_s16   ;;  %s1123_s15 = sphi %s1157_s15, %s1289_s15   ;;  %s1119_s14 = sphi %s1155_s14, %s1288_s14   ;;  %s1115_s13 = sphi %s1153_s13, %s1287_s13   ;;  %s1111_s12 = sphi %s1151_s12, %s1286_s12  }
   0x4   : > { %p26_p0 = scmp.ge.s32.totalorder %s25_s17, 3  ;;  %p49_p2 = scmp.eq.s32.totalorder %s1127_s16, 0 }
   0x5   : > { %s41_s19 = sadd.s32 1, %s1115_s13  ;;  %p893_p5 = scmp.ge.s32.totalorder %s1127_s16, 3 }
   0x6   : > { %s1291_s17 = smov (%p26_p0, %s25_s17), 0  ;;  %p50_p3 = por %p49_p2, %p48_p1 }
   0x7   : > { %s37_s18 = ssub.s32 %s1123_s15, %s1291_s17  ;;  %164 = sbr.rel (%p893_p5) target bundleno = 21 (0x15), region = 20 }
   0x8   : > { %p39_p4 = scmp.eq.s32.totalorder %s37_s18, 0 }
   0xa   : > { %s1186_s20 = scalar_select %p39_p4, %s1115_s13, %s41_s19  }
   0xe   : > { %167 = sbr.rel (!%p50_p3) target bundleno = 21 (0x15), region = 24  ;;  %s169_s21 = sand.u32 (%p50_p3), 1, %s1115_s13  }
   0xf   : > { %s961_s22 = smul.u32 (%p50_p3), 12, %s1123_s15 }
  0x10   : > { %s969_s23 = smul.u32 (%p50_p3), 24, %s169_s21 }
  0x11   : > { %s177_s26 = scalar_lea.vmem (%p50_p3), %s1282_s0, %s961_s22 }
  0x12   : > { %v192_v0 = vld [vmem:[%s177_s26] sm:$0xff] (%p50_p3)  ;;  %v895_v2 = vld [vmem:[%s177_s26 + $0x8] sm:$0xf] (%p50_p3)  ;;  %s171_s27 = scalar_lea.vmem (%p50_p3), [#allocation3], %s969_s23  ;;  %v897_v3 = vld [vmem:[%s177_s26 + $0x2c] sm:$0xf] (%p50_p3) }
  0x13   : > { %v194_v1 = vld [vmem:[%s177_s26 + $0x24] sm:$0xff] (%p50_p3)  ;;  %193 = vst [vmem:[%s171_s27] sm:$0xff] (%p50_p3), %v192_v0  ;;  %896 = vst [vmem:[%s171_s27 + $0x8] sm:$0xf] (%p50_p3), %v895_v2 }
  0x14   : > { %195 = vst [vmem:[%s171_s27 + $0xc] sm:$0xff] (%p50_p3), %v194_v1  ;;  %898 = vst [vmem:[%s171_s27 + $0x14] sm:$0xf] (%p50_p3), %v897_v3 }
  0x15 PF: > { %p899_p6 = scmp.ge.s32.totalorder %s1127_s16, 1  ;;  %p226_p7 = scmp.lt.s32.totalorder %s1127_s16, 4 }
  0x17   : > { %p227_p8 = pnand %p899_p6, %p226_p7 }
  0x18   : > { %s233_s28 = sand.u32 (!%p227_p8), 1, %s1111_s12   ;;  %s277_s29 = smul.u32 (!%p227_p8), 48, %s1119_s14 }
  0x19   : > { %230 = sbr.rel (%p227_p8) target bundleno = 338 (0x152), region = 54  ;;  %p902_p10 = scmp.ne.s32.totalorder (!%p227_p8), %s1119_s14, 0 }
  0x1a   : > { %s970_s30 = smul.u32 (!%p227_p8), 24, %s233_s28  ;;  %p279_p9 = scmp.lt.s32.totalorder (!%p227_p8), %s277_s29, 143 }
  0x1c   : > { %s1203_s8 = scalar_lea.vmem (!%p227_p8), [#allocation3], %s970_s30 }
  0x20   : > { %s1293_s29 = smov (!%p279_p9, %s277_s29), 143  ;;  %310 = sbr.rel (%p902_p10) target bundleno = 39 (0x27), region = 62 }
  0x21   : > { %s962_s4 = sshll.u32 %s1293_s29, 3  ;;  %v1129_v4 = vmov (!%p902_p10), 0.0  }
  0x22   : > { %s1201_s7 = scalar_lea.vmem %s1283_s1, %s962_s4  ;;  %311 = vst [vmem:[#allocation2] sm:$0xff] (!%p902_p10), %v1129_v4  ;;  %312 = vst [vmem:[#allocation2 + $0x8] sm:$0xff] (!%p902_p10), %v1129_v4 }
  0x23   : > { %313 = vst [vmem:[#allocation2 + $0x10] sm:$0xff] (!%p902_p10), %v1129_v4  ;;  %314 = vst [vmem:[#allocation2 + $0x18] sm:$0xff] (!%p902_p10), %v1129_v4 }
  0x27 PF: > { %v1013_v5 = vld [vmem:[%s1201_s7 + $0x4] ss:$8 sps:$4 sm:$0xff]   ;;  %v1015_v6 = vld [vmem:[%s1201_s7] ss:$8 sps:$4 sm:$0xff]   ;;  %v1130_v7 = vmov 0   ;;  %p954_p11 = scmp.ne.s32.totalorder %s1119_s14, 2 }
  0x28   : > { %702 = vmatprep.mubr.bf16.mxu0 %v1130_v7  ;;  %627 = vmatprep.subr.bf16.mxu1 %v1013_v5  ;;  %v1016_v8 = vld [vmem:[%s1201_s7 + $0x14] ss:$8 sps:$4 sm:$0xff]   ;;  %v1018_v9 = vld [vmem:[%s1201_s7 + $0x10] ss:$8 sps:$4 sm:$0xff]   ;;  %v1019_v10 = vld [vmem:[%s1201_s7 + $0x24] ss:$8 sps:$4 sm:$0xff]  }
  0x29   : > { %628 = vmatpush1.bf16.msra.mxu1 %v1015_v6  ;;  %v1021_v11 = vld [vmem:[%s1201_s7 + $0x20] ss:$8 sps:$4 sm:$0xff]   ;;  %v1022_v12 = vld [vmem:[%s1201_s7 + $0x34] ss:$8 sps:$4 sm:$0xff]   ;;  %v1024_v13 = vld [vmem:[%s1201_s7 + $0x30] ss:$8 sps:$4 sm:$0xff]  }
  0x2a   : > { %629 = vmatprep.subr.bf16.mxu1 %v1016_v8  ;;  %v1037_v14 = vld [vmem:[%s1201_s7 + $0x104] ss:$8 sps:$4 sm:$0xff]   ;;  %v1039_v15 = vld [vmem:[%s1201_s7 + $0x100] ss:$8 sps:$4 sm:$0xff]   ;;  %v1043_v17 = vld [vmem:[%s1201_s7 + $0x114] ss:$8 sps:$4 sm:$0xff]  }
  0x2b   : > { %v1025_v16 = vld [vmem:[%s1201_s7 + $0x44] ss:$8 sps:$4 sm:$0xff]   ;;  %670 = vmatprep.subr.bf16.mxu0 %v1037_v14  ;;  %v1045_v18 = vld [vmem:[%s1201_s7 + $0x110] ss:$8 sps:$4 sm:$0xff]   ;;  %v1027_v19 = vld [vmem:[%s1201_s7 + $0x40] ss:$8 sps:$4 sm:$0xff]  }
  0x2c   : > { %671 = vmatpush1.bf16.msra.mxu0 %v1039_v15  ;;  %v1028_v20 = vld [vmem:[%s1201_s7 + $0x54] ss:$8 sps:$4 sm:$0xff]   ;;  %v1049_v21 = vld [vmem:[%s1201_s7 + $0x124] ss:$8 sps:$4 sm:$0xff]   ;;  %v1051_v22 = vld [vmem:[%s1201_s7 + $0x120] ss:$8 sps:$4 sm:$0xff]  }
  0x2d   : > { %630 = vmatpush1.bf16.msra.mxu1 %v1018_v9  ;;  %672 = vmatprep.subr.bf16.mxu0 %v1043_v17  ;;  %v1030_v23 = vld [vmem:[%s1201_s7 + $0x50] ss:$8 sps:$4 sm:$0xff]   ;;  %v1055_v24 = vld [vmem:[%s1201_s7 + $0x134] ss:$8 sps:$4 sm:$0xff]   ;;  %v1031_v25 = vld [vmem:[%s1201_s7 + $0x64] ss:$8 sps:$4 sm:$0xff]  }
  0x2e   : > { %631 = vmatprep.subr.bf16.mxu1 %v1019_v10  ;;  %v1057_v26 = vld [vmem:[%s1201_s7 + $0x130] ss:$8 sps:$4 sm:$0xff]   ;;  %v1033_v27 = vld [vmem:[%s1201_s7 + $0x60] ss:$8 sps:$4 sm:$0xff]   ;;  %v1061_v28 = vld [vmem:[%s1201_s7 + $0x144] ss:$8 sps:$4 sm:$0xff]  }
  0x2f   : > { %v1034_v29 = vld [vmem:[%s1201_s7 + $0x74] ss:$8 sps:$4 sm:$0xff]   ;;  %v1063_v30 = vld [vmem:[%s1201_s7 + $0x140] ss:$8 sps:$4 sm:$0xff]   ;;  %v1036_v31 = vld [vmem:[%s1201_s7 + $0x70] ss:$8 sps:$4 sm:$0xff]  }
  0x30   : > { %673 = vmatpush1.bf16.msra.mxu0 %v1045_v18  ;;  %v1067_v32 = vld [vmem:[%s1201_s7 + $0x154] ss:$8 sps:$4 sm:$0xff]   ;;  %v1040_v33 = vld [vmem:[%s1201_s7 + $0x84] ss:$8 sps:$4 sm:$0xff]   ;;  %v1069_v34 = vld [vmem:[%s1201_s7 + $0x150] ss:$8 sps:$4 sm:$0xff]  }
  0x31   : > { %632 = vmatpush1.bf16.msra.mxu1 %v1021_v11  ;;  %674 = vmatprep.subr.bf16.mxu0 %v1049_v21  ;;  %v1042_v35 = vld [vmem:[%s1201_s7 + $0x80] ss:$8 sps:$4 sm:$0xff]   ;;  %v1073_v36 = vld [vmem:[%s1201_s7 + $0x164] ss:$8 sps:$4 sm:$0xff]   ;;  %v1046_v37 = vld [vmem:[%s1201_s7 + $0x94] ss:$8 sps:$4 sm:$0xff]  }
  0x32   : > { %633 = vmatprep.subr.bf16.mxu1 %v1022_v12  ;;  %v1075_v38 = vld [vmem:[%s1201_s7 + $0x160] ss:$8 sps:$4 sm:$0xff]   ;;  %v1048_v40 = vld [vmem:[%s1201_s7 + $0x90] ss:$8 sps:$4 sm:$0xff]   ;;  %v1079_v41 = vld [vmem:[%s1201_s7 + $0x174] ss:$8 sps:$4 sm:$0xff]  }
  0x33   : > { %v1088_v39 = vld [vmem:[%s1203_s8 + $0x4] ss:$12 sps:$4 sm:$0xff]   ;;  %v1085_v46 = vld [vmem:[%s1203_s8 + $0x8] ss:$12 sps:$4 sm:$0xff]   ;;  %v1086_v56 = vld [vmem:[%s1203_s8] ss:$12 sps:$4 sm:$0xff]  }
  0x34   : > { %675 = vmatpush1.bf16.msra.mxu0 %v1051_v22  ;;  %v1052_v42 = vld [vmem:[%s1201_s7 + $0xa4] ss:$8 sps:$4 sm:$0xff]   ;;  %659 = vmatprep.mubr.bf16.mxu1 %v1088_v39  ;;  %v1081_v43 = vld [vmem:[%s1201_s7 + $0x170] ss:$8 sps:$4 sm:$0xff]   ;;  %v1054_v44 = vld [vmem:[%s1201_s7 + $0xa0] ss:$8 sps:$4 sm:$0xff]  }
  0x35   : > { %634 = vmatpush1.bf16.msra.mxu1 %v1024_v13  ;;  %676 = vmatprep.subr.bf16.mxu0 %v1055_v24  ;;  %v1058_v45 = vld [vmem:[%s1201_s7 + $0xb4] ss:$8 sps:$4 sm:$0xff]   ;;  %v1060_v47 = vld [vmem:[%s1201_s7 + $0xb0] ss:$8 sps:$4 sm:$0xff]   ;;  %v1064_v48 = vld [vmem:[%s1201_s7 + $0xc4] ss:$8 sps:$4 sm:$0xff]   ;;  %v731_v13 = vlaneseq (!%p954_p11) }
  0x36   : > { %635 = vmatprep.subr.bf16.mxu1 %v1025_v16  ;;  %v1066_v49 = vld [vmem:[%s1201_s7 + $0xc0] ss:$8 sps:$4 sm:$0xff]   ;;  %v1070_v50 = vld [vmem:[%s1201_s7 + $0xd4] ss:$8 sps:$4 sm:$0xff]   ;;  %v1072_v51 = vld [vmem:[%s1201_s7 + $0xd0] ss:$8 sps:$4 sm:$0xff]  }
  0x37   : > { %v1076_v52 = vld [vmem:[%s1201_s7 + $0xe4] ss:$8 sps:$4 sm:$0xff]   ;;  %v1078_v53 = vld [vmem:[%s1201_s7 + $0xe0] ss:$8 sps:$4 sm:$0xff]   ;;  %v1082_v54 = vld [vmem:[%s1201_s7 + $0xf4] ss:$8 sps:$4 sm:$0xff]  }
  0x38   : > { %677 = vmatpush1.bf16.msra.mxu0 %v1057_v26  ;;  %v1084_v55 = vld [vmem:[%s1201_s7 + $0xf0] ss:$8 sps:$4 sm:$0xff]   ;;  %v315_v61 = vld [vmem:[#allocation2] sm:$0xff]  ;;  %v316_v0 = vld [vmem:[#allocation2 + $0x8] sm:$0xff]  ;;  %v732_v14 = vshrl.u32 (!%p954_p11), %v731_v13, 7 }
  0x39   : > { %636 = vmatpush1.bf16.msra.mxu1 %v1027_v19  ;;  %678 = vmatprep.subr.bf16.mxu0 %v1061_v28  ;;  %v317_v3 = vld [vmem:[#allocation2 + $0x10] sm:$0xff]  ;;  %v318_v7 = vld [vmem:[#allocation2 + $0x18] sm:$0xff]  ;;  %v729_v15 = vld [vmem:[%s1284_s2] sm:$0x3] (!%p954_p11) }
  0x3a   : > { %637 = vmatprep.subr.bf16.mxu1 %v1028_v20  ;;  %v733_v17 = vsub.s32 (!%p954_p11), 0, %v732_v14  ;;  %v737_v18 = vsub.s32 (!%p954_p11), 1, %v732_v14 }
  0x3c   : > { %679 = vmatpush1.bf16.msra.mxu0 %v1063_v30  ;;  %v734_v22 = vrot.slane (!%p954_p11), %v729_v15, %v733_v17 }
  0x3d   : > { %638 = vmatpush1.bf16.msra.mxu1 %v1030_v23  ;;  %680 = vmatprep.subr.bf16.mxu0 %v1067_v32  ;;  %v738_v23 = vrot.slane (!%p954_p11), %v729_v15, %v737_v18 }
  0x3e   : > { %639 = vmatprep.subr.bf16.mxu1 %v1031_v25 }
  0x40   : > { %681 = vmatpush1.bf16.msra.mxu0 %v1069_v34 }
  0x41   : > { %640 = vmatpush1.bf16.msra.mxu1 %v1033_v27  ;;  %682 = vmatprep.subr.bf16.mxu0 %v1073_v36 }
  0x42   : > { %641 = vmatprep.subr.bf16.mxu1 %v1034_v29 }
  0x44   : > { %683 = vmatpush1.bf16.msra.mxu0 %v1075_v38 }
  0x45   : > { %642 = vmatpush1.bf16.msra.mxu1 %v1036_v31  ;;  %684 = vmatprep.subr.bf16.mxu0 %v1079_v41 }
  0x46   : > { %643 = vmatprep.subr.bf16.mxu1 %v1040_v33 }
  0x48   : > { %685 = vmatpush1.bf16.msra.mxu0 %v1081_v43 }
  0x49   : > { %644 = vmatpush1.bf16.msra.mxu1 %v1042_v35 }
  0x4a   : > { %645 = vmatprep.subr.bf16.mxu1 %v1046_v37 }
  0x4b   : > { %703 = vmatmul.mubr.bf16.vlgmr.msra.gmra.mrb[0].mxu0 %v1085_v46 }
  0x4d   : > { %646 = vmatpush1.bf16.msra.mxu1 %v1048_v40 }
  0x4e   : > { %647 = vmatprep.subr.bf16.mxu1 %v1052_v42 }
  0x51   : > { %648 = vmatpush1.bf16.msra.mxu1 %v1054_v44 }
  0x52   : > { %649 = vmatprep.subr.bf16.mxu1 %v1058_v45 }
  0x55   : > { %650 = vmatpush1.bf16.msra.mxu1 %v1060_v47 }
  0x56   : > { %651 = vmatprep.subr.bf16.mxu1 %v1064_v48 }
  0x59   : > { %652 = vmatpush1.bf16.msra.mxu1 %v1066_v49 }
  0x5a   : > { %653 = vmatprep.subr.bf16.mxu1 %v1070_v50 }
  0x5d   : > { %654 = vmatpush1.bf16.msra.mxu1 %v1072_v51 }
  0x5e   : > { %655 = vmatprep.subr.bf16.mxu1 %v1076_v52 }
  0x61   : > { %656 = vmatpush1.bf16.msra.mxu1 %v1078_v53 }
  0x62   : > { %657 = vmatprep.subr.bf16.mxu1 %v1082_v54 }
  0x65   : > { %658 = vmatpush1.bf16.msra.mxu1 %v1084_v55 }
  0x68   : > { %660 = vmatmul.mubr.bf16.vlgmr.msra.gmra.mrb[0].mxu1 %v1086_v56 }
 0x11e   : > { %v704_v57 = vpop.f32.mrb[0].mxu0 }
 0x11f   : > { %v706_v58 = vpop.f32.mrb[1].mxu0 }
 0x120   : > { %v708_v59 = vpop.f32.mrb[2].mxu0 }
 0x121   : > { %v710_v60 = vpop.f32.mrb[3].mxu0 }
 0x13b   : > { %v661_v62 = vpop.f32.mrb[0].mxu1 }
 0x13c   : > { %v705_v63 = vadd.f32 %v704_v57, %v661_v62  ;;  %v663_v1 = vpop.f32.mrb[1].mxu1 }
 0x13d   : > { %v707_v2 = vadd.f32 %v706_v58, %v663_v1  ;;  %v665_v4 = vpop.f32.mrb[2].mxu1  ;;  %724 = sbr.rel (%p954_p11) target bundleno = 338 (0x152), region = 66 }
 0x13e   : > { %v713_v5 = vadd.f32 %v705_v63, %v315_v61  ;;  %v709_v6 = vadd.f32 %v708_v59, %v665_v4  ;;  %v667_v8 = vpop.f32.mrb[3].mxu1 }
 0x13f   : > { %v714_v9 = vadd.f32 %v707_v2, %v316_v0  ;;  %v711_v10 = vadd.f32 %v710_v60, %v667_v8 }
 0x140   : > { %717 = vst [vmem:[#allocation2] sm:$0xff] %v713_v5  ;;  %v715_v11 = vadd.f32 %v709_v6, %v317_v3 }
 0x141   : > { %718 = vst [vmem:[#allocation2 + $0x8] sm:$0xff] %v714_v9  ;;  %v716_v12 = vadd.f32 %v711_v10, %v318_v7 }
 0x142   : > { %719 = vst [vmem:[#allocation2 + $0x10] sm:$0xff] %v715_v11 }
 0x143   : > { %720 = vst [vmem:[#allocation2 + $0x18] sm:$0xff] %v716_v12 }
 0x147   : > { %v725_v16 = vld [vmem:[#allocation2] sm:$0xff] }
 0x148   : > { %v726_v19 = vld [vmem:[#allocation2 + $0x8] sm:$0xff]  ;;  %v741_v24 = vadd.f32 %v734_v22, %v725_v16 }
 0x149   : > { %v727_v20 = vld [vmem:[#allocation2 + $0x10] sm:$0xff]  ;;  %v742_v25 = vadd.f32 %v738_v23, %v726_v19 }
 0x14a   : > { %v728_v21 = vld [vmem:[#allocation2 + $0x18] sm:$0xff]  ;;  %v743_v26 = vadd.f32 %v734_v22, %v727_v20  ;;  %v745_v28 = vmax.f32 %v741_v24, 0.0 }
 0x14b   : > { %v744_v27 = vadd.f32 %v738_v23, %v728_v21  ;;  %v746_v29 = vmax.f32 %v742_v25, 0.0 }
 0x14c   : > { %v747_v30 = vmax.f32 %v743_v26, 0.0 }
 0x14d   : > { %v748_v31 = vmax.f32 %v744_v27, 0.0  ;;  %v963_v32 = vpack.c.bf16 %v746_v29, %v745_v28 }
 0x14f   : > { %v964_v33 = vpack.c.bf16 %v748_v31, %v747_v30  ;;  %761 = vst [vmem:[%s1285_s3] sm:$0xff] %v963_v32 }
 0x151   : > { %762 = vst [vmem:[%s1285_s3 + $0x8] sm:$0xff] %v964_v33 }
 0x152 PF: > { %s13_s16 = sadd.s32 1, %s1127_s16   ;;  %s1286_s12 = smov %s1115_s13 }
 0x153   : > { %p10_p12 = scmp.ge.s32.totalorder %s13_s16, 5   ;;  %s1287_s13 = smov %s1186_s20 }
 0x154   : > { %s1288_s14 = smov %s1123_s15  ;;  %s1289_s15 = smov %s1291_s17 }
 0x155   :  { %12 = sbr.rel (!%p10_p12) target bundleno = 3 (0x3), region = 113 }

// kernel: netg_forward.101
= control target key start
LH: loop header
LB: loop body
LE: loop exit
PB: predicated region body
PF: predicated region fallthrough
CT: control target
= control target key end

     0   :  { %s1043_s21 = smov 0   ;;  %s1045_s22 = smov 0   ;;  %s1140_s0 = inlined_call_operand.vmem [shape: bf16[16,640], index: 0, kind: input, shape index: {}]   ;;  %s1141_s1 = inlined_call_operand.vmem [shape: bf16[640,128], index: 1, kind: input, shape index: {}]   ;;  %s1142_s2 = inlined_call_operand.vmem [shape: f32[1,128], index: 2, kind: input, shape index: {}]   ;;  %s1143_s3 = inlined_call_operand.vmem [shape: bf16[16,128], index: 3, kind: input, shape index: {}]   ;;  %s1144_s4 = inlined_call_operand.vmem [shape: bf16[16,128], index: 4, kind: input, shape index: {}]   ;;  %s1145_s5 = inlined_call_operand.vmem [shape: bf16[16,128], index: 5, kind: input, shape index: {}]   ;;  %s1146_s6 = inlined_call_operand.vmem [shape: bf16[16,128], index: 6, kind: output, shape index: {}]  }
   0x1   :  { %s1047_s23 = smov 0   ;;  %s1049_s24 = smov 0  }
   0x2   :  { %s1051_s25 = smov 0  }
   0x3 LB: > { %s28_s26 = sadd.s32 1, %s999_s24  ;;  %p51_p1 = scmp.ne.s32.totalorder %s991_s22, %s987_s21  ;;  %s1003_s25 = sphi %s1051_s25, %s16_s25   ;;  %s999_s24 = sphi %s1049_s24, %s1150_s24   ;;  %s995_s23 = sphi %s1047_s23, %s1149_s23   ;;  %s991_s22 = sphi %s1045_s22, %s1148_s22   ;;  %s987_s21 = sphi %s1043_s21, %s1147_s21  }
   0x4   : > { %p29_p0 = scmp.ge.s32.totalorder %s28_s26, 5  ;;  %p52_p2 = scmp.eq.s32.totalorder %s1003_s25, 0 }
   0x5   : > { %s44_s28 = sadd.s32 1, %s991_s22  ;;  %p832_p5 = scmp.ge.s32.totalorder %s1003_s25, 5 }
   0x6   : > { %s1152_s26 = smov (%p29_p0, %s28_s26), 0  ;;  %p53_p3 = por %p52_p2, %p51_p1 }
   0x7   : > { %s40_s27 = ssub.s32 %s999_s24, %s1152_s26  ;;  %285 = sbr.rel (%p832_p5) target bundleno = 21 (0x15), region = 32 }
   0x8   : > { %p42_p4 = scmp.eq.s32.totalorder %s40_s27, 0 }
   0xa   : > { %s1078_s29 = scalar_select %p42_p4, %s991_s22, %s44_s28  }
   0xe   : > { %288 = sbr.rel (!%p53_p3) target bundleno = 21 (0x15), region = 36  ;;  %s290_s30 = sand.u32 (%p53_p3), 1, %s991_s22  }
   0xf   : > { %s834_s7 = sshll.u32 (%p53_p3), %s999_s24, 2  ;;  %s833_s8 = sshll.u32 (%p53_p3), %s290_s30, 3 }
  0x10   : > { %s297_s11 = scalar_lea.vmem (%p53_p3), %s1140_s0, %s834_s7  ;;  %s292_s12 = scalar_lea.vmem (%p53_p3), [#allocation3], %s833_s8 }
  0x11   : > { %v313_v0 = vld [vmem:[%s297_s11] sm:$0xf] (%p53_p3)  ;;  %v315_v1 = vld [vmem:[%s297_s11 + $0x14] sm:$0xf] (%p53_p3) }
  0x12   : > { %314 = vst [vmem:[%s292_s12] sm:$0xf] (%p53_p3), %v313_v0  ;;  %316 = vst [vmem:[%s292_s12 + $0x4] sm:$0xf] (%p53_p3), %v315_v1 }
  0x15 PF: > { %p835_p6 = scmp.ge.s32.totalorder %s1003_s25, 1  ;;  %p354_p7 = scmp.lt.s32.totalorder %s1003_s25, 6 }
  0x17   : > { %p355_p8 = pnand %p835_p6, %p354_p7 }
  0x18   : > { %s361_s13 = sand.u32 (!%p355_p8), 1, %s987_s21   ;;  %s837_s14 = sshll.u32 (!%p355_p8), %s995_s23, 4 }
  0x19   : > { %358 = sbr.rel (%p355_p8) target bundleno = 307 (0x133), region = 81  ;;  %s1090_s15 = sshll.u32 (!%p355_p8), %s361_s13, 3 }
  0x1a   : > { %p430_p9 = scmp.lt.s32.totalorder (!%p355_p8), %s837_s14, 79  ;;  %s363_s20 = scalar_lea.vmem (!%p355_p8), [#allocation3], %s1090_s15 }
  0x1b   : > { %p839_p10 = scmp.ne.s32.totalorder (!%p355_p8), %s995_s23, 0 }
  0x20   : > { %s1154_s14 = smov (!%p430_p9, %s837_s14), 79  ;;  %481 = sbr.rel (%p839_p10) target bundleno = 39 (0x27), region = 89 }
  0x21   : > { %s838_s16 = sshll.u32 %s1154_s14, 2  ;;  %v1005_v2 = vmov (!%p839_p10), 0.0  }
  0x22   : > { %s1095_s19 = scalar_lea.vmem %s1141_s1, %s838_s16  ;;  %482 = vst [vmem:[#allocation2] sm:$0xff] (!%p839_p10), %v1005_v2  ;;  %483 = vst [vmem:[#allocation2 + $0x8] sm:$0xff] (!%p839_p10), %v1005_v2 }
  0x27 PF: > { %v948_v3 = vld [vmem:[%s1095_s19] sm:$0xff]   ;;  %v1006_v4 = vmov 0.0   ;;  %v949_v5 = vld [vmem:[%s1095_s19 + $0x8] sm:$0xff]   ;;  %vm1007_vm0 = vmmov 0   ;;  %v950_v6 = vld [vmem:[%s1095_s19 + $0x10] sm:$0xff]   ;;  %p849_p11 = scmp.ne.s32.totalorder %s995_s23, 4 }
  0x28   : > { %885 = vmatprep.subr.bf16.mxu0 %v1006_v4  ;;  %901 = vmatprep.mubr.msk.bf16.mxu0 %vm1007_vm0, %v1006_v4  ;;  %v951_v7 = vld [vmem:[%s1095_s19 + $0x18] sm:$0xff]   ;;  %v952_v8 = vld [vmem:[%s1095_s19 + $0x20] sm:$0xff]   ;;  %v953_v9 = vld [vmem:[%s1095_s19 + $0x28] sm:$0xff]  }
  0x29   : > { %886 = vmatpush3.bf16.msra.mxu0 %v948_v3  ;;  %v954_v10 = vld [vmem:[%s1095_s19 + $0x30] sm:$0xff]   ;;  %v955_v11 = vld [vmem:[%s1095_s19 + $0x38] sm:$0xff]   ;;  %v484_v13 = vld [vmem:[#allocation2] sm:$0xff] }
  0x2a   : > { %887 = vmatprep.subr.bf16.mxu0 %v1006_v4  ;;  %v956_v12 = vld [vmem:[%s363_s20] sm:$0xff]   ;;  %v485_v15 = vld [vmem:[#allocation2 + $0x8] sm:$0xff]  ;;  %v864_v21 = vld [vmem:[%s1144_s4] sm:$0xff] (!%p849_p11)  }
  0x2b   : > { %v868_v22 = vld [vmem:[%s1145_s5] sm:$0xff] (!%p849_p11)   ;;  %v865_v23 = vunpack.c.l.bf16 (!%p849_p11), %v864_v21  ;;  %v866_v24 = vunpack.c.h.bf16 (!%p849_p11), %v864_v21 }
  0x2c   : > { %v869_v25 = vunpack.c.l.bf16 (!%p849_p11), %v868_v22  ;;  %v870_v26 = vunpack.c.h.bf16 (!%p849_p11), %v868_v22  ;;  %v850_v32 = vld [vmem:[%s1142_s2] ss:$0 sm:$0xff] (!%p849_p11) }
  0x2d   : > { %888 = vmatpush3.bf16.msra.mxu0 %v949_v5  ;;  %v632_v27 = vmul.f32 (!%p849_p11), 0.5, %v865_v23  ;;  %v633_v28 = vmul.f32 (!%p849_p11), 0.5, %v866_v24  ;;  %v860_v33 = vld [vmem:[%s1143_s3] sm:$0xff] (!%p849_p11)  }
  0x2e   : > { %889 = vmatprep.subr.bf16.mxu0 %v1006_v4  ;;  %v642_v29 = vmul.f32 (!%p849_p11), 0.5, %v869_v25  ;;  %v643_v30 = vmul.f32 (!%p849_p11), 0.5, %v870_v26  ;;  %v861_v36 = vunpack.c.l.bf16 (!%p849_p11), %v860_v33  ;;  %v862_v38 = vunpack.c.h.bf16 (!%p849_p11), %v860_v33 }
  0x2f   : > { %957 = vtanh.f32 (!%p849_p11), %v632_v27 }
  0x30   : > { %959 = vtanh.f32 (!%p849_p11), %v633_v28 }
  0x31   : > { %890 = vmatpush3.bf16.msra.mxu0 %v950_v6  ;;  %961 = vtanh.f32 (!%p849_p11), %v642_v29 }
  0x32   : > { %891 = vmatprep.subr.bf16.mxu0 %v1006_v4  ;;  %963 = vtanh.f32 (!%p849_p11), %v643_v30 }
  0x35   : > { %892 = vmatpush3.bf16.msra.mxu0 %v951_v7 }
  0x36   : > { %893 = vmatprep.subr.bf16.mxu0 %v1006_v4 }
  0x39   : > { %894 = vmatpush3.bf16.msra.mxu0 %v952_v8  ;;  %v958_v39 = vpop.eup (!%p849_p11), %957 }
  0x3a   : > { %895 = vmatprep.subr.bf16.mxu0 %v1006_v4  ;;  %v960_v40 = vpop.eup (!%p849_p11), %959  ;;  %v636_v42 = vadd.f32 (!%p849_p11), 1.0, %v958_v39 }
  0x3b   : > { %v962_v43 = vpop.eup (!%p849_p11), %961  ;;  %v637_v45 = vadd.f32 (!%p849_p11), 1.0, %v960_v40 }
  0x3c   : > { %v964_v46 = vpop.eup (!%p849_p11), %963  ;;  %v638_v47 = vmul.f32 (!%p849_p11), 0.5, %v636_v42  ;;  %v646_v48 = vadd.f32 (!%p849_p11), 1.0, %v962_v43 }
  0x3d   : > { %896 = vmatpush3.bf16.msra.mxu0 %v953_v9  ;;  %v639_v49 = vmul.f32 (!%p849_p11), 0.5, %v637_v45  ;;  %v647_v50 = vadd.f32 (!%p849_p11), 1.0, %v964_v46 }
  0x3e   : > { %897 = vmatprep.subr.bf16.mxu0 %v1006_v4  ;;  %v648_v52 = vmul.f32 (!%p849_p11), 0.5, %v646_v48 }
  0x3f   : > { %v649_v54 = vmul.f32 (!%p849_p11), 0.5, %v647_v50 }
  0x41   : > { %898 = vmatpush3.bf16.msra.mxu0 %v954_v10 }
  0x42   : > { %899 = vmatprep.subr.bf16.mxu0 %v1006_v4 }
  0x45   : > { %900 = vmatpush3.bf16.msra.mxu0 %v955_v11 }
  0x48   : > { %902 = vmatmul.mubr.bf16.vlgmr.msra.gmra.mrb[0].mxu0 %v956_v12 }
 0x11a   : > { %606 = sbr.rel (%p849_p11) target bundleno = 307 (0x133), region = 93 }
 0x11b   : > { %v592_v14 = vpop.f32.mrb[0].mxu0 }
 0x11c   : > { %v599_v16 = vadd.f32 %v592_v14, %v484_v13  ;;  %v903_v17 = vpop.f32.mrb[1].mxu0 }
 0x11d   : > { %v595_v18 = vpop.f32.mrb[2].mxu0 }
 0x11e   : > { %601 = vst [vmem:[#allocation2] sm:$0xff] %v599_v16  ;;  %v600_v19 = vadd.f32 %v595_v18, %v485_v15  ;;  %v904_v20 = vpop.f32.mrb[3].mxu0 }
 0x120   : > { %602 = vst [vmem:[#allocation2 + $0x8] sm:$0xff] %v600_v19 }
 0x125   : > { %v607_v31 = vld [vmem:[#allocation2] sm:$0xff] }
 0x126   : > { %v616_v35 = vadd.f32 %v850_v32, %v607_v31 }
 0x127   : > { %v608_v34 = vld [vmem:[#allocation2 + $0x8] sm:$0xff] }
 0x128   : > { %v617_v37 = vadd.f32 %v850_v32, %v608_v34  ;;  %v622_v41 = vadd.f32 %v861_v36, %v616_v35 }
 0x12a   : > { %v623_v44 = vadd.f32 %v862_v38, %v617_v37  ;;  %v640_v51 = vmul.f32 %v638_v47, %v622_v41 }
 0x12c   : > { %v641_v53 = vmul.f32 %v639_v49, %v623_v44  ;;  %v650_v55 = vmul.f32 %v648_v52, %v640_v51 }
 0x12e   : > { %v651_v56 = vmul.f32 %v649_v54, %v641_v53 }
 0x130   : > { %v874_v57 = vpack.c.bf16 %v651_v56, %v650_v55 }
 0x132   : > { %875 = vst [vmem:[%s1146_s6] sm:$0xff] %v874_v57  }
 0x133 PF: > { %s16_s25 = sadd.s32 1, %s1003_s25   ;;  %s1147_s21 = smov %s991_s22 }
 0x134   : > { %p13_p12 = scmp.ge.s32.totalorder %s16_s25, 7   ;;  %s1148_s22 = smov %s1078_s29 }
 0x135   : > { %s1149_s23 = smov %s999_s24  ;;  %s1150_s24 = smov %s1152_s26 }
 0x136   :  { %15 = sbr.rel (!%p13_p12) target bundleno = 3 (0x3), region = 143 }

// kernel: tile.53
= control target key start
LH: loop header
LB: loop body
LE: loop exit
PB: predicated region body
PF: predicated region fallthrough
CT: control target
= control target key end

     0   :  { %s22_s0 = inlined_call_operand.vmem [shape: f32[32], index: 0, kind: input, shape index: {}]   ;;  %s23_s1 = inlined_call_operand.vmem [shape: f32[4,32], index: 1, kind: output, shape index: {}]  }
   0x1   :  { %v4_v0 = vld [vmem:[%s22_s0] ss:$0 sm:$0xff] }
   0x2   :  { %5 = vst [vmem:[%s23_s1] sm:$0xf] %v4_v0 }

// kernel: mul.507
= control target key start
LH: loop header
LB: loop body
LE: loop exit
PB: predicated region body
PF: predicated region fallthrough
CT: control target
= control target key end

     0   :  { %vm7_vm0 = vcmask 261120   ;;  %s37_s8 = smov 32   ;;  %s38_s9 = smov 64   ;;  %vm13_vm1 = vcmask 1048320   ;;  %vm19_vm2 = vcmask 785920   ;;  %vm25_vm3 = vcmask 523520   ;;  %s55_s0 = inlined_call_operand.vmem [shape: f32[4,32], index: 0, kind: input, shape index: {}]   ;;  %s56_s1 = inlined_call_operand.vmem [shape: f32[128], index: 1, kind: output, shape index: {}]  }
   0x1   :  { %v4_v0 = vld [vmem:[%s55_s0] sm:$0xf]  ;;  %s36_s0 = smov 96  }
   0x2   :  { %5 = vst [vmem:[#allocation1] sm:$0xf] %v4_v0 }
   0x9   :  { %v10_v1 = vld [vmem:[#allocation1 + $0x3] sm:$0x1]   ;;  %v22_v2 = vld [vmem:[#allocation1 + $0x1] sm:$0x1]   ;;  %v6_v3 = vld [vmem:[#allocation1] sm:$0x1]  }
   0xa   :  { %11 = vrot.lane.b32.xlu0 %v10_v1, %s36_s0  ;;  %23 = vrot.lane.b32.xlu1 %v22_v2, %s37_s8  ;;  %v16_v4 = vld [vmem:[#allocation1 + $0x2] sm:$0x1]   ;;  %8 = vst.msk [vmem:[#allocation0] sm:$0x1] %vm7_vm0, %v6_v3  }
   0xe   :  { %17 = vrot.lane.b32.xlu0 %v16_v4, %s38_s9 }
  0x7c   :  { %v12_v5 = vpop.permute.xlu0 %11   ;;  %v24_v6 = vpop.permute.xlu1 %23  }
  0x7d   :  { %14 = vst.msk [vmem:[#allocation0] sm:$0x1] %vm13_vm1, %v12_v5  }
  0x80   :  { %v18_v7 = vpop.permute.xlu0 %17  }
  0x81   :  { %20 = vst.msk [vmem:[#allocation0] sm:$0x1] %vm19_vm2, %v18_v7  }
  0x82   :  { %26 = vst.msk [vmem:[#allocation0] sm:$0x1] %vm25_vm3, %v24_v6  }
  0x89   :  { %v30_v8 = vld [vmem:[#allocation0] sm:$0x1] }
  0x8a   :  { %32 = vst [vmem:[%s56_s1] sm:$0x1] %v30_v8 }

// kernel: tile.59
= control target key start
LH: loop header
LB: loop body
LE: loop exit
PB: predicated region body
PF: predicated region fallthrough
CT: control target
= control target key end

     0   :  { %vm7_vm0 = vcmask 261120   ;;  %s37_s8 = smov 32   ;;  %s38_s9 = smov 64   ;;  %vm13_vm1 = vcmask 1048320   ;;  %vm19_vm2 = vcmask 785920   ;;  %vm25_vm3 = vcmask 523520   ;;  %s55_s0 = inlined_call_operand.vmem [shape: f32[4,32], index: 0, kind: input, shape index: {}]   ;;  %s56_s1 = inlined_call_operand.vmem [shape: f32[1,128], index: 1, kind: output, shape index: {}]  }
   0x1   :  { %v4_v0 = vld [vmem:[%s55_s0] sm:$0xf]  ;;  %s36_s0 = smov 96  }
   0x2   :  { %5 = vst [vmem:[#allocation1] sm:$0xf] %v4_v0 }
   0x9   :  { %v10_v1 = vld [vmem:[#allocation1 + $0x3] sm:$0x1]   ;;  %v22_v2 = vld [vmem:[#allocation1 + $0x1] sm:$0x1]   ;;  %v6_v3 = vld [vmem:[#allocation1] sm:$0x1]  }
   0xa   :  { %11 = vrot.lane.b32.xlu0 %v10_v1, %s36_s0  ;;  %23 = vrot.lane.b32.xlu1 %v22_v2, %s37_s8  ;;  %v16_v4 = vld [vmem:[#allocation1 + $0x2] sm:$0x1]   ;;  %8 = vst.msk [vmem:[#allocation0] sm:$0x1] %vm7_vm0, %v6_v3  }
   0xe   :  { %17 = vrot.lane.b32.xlu0 %v16_v4, %s38_s9 }
  0x7c   :  { %v12_v5 = vpop.permute.xlu0 %11   ;;  %v24_v6 = vpop.permute.xlu1 %23  }
  0x7d   :  { %14 = vst.msk [vmem:[#allocation0] sm:$0x1] %vm13_vm1, %v12_v5  }
  0x80   :  { %v18_v7 = vpop.permute.xlu0 %17  }
  0x81   :  { %20 = vst.msk [vmem:[#allocation0] sm:$0x1] %vm19_vm2, %v18_v7  }
  0x82   :  { %26 = vst.msk [vmem:[#allocation0] sm:$0x1] %vm25_vm3, %v24_v6  }
  0x89   :  { %v30_v8 = vld [vmem:[#allocation0] sm:$0x1] }
  0x8a   :  { %32 = vst [vmem:[%s56_s1] sm:$0x1] %v30_v8 }

// kernel: netg_forward.104
= control target key start
LH: loop header
LB: loop body
LE: loop exit
PB: predicated region body
PF: predicated region fallthrough
CT: control target
= control target key end

     0   :  { %s819_s1 = inlined_call_operand.vmem [shape: bf16[384,128], index: 1, kind: input, shape index: {}]   ;;  %s820_s0 = inlined_call_operand.vmem [shape: bf16[32,384], index: 0, kind: input, shape index: {}]   ;;  %s821_s4 = inlined_call_operand.vmem [shape: bf16[32,128], index: 4, kind: input, shape index: {}]   ;;  %s822_s5 = inlined_call_operand.vmem [shape: bf16[32,128], index: 5, kind: input, shape index: {}]   ;;  %s823_s3 = inlined_call_operand.vmem [shape: bf16[32,128], index: 3, kind: input, shape index: {}]   ;;  %s824_s2 = inlined_call_operand.vmem [shape: f32[1,128], index: 2, kind: input, shape index: {}]   ;;  %s825_s6 = inlined_call_operand.vmem [shape: bf16[32,128], index: 6, kind: output, shape index: {}]  }
   0x1   :  { %v619_v0 = vld [vmem:[%s819_s1 + $0x40] sm:$0xff]   ;;  %v622_v3 = vld [vmem:[%s819_s1 + $0x48] sm:$0xff]   ;;  %v625_v6 = vld [vmem:[%s819_s1 + $0x50] sm:$0xff]  }
   0x2   :  { %v620_v1 = vld [vmem:[%s819_s1] sm:$0xff]   ;;  %561 = vmatprep.subr.bf16.mxu0 %v619_v0  ;;  %v623_v4 = vld [vmem:[%s819_s1 + $0x8] sm:$0xff]   ;;  %v626_v7 = vld [vmem:[%s819_s1 + $0x10] sm:$0xff]  }
   0x3   :  { %v621_v2 = vld [vmem:[%s819_s1 + $0x80] sm:$0xff]   ;;  %562 = vmatpush3.bf16.msra.mxu0 %v620_v1  ;;  %v624_v5 = vld [vmem:[%s819_s1 + $0x88] sm:$0xff]   ;;  %v627_v8 = vld [vmem:[%s819_s1 + $0x90] sm:$0xff]  }
   0x4   :  { %599 = vmatprep.subr.bf16.mxu1 %v621_v2  ;;  %563 = vmatprep.subr.bf16.mxu0 %v622_v3  ;;  %v628_v9 = vld [vmem:[%s819_s1 + $0x58] sm:$0xff]   ;;  %v631_v12 = vld [vmem:[%s819_s1 + $0x60] sm:$0xff]   ;;  %v634_v15 = vld [vmem:[%s819_s1 + $0x68] sm:$0xff]  }
   0x5   :  { %600 = vmatpush3.bf16.msra.mxu1 %v621_v2  ;;  %v629_v10 = vld [vmem:[%s819_s1 + $0x18] sm:$0xff]   ;;  %v633_v13 = vld [vmem:[%s819_s1 + $0xa0] sm:$0xff]   ;;  %v636_v16 = vld [vmem:[%s819_s1 + $0xa8] sm:$0xff]  }
   0x6   :  { %601 = vmatprep.subr.bf16.mxu1 %v624_v5  ;;  %v630_v11 = vld [vmem:[%s819_s1 + $0x98] sm:$0xff]   ;;  %v632_v14 = vld [vmem:[%s819_s1 + $0x20] sm:$0xff]   ;;  %v635_v17 = vld [vmem:[%s819_s1 + $0x28] sm:$0xff]  }
   0x7   :  { %564 = vmatpush3.bf16.msra.mxu0 %v623_v4  ;;  %v637_v18 = vld [vmem:[%s819_s1 + $0x70] sm:$0xff]   ;;  %v640_v21 = vld [vmem:[%s819_s1 + $0x78] sm:$0xff]   ;;  %v643_v26 = vld [vmem:[%s820_s0] ss:$12 sps:$4 sm:$0xff]  }
   0x8   :  { %565 = vmatprep.subr.bf16.mxu0 %v625_v6  ;;  %v638_v19 = vld [vmem:[%s819_s1 + $0x30] sm:$0xff]   ;;  %v642_v22 = vld [vmem:[%s819_s1 + $0xb8] sm:$0xff]   ;;  %v647_v28 = vld [vmem:[%s820_s0 + $0x20] ss:$12 sps:$4 sm:$0xff]  }
   0x9   :  { %602 = vmatpush3.bf16.msra.mxu1 %v624_v5  ;;  %v639_v20 = vld [vmem:[%s819_s1 + $0xb0] sm:$0xff]   ;;  %v641_v25 = vld [vmem:[%s819_s1 + $0x38] sm:$0xff]   ;;  %v532_v30 = vld [vmem:[%s821_s4] sm:$0xff]  }
   0xa   :  { %603 = vmatprep.subr.bf16.mxu1 %v627_v8  ;;  %v645_v23 = vld [vmem:[%s820_s0 + $0x4] ss:$12 sps:$4 sm:$0xff]   ;;  %v646_v24 = vld [vmem:[%s820_s0 + $0x8] ss:$12 sps:$4 sm:$0xff]   ;;  %v533_v31 = vunpack.c.l.bf16 %v532_v30  ;;  %v534_v33 = vunpack.c.h.bf16 %v532_v30  ;;  %v514_v63 = vld [vmem:[%s824_s2] ss:$0 sm:$0xff] }
   0xb   :  { %566 = vmatpush3.bf16.msra.mxu0 %v626_v7  ;;  %300 = vmatprep.mubr.bf16.mxu0 %v645_v23  ;;  %v648_v27 = vld [vmem:[%s820_s0 + $0x1c] ss:$12 sps:$4 sm:$0xff]   ;;  %v650_v29 = vld [vmem:[%s820_s0 + $0x18] ss:$12 sps:$4 sm:$0xff]  }
   0xc   :  { %567 = vmatprep.subr.bf16.mxu0 %v628_v9  ;;  %615 = vmatprep.mubr.bf16.mxu1 %v646_v24  ;;  %v540_v32 = vld [vmem:[%s822_s5] sm:$0xff]   ;;  %v420_v35 = vmul.f32 0.5, %v533_v31  ;;  %v558_v37 = vld [vmem:[%s821_s4 + $0x8] sm:$0xff]   ;;  %v421_v38 = vmul.f32 0.5, %v534_v33 }
   0xd   :  { %604 = vmatpush3.bf16.msra.mxu1 %v627_v8  ;;  %v541_v34 = vunpack.c.l.bf16 %v540_v32  ;;  %v542_v36 = vunpack.c.h.bf16 %v540_v32  ;;  %v559_v39 = vld [vmem:[%s822_s5 + $0x8] sm:$0xff]   ;;  %v537_v41 = vunpack.c.l.bf16 %v558_v37  ;;  %v538_v44 = vunpack.c.h.bf16 %v558_v37  ;;  %v524_v54 = vld [vmem:[%s823_s3] sm:$0xff]  }
   0xe   :  { %605 = vmatprep.subr.bf16.mxu1 %v630_v11  ;;  %651 = vtanh.f32 %v420_v35  ;;  %v545_v43 = vunpack.c.l.bf16 %v559_v39  ;;  %v546_v46 = vunpack.c.h.bf16 %v559_v39  ;;  %v525_v2 = vunpack.c.l.bf16 %v524_v54 }
   0xf   :  { %568 = vmatpush3.bf16.msra.mxu0 %v629_v10  ;;  %v440_v40 = vmul.f32 0.5, %v541_v34  ;;  %v441_v42 = vmul.f32 0.5, %v542_v36  ;;  %653 = vtanh.f32 %v421_v38  ;;  %v422_v45 = vmul.f32 0.5, %v537_v41 }
  0x10   :  { %569 = vmatprep.subr.bf16.mxu0 %v631_v12  ;;  %v442_v47 = vmul.f32 0.5, %v545_v43  ;;  %v423_v48 = vmul.f32 0.5, %v538_v44  ;;  %v443_v49 = vmul.f32 0.5, %v546_v46 }
  0x11   :  { %606 = vmatpush3.bf16.msra.mxu1 %v630_v11  ;;  %655 = vtanh.f32 %v440_v40  ;;  %v526_v11 = vunpack.c.h.bf16 %v524_v54 }
  0x12   :  { %607 = vmatprep.subr.bf16.mxu1 %v633_v13  ;;  %657 = vtanh.f32 %v441_v42 }
  0x13   :  { %570 = vmatpush3.bf16.msra.mxu0 %v632_v14  ;;  %659 = vtanh.f32 %v422_v45 }
  0x14   :  { %571 = vmatprep.subr.bf16.mxu0 %v634_v15  ;;  %661 = vtanh.f32 %v442_v47 }
  0x15   :  { %608 = vmatpush3.bf16.msra.mxu1 %v633_v13  ;;  %663 = vtanh.f32 %v423_v48 }
  0x16   :  { %609 = vmatprep.subr.bf16.mxu1 %v636_v16  ;;  %665 = vtanh.f32 %v443_v49 }
  0x17   :  { %572 = vmatpush3.bf16.msra.mxu0 %v635_v17 }
  0x18   :  { %573 = vmatprep.subr.bf16.mxu0 %v637_v18  ;;  %v652_v50 = vpop.eup %651  ;;  %v557_v18 = vld [vmem:[%s823_s3 + $0x8] sm:$0xff]  }
  0x19   :  { %610 = vmatpush3.bf16.msra.mxu1 %v636_v16  ;;  %v654_v52 = vpop.eup %653  ;;  %v428_v55 = vadd.f32 1.0, %v652_v50  ;;  %v530_v37 = vunpack.c.h.bf16 %v557_v18 }
  0x1a   :  { %611 = vmatprep.subr.bf16.mxu1 %v639_v20  ;;  %v429_v4 = vadd.f32 1.0, %v654_v52 }
  0x1b   :  { %574 = vmatpush3.bf16.msra.mxu0 %v638_v19  ;;  %v656_v56 = vpop.eup %655  ;;  %v432_v5 = vmul.f32 0.5, %v428_v55 }
  0x1c   :  { %575 = vmatprep.subr.bf16.mxu0 %v640_v21  ;;  %v658_v60 = vpop.eup %657  ;;  %v448_v6 = vadd.f32 1.0, %v656_v56  ;;  %v433_v16 = vmul.f32 0.5, %v429_v4 }
  0x1d   :  { %612 = vmatpush3.bf16.msra.mxu1 %v639_v20  ;;  %v660_v8 = vpop.eup %659  ;;  %v449_v12 = vadd.f32 1.0, %v658_v60 }
  0x1e   :  { %613 = vmatprep.subr.bf16.mxu1 %v642_v22  ;;  %v662_v13 = vpop.eup %661  ;;  %v452_v20 = vmul.f32 0.5, %v448_v6 }
  0x1f   :  { %576 = vmatpush3.bf16.msra.mxu0 %v641_v25  ;;  %v664_v19 = vpop.eup %663  ;;  %v450_v36 = vadd.f32 1.0, %v662_v13 }
  0x20   :  { %v666_v23 = vpop.eup %665  ;;  %v431_v34 = vadd.f32 1.0, %v664_v19 }
  0x21   :  { %614 = vmatpush3.bf16.msra.mxu1 %v642_v22  ;;  %v430_v22 = vadd.f32 1.0, %v660_v8  ;;  %v451_v38 = vadd.f32 1.0, %v666_v23  ;;  %v454_v48 = vmul.f32 0.5, %v450_v36 }
  0x22   :  { %301 = vmatmul.mubr.bf16.vlgmr.msra.gmra.mrb[0].mxu0 %v643_v26  ;;  %v453_v26 = vmul.f32 0.5, %v449_v12  ;;  %v435_v46 = vmul.f32 0.5, %v431_v34 }
  0x23   :  { %308 = vmatprep.mubr.bf16.mxu0 %v648_v27  ;;  %v434_v35 = vmul.f32 0.5, %v430_v22  ;;  %v455_v50 = vmul.f32 0.5, %v451_v38 }
  0x24   :  { %616 = vmatmul.mubr.bf16.vlgmr.msra.gmra.mrb[0].mxu1 %v647_v28 }
  0x2a   :  { %309 = vmatmul.mubr.bf16.gmra.mrb[4].mxu0 %v650_v29  ;;  %v529_v29 = vunpack.c.l.bf16 %v557_v18 }
  0xf5   :  { %v577_v51 = vpop.f32.mrb[0].mxu0 }
  0xf6   :  { %v578_v53 = vpop.f32.mrb[1].mxu0 }
  0xf7   :  { %v579_v57 = vadd.f32 %v578_v53, %v577_v51  ;;  %v580_v58 = vpop.f32.mrb[2].mxu0  ;;  %v617_v59 = vpop.f32.mrb[0].mxu1 }
  0xf8   :  { %v581_v61 = vpop.f32.mrb[3].mxu0  ;;  %v351_v62 = vpop.f32.mrb[1].mxu1 }
  0xf9   :  { %v582_v0 = vadd.f32 %v581_v61, %v580_v58  ;;  %v352_v1 = vadd.f32 %v579_v57, %v351_v62  ;;  %v618_v3 = vpop.f32.mrb[2].mxu1 }
  0xfa   :  { %v354_v7 = vpop.f32.mrb[3].mxu1 }
  0xfb   :  { %v388_v9 = vadd.f32 %v514_v63, %v352_v1  ;;  %v355_v10 = vadd.f32 %v582_v0, %v354_v7 }
  0xfd   :  { %v400_v14 = vadd.f32 %v525_v2, %v388_v9  ;;  %v389_v15 = vadd.f32 %v514_v63, %v355_v10  ;;  %v583_v17 = vpop.f32.mrb[4].mxu0 }
  0xfe   :  { %v584_v21 = vpop.f32.mrb[5].mxu0 }
  0xff   :  { %v436_v24 = vmul.f32 %v432_v5, %v400_v14  ;;  %v401_v25 = vadd.f32 %v526_v11, %v389_v15  ;;  %v585_v27 = vadd.f32 %v584_v21, %v583_v17  ;;  %v586_v28 = vpop.f32.mrb[6].mxu0 }
 0x100   :  { %v587_v30 = vpop.f32.mrb[7].mxu0 }
 0x101   :  { %v437_v31 = vmul.f32 %v433_v16, %v401_v25  ;;  %v360_v32 = vadd.f32 %v617_v59, %v585_v27  ;;  %v588_v33 = vadd.f32 %v587_v30, %v586_v28  ;;  %v456_v39 = vmul.f32 %v452_v20, %v436_v24 }
 0x103   :  { %v457_v40 = vmul.f32 %v453_v26, %v437_v31  ;;  %v390_v41 = vadd.f32 %v514_v63, %v360_v32  ;;  %v363_v42 = vadd.f32 %v618_v3, %v588_v33 }
 0x105   :  { %v550_v43 = vpack.c.bf16 %v457_v40, %v456_v39  ;;  %v402_v44 = vadd.f32 %v529_v29, %v390_v41  ;;  %v391_v45 = vadd.f32 %v514_v63, %v363_v42 }
 0x107   :  { %551 = vst [vmem:[%s825_s6] sm:$0xff] %v550_v43   ;;  %v438_v47 = vmul.f32 %v434_v35, %v402_v44  ;;  %v403_v49 = vadd.f32 %v530_v37, %v391_v45 }
 0x109   :  { %v439_v51 = vmul.f32 %v435_v46, %v403_v49  ;;  %v458_v52 = vmul.f32 %v454_v48, %v438_v47 }
 0x10b   :  { %v459_v53 = vmul.f32 %v455_v50, %v439_v51 }
 0x10d   :  { %v555_v54 = vpack.c.bf16 %v459_v53, %v458_v52 }
 0x10f   :  { %560 = vst [vmem:[%s825_s6 + $0x8] sm:$0xff] %v555_v54  }

// kernel: tile.63
= control target key start
LH: loop header
LB: loop body
LE: loop exit
PB: predicated region body
PF: predicated region fallthrough
CT: control target
= control target key end

     0   :  { %s22_s0 = inlined_call_operand.vmem [shape: f32[16], index: 0, kind: input, shape index: {}]   ;;  %s23_s1 = inlined_call_operand.vmem [shape: f32[4,16], index: 1, kind: output, shape index: {}]  }
   0x1   :  { %v4_v0 = vld [vmem:[%s22_s0] ss:$0 sm:$0xff] }
   0x2   :  { %5 = vst [vmem:[%s23_s1] sm:$0xf] %v4_v0 }

// kernel: mul.522
= control target key start
LH: loop header
LB: loop body
LE: loop exit
PB: predicated region body
PF: predicated region fallthrough
CT: control target
= control target key end

     0   :  { %vm7_vm0 = vcmask 130048   ;;  %s37_s8 = smov 16   ;;  %s38_s9 = smov 32   ;;  %vm13_vm1 = vcmask 523648   ;;  %vm19_vm2 = vcmask 392448   ;;  %vm25_vm3 = vcmask 261248   ;;  %s55_s0 = inlined_call_operand.vmem [shape: f32[4,16], index: 0, kind: input, shape index: {}]   ;;  %s56_s1 = inlined_call_operand.vmem [shape: f32[64], index: 1, kind: output, shape index: {}]  }
   0x1   :  { %v4_v0 = vld [vmem:[%s55_s0] sm:$0xf]  ;;  %s36_s0 = smov 48  }
   0x2   :  { %5 = vst [vmem:[#allocation1] sm:$0xf] %v4_v0 }
   0x9   :  { %v10_v1 = vld [vmem:[#allocation1 + $0x3] sm:$0x1]   ;;  %v22_v2 = vld [vmem:[#allocation1 + $0x1] sm:$0x1]   ;;  %v6_v3 = vld [vmem:[#allocation1] sm:$0x1]  }
   0xa   :  { %11 = vrot.lane.b32.xlu0 %v10_v1, %s36_s0  ;;  %23 = vrot.lane.b32.xlu1 %v22_v2, %s37_s8  ;;  %v16_v4 = vld [vmem:[#allocation1 + $0x2] sm:$0x1]   ;;  %8 = vst.msk [vmem:[#allocation0] sm:$0x1] %vm7_vm0, %v6_v3  }
   0xe   :  { %17 = vrot.lane.b32.xlu0 %v16_v4, %s38_s9 }
  0x7c   :  { %v12_v5 = vpop.permute.xlu0 %11   ;;  %v24_v6 = vpop.permute.xlu1 %23  }
  0x7d   :  { %14 = vst.msk [vmem:[#allocation0] sm:$0x1] %vm13_vm1, %v12_v5  }
  0x80   :  { %v18_v7 = vpop.permute.xlu0 %17  }
  0x81   :  { %20 = vst.msk [vmem:[#allocation0] sm:$0x1] %vm19_vm2, %v18_v7  }
  0x82   :  { %26 = vst.msk [vmem:[#allocation0] sm:$0x1] %vm25_vm3, %v24_v6  }
  0x89   :  { %v30_v8 = vld [vmem:[#allocation0] sm:$0x1] }
  0x8a   :  { %32 = vst [vmem:[%s56_s1] sm:$0x1] %v30_v8 }

// kernel: tile.69
= control target key start
LH: loop header
LB: loop body
LE: loop exit
PB: predicated region body
PF: predicated region fallthrough
CT: control target
= control target key end

     0   :  { %vm7_vm0 = vcmask 130048   ;;  %s37_s8 = smov 16   ;;  %s38_s9 = smov 32   ;;  %vm13_vm1 = vcmask 523648   ;;  %vm19_vm2 = vcmask 392448   ;;  %vm25_vm3 = vcmask 261248   ;;  %s55_s0 = inlined_call_operand.vmem [shape: f32[4,16], index: 0, kind: input, shape index: {}]   ;;  %s56_s1 = inlined_call_operand.vmem [shape: f32[1,64], index: 1, kind: output, shape index: {}]  }
   0x1   :  { %v4_v0 = vld [vmem:[%s55_s0] sm:$0xf]  ;;  %s36_s0 = smov 48  }
   0x2   :  { %5 = vst [vmem:[#allocation1] sm:$0xf] %v4_v0 }
   0x9   :  { %v10_v1 = vld [vmem:[#allocation1 + $0x3] sm:$0x1]   ;;  %v22_v2 = vld [vmem:[#allocation1 + $0x1] sm:$0x1]   ;;  %v6_v3 = vld [vmem:[#allocation1] sm:$0x1]  }
   0xa   :  { %11 = vrot.lane.b32.xlu0 %v10_v1, %s36_s0  ;;  %23 = vrot.lane.b32.xlu1 %v22_v2, %s37_s8  ;;  %v16_v4 = vld [vmem:[#allocation1 + $0x2] sm:$0x1]   ;;  %8 = vst.msk [vmem:[#allocation0] sm:$0x1] %vm7_vm0, %v6_v3  }
   0xe   :  { %17 = vrot.lane.b32.xlu0 %v16_v4, %s38_s9 }
  0x7c   :  { %v12_v5 = vpop.permute.xlu0 %11   ;;  %v24_v6 = vpop.permute.xlu1 %23  }
  0x7d   :  { %14 = vst.msk [vmem:[#allocation0] sm:$0x1] %vm13_vm1, %v12_v5  }
  0x80   :  { %v18_v7 = vpop.permute.xlu0 %17  }
  0x81   :  { %20 = vst.msk [vmem:[#allocation0] sm:$0x1] %vm19_vm2, %v18_v7  }
  0x82   :  { %26 = vst.msk [vmem:[#allocation0] sm:$0x1] %vm25_vm3, %v24_v6  }
  0x89   :  { %v30_v8 = vld [vmem:[#allocation0] sm:$0x1] }
  0x8a   :  { %32 = vst [vmem:[%s56_s1] sm:$0x1] %v30_v8 }

// kernel: mul.537
= control target key start
LH: loop header
LB: loop body
LE: loop exit
PB: predicated region body
PF: predicated region fallthrough
CT: control target
= control target key end

     0   :  { %vm7_vm0 = vcmask 64512   ;;  %s37_s8 = smov 8   ;;  %s38_s9 = smov 16   ;;  %vm13_vm1 = vcmask 261312   ;;  %vm19_vm2 = vcmask 195712   ;;  %vm25_vm3 = vcmask 130112   ;;  %s55_s0 = inlined_call_operand.vmem [shape: f32[4,8], index: 0, kind: input, shape index: {}]   ;;  %s56_s1 = inlined_call_operand.vmem [shape: f32[32], index: 1, kind: output, shape index: {}]  }
   0x1   :  { %v4_v0 = vld [vmem:[%s55_s0] sm:$0xf]  ;;  %s36_s0 = smov 24  }
   0x2   :  { %5 = vst [vmem:[#allocation1] sm:$0xf] %v4_v0 }
   0x9   :  { %v10_v1 = vld [vmem:[#allocation1 + $0x3] sm:$0x1]   ;;  %v22_v2 = vld [vmem:[#allocation1 + $0x1] sm:$0x1]   ;;  %v6_v3 = vld [vmem:[#allocation1] sm:$0x1]  }
   0xa   :  { %11 = vrot.lane.b32.xlu0 %v10_v1, %s36_s0  ;;  %23 = vrot.lane.b32.xlu1 %v22_v2, %s37_s8  ;;  %v16_v4 = vld [vmem:[#allocation1 + $0x2] sm:$0x1]   ;;  %8 = vst.msk [vmem:[#allocation0] sm:$0x1] %vm7_vm0, %v6_v3  }
   0xe   :  { %17 = vrot.lane.b32.xlu0 %v16_v4, %s38_s9 }
  0x7c   :  { %v12_v5 = vpop.permute.xlu0 %11   ;;  %v24_v6 = vpop.permute.xlu1 %23  }
  0x7d   :  { %14 = vst.msk [vmem:[#allocation0] sm:$0x1] %vm13_vm1, %v12_v5  }
  0x80   :  { %v18_v7 = vpop.permute.xlu0 %17  }
  0x81   :  { %20 = vst.msk [vmem:[#allocation0] sm:$0x1] %vm19_vm2, %v18_v7  }
  0x82   :  { %26 = vst.msk [vmem:[#allocation0] sm:$0x1] %vm25_vm3, %v24_v6  }
  0x89   :  { %v30_v8 = vld [vmem:[#allocation0] sm:$0x1] }
  0x8a   :  { %32 = vst [vmem:[%s56_s1] sm:$0x1] %v30_v8 }

// kernel: tile.73
= control target key start
LH: loop header
LB: loop body
LE: loop exit
PB: predicated region body
PF: predicated region fallthrough
CT: control target
= control target key end

     0   :  { %s22_s0 = inlined_call_operand.vmem [shape: f32[8], index: 0, kind: input, shape index: {}]   ;;  %s23_s1 = inlined_call_operand.vmem [shape: f32[4,8], index: 1, kind: output, shape index: {}]  }
   0x1   :  { %v4_v0 = vld [vmem:[%s22_s0] ss:$0 sm:$0xff] }
   0x2   :  { %5 = vst [vmem:[%s23_s1] sm:$0xf] %v4_v0 }

// kernel: tile.79
= control target key start
LH: loop header
LB: loop body
LE: loop exit
PB: predicated region body
PF: predicated region fallthrough
CT: control target
= control target key end

     0   :  { %vm7_vm0 = vcmask 64512   ;;  %s37_s8 = smov 8   ;;  %s38_s9 = smov 16   ;;  %vm13_vm1 = vcmask 261312   ;;  %vm19_vm2 = vcmask 195712   ;;  %vm25_vm3 = vcmask 130112   ;;  %s55_s0 = inlined_call_operand.vmem [shape: f32[4,8], index: 0, kind: input, shape index: {}]   ;;  %s56_s1 = inlined_call_operand.vmem [shape: f32[1,32], index: 1, kind: output, shape index: {}]  }
   0x1   :  { %v4_v0 = vld [vmem:[%s55_s0] sm:$0xf]  ;;  %s36_s0 = smov 24  }
   0x2   :  { %5 = vst [vmem:[#allocation1] sm:$0xf] %v4_v0 }
   0x9   :  { %v10_v1 = vld [vmem:[#allocation1 + $0x3] sm:$0x1]   ;;  %v22_v2 = vld [vmem:[#allocation1 + $0x1] sm:$0x1]   ;;  %v6_v3 = vld [vmem:[#allocation1] sm:$0x1]  }
   0xa   :  { %11 = vrot.lane.b32.xlu0 %v10_v1, %s36_s0  ;;  %23 = vrot.lane.b32.xlu1 %v22_v2, %s37_s8  ;;  %v16_v4 = vld [vmem:[#allocation1 + $0x2] sm:$0x1]   ;;  %8 = vst.msk [vmem:[#allocation0] sm:$0x1] %vm7_vm0, %v6_v3  }
   0xe   :  { %17 = vrot.lane.b32.xlu0 %v16_v4, %s38_s9 }
  0x7c   :  { %v12_v5 = vpop.permute.xlu0 %11   ;;  %v24_v6 = vpop.permute.xlu1 %23  }
  0x7d   :  { %14 = vst.msk [vmem:[#allocation0] sm:$0x1] %vm13_vm1, %v12_v5  }
  0x80   :  { %v18_v7 = vpop.permute.xlu0 %17  }
  0x81   :  { %20 = vst.msk [vmem:[#allocation0] sm:$0x1] %vm19_vm2, %v18_v7  }
  0x82   :  { %26 = vst.msk [vmem:[#allocation0] sm:$0x1] %vm25_vm3, %v24_v6  }
  0x89   :  { %v30_v8 = vld [vmem:[#allocation0] sm:$0x1] }
  0x8a   :  { %32 = vst [vmem:[%s56_s1] sm:$0x1] %v30_v8 }

// kernel: netg_forward.107
= control target key start
LH: loop header
LB: loop body
LE: loop exit
PB: predicated region body
PF: predicated region fallthrough
CT: control target
= control target key end

     0   :  { %s1634_s1 = inlined_call_operand.vmem [shape: bf16[256,128], index: 1, kind: input, shape index: {}]   ;;  %s1635_s0 = inlined_call_operand.vmem [shape: bf16[128,256], index: 0, kind: input, shape index: {}]   ;;  %s1636_s4 = inlined_call_operand.vmem [shape: bf16[128,128], index: 4, kind: input, shape index: {}]   ;;  %s1637_s5 = inlined_call_operand.vmem [shape: bf16[128,128], index: 5, kind: input, shape index: {}]   ;;  %s1638_s3 = inlined_call_operand.vmem [shape: bf16[128,128], index: 3, kind: input, shape index: {}]   ;;  %s1639_s2 = inlined_call_operand.vmem [shape: f32[1,128], index: 2, kind: input, shape index: {}]   ;;  %s1640_s6 = inlined_call_operand.vmem [shape: bf16[128,128], index: 6, kind: output, shape index: {}]  }
   0x1   :  { %v1120_v0 = vld [vmem:[%s1634_s1 + $0x40] sm:$0xff]   ;;  %v1122_v2 = vld [vmem:[%s1634_s1 + $0x48] sm:$0xff]   ;;  %v1124_v4 = vld [vmem:[%s1634_s1 + $0x50] sm:$0xff]  }
   0x2   :  { %v1121_v1 = vld [vmem:[%s1634_s1] sm:$0xff]   ;;  %1040 = vmatprep.subr.bf16.mxu0 %v1120_v0  ;;  %1104 = vmatprep.subr.bf16.mxu1 %v1120_v0  ;;  %v1123_v3 = vld [vmem:[%s1634_s1 + $0x8] sm:$0xff]   ;;  %v1125_v5 = vld [vmem:[%s1634_s1 + $0x10] sm:$0xff]  }
   0x3   :  { %1041 = vmatpush3.bf16.msra.mxu0 %v1121_v1  ;;  %1112 = vmatpush3.bf16.msra.mxu1 %v1121_v1  ;;  %v1126_v6 = vld [vmem:[%s1634_s1 + $0x58] sm:$0xff]   ;;  %v1128_v8 = vld [vmem:[%s1634_s1 + $0x60] sm:$0xff]   ;;  %v1130_v10 = vld [vmem:[%s1634_s1 + $0x68] sm:$0xff]  }
   0x4   :  { %1042 = vmatprep.subr.bf16.mxu0 %v1122_v2  ;;  %1105 = vmatprep.subr.bf16.mxu1 %v1122_v2  ;;  %v1127_v7 = vld [vmem:[%s1634_s1 + $0x18] sm:$0xff]   ;;  %v1129_v9 = vld [vmem:[%s1634_s1 + $0x20] sm:$0xff]   ;;  %v1131_v13 = vld [vmem:[%s1634_s1 + $0x28] sm:$0xff]  }
   0x5   :  { %v1138_v11 = vld [vmem:[%s1635_s0 + $0x4] ss:$8 sps:$4 sm:$0xff]   ;;  %v1132_v14 = vld [vmem:[%s1634_s1 + $0x70] sm:$0xff]   ;;  %v1134_v16 = vld [vmem:[%s1634_s1 + $0x78] sm:$0xff]  }
   0x6   :  { %v1141_v12 = vld [vmem:[%s1635_s0 + $0x44] ss:$8 sps:$4 sm:$0xff]   ;;  %316 = vmatprep.mubr.bf16.mxu0 %v1138_v11  ;;  %v1133_v15 = vld [vmem:[%s1634_s1 + $0x30] sm:$0xff]   ;;  %v1135_v17 = vld [vmem:[%s1634_s1 + $0x38] sm:$0xff]  }
   0x7   :  { %1043 = vmatpush3.bf16.msra.mxu0 %v1123_v3  ;;  %1113 = vmatpush3.bf16.msra.mxu1 %v1123_v3  ;;  %v1136_v18 = vld [vmem:[%s1635_s0] ss:$8 sps:$4 sm:$0xff]   ;;  %v1142_v20 = vld [vmem:[%s1635_s0 + $0x14] ss:$8 sps:$4 sm:$0xff]   ;;  %v1146_v22 = vld [vmem:[%s1635_s0 + $0x10] ss:$8 sps:$4 sm:$0xff]  }
   0x8   :  { %1044 = vmatprep.subr.bf16.mxu0 %v1124_v4  ;;  %1106 = vmatprep.subr.bf16.mxu1 %v1124_v4  ;;  %v1139_v19 = vld [vmem:[%s1635_s0 + $0x40] ss:$8 sps:$4 sm:$0xff]   ;;  %v1144_v21 = vld [vmem:[%s1635_s0 + $0x54] ss:$8 sps:$4 sm:$0xff]   ;;  %v1147_v23 = vld [vmem:[%s1635_s0 + $0x50] ss:$8 sps:$4 sm:$0xff]  }
   0x9   :  { %348 = vmatprep.mubr.bf16.mxu1 %v1141_v12  ;;  %v1148_v24 = vld [vmem:[%s1635_s0 + $0x24] ss:$8 sps:$4 sm:$0xff]   ;;  %v1152_v26 = vld [vmem:[%s1635_s0 + $0x20] ss:$8 sps:$4 sm:$0xff]   ;;  %v1154_v28 = vld [vmem:[%s1635_s0 + $0x34] ss:$8 sps:$4 sm:$0xff]  }
   0xa   :  { %v1150_v25 = vld [vmem:[%s1635_s0 + $0x64] ss:$8 sps:$4 sm:$0xff]   ;;  %v1153_v27 = vld [vmem:[%s1635_s0 + $0x60] ss:$8 sps:$4 sm:$0xff]   ;;  %v1156_v29 = vld [vmem:[%s1635_s0 + $0x74] ss:$8 sps:$4 sm:$0xff]  }
   0xb   :  { %1045 = vmatpush3.bf16.msra.mxu0 %v1125_v5  ;;  %1114 = vmatpush3.bf16.msra.mxu1 %v1125_v5  ;;  %v1158_v30 = vld [vmem:[%s1635_s0 + $0x30] ss:$8 sps:$4 sm:$0xff]   ;;  %v909_v32 = vld [vmem:[%s1636_s4] sm:$0xff]   ;;  %v1019_v46 = vld [vmem:[%s1636_s4 + $0x8] sm:$0xff]  }
   0xc   :  { %1046 = vmatprep.subr.bf16.mxu0 %v1126_v6  ;;  %1107 = vmatprep.subr.bf16.mxu1 %v1126_v6  ;;  %v1159_v31 = vld [vmem:[%s1635_s0 + $0x70] ss:$8 sps:$4 sm:$0xff]   ;;  %v1022_v33 = vld [vmem:[%s1636_s4 + $0x20] sm:$0xff]   ;;  %v910_v35 = vunpack.c.l.bf16 %v909_v32  ;;  %v911_v41 = vunpack.c.h.bf16 %v909_v32  ;;  %v1023_v49 = vld [vmem:[%s1636_s4 + $0x28] sm:$0xff]   ;;  %v914_v53 = vunpack.c.l.bf16 %v1019_v46  ;;  %v915_v61 = vunpack.c.h.bf16 %v1019_v46 }
   0xd   :  { %v941_v34 = vld [vmem:[%s1637_s5] sm:$0xff]   ;;  %v926_v37 = vunpack.c.l.bf16 %v1022_v33  ;;  %v927_v45 = vunpack.c.h.bf16 %v1022_v33  ;;  %v1026_v51 = vld [vmem:[%s1637_s5 + $0x8] sm:$0xff]   ;;  %v930_v56 = vunpack.c.l.bf16 %v1023_v49  ;;  %v1382_v0 = vld [vmem:[%s1636_s4 + $0x10] sm:$0xff]   ;;  %v931_v2 = vunpack.c.h.bf16 %v1023_v49 }
   0xe   :  { %v1029_v36 = vld [vmem:[%s1637_s5 + $0x20] sm:$0xff]   ;;  %v942_v38 = vunpack.c.l.bf16 %v941_v34  ;;  %v567_v40 = vmul.f32 0.5, %v910_v35  ;;  %v943_v43 = vunpack.c.h.bf16 %v941_v34  ;;  %v568_v50 = vmul.f32 0.5, %v911_v41  ;;  %v1030_v54 = vld [vmem:[%s1637_s5 + $0x28] sm:$0xff]   ;;  %v1387_v3 = vld [vmem:[%s1637_s5 + $0x10] sm:$0xff]  }
   0xf   :  { %1047 = vmatpush3.bf16.msra.mxu0 %v1127_v7  ;;  %1115 = vmatpush3.bf16.msra.mxu1 %v1127_v7  ;;  %v958_v39 = vunpack.c.l.bf16 %v1029_v36  ;;  %v575_v42 = vmul.f32 0.5, %v926_v37  ;;  %v959_v48 = vunpack.c.h.bf16 %v1029_v36  ;;  %v576_v55 = vmul.f32 0.5, %v927_v45 }
  0x10   :  { %1048 = vmatprep.subr.bf16.mxu0 %v1128_v8  ;;  %1108 = vmatprep.subr.bf16.mxu1 %v1128_v8  ;;  %v647_v44 = vmul.f32 0.5, %v942_v38  ;;  %1160 = vtanh.f32 %v567_v40  ;;  %v648_v52 = vmul.f32 0.5, %v943_v43  ;;  %v946_v58 = vunpack.c.l.bf16 %v1026_v51 }
  0x11   :  { %v655_v47 = vmul.f32 0.5, %v958_v39  ;;  %1162 = vtanh.f32 %v575_v42  ;;  %v656_v57 = vmul.f32 0.5, %v959_v48  ;;  %v962_v59 = vunpack.c.l.bf16 %v1030_v54 }
  0x12   :  { %1164 = vtanh.f32 %v647_v44  ;;  %v569_v60 = vmul.f32 0.5, %v914_v53  ;;  %v577_v62 = vmul.f32 0.5, %v930_v56  ;;  %v947_v63 = vunpack.c.h.bf16 %v1026_v51 }
  0x13   :  { %1049 = vmatpush3.bf16.msra.mxu0 %v1129_v9  ;;  %1116 = vmatpush3.bf16.msra.mxu1 %v1129_v9  ;;  %1166 = vtanh.f32 %v655_v47  ;;  %v649_v1 = vmul.f32 0.5, %v946_v58  ;;  %v657_v4 = vmul.f32 0.5, %v962_v59  ;;  %v963_v5 = vunpack.c.h.bf16 %v1030_v54 }
  0x14   :  { %1050 = vmatprep.subr.bf16.mxu0 %v1130_v10  ;;  %1109 = vmatprep.subr.bf16.mxu1 %v1130_v10  ;;  %1168 = vtanh.f32 %v568_v50  ;;  %v570_v6 = vmul.f32 0.5, %v915_v61  ;;  %v918_v7 = vunpack.c.l.bf16 %v1382_v0  ;;  %v650_v9 = vmul.f32 0.5, %v947_v63  ;;  %v1427_v50 = vld [vmem:[%s1638_s3 + $0x8] sm:$0xff]  }
  0x15   :  { %1170 = vtanh.f32 %v648_v52  ;;  %v950_v10 = vunpack.c.l.bf16 %v1387_v3  ;;  %v578_v12 = vmul.f32 0.5, %v931_v2  ;;  %v919_v36 = vunpack.c.h.bf16 %v1382_v0 }
  0x16   :  { %1172 = vtanh.f32 %v576_v55  ;;  %v951_v52 = vunpack.c.h.bf16 %v1387_v3  ;;  %v882_v0 = vunpack.c.l.bf16 %v1427_v50  ;;  %v1450_v3 = vld [vmem:[%s1636_s4 + $0x18] sm:$0xff]  }
  0x17   :  { %1051 = vmatpush3.bf16.msra.mxu0 %v1131_v13  ;;  %1117 = vmatpush3.bf16.msra.mxu1 %v1131_v13  ;;  %1174 = vtanh.f32 %v656_v57  ;;  %v1439_v57 = vld [vmem:[%s1638_s3 + $0x28] sm:$0xff]   ;;  %v572_v58 = vmul.f32 0.5, %v919_v36 }
  0x18   :  { %1052 = vmatprep.subr.bf16.mxu0 %v1132_v14  ;;  %1110 = vmatprep.subr.bf16.mxu1 %v1132_v14  ;;  %1176 = vtanh.f32 %v569_v60  ;;  %v658_v14 = vmul.f32 0.5, %v963_v5 }
  0x19   :  { %1178 = vtanh.f32 %v577_v62 }
  0x1a   :  { %v1161_v8 = vpop.eup %1160  ;;  %1180 = vtanh.f32 %v649_v1 }
  0x1b   :  { %1053 = vmatpush3.bf16.msra.mxu0 %v1133_v15  ;;  %1118 = vmatpush3.bf16.msra.mxu1 %v1133_v15  ;;  %v1163_v11 = vpop.eup %1162  ;;  %1182 = vtanh.f32 %v657_v4 }
  0x1c   :  { %1054 = vmatprep.subr.bf16.mxu0 %v1134_v16  ;;  %1111 = vmatprep.subr.bf16.mxu1 %v1134_v16  ;;  %v1165_v13 = vpop.eup %1164  ;;  %1184 = vtanh.f32 %v570_v6  ;;  %v571_v16 = vmul.f32 0.5, %v918_v7  ;;  %v898_v6 = vunpack.c.l.bf16 %v1439_v57 }
  0x1d   :  { %v1167_v15 = vpop.eup %1166  ;;  %1186 = vtanh.f32 %v650_v9  ;;  %v1458_v9 = vld [vmem:[%s1637_s5 + $0x18] sm:$0xff]  }
  0x1e   :  { %1188 = vtanh.f32 %v578_v12  ;;  %v687_v33 = vadd.f32 1.0, %v1167_v15 }
  0x1f   :  { %1055 = vmatpush3.bf16.msra.mxu0 %v1135_v17  ;;  %1119 = vmatpush3.bf16.msra.mxu1 %v1135_v17  ;;  %v1394_v17 = vld [vmem:[%s1636_s4 + $0x30] sm:$0xff]   ;;  %1190 = vtanh.f32 %v658_v14  ;;  %v1465_v14 = vld [vmem:[%s1636_s4 + $0x38] sm:$0xff]  }
  0x20   :  { %1192 = vtanh.f32 %v571_v16  ;;  %v1430_v54 = vmul.f32 0.5, %v687_v33  ;;  %v935_v2 = vunpack.c.h.bf16 %v1394_v17 }
  0x22   :  { %317 = vmatmul.mubr.bf16.vlgmr.msra.gmra.mrb[0].mxu0 %v1136_v18  ;;  %349 = vmatmul.mubr.bf16.vlgmr.msra.gmra.mrb[0].mxu1 %v1139_v19  ;;  %v1169_v18 = vpop.eup %1168  ;;  %v651_v19 = vmul.f32 0.5, %v950_v10 }
  0x23   :  { %324 = vmatprep.mubr.bf16.mxu0 %v1142_v20  ;;  %356 = vmatprep.mubr.bf16.mxu1 %v1144_v21  ;;  %v1399_v20 = vld [vmem:[%s1637_s5 + $0x30] sm:$0xff]   ;;  %v1171_v21 = vpop.eup %1170  ;;  %v600_v34 = vadd.f32 1.0, %v1169_v18  ;;  %v899_v18 = vunpack.c.h.bf16 %v1439_v57 }
  0x24   :  { %1194 = vtanh.f32 %v651_v19  ;;  %v680_v35 = vadd.f32 1.0, %v1171_v21  ;;  %v922_v19 = vunpack.c.l.bf16 %v1450_v3 }
  0x25   :  { %v1432_v55 = vmul.f32 0.5, %v600_v34 }
  0x26   :  { %v1434_v56 = vmul.f32 0.5, %v680_v35 }
  0x2a   :  { %325 = vmatmul.mubr.bf16.gmra.mrb[4].mxu0 %v1146_v22  ;;  %357 = vmatmul.mubr.bf16.gmra.mrb[4].mxu1 %v1147_v23  ;;  %v1404_v22 = vld [vmem:[%s1638_s3] sm:$0xff]   ;;  %v1173_v23 = vpop.eup %1172 }
  0x2b   :  { %332 = vmatprep.mubr.bf16.mxu0 %v1148_v24  ;;  %364 = vmatprep.mubr.bf16.mxu1 %v1150_v25  ;;  %v934_v24 = vunpack.c.l.bf16 %v1394_v17  ;;  %v1175_v25 = vpop.eup %1174  ;;  %v608_v39 = vadd.f32 1.0, %v1173_v23  ;;  %v879_v44 = vunpack.c.h.bf16 %v1404_v22 }
  0x2c   :  { %v1177_v32 = vpop.eup %1176  ;;  %v688_v40 = vadd.f32 1.0, %v1175_v25  ;;  %v954_v25 = vunpack.c.l.bf16 %v1458_v9 }
  0x2d   :  { %v1179_v37 = vpop.eup %1178  ;;  %v579_v41 = vmul.f32 0.5, %v934_v24  ;;  %v601_v51 = vadd.f32 1.0, %v1177_v32  ;;  %v1441_v60 = vmul.f32 0.5, %v608_v39  ;;  %v580_v24 = vmul.f32 0.5, %v935_v2 }
  0x2e   :  { %v1181_v42 = vpop.eup %1180  ;;  %v1443_v61 = vmul.f32 0.5, %v688_v40  ;;  %v609_v62 = vadd.f32 1.0, %v1179_v37  ;;  %v938_v32 = vunpack.c.l.bf16 %v1465_v14  ;;  %v573_v40 = vmul.f32 0.5, %v922_v19 }
  0x2f   :  { %v1183_v47 = vpop.eup %1182  ;;  %1196 = vtanh.f32 %v579_v41  ;;  %v681_v1 = vadd.f32 1.0, %v1181_v42  ;;  %v1452_v5 = vmul.f32 0.5, %v601_v51 }
  0x30   :  { %v1185_v53 = vpop.eup %1184  ;;  %v689_v7 = vadd.f32 1.0, %v1183_v47  ;;  %v1467_v16 = vmul.f32 0.5, %v609_v62  ;;  %v653_v47 = vmul.f32 0.5, %v954_v25 }
  0x31   :  { %v1187_v59 = vpop.eup %1186  ;;  %v602_v12 = vadd.f32 1.0, %v1185_v53  ;;  %v1471_v21 = vmul.f32 0.5, %v681_v1 }
  0x32   :  { %333 = vmatmul.mubr.bf16.gmra.mrb[8].mxu0 %v1152_v26  ;;  %365 = vmatmul.mubr.bf16.gmra.mrb[8].mxu1 %v1153_v27  ;;  %v599_v26 = vadd.f32 1.0, %v1161_v8  ;;  %v1410_v27 = vld [vmem:[%s1638_s3 + $0x20] sm:$0xff]   ;;  %v1189_v63 = vpop.eup %1188  ;;  %v652_v8 = vmul.f32 0.5, %v951_v52  ;;  %v682_v17 = vadd.f32 1.0, %v1187_v59  ;;  %v923_v59 = vunpack.c.h.bf16 %v1450_v3 }
  0x33   :  { %340 = vmatprep.mubr.bf16.mxu0 %v1154_v28  ;;  %372 = vmatprep.mubr.bf16.mxu1 %v1156_v29  ;;  %v966_v28 = vunpack.c.l.bf16 %v1399_v20  ;;  %v878_v29 = vunpack.c.l.bf16 %v1404_v22  ;;  %v894_v38 = vunpack.c.l.bf16 %v1410_v27  ;;  %v895_v45 = vunpack.c.h.bf16 %v1410_v27  ;;  %v1191_v4 = vpop.eup %1190 }
  0x34   :  { %v1416_v43 = vmul.f32 0.5, %v599_v26  ;;  %v1193_v10 = vpop.eup %1192  ;;  %v610_v23 = vadd.f32 1.0, %v1189_v63  ;;  %v1482_v26 = vld [vmem:[%s1637_s5 + $0x38] sm:$0xff]   ;;  %v1492_v33 = vmul.f32 0.5, %v602_v12  ;;  %v1494_v37 = vmul.f32 0.5, %v682_v17 }
  0x35   :  { %v659_v46 = vmul.f32 0.5, %v966_v28  ;;  %v1195_v15 = vpop.eup %1194  ;;  %v1484_v28 = vmul.f32 0.5, %v689_v7  ;;  %v603_v34 = vadd.f32 1.0, %v1193_v10  ;;  %v970_v41 = vunpack.c.l.bf16 %v1482_v26  ;;  %v1513_v10 = vld [vmem:[%s1639_s2] ss:$0 sm:$0xff] }
  0x36   :  { %v683_v35 = vadd.f32 1.0, %v1195_v15  ;;  %v1498_v42 = vmul.f32 0.5, %v610_v23  ;;  %v955_v3 = vunpack.c.h.bf16 %v1458_v9  ;;  %v939_v15 = vunpack.c.h.bf16 %v1465_v14 }
  0x37   :  { %1198 = vtanh.f32 %v659_v46  ;;  %v1505_v2 = vmul.f32 0.5, %v603_v34  ;;  %v971_v7 = vunpack.c.h.bf16 %v1482_v26 }
  0x38   :  { %1200 = vtanh.f32 %v572_v58  ;;  %v581_v58 = vmul.f32 0.5, %v938_v32  ;;  %v654_v26 = vmul.f32 0.5, %v955_v3 }
  0x39   :  { %1202 = vtanh.f32 %v652_v8  ;;  %v1197_v51 = vpop.eup %1196 }
  0x3a   :  { %341 = vmatmul.mubr.bf16.gmra.mrb[12].mxu0 %v1158_v30  ;;  %373 = vmatmul.mubr.bf16.gmra.mrb[12].mxu1 %v1159_v31  ;;  %v679_v30 = vadd.f32 1.0, %v1165_v13  ;;  %v607_v31 = vadd.f32 1.0, %v1163_v11  ;;  %v883_v11 = vunpack.c.h.bf16 %v1427_v50  ;;  %v967_v13 = vunpack.c.h.bf16 %v1399_v20  ;;  %v1476_v20 = vld [vmem:[%s1638_s3 + $0x10] sm:$0xff]  }
  0x3b   :  { %v886_v39 = vunpack.c.l.bf16 %v1476_v20  ;;  %1204 = vtanh.f32 %v580_v24  ;;  %v887_v53 = vunpack.c.h.bf16 %v1476_v20 }
  0x3c   :  { %v1420_v48 = vmul.f32 0.5, %v679_v30  ;;  %v1422_v49 = vmul.f32 0.5, %v607_v31  ;;  %v690_v30 = vadd.f32 1.0, %v1191_v4  ;;  %v1489_v31 = vld [vmem:[%s1638_s3 + $0x30] sm:$0xff]   ;;  %v660_v36 = vmul.f32 0.5, %v967_v13 }
  0x3d   :  { %v902_v46 = vunpack.c.l.bf16 %v1489_v31  ;;  %v1507_v4 = vmul.f32 0.5, %v683_v35  ;;  %v661_v13 = vmul.f32 0.5, %v970_v41 }
  0x3e   :  { %v1501_v52 = vmul.f32 0.5, %v690_v30  ;;  %1206 = vtanh.f32 %v660_v36  ;;  %v611_v30 = vadd.f32 1.0, %v1197_v51  ;;  %v574_v36 = vmul.f32 0.5, %v923_v59 }
  0x3f   :  { %1208 = vtanh.f32 %v573_v40  ;;  %v582_v59 = vmul.f32 0.5, %v939_v15 }
  0x40   :  { %1210 = vtanh.f32 %v653_v47  ;;  %v1528_v47 = vld [vmem:[%s1638_s3 + $0x38] sm:$0xff]  }
  0x41   :  { %v1199_v62 = vpop.eup %1198  ;;  %1212 = vtanh.f32 %v581_v58 }
  0x42   :  { %v1201_v17 = vpop.eup %1200  ;;  %v691_v35 = vadd.f32 1.0, %v1199_v62  ;;  %1214 = vtanh.f32 %v661_v13 }
  0x43   :  { %v1203_v51 = vpop.eup %1202  ;;  %v604_v58 = vadd.f32 1.0, %v1201_v17  ;;  %1216 = vtanh.f32 %v574_v36  ;;  %v662_v36 = vmul.f32 0.5, %v971_v7 }
  0x44   :  { %1218 = vtanh.f32 %v654_v26 }
  0x45   :  { %v1205_v13 = vpop.eup %1204  ;;  %1220 = vtanh.f32 %v582_v59 }
  0x46   :  { %1222 = vtanh.f32 %v662_v36 }
  0xf5   :  { %v1056_v63 = vpop.f32.mrb[0].mxu0  ;;  %v1080_v1 = vpop.f32.mrb[0].mxu1 }
  0xf6   :  { %v1057_v8 = vpop.f32.mrb[1].mxu0  ;;  %v1081_v12 = vpop.f32.mrb[1].mxu1 }
  0xf7   :  { %v1058_v19 = vadd.f32 %v1057_v8, %v1056_v63  ;;  %v1082_v23 = vadd.f32 %v1081_v12, %v1080_v1  ;;  %v1059_v24 = vpop.f32.mrb[2].mxu0  ;;  %v1083_v25 = vpop.f32.mrb[2].mxu1  ;;  %v1523_v63 = vld [vmem:[%s1638_s3 + $0x18] sm:$0xff]  }
  0xf8   :  { %v1060_v32 = vpop.f32.mrb[3].mxu0  ;;  %v1084_v34 = vpop.f32.mrb[3].mxu1 }
  0xf9   :  { %v439_v40 = vadd.f32 %v1058_v19, %v1513_v10  ;;  %v447_v9 = vadd.f32 %v1082_v23, %v1513_v10  ;;  %v1061_v41 = vadd.f32 %v1060_v32, %v1059_v24  ;;  %v1085_v14 = vadd.f32 %v1084_v34, %v1083_v25 }
  0xfa   :  { %v1536_v19 = vmul.f32 0.5, %v611_v30  ;;  %v890_v23 = vunpack.c.l.bf16 %v1523_v63  ;;  %v906_v24 = vunpack.c.l.bf16 %v1528_v47  ;;  %v1546_v34 = vmul.f32 0.5, %v691_v35 }
  0xfb   :  { %v487_v62 = vadd.f32 %v878_v29, %v439_v40  ;;  %v495_v1 = vadd.f32 %v894_v38, %v447_v9  ;;  %v440_v8 = vadd.f32 %v1061_v41, %v1513_v10  ;;  %v448_v12 = vadd.f32 %v1085_v14, %v1513_v10  ;;  %v1207_v9 = vpop.eup %1206 }
  0xfc   :  { %v684_v40 = vadd.f32 1.0, %v1203_v51  ;;  %v1209_v27 = vpop.eup %1208  ;;  %v692_v36 = vadd.f32 1.0, %v1207_v9 }
  0xfd   :  { %v631_v3 = vmul.f32 %v1416_v43, %v487_v62  ;;  %v639_v15 = vmul.f32 %v1422_v49, %v495_v1  ;;  %v488_v29 = vadd.f32 %v879_v44, %v440_v8  ;;  %v496_v38 = vadd.f32 %v895_v45, %v448_v12  ;;  %v1062_v17 = vpop.f32.mrb[4].mxu0  ;;  %v1086_v25 = vpop.f32.mrb[4].mxu1 }
  0xfe   :  { %v1063_v30 = vpop.f32.mrb[5].mxu0  ;;  %v1087_v32 = vpop.f32.mrb[5].mxu1  ;;  %v1550_v44 = vmul.f32 0.5, %v604_v58 }
  0xff   :  { %v632_v43 = vmul.f32 %v1432_v55, %v488_v29  ;;  %v640_v49 = vmul.f32 %v1441_v60, %v496_v38  ;;  %v1065_v41 = vpop.f32.mrb[6].mxu0  ;;  %v1089_v22 = vpop.f32.mrb[6].mxu1  ;;  %v711_v45 = vmul.f32 %v1420_v48, %v631_v3  ;;  %v719_v14 = vmul.f32 %v1430_v54, %v639_v15 }
 0x100   :  { %v1064_v35 = vadd.f32 %v1063_v30, %v1062_v17  ;;  %v1088_v62 = vadd.f32 %v1087_v32, %v1086_v25  ;;  %v1066_v51 = vpop.f32.mrb[7].mxu0  ;;  %v1090_v26 = vpop.f32.mrb[7].mxu1  ;;  %v891_v48 = vunpack.c.h.bf16 %v1523_v63  ;;  %v1565_v17 = vmul.f32 0.5, %v684_v40 }
 0x101   :  { %v1211_v7 = vpop.eup %1210  ;;  %v712_v1 = vmul.f32 %v1434_v56, %v632_v43  ;;  %v720_v55 = vmul.f32 %v1443_v61, %v640_v49  ;;  %v1067_v60 = vadd.f32 %v1066_v51, %v1065_v41  ;;  %v1091_v8 = vadd.f32 %v1090_v26, %v1089_v22 }
 0x102   :  { %v1213_v12 = vpop.eup %1212  ;;  %v441_v58 = vadd.f32 %v1064_v35, %v1513_v10  ;;  %v449_v59 = vadd.f32 %v1088_v62, %v1513_v10  ;;  %v907_v25 = vunpack.c.h.bf16 %v1528_v47  ;;  %v612_v40 = vadd.f32 1.0, %v1205_v13 }
 0x103   :  { %v975_v54 = vpack.c.bf16 %v712_v1, %v711_v45  ;;  %v995_v3 = vpack.c.bf16 %v720_v55, %v719_v14  ;;  %v442_v15 = vadd.f32 %v1067_v60, %v1513_v10  ;;  %v450_v29 = vadd.f32 %v1091_v8, %v1513_v10  ;;  %v1215_v38 = vpop.eup %1214 }
 0x104   :  { %v489_v56 = vadd.f32 %v882_v0, %v441_v58  ;;  %v497_v61 = vadd.f32 %v898_v6, %v449_v59  ;;  %v1217_v43 = vpop.eup %1216  ;;  %v605_v14 = vadd.f32 1.0, %v1209_v27  ;;  %v685_v35 = vadd.f32 1.0, %v1211_v7 }
 0x105   :  { %976 = vst [vmem:[%s1640_s6] sm:$0xff] %v975_v54   ;;  %1036 = vst [vmem:[%s1640_s6 + $0x20] sm:$0xff] %v995_v3   ;;  %v490_v30 = vadd.f32 %v883_v11, %v442_v15  ;;  %v498_v0 = vadd.f32 %v899_v18, %v450_v29  ;;  %v1068_v32 = vpop.f32.mrb[8].mxu0  ;;  %v1092_v6 = vpop.f32.mrb[8].mxu1  ;;  %v693_v55 = vadd.f32 1.0, %v1215_v38  ;;  %v628_v59 = vmul.f32 0.5, %v612_v40 }
 0x106   :  { %v633_v49 = vmul.f32 %v1452_v5, %v489_v56  ;;  %v641_v41 = vmul.f32 %v1467_v16, %v497_v61  ;;  %v1069_v22 = vpop.f32.mrb[9].mxu0  ;;  %v1093_v45 = vpop.f32.mrb[9].mxu1  ;;  %v613_v16 = vadd.f32 1.0, %v1213_v12  ;;  %v606_v54 = vadd.f32 1.0, %v1217_v43 }
 0x107   :  { %v634_v62 = vmul.f32 %v1492_v33, %v490_v30  ;;  %v642_v50 = vmul.f32 %v1498_v42, %v498_v0  ;;  %v1070_v11 = vadd.f32 %v1069_v22, %v1068_v32  ;;  %v1094_v57 = vadd.f32 %v1093_v45, %v1092_v6  ;;  %v1071_v18 = vpop.f32.mrb[10].mxu0  ;;  %v1095_v51 = vpop.f32.mrb[10].mxu1 }
 0x108   :  { %v1219_v26 = vpop.eup %1218  ;;  %v713_v13 = vmul.f32 %v1471_v21, %v633_v49  ;;  %v721_v9 = vmul.f32 %v1484_v28, %v641_v41  ;;  %v1072_v5 = vpop.f32.mrb[11].mxu0  ;;  %v708_v29 = vmul.f32 0.5, %v692_v36  ;;  %v621_v61 = vmul.f32 0.5, %v605_v14 }
 0x109   :  { %v1096_v1 = vpop.f32.mrb[11].mxu1  ;;  %v1221_v60 = vpop.eup %1220  ;;  %v714_v27 = vmul.f32 %v1494_v37, %v634_v62  ;;  %v722_v33 = vmul.f32 %v1501_v52, %v642_v50  ;;  %v443_v42 = vadd.f32 %v1070_v11, %v1513_v10  ;;  %v451_v7 = vadd.f32 %v1094_v57, %v1513_v10 }
 0x10a   :  { %v1073_v8 = vadd.f32 %v1072_v5, %v1071_v18  ;;  %v1097_v58 = vadd.f32 %v1096_v1, %v1095_v51  ;;  %v1223_v15 = vpop.eup %1222  ;;  %v614_v38 = vadd.f32 1.0, %v1221_v60  ;;  %v701_v30 = vmul.f32 0.5, %v685_v35 }
 0x10b   :  { %v980_v21 = vpack.c.bf16 %v714_v27, %v713_v13  ;;  %v1000_v3 = vpack.c.bf16 %v722_v33, %v721_v9  ;;  %v491_v28 = vadd.f32 %v886_v39, %v443_v42  ;;  %v499_v12 = vadd.f32 %v902_v46, %v451_v7 }
 0x10c   :  { %v444_v37 = vadd.f32 %v1073_v8, %v1513_v10  ;;  %v452_v52 = vadd.f32 %v1097_v58, %v1513_v10  ;;  %v629_v46 = vmul.f32 0.5, %v613_v16  ;;  %v709_v0 = vmul.f32 0.5, %v693_v55 }
 0x10d   :  { %1033 = vst [vmem:[%s1640_s6 + $0x8] sm:$0xff] %v980_v21   ;;  %1037 = vst [vmem:[%s1640_s6 + $0x28] sm:$0xff] %v1000_v3   ;;  %v1074_v56 = vpop.f32.mrb[12].mxu0  ;;  %v1098_v39 = vpop.f32.mrb[12].mxu1  ;;  %v635_v32 = vmul.f32 %v1505_v2, %v491_v28  ;;  %v643_v6 = vmul.f32 %v1536_v19, %v499_v12  ;;  %v1641_v36 = vunpack.c.h.bf16 %v1489_v31  ;;  %v622_v14 = vmul.f32 0.5, %v606_v54 }
 0x10e   :  { %v492_v40 = vadd.f32 %v887_v53, %v444_v37  ;;  %v1075_v49 = vpop.f32.mrb[13].mxu0  ;;  %v1099_v41 = vpop.f32.mrb[13].mxu1  ;;  %v686_v35 = vadd.f32 1.0, %v1219_v26  ;;  %v630_v19 = vmul.f32 0.5, %v614_v38  ;;  %v694_v51 = vadd.f32 1.0, %v1223_v15 }
 0x10f   :  { %v500_v43 = vadd.f32 %v1641_v36, %v452_v52  ;;  %v1076_v22 = vadd.f32 %v1075_v49, %v1074_v56  ;;  %v1100_v45 = vadd.f32 %v1099_v41, %v1098_v39  ;;  %v1077_v62 = vpop.f32.mrb[14].mxu0  ;;  %v1101_v50 = vpop.f32.mrb[14].mxu1  ;;  %v715_v9 = vmul.f32 %v1507_v4, %v635_v32 }
 0x110   :  { %v636_v11 = vmul.f32 %v1550_v44, %v492_v40  ;;  %v1078_v2 = vpop.f32.mrb[15].mxu0  ;;  %v1102_v18 = vpop.f32.mrb[15].mxu1  ;;  %v723_v5 = vmul.f32 %v1546_v34, %v643_v6  ;;  %v702_v42 = vmul.f32 0.5, %v686_v35  ;;  %v710_v7 = vmul.f32 0.5, %v694_v51 }
 0x111   :  { %v644_v57 = vmul.f32 %v628_v59, %v500_v43  ;;  %v445_v20 = vadd.f32 %v1076_v22, %v1513_v10  ;;  %v453_v31 = vadd.f32 %v1100_v45, %v1513_v10  ;;  %v1079_v53 = vadd.f32 %v1078_v2, %v1077_v62 }
 0x112   :  { %v1103_v13 = vadd.f32 %v1102_v18, %v1101_v50  ;;  %v716_v1 = vmul.f32 %v1565_v17, %v636_v11 }
 0x113   :  { %v724_v26 = vmul.f32 %v708_v29, %v644_v57  ;;  %v493_v44 = vadd.f32 %v890_v23, %v445_v20  ;;  %v501_v16 = vadd.f32 %v906_v24, %v453_v31  ;;  %v446_v55 = vadd.f32 %v1079_v53, %v1513_v10 }
 0x114   :  { %v454_v60 = vadd.f32 %v1103_v13, %v1513_v10  ;;  %v985_v27 = vpack.c.bf16 %v716_v1, %v715_v9 }
 0x115   :  { %v1005_v33 = vpack.c.bf16 %v724_v26, %v723_v5  ;;  %v637_v4 = vmul.f32 %v621_v61, %v493_v44  ;;  %v645_v8 = vmul.f32 %v629_v46, %v501_v16  ;;  %v494_v34 = vadd.f32 %v891_v48, %v446_v55 }
 0x116   :  { %v502_v17 = vadd.f32 %v907_v25, %v454_v60  ;;  %1034 = vst [vmem:[%s1640_s6 + $0x10] sm:$0xff] %v985_v27  }
 0x117   :  { %1038 = vst [vmem:[%s1640_s6 + $0x30] sm:$0xff] %v1005_v33   ;;  %v638_v10 = vmul.f32 %v622_v14, %v494_v34  ;;  %v717_v24 = vmul.f32 %v701_v30, %v637_v4  ;;  %v725_v58 = vmul.f32 %v709_v0, %v645_v8 }
 0x118   :  { %v646_v23 = vmul.f32 %v630_v19, %v502_v17 }
 0x119   :  { %v718_v59 = vmul.f32 %v702_v42, %v638_v10 }
 0x11a   :  { %v726_v54 = vmul.f32 %v710_v7, %v646_v23 }
 0x11b   :  { %v990_v21 = vpack.c.bf16 %v718_v59, %v717_v24 }
 0x11c   :  { %v1010_v63 = vpack.c.bf16 %v726_v54, %v725_v58 }
 0x11d   :  { %1035 = vst [vmem:[%s1640_s6 + $0x18] sm:$0xff] %v990_v21  }
 0x11e   :  { %1039 = vst [vmem:[%s1640_s6 + $0x38] sm:$0xff] %v1010_v63  }

// kernel: netg_forward.110
= control target key start
LH: loop header
LB: loop body
LE: loop exit
PB: predicated region body
PF: predicated region fallthrough
CT: control target
= control target key end

     0   :  { %s2642_s1 = inlined_call_operand.vmem [shape: bf16[128,128], index: 1, kind: input, shape index: {}]   ;;  %s2643_s0 = inlined_call_operand.vmem [shape: bf16[512,128], index: 0, kind: input, shape index: {}]   ;;  %s2644_s3 = inlined_call_operand.vmem [shape: bf16[512,128], index: 3, kind: input, shape index: {}]   ;;  %s2645_s2 = inlined_call_operand.vmem [shape: f32[1,128], index: 2, kind: input, shape index: {}]   ;;  %s2646_s4 = inlined_call_operand.vmem [shape: bf16[512,128], index: 4, kind: output, shape index: {}]  }
   0x1   :  { %v2196_v0 = vld [vmem:[%s2642_s1] sm:$0xff]   ;;  %v2197_v1 = vld [vmem:[%s2642_s1 + $0x8] sm:$0xff]   ;;  %v2198_v2 = vld [vmem:[%s2642_s1 + $0x10] sm:$0xff]  }
   0x2   :  { %2100 = vmatprep.subr.bf16.mxu0 %v2196_v0  ;;  %2180 = vmatprep.subr.bf16.mxu1 %v2196_v0  ;;  %v2199_v3 = vld [vmem:[%s2642_s1 + $0x18] sm:$0xff]   ;;  %v2204_v4 = vld [vmem:[%s2643_s0] sm:$0xff]   ;;  %v2201_v7 = vld [vmem:[%s2642_s1 + $0x28] sm:$0xff]  }
   0x3   :  { %2101 = vmatpush3.bf16.msra.mxu0 %v2196_v0  ;;  %2188 = vmatpush3.bf16.msra.mxu1 %v2196_v0  ;;  %v2205_v5 = vld [vmem:[%s2643_s0 + $0x80] sm:$0xff]   ;;  %v2202_v8 = vld [vmem:[%s2642_s1 + $0x30] sm:$0xff]   ;;  %v2203_v9 = vld [vmem:[%s2642_s1 + $0x38] sm:$0xff]  }
   0x4   :  { %2102 = vmatprep.subr.bf16.mxu0 %v2197_v1  ;;  %2181 = vmatprep.subr.bf16.mxu1 %v2197_v1  ;;  %v2200_v6 = vld [vmem:[%s2642_s1 + $0x20] sm:$0xff]   ;;  %v2206_v10 = vld [vmem:[%s2643_s0 + $0x8] sm:$0xff]   ;;  %v2208_v12 = vld [vmem:[%s2643_s0 + $0x10] sm:$0xff]  }
   0x5   :  { %2116 = vmatprep.mubr.bf16.mxu0 %v2204_v4  ;;  %2148 = vmatprep.mubr.bf16.mxu1 %v2205_v5  ;;  %v2207_v11 = vld [vmem:[%s2643_s0 + $0x88] sm:$0xff]   ;;  %v2209_v13 = vld [vmem:[%s2643_s0 + $0x90] sm:$0xff]   ;;  %v2210_v14 = vld [vmem:[%s2643_s0 + $0x18] sm:$0xff]  }
   0x6   :  { %v2211_v15 = vld [vmem:[%s2643_s0 + $0x98] sm:$0xff]   ;;  %v2212_v16 = vld [vmem:[%s2643_s0 + $0x20] sm:$0xff]   ;;  %v2214_v18 = vld [vmem:[%s2643_s0 + $0x28] sm:$0xff]  }
   0x7   :  { %2103 = vmatpush3.bf16.msra.mxu0 %v2197_v1  ;;  %2189 = vmatpush3.bf16.msra.mxu1 %v2197_v1  ;;  %v2213_v17 = vld [vmem:[%s2643_s0 + $0xa0] sm:$0xff]   ;;  %v2215_v19 = vld [vmem:[%s2643_s0 + $0xa8] sm:$0xff]   ;;  %v2216_v20 = vld [vmem:[%s2643_s0 + $0x30] sm:$0xff]  }
   0x8   :  { %2104 = vmatprep.subr.bf16.mxu0 %v2198_v2  ;;  %2182 = vmatprep.subr.bf16.mxu1 %v2198_v2  ;;  %v2217_v21 = vld [vmem:[%s2643_s0 + $0xb0] sm:$0xff]   ;;  %v2218_v22 = vld [vmem:[%s2643_s0 + $0x38] sm:$0xff]   ;;  %v2220_v24 = vld [vmem:[%s2643_s0 + $0x40] sm:$0xff]  }
   0x9   :  { %v2219_v23 = vld [vmem:[%s2643_s0 + $0xb8] sm:$0xff]   ;;  %v2221_v25 = vld [vmem:[%s2643_s0 + $0xc0] sm:$0xff]   ;;  %v2222_v26 = vld [vmem:[%s2643_s0 + $0x48] sm:$0xff]  }
   0xa   :  { %v2223_v27 = vld [vmem:[%s2643_s0 + $0xc8] sm:$0xff]   ;;  %v2224_v28 = vld [vmem:[%s2643_s0 + $0x50] sm:$0xff]   ;;  %v2226_v30 = vld [vmem:[%s2643_s0 + $0x58] sm:$0xff]  }
   0xb   :  { %2105 = vmatpush3.bf16.msra.mxu0 %v2198_v2  ;;  %2190 = vmatpush3.bf16.msra.mxu1 %v2198_v2  ;;  %v2225_v29 = vld [vmem:[%s2643_s0 + $0xd0] sm:$0xff]   ;;  %v2227_v31 = vld [vmem:[%s2643_s0 + $0xd8] sm:$0xff]   ;;  %v2228_v32 = vld [vmem:[%s2643_s0 + $0x60] sm:$0xff]  }
   0xc   :  { %2106 = vmatprep.subr.bf16.mxu0 %v2199_v3  ;;  %2183 = vmatprep.subr.bf16.mxu1 %v2199_v3  ;;  %v2229_v33 = vld [vmem:[%s2643_s0 + $0xe0] sm:$0xff]   ;;  %v2230_v34 = vld [vmem:[%s2643_s0 + $0x68] sm:$0xff]   ;;  %v2232_v36 = vld [vmem:[%s2643_s0 + $0x70] sm:$0xff]  }
   0xd   :  { %v2231_v35 = vld [vmem:[%s2643_s0 + $0xe8] sm:$0xff]   ;;  %v2233_v37 = vld [vmem:[%s2643_s0 + $0xf0] sm:$0xff]   ;;  %v2234_v38 = vld [vmem:[%s2643_s0 + $0x78] sm:$0xff]  }
   0xe   :  { %v2235_v39 = vld [vmem:[%s2643_s0 + $0xf8] sm:$0xff]   ;;  %v1998_v40 = vld [vmem:[%s2644_s3 + $0x8] sm:$0xff]   ;;  %v1711_v42 = vld [vmem:[%s2644_s3] sm:$0xff]  }
   0xf   :  { %2107 = vmatpush3.bf16.msra.mxu0 %v2199_v3  ;;  %2191 = vmatpush3.bf16.msra.mxu1 %v2199_v3  ;;  %v2014_v41 = vld [vmem:[%s2644_s3 + $0x88] sm:$0xff]   ;;  %v2013_v43 = vld [vmem:[%s2644_s3 + $0x80] sm:$0xff]   ;;  %v1716_v46 = vunpack.c.l.bf16 %v1998_v40  ;;  %v1712_v49 = vunpack.c.l.bf16 %v1711_v42  ;;  %v1717_v55 = vunpack.c.h.bf16 %v1998_v40  ;;  %v1713_v61 = vunpack.c.h.bf16 %v1711_v42  ;;  %v2000_v5 = vld [vmem:[%s2644_s3 + $0x18] sm:$0xff]  }
  0x10   :  { %2108 = vmatprep.subr.bf16.mxu0 %v2200_v6  ;;  %2184 = vmatprep.subr.bf16.mxu1 %v2200_v6  ;;  %v2396_v44 = vld [vmem:[%s2645_s2] ss:$0 sm:$0xff]  ;;  %v1780_v48 = vunpack.c.l.bf16 %v2014_v41  ;;  %v1776_v50 = vunpack.c.l.bf16 %v2013_v43  ;;  %v1781_v56 = vunpack.c.h.bf16 %v2014_v41  ;;  %v1777_v62 = vunpack.c.h.bf16 %v2013_v43 }
  0x13   :  { %2109 = vmatpush3.bf16.msra.mxu0 %v2200_v6  ;;  %2192 = vmatpush3.bf16.msra.mxu1 %v2200_v6  ;;  %v2016_v6 = vld [vmem:[%s2644_s3 + $0x98] sm:$0xff]  }
  0x14   :  { %2110 = vmatprep.subr.bf16.mxu0 %v2201_v7  ;;  %2185 = vmatprep.subr.bf16.mxu1 %v2201_v7 }
  0x17   :  { %2111 = vmatpush3.bf16.msra.mxu0 %v2201_v7  ;;  %2193 = vmatpush3.bf16.msra.mxu1 %v2201_v7 }
  0x18   :  { %2112 = vmatprep.subr.bf16.mxu0 %v2202_v8  ;;  %2186 = vmatprep.subr.bf16.mxu1 %v2202_v8 }
  0x1b   :  { %2113 = vmatpush3.bf16.msra.mxu0 %v2202_v8  ;;  %2194 = vmatpush3.bf16.msra.mxu1 %v2202_v8 }
  0x1c   :  { %2114 = vmatprep.subr.bf16.mxu0 %v2203_v9  ;;  %2187 = vmatprep.subr.bf16.mxu1 %v2203_v9 }
  0x1f   :  { %2115 = vmatpush3.bf16.msra.mxu0 %v2203_v9  ;;  %2195 = vmatpush3.bf16.msra.mxu1 %v2203_v9 }
  0x22   :  { %2117 = vmatmul.mubr.bf16.vlgmr.msra.gmra.mrb[0].mxu0 %v2206_v10  ;;  %2149 = vmatmul.mubr.bf16.vlgmr.msra.gmra.mrb[0].mxu1 %v2207_v11  ;;  %v1999_v11 = vld [vmem:[%s2644_s3 + $0x10] sm:$0xff]  }
  0x23   :  { %2120 = vmatprep.mubr.bf16.mxu0 %v2208_v12  ;;  %2152 = vmatprep.mubr.bf16.mxu1 %v2209_v13  ;;  %v2015_v12 = vld [vmem:[%s2644_s3 + $0x90] sm:$0xff]  }
  0x2a   :  { %2121 = vmatmul.mubr.bf16.gmra.mrb[4].mxu0 %v2210_v14  ;;  %2153 = vmatmul.mubr.bf16.gmra.mrb[4].mxu1 %v2211_v15 }
  0x2b   :  { %2124 = vmatprep.mubr.bf16.mxu0 %v2212_v16  ;;  %2156 = vmatprep.mubr.bf16.mxu1 %v2213_v17 }
  0x32   :  { %2125 = vmatmul.mubr.bf16.gmra.mrb[8].mxu0 %v2214_v18  ;;  %2157 = vmatmul.mubr.bf16.gmra.mrb[8].mxu1 %v2215_v19  ;;  %v1724_v19 = vunpack.c.l.bf16 %v2000_v5 }
  0x33   :  { %2128 = vmatprep.mubr.bf16.mxu0 %v2216_v20  ;;  %2160 = vmatprep.mubr.bf16.mxu1 %v2217_v21  ;;  %v1788_v20 = vunpack.c.l.bf16 %v2016_v6 }
  0x3a   :  { %2129 = vmatmul.mubr.bf16.gmra.mrb[12].mxu0 %v2218_v22  ;;  %2161 = vmatmul.mubr.bf16.gmra.mrb[12].mxu1 %v2219_v23 }
  0x3b   :  { %2132 = vmatprep.mubr.bf16.mxu0 %v2220_v24  ;;  %2164 = vmatprep.mubr.bf16.mxu1 %v2221_v25  ;;  %v1720_v25 = vunpack.c.l.bf16 %v1999_v11 }
  0x42   :  { %2133 = vmatmul.mubr.bf16.gmra.mrb[16].mxu0 %v2222_v26  ;;  %2165 = vmatmul.mubr.bf16.gmra.mrb[16].mxu1 %v2223_v27  ;;  %v1784_v26 = vunpack.c.l.bf16 %v2015_v12 }
  0x43   :  { %2136 = vmatprep.mubr.bf16.mxu0 %v2224_v28  ;;  %2168 = vmatprep.mubr.bf16.mxu1 %v2225_v29 }
  0x4a   :  { %2137 = vmatmul.mubr.bf16.gmra.mrb[20].mxu0 %v2226_v30  ;;  %2169 = vmatmul.mubr.bf16.gmra.mrb[20].mxu1 %v2227_v31  ;;  %v1725_v31 = vunpack.c.h.bf16 %v2000_v5 }
  0x4b   :  { %2140 = vmatprep.mubr.bf16.mxu0 %v2228_v32  ;;  %2172 = vmatprep.mubr.bf16.mxu1 %v2229_v33  ;;  %v1789_v32 = vunpack.c.h.bf16 %v2016_v6 }
  0x52   :  { %2141 = vmatmul.mubr.bf16.gmra.mrb[24].mxu0 %v2230_v34  ;;  %2173 = vmatmul.mubr.bf16.gmra.mrb[24].mxu1 %v2231_v35 }
  0x53   :  { %2144 = vmatprep.mubr.bf16.mxu0 %v2232_v36  ;;  %2176 = vmatprep.mubr.bf16.mxu1 %v2233_v37  ;;  %v1721_v37 = vunpack.c.h.bf16 %v1999_v11 }
  0x5a   :  { %2145 = vmatmul.mubr.bf16.gmra.mrb[28].mxu0 %v2234_v38  ;;  %2177 = vmatmul.mubr.bf16.gmra.mrb[28].mxu1 %v2235_v39  ;;  %v1785_v38 = vunpack.c.h.bf16 %v2015_v12 }
  0xf5   :  { %v2118_v45 = vpop.f32.mrb[0].mxu0  ;;  %v2150_v47 = vpop.f32.mrb[0].mxu1 }
  0xf6   :  { %v963_v51 = vadd.f32 %v2118_v45, %v2396_v44  ;;  %v995_v52 = vadd.f32 %v2150_v47, %v2396_v44  ;;  %v504_v53 = vpop.f32.mrb[1].mxu0  ;;  %v632_v54 = vpop.f32.mrb[1].mxu1  ;;  %v2018_v47 = vld [vmem:[%s2644_s3 + $0xa8] sm:$0xff]  }
  0xf7   :  { %v961_v57 = vadd.f32 %v2396_v44, %v504_v53  ;;  %v993_v58 = vadd.f32 %v2396_v44, %v632_v54  ;;  %v2119_v59 = vpop.f32.mrb[2].mxu0  ;;  %v2151_v60 = vpop.f32.mrb[2].mxu1  ;;  %v2017_v53 = vld [vmem:[%s2644_s3 + $0xa0] sm:$0xff]  }
  0xf8   :  { %v964_v63 = vadd.f32 %v2119_v59, %v2396_v44  ;;  %v996_v0 = vadd.f32 %v2151_v60, %v2396_v44  ;;  %v507_v1 = vpop.f32.mrb[3].mxu0  ;;  %v635_v2 = vpop.f32.mrb[3].mxu1  ;;  %v1155_v7 = vadd.f32 %v1716_v46, %v963_v51  ;;  %v1187_v8 = vadd.f32 %v1780_v48, %v995_v52  ;;  %v2002_v46 = vld [vmem:[%s2644_s3 + $0x28] sm:$0xff]   ;;  %v2001_v52 = vld [vmem:[%s2644_s3 + $0x20] sm:$0xff]  }
  0xf9   :  { %v962_v3 = vadd.f32 %v2396_v44, %v507_v1  ;;  %v994_v4 = vadd.f32 %v2396_v44, %v635_v2  ;;  %v1153_v13 = vadd.f32 %v1712_v49, %v961_v57  ;;  %v1185_v14 = vadd.f32 %v1776_v50, %v993_v58 }
  0xfa   :  { %v1156_v9 = vadd.f32 %v1717_v55, %v964_v63  ;;  %v1188_v10 = vadd.f32 %v1781_v56, %v996_v0  ;;  %v1732_v60 = vunpack.c.l.bf16 %v2002_v46  ;;  %v1728_v2 = vunpack.c.l.bf16 %v2001_v52 }
  0xfb   :  { %v1154_v15 = vadd.f32 %v1713_v61, %v962_v3  ;;  %v1186_v16 = vadd.f32 %v1777_v62, %v994_v4  ;;  %v1796_v61 = vunpack.c.l.bf16 %v2018_v47  ;;  %v1792_v3 = vunpack.c.l.bf16 %v2017_v53 }
  0xfc   :  { %v1846_v17 = vpack.c.bf16 %v1156_v9, %v1155_v7  ;;  %v1926_v18 = vpack.c.bf16 %v1188_v10, %v1187_v8  ;;  %v1733_v8 = vunpack.c.h.bf16 %v2002_v46  ;;  %v1797_v9 = vunpack.c.h.bf16 %v2018_v47 }
  0xfd   :  { %v1841_v21 = vpack.c.bf16 %v1154_v15, %v1153_v13  ;;  %v1921_v22 = vpack.c.bf16 %v1186_v16, %v1185_v14  ;;  %v2122_v23 = vpop.f32.mrb[4].mxu0  ;;  %v2154_v24 = vpop.f32.mrb[4].mxu1  ;;  %v1729_v14 = vunpack.c.h.bf16 %v2001_v52  ;;  %v1793_v15 = vunpack.c.h.bf16 %v2017_v53 }
  0xfe   :  { %2029 = vst [vmem:[%s2646_s4 + $0x8] sm:$0xff] %v1846_v17   ;;  %2045 = vst [vmem:[%s2646_s4 + $0x88] sm:$0xff] %v1926_v18   ;;  %v967_v27 = vadd.f32 %v2122_v23, %v2396_v44  ;;  %v999_v28 = vadd.f32 %v2154_v24, %v2396_v44  ;;  %v520_v29 = vpop.f32.mrb[5].mxu0  ;;  %v648_v30 = vpop.f32.mrb[5].mxu1  ;;  %v2020_v23 = vld [vmem:[%s2644_s3 + $0xb8] sm:$0xff]  }
  0xff   :  { %1842 = vst [vmem:[%s2646_s4] sm:$0xff] %v1841_v21   ;;  %2044 = vst [vmem:[%s2646_s4 + $0x80] sm:$0xff] %v1921_v22   ;;  %v965_v33 = vadd.f32 %v2396_v44, %v520_v29  ;;  %v997_v34 = vadd.f32 %v2396_v44, %v648_v30  ;;  %v2123_v35 = vpop.f32.mrb[6].mxu0  ;;  %v2155_v36 = vpop.f32.mrb[6].mxu1  ;;  %v2004_v22 = vld [vmem:[%s2644_s3 + $0x38] sm:$0xff]   ;;  %v2019_v29 = vld [vmem:[%s2644_s3 + $0xb0] sm:$0xff]  }
 0x100   :  { %v968_v39 = vadd.f32 %v2123_v35, %v2396_v44  ;;  %v1000_v40 = vadd.f32 %v2155_v36, %v2396_v44  ;;  %v523_v41 = vpop.f32.mrb[7].mxu0  ;;  %v651_v42 = vpop.f32.mrb[7].mxu1  ;;  %v1159_v48 = vadd.f32 %v1724_v19, %v967_v27  ;;  %v1191_v49 = vadd.f32 %v1788_v20, %v999_v28  ;;  %v2003_v28 = vld [vmem:[%s2644_s3 + $0x30] sm:$0xff]  }
 0x101   :  { %v966_v43 = vadd.f32 %v2396_v44, %v523_v41  ;;  %v998_v45 = vadd.f32 %v2396_v44, %v651_v42  ;;  %v1157_v54 = vadd.f32 %v1720_v25, %v965_v33  ;;  %v1189_v55 = vadd.f32 %v1784_v26, %v997_v34 }
 0x102   :  { %v1160_v50 = vadd.f32 %v1725_v31, %v968_v39  ;;  %v1192_v51 = vadd.f32 %v1789_v32, %v1000_v40  ;;  %v1740_v36 = vunpack.c.l.bf16 %v2004_v22  ;;  %v1736_v42 = vunpack.c.l.bf16 %v2003_v28 }
 0x103   :  { %v1158_v56 = vadd.f32 %v1721_v37, %v966_v43  ;;  %v1190_v57 = vadd.f32 %v1785_v38, %v998_v45  ;;  %v1804_v37 = vunpack.c.l.bf16 %v2020_v23  ;;  %v1800_v43 = vunpack.c.l.bf16 %v2019_v29 }
 0x104   :  { %v1856_v58 = vpack.c.bf16 %v1160_v50, %v1159_v48  ;;  %v1936_v59 = vpack.c.bf16 %v1192_v51, %v1191_v49  ;;  %v1741_v49 = vunpack.c.h.bf16 %v2004_v22  ;;  %v1805_v50 = vunpack.c.h.bf16 %v2020_v23 }
 0x105   :  { %v1851_v62 = vpack.c.bf16 %v1158_v56, %v1157_v54  ;;  %v1931_v63 = vpack.c.bf16 %v1190_v57, %v1189_v55  ;;  %v2126_v0 = vpop.f32.mrb[8].mxu0  ;;  %v2158_v1 = vpop.f32.mrb[8].mxu1  ;;  %v1737_v55 = vunpack.c.h.bf16 %v2003_v28  ;;  %v1801_v56 = vunpack.c.h.bf16 %v2019_v29 }
 0x106   :  { %2031 = vst [vmem:[%s2646_s4 + $0x18] sm:$0xff] %v1856_v58   ;;  %2047 = vst [vmem:[%s2646_s4 + $0x98] sm:$0xff] %v1936_v59   ;;  %v971_v4 = vadd.f32 %v2126_v0, %v2396_v44  ;;  %v1003_v5 = vadd.f32 %v2158_v1, %v2396_v44  ;;  %v536_v6 = vpop.f32.mrb[9].mxu0  ;;  %v664_v7 = vpop.f32.mrb[9].mxu1  ;;  %v2022_v0 = vld [vmem:[%s2644_s3 + $0xc8] sm:$0xff]  }
 0x107   :  { %2030 = vst [vmem:[%s2646_s4 + $0x10] sm:$0xff] %v1851_v62   ;;  %2046 = vst [vmem:[%s2646_s4 + $0x90] sm:$0xff] %v1931_v63   ;;  %v969_v10 = vadd.f32 %v2396_v44, %v536_v6  ;;  %v1001_v11 = vadd.f32 %v2396_v44, %v664_v7  ;;  %v2127_v12 = vpop.f32.mrb[10].mxu0  ;;  %v2159_v13 = vpop.f32.mrb[10].mxu1  ;;  %v2006_v63 = vld [vmem:[%s2644_s3 + $0x48] sm:$0xff]   ;;  %v2021_v6 = vld [vmem:[%s2644_s3 + $0xc0] sm:$0xff]  }
 0x108   :  { %v972_v16 = vadd.f32 %v2127_v12, %v2396_v44  ;;  %v1004_v17 = vadd.f32 %v2159_v13, %v2396_v44  ;;  %v539_v18 = vpop.f32.mrb[11].mxu0  ;;  %v667_v19 = vpop.f32.mrb[11].mxu1  ;;  %v1163_v24 = vadd.f32 %v1732_v60, %v971_v4  ;;  %v1195_v25 = vadd.f32 %v1796_v61, %v1003_v5  ;;  %v2005_v5 = vld [vmem:[%s2644_s3 + $0x40] sm:$0xff]  }
 0x109   :  { %v970_v20 = vadd.f32 %v2396_v44, %v539_v18  ;;  %v1002_v21 = vadd.f32 %v2396_v44, %v667_v19  ;;  %v1161_v30 = vadd.f32 %v1728_v2, %v969_v10  ;;  %v1193_v31 = vadd.f32 %v1792_v3, %v1001_v11 }
 0x10a   :  { %v1164_v26 = vadd.f32 %v1733_v8, %v972_v16  ;;  %v1196_v27 = vadd.f32 %v1797_v9, %v1004_v17  ;;  %v1748_v13 = vunpack.c.l.bf16 %v2006_v63  ;;  %v1744_v19 = vunpack.c.l.bf16 %v2005_v5 }
 0x10b   :  { %v1162_v32 = vadd.f32 %v1729_v14, %v970_v20  ;;  %v1194_v33 = vadd.f32 %v1793_v15, %v1002_v21  ;;  %v1812_v14 = vunpack.c.l.bf16 %v2022_v0  ;;  %v1808_v20 = vunpack.c.l.bf16 %v2021_v6 }
 0x10c   :  { %v1866_v34 = vpack.c.bf16 %v1164_v26, %v1163_v24  ;;  %v1946_v35 = vpack.c.bf16 %v1196_v27, %v1195_v25  ;;  %v1749_v25 = vunpack.c.h.bf16 %v2006_v63  ;;  %v1813_v26 = vunpack.c.h.bf16 %v2022_v0 }
 0x10d   :  { %v1861_v38 = vpack.c.bf16 %v1162_v32, %v1161_v30  ;;  %v1941_v39 = vpack.c.bf16 %v1194_v33, %v1193_v31  ;;  %v2130_v40 = vpop.f32.mrb[12].mxu0  ;;  %v2162_v41 = vpop.f32.mrb[12].mxu1  ;;  %v1745_v31 = vunpack.c.h.bf16 %v2005_v5  ;;  %v1809_v32 = vunpack.c.h.bf16 %v2021_v6 }
 0x10e   :  { %2033 = vst [vmem:[%s2646_s4 + $0x28] sm:$0xff] %v1866_v34   ;;  %2049 = vst [vmem:[%s2646_s4 + $0xa8] sm:$0xff] %v1946_v35   ;;  %v975_v45 = vadd.f32 %v2130_v40, %v2396_v44  ;;  %v1007_v46 = vadd.f32 %v2162_v41, %v2396_v44  ;;  %v552_v47 = vpop.f32.mrb[13].mxu0  ;;  %v680_v48 = vpop.f32.mrb[13].mxu1  ;;  %v2024_v40 = vld [vmem:[%s2644_s3 + $0xd8] sm:$0xff]  }
 0x10f   :  { %2032 = vst [vmem:[%s2646_s4 + $0x20] sm:$0xff] %v1861_v38   ;;  %2048 = vst [vmem:[%s2646_s4 + $0xa0] sm:$0xff] %v1941_v39   ;;  %v973_v51 = vadd.f32 %v2396_v44, %v552_v47  ;;  %v1005_v52 = vadd.f32 %v2396_v44, %v680_v48  ;;  %v2131_v53 = vpop.f32.mrb[14].mxu0  ;;  %v2163_v54 = vpop.f32.mrb[14].mxu1  ;;  %v2008_v39 = vld [vmem:[%s2644_s3 + $0x58] sm:$0xff]   ;;  %v2023_v47 = vld [vmem:[%s2644_s3 + $0xd0] sm:$0xff]  }
 0x110   :  { %v976_v57 = vadd.f32 %v2131_v53, %v2396_v44  ;;  %v1008_v58 = vadd.f32 %v2163_v54, %v2396_v44  ;;  %v555_v59 = vpop.f32.mrb[15].mxu0  ;;  %v683_v60 = vpop.f32.mrb[15].mxu1  ;;  %v1167_v1 = vadd.f32 %v1740_v36, %v975_v45  ;;  %v1199_v2 = vadd.f32 %v1804_v37, %v1007_v46  ;;  %v2007_v46 = vld [vmem:[%s2644_s3 + $0x50] sm:$0xff]  }
 0x111   :  { %v974_v61 = vadd.f32 %v2396_v44, %v555_v59  ;;  %v1006_v62 = vadd.f32 %v2396_v44, %v683_v60  ;;  %v1165_v7 = vadd.f32 %v1736_v42, %v973_v51  ;;  %v1197_v8 = vadd.f32 %v1800_v43, %v1005_v52 }
 0x112   :  { %v1168_v3 = vadd.f32 %v1741_v49, %v976_v57  ;;  %v1200_v4 = vadd.f32 %v1805_v50, %v1008_v58  ;;  %v1756_v54 = vunpack.c.l.bf16 %v2008_v39  ;;  %v1752_v60 = vunpack.c.l.bf16 %v2007_v46 }
 0x113   :  { %v1166_v9 = vadd.f32 %v1737_v55, %v974_v61  ;;  %v1198_v10 = vadd.f32 %v1801_v56, %v1006_v62  ;;  %v1820_v55 = vunpack.c.l.bf16 %v2024_v40  ;;  %v1816_v61 = vunpack.c.l.bf16 %v2023_v47 }
 0x114   :  { %v1876_v11 = vpack.c.bf16 %v1168_v3, %v1167_v1  ;;  %v1956_v12 = vpack.c.bf16 %v1200_v4, %v1199_v2  ;;  %v1757_v2 = vunpack.c.h.bf16 %v2008_v39  ;;  %v1821_v3 = vunpack.c.h.bf16 %v2024_v40 }
 0x115   :  { %v1871_v15 = vpack.c.bf16 %v1166_v9, %v1165_v7  ;;  %v1951_v16 = vpack.c.bf16 %v1198_v10, %v1197_v8  ;;  %v2134_v17 = vpop.f32.mrb[16].mxu0  ;;  %v2166_v18 = vpop.f32.mrb[16].mxu1  ;;  %v1753_v8 = vunpack.c.h.bf16 %v2007_v46  ;;  %v1817_v9 = vunpack.c.h.bf16 %v2023_v47 }
 0x116   :  { %2035 = vst [vmem:[%s2646_s4 + $0x38] sm:$0xff] %v1876_v11   ;;  %2051 = vst [vmem:[%s2646_s4 + $0xb8] sm:$0xff] %v1956_v12   ;;  %v979_v21 = vadd.f32 %v2134_v17, %v2396_v44  ;;  %v1011_v22 = vadd.f32 %v2166_v18, %v2396_v44  ;;  %v568_v23 = vpop.f32.mrb[17].mxu0  ;;  %v696_v24 = vpop.f32.mrb[17].mxu1  ;;  %v2026_v17 = vld [vmem:[%s2644_s3 + $0xe8] sm:$0xff]  }
 0x117   :  { %2034 = vst [vmem:[%s2646_s4 + $0x30] sm:$0xff] %v1871_v15   ;;  %2050 = vst [vmem:[%s2646_s4 + $0xb0] sm:$0xff] %v1951_v16   ;;  %v977_v27 = vadd.f32 %v2396_v44, %v568_v23  ;;  %v1009_v28 = vadd.f32 %v2396_v44, %v696_v24  ;;  %v2135_v29 = vpop.f32.mrb[18].mxu0  ;;  %v2167_v30 = vpop.f32.mrb[18].mxu1  ;;  %v2010_v16 = vld [vmem:[%s2644_s3 + $0x68] sm:$0xff]   ;;  %v2025_v23 = vld [vmem:[%s2644_s3 + $0xe0] sm:$0xff]  }
 0x118   :  { %v980_v33 = vadd.f32 %v2135_v29, %v2396_v44  ;;  %v1012_v34 = vadd.f32 %v2167_v30, %v2396_v44  ;;  %v571_v35 = vpop.f32.mrb[19].mxu0  ;;  %v699_v36 = vpop.f32.mrb[19].mxu1  ;;  %v1171_v41 = vadd.f32 %v1748_v13, %v979_v21  ;;  %v1203_v42 = vadd.f32 %v1812_v14, %v1011_v22  ;;  %v2009_v22 = vld [vmem:[%s2644_s3 + $0x60] sm:$0xff]  }
 0x119   :  { %v978_v37 = vadd.f32 %v2396_v44, %v571_v35  ;;  %v1010_v38 = vadd.f32 %v2396_v44, %v699_v36  ;;  %v1169_v48 = vadd.f32 %v1744_v19, %v977_v27  ;;  %v1201_v49 = vadd.f32 %v1808_v20, %v1009_v28 }
 0x11a   :  { %v1172_v43 = vadd.f32 %v1749_v25, %v980_v33  ;;  %v1204_v45 = vadd.f32 %v1813_v26, %v1012_v34  ;;  %v1764_v30 = vunpack.c.l.bf16 %v2010_v16  ;;  %v1760_v36 = vunpack.c.l.bf16 %v2009_v22 }
 0x11b   :  { %v1170_v50 = vadd.f32 %v1745_v31, %v978_v37  ;;  %v1202_v51 = vadd.f32 %v1809_v32, %v1010_v38  ;;  %v1828_v31 = vunpack.c.l.bf16 %v2026_v17  ;;  %v1824_v37 = vunpack.c.l.bf16 %v2025_v23 }
 0x11c   :  { %v1886_v52 = vpack.c.bf16 %v1172_v43, %v1171_v41  ;;  %v1966_v53 = vpack.c.bf16 %v1204_v45, %v1203_v42  ;;  %v1765_v42 = vunpack.c.h.bf16 %v2010_v16  ;;  %v1829_v43 = vunpack.c.h.bf16 %v2026_v17 }
 0x11d   :  { %v1881_v56 = vpack.c.bf16 %v1170_v50, %v1169_v48  ;;  %v1961_v57 = vpack.c.bf16 %v1202_v51, %v1201_v49  ;;  %v2138_v58 = vpop.f32.mrb[20].mxu0  ;;  %v2170_v59 = vpop.f32.mrb[20].mxu1  ;;  %v1761_v49 = vunpack.c.h.bf16 %v2009_v22  ;;  %v1825_v50 = vunpack.c.h.bf16 %v2025_v23 }
 0x11e   :  { %2037 = vst [vmem:[%s2646_s4 + $0x48] sm:$0xff] %v1886_v52   ;;  %2053 = vst [vmem:[%s2646_s4 + $0xc8] sm:$0xff] %v1966_v53   ;;  %v983_v62 = vadd.f32 %v2138_v58, %v2396_v44  ;;  %v1015_v63 = vadd.f32 %v2170_v59, %v2396_v44  ;;  %v584_v0 = vpop.f32.mrb[21].mxu0  ;;  %v712_v1 = vpop.f32.mrb[21].mxu1  ;;  %v2028_v58 = vld [vmem:[%s2644_s3 + $0xf8] sm:$0xff]  }
 0x11f   :  { %2036 = vst [vmem:[%s2646_s4 + $0x40] sm:$0xff] %v1881_v56   ;;  %2052 = vst [vmem:[%s2646_s4 + $0xc0] sm:$0xff] %v1961_v57   ;;  %v981_v4 = vadd.f32 %v2396_v44, %v584_v0  ;;  %v1013_v5 = vadd.f32 %v2396_v44, %v712_v1  ;;  %v2139_v6 = vpop.f32.mrb[22].mxu0  ;;  %v2171_v7 = vpop.f32.mrb[22].mxu1  ;;  %v2012_v57 = vld [vmem:[%s2644_s3 + $0x78] sm:$0xff]   ;;  %v2027_v0 = vld [vmem:[%s2644_s3 + $0xf0] sm:$0xff]  }
 0x120   :  { %v984_v10 = vadd.f32 %v2139_v6, %v2396_v44  ;;  %v1016_v11 = vadd.f32 %v2171_v7, %v2396_v44  ;;  %v587_v12 = vpop.f32.mrb[23].mxu0  ;;  %v715_v13 = vpop.f32.mrb[23].mxu1  ;;  %v1175_v18 = vadd.f32 %v1756_v54, %v983_v62  ;;  %v1207_v19 = vadd.f32 %v1820_v55, %v1015_v63  ;;  %v2011_v63 = vld [vmem:[%s2644_s3 + $0x70] sm:$0xff]  }
 0x121   :  { %v982_v14 = vadd.f32 %v2396_v44, %v587_v12  ;;  %v1014_v15 = vadd.f32 %v2396_v44, %v715_v13  ;;  %v1173_v24 = vadd.f32 %v1752_v60, %v981_v4  ;;  %v1205_v25 = vadd.f32 %v1816_v61, %v1013_v5 }
 0x122   :  { %v1176_v20 = vadd.f32 %v1757_v2, %v984_v10  ;;  %v1208_v21 = vadd.f32 %v1821_v3, %v1016_v11  ;;  %v1772_v7 = vunpack.c.l.bf16 %v2012_v57  ;;  %v1768_v13 = vunpack.c.l.bf16 %v2011_v63 }
 0x123   :  { %v1174_v26 = vadd.f32 %v1753_v8, %v982_v14  ;;  %v1206_v27 = vadd.f32 %v1817_v9, %v1014_v15  ;;  %v1836_v8 = vunpack.c.l.bf16 %v2028_v58  ;;  %v1832_v14 = vunpack.c.l.bf16 %v2027_v0 }
 0x124   :  { %v1896_v28 = vpack.c.bf16 %v1176_v20, %v1175_v18  ;;  %v1976_v29 = vpack.c.bf16 %v1208_v21, %v1207_v19  ;;  %v1773_v19 = vunpack.c.h.bf16 %v2012_v57  ;;  %v1837_v20 = vunpack.c.h.bf16 %v2028_v58 }
 0x125   :  { %v1891_v32 = vpack.c.bf16 %v1174_v26, %v1173_v24  ;;  %v1971_v33 = vpack.c.bf16 %v1206_v27, %v1205_v25  ;;  %v2142_v34 = vpop.f32.mrb[24].mxu0  ;;  %v2174_v35 = vpop.f32.mrb[24].mxu1  ;;  %v1769_v25 = vunpack.c.h.bf16 %v2011_v63  ;;  %v1833_v26 = vunpack.c.h.bf16 %v2027_v0 }
 0x126   :  { %2039 = vst [vmem:[%s2646_s4 + $0x58] sm:$0xff] %v1896_v28   ;;  %2055 = vst [vmem:[%s2646_s4 + $0xd8] sm:$0xff] %v1976_v29   ;;  %v987_v38 = vadd.f32 %v2142_v34, %v2396_v44  ;;  %v1019_v39 = vadd.f32 %v2174_v35, %v2396_v44  ;;  %v600_v40 = vpop.f32.mrb[25].mxu0  ;;  %v728_v41 = vpop.f32.mrb[25].mxu1 }
 0x127   :  { %2038 = vst [vmem:[%s2646_s4 + $0x50] sm:$0xff] %v1891_v32   ;;  %2054 = vst [vmem:[%s2646_s4 + $0xd0] sm:$0xff] %v1971_v33   ;;  %v985_v45 = vadd.f32 %v2396_v44, %v600_v40  ;;  %v1017_v46 = vadd.f32 %v2396_v44, %v728_v41  ;;  %v2143_v47 = vpop.f32.mrb[26].mxu0  ;;  %v2175_v48 = vpop.f32.mrb[26].mxu1 }
 0x128   :  { %v988_v51 = vadd.f32 %v2143_v47, %v2396_v44  ;;  %v1020_v52 = vadd.f32 %v2175_v48, %v2396_v44  ;;  %v603_v53 = vpop.f32.mrb[27].mxu0  ;;  %v731_v54 = vpop.f32.mrb[27].mxu1  ;;  %v1179_v59 = vadd.f32 %v1764_v30, %v987_v38  ;;  %v1211_v60 = vadd.f32 %v1828_v31, %v1019_v39 }
 0x129   :  { %v986_v55 = vadd.f32 %v2396_v44, %v603_v53  ;;  %v1018_v56 = vadd.f32 %v2396_v44, %v731_v54  ;;  %v1177_v1 = vadd.f32 %v1760_v36, %v985_v45  ;;  %v1209_v2 = vadd.f32 %v1824_v37, %v1017_v46 }
 0x12a   :  { %v1180_v61 = vadd.f32 %v1765_v42, %v988_v51  ;;  %v1212_v62 = vadd.f32 %v1829_v43, %v1020_v52 }
 0x12b   :  { %v1178_v3 = vadd.f32 %v1761_v49, %v986_v55  ;;  %v1210_v4 = vadd.f32 %v1825_v50, %v1018_v56 }
 0x12c   :  { %v1906_v5 = vpack.c.bf16 %v1180_v61, %v1179_v59  ;;  %v1986_v6 = vpack.c.bf16 %v1212_v62, %v1211_v60 }
 0x12d   :  { %v1901_v9 = vpack.c.bf16 %v1178_v3, %v1177_v1  ;;  %v1981_v10 = vpack.c.bf16 %v1210_v4, %v1209_v2  ;;  %v2146_v11 = vpop.f32.mrb[28].mxu0  ;;  %v2178_v12 = vpop.f32.mrb[28].mxu1 }
 0x12e   :  { %2041 = vst [vmem:[%s2646_s4 + $0x68] sm:$0xff] %v1906_v5   ;;  %2057 = vst [vmem:[%s2646_s4 + $0xe8] sm:$0xff] %v1986_v6   ;;  %v991_v15 = vadd.f32 %v2146_v11, %v2396_v44  ;;  %v1023_v16 = vadd.f32 %v2178_v12, %v2396_v44  ;;  %v616_v17 = vpop.f32.mrb[29].mxu0  ;;  %v744_v18 = vpop.f32.mrb[29].mxu1 }
 0x12f   :  { %2040 = vst [vmem:[%s2646_s4 + $0x60] sm:$0xff] %v1901_v9   ;;  %2056 = vst [vmem:[%s2646_s4 + $0xe0] sm:$0xff] %v1981_v10   ;;  %v989_v21 = vadd.f32 %v2396_v44, %v616_v17  ;;  %v1021_v22 = vadd.f32 %v2396_v44, %v744_v18  ;;  %v2147_v23 = vpop.f32.mrb[30].mxu0  ;;  %v2179_v24 = vpop.f32.mrb[30].mxu1 }
 0x130   :  { %v992_v27 = vadd.f32 %v2147_v23, %v2396_v44  ;;  %v1024_v28 = vadd.f32 %v2179_v24, %v2396_v44  ;;  %v619_v29 = vpop.f32.mrb[31].mxu0  ;;  %v747_v30 = vpop.f32.mrb[31].mxu1  ;;  %v1183_v33 = vadd.f32 %v1772_v7, %v991_v15  ;;  %v1215_v34 = vadd.f32 %v1836_v8, %v1023_v16 }
 0x131   :  { %v990_v31 = vadd.f32 %v2396_v44, %v619_v29  ;;  %v1022_v32 = vadd.f32 %v2396_v44, %v747_v30  ;;  %v1181_v37 = vadd.f32 %v1768_v13, %v989_v21  ;;  %v1213_v38 = vadd.f32 %v1832_v14, %v1021_v22 }
 0x132   :  { %v1184_v35 = vadd.f32 %v1773_v19, %v992_v27  ;;  %v1216_v36 = vadd.f32 %v1837_v20, %v1024_v28 }
 0x133   :  { %v1182_v39 = vadd.f32 %v1769_v25, %v990_v31  ;;  %v1214_v40 = vadd.f32 %v1833_v26, %v1022_v32 }
 0x134   :  { %v1916_v41 = vpack.c.bf16 %v1184_v35, %v1183_v33  ;;  %v1996_v42 = vpack.c.bf16 %v1216_v36, %v1215_v34 }
 0x135   :  { %v1911_v43 = vpack.c.bf16 %v1182_v39, %v1181_v37  ;;  %v1991_v45 = vpack.c.bf16 %v1214_v40, %v1213_v38 }
 0x136   :  { %2043 = vst [vmem:[%s2646_s4 + $0x78] sm:$0xff] %v1916_v41   ;;  %2059 = vst [vmem:[%s2646_s4 + $0xf8] sm:$0xff] %v1996_v42  }
 0x137   :  { %2042 = vst [vmem:[%s2646_s4 + $0x70] sm:$0xff] %v1911_v43   ;;  %2058 = vst [vmem:[%s2646_s4 + $0xf0] sm:$0xff] %v1991_v45  }

// kernel: netg_forward.119
= control target key start
LH: loop header
LB: loop body
LE: loop exit
PB: predicated region body
PF: predicated region fallthrough
CT: control target
= control target key end

     0   :  { %s2379_s1 = inlined_call_operand.vmem [shape: bf16[128,128], index: 1, kind: input, shape index: {}]   ;;  %s2380_s0 = inlined_call_operand.vmem [shape: bf16[512,128], index: 0, kind: input, shape index: {}]   ;;  %s2381_s2 = inlined_call_operand.vmem [shape: f32[1,128], index: 2, kind: input, shape index: {}]   ;;  %s2382_s3 = inlined_call_operand.vmem [shape: bf16[512,128], index: 3, kind: output, shape index: {}]  }
   0x1   :  { %v1906_v0 = vld [vmem:[%s2379_s1] sm:$0xff]   ;;  %v1907_v1 = vld [vmem:[%s2379_s1 + $0x8] sm:$0xff]   ;;  %v1908_v2 = vld [vmem:[%s2379_s1 + $0x10] sm:$0xff]  }
   0x2   :  { %1810 = vmatprep.subr.bf16.mxu0 %v1906_v0  ;;  %1890 = vmatprep.subr.bf16.mxu1 %v1906_v0  ;;  %v1909_v3 = vld [vmem:[%s2379_s1 + $0x18] sm:$0xff]   ;;  %v1914_v4 = vld [vmem:[%s2380_s0] sm:$0xff]   ;;  %v1911_v7 = vld [vmem:[%s2379_s1 + $0x28] sm:$0xff]  }
   0x3   :  { %1811 = vmatpush3.bf16.msra.mxu0 %v1906_v0  ;;  %1898 = vmatpush3.bf16.msra.mxu1 %v1906_v0  ;;  %v1915_v5 = vld [vmem:[%s2380_s0 + $0x80] sm:$0xff]   ;;  %v1912_v8 = vld [vmem:[%s2379_s1 + $0x30] sm:$0xff]   ;;  %v1913_v9 = vld [vmem:[%s2379_s1 + $0x38] sm:$0xff]  }
   0x4   :  { %1812 = vmatprep.subr.bf16.mxu0 %v1907_v1  ;;  %1891 = vmatprep.subr.bf16.mxu1 %v1907_v1  ;;  %v1910_v6 = vld [vmem:[%s2379_s1 + $0x20] sm:$0xff]   ;;  %v1916_v10 = vld [vmem:[%s2380_s0 + $0x8] sm:$0xff]   ;;  %v1918_v12 = vld [vmem:[%s2380_s0 + $0x10] sm:$0xff]  }
   0x5   :  { %1826 = vmatprep.mubr.bf16.mxu0 %v1914_v4  ;;  %1858 = vmatprep.mubr.bf16.mxu1 %v1915_v5  ;;  %v1917_v11 = vld [vmem:[%s2380_s0 + $0x88] sm:$0xff]   ;;  %v1919_v13 = vld [vmem:[%s2380_s0 + $0x90] sm:$0xff]   ;;  %v1920_v14 = vld [vmem:[%s2380_s0 + $0x18] sm:$0xff]  }
   0x6   :  { %v1921_v15 = vld [vmem:[%s2380_s0 + $0x98] sm:$0xff]   ;;  %v1922_v16 = vld [vmem:[%s2380_s0 + $0x20] sm:$0xff]   ;;  %v1924_v18 = vld [vmem:[%s2380_s0 + $0x28] sm:$0xff]  }
   0x7   :  { %1813 = vmatpush3.bf16.msra.mxu0 %v1907_v1  ;;  %1899 = vmatpush3.bf16.msra.mxu1 %v1907_v1  ;;  %v1923_v17 = vld [vmem:[%s2380_s0 + $0xa0] sm:$0xff]   ;;  %v1925_v19 = vld [vmem:[%s2380_s0 + $0xa8] sm:$0xff]   ;;  %v1926_v20 = vld [vmem:[%s2380_s0 + $0x30] sm:$0xff]  }
   0x8   :  { %1814 = vmatprep.subr.bf16.mxu0 %v1908_v2  ;;  %1892 = vmatprep.subr.bf16.mxu1 %v1908_v2  ;;  %v1927_v21 = vld [vmem:[%s2380_s0 + $0xb0] sm:$0xff]   ;;  %v1928_v22 = vld [vmem:[%s2380_s0 + $0x38] sm:$0xff]   ;;  %v1930_v24 = vld [vmem:[%s2380_s0 + $0x40] sm:$0xff]  }
   0x9   :  { %v1929_v23 = vld [vmem:[%s2380_s0 + $0xb8] sm:$0xff]   ;;  %v1931_v25 = vld [vmem:[%s2380_s0 + $0xc0] sm:$0xff]   ;;  %v1932_v26 = vld [vmem:[%s2380_s0 + $0x48] sm:$0xff]  }
   0xa   :  { %v1933_v27 = vld [vmem:[%s2380_s0 + $0xc8] sm:$0xff]   ;;  %v1934_v28 = vld [vmem:[%s2380_s0 + $0x50] sm:$0xff]   ;;  %v1936_v30 = vld [vmem:[%s2380_s0 + $0x58] sm:$0xff]  }
   0xb   :  { %1815 = vmatpush3.bf16.msra.mxu0 %v1908_v2  ;;  %1900 = vmatpush3.bf16.msra.mxu1 %v1908_v2  ;;  %v1935_v29 = vld [vmem:[%s2380_s0 + $0xd0] sm:$0xff]   ;;  %v1937_v31 = vld [vmem:[%s2380_s0 + $0xd8] sm:$0xff]   ;;  %v1938_v32 = vld [vmem:[%s2380_s0 + $0x60] sm:$0xff]  }
   0xc   :  { %1816 = vmatprep.subr.bf16.mxu0 %v1909_v3  ;;  %1893 = vmatprep.subr.bf16.mxu1 %v1909_v3  ;;  %v1939_v33 = vld [vmem:[%s2380_s0 + $0xe0] sm:$0xff]   ;;  %v1940_v34 = vld [vmem:[%s2380_s0 + $0x68] sm:$0xff]   ;;  %v1942_v36 = vld [vmem:[%s2380_s0 + $0x70] sm:$0xff]  }
   0xd   :  { %v1941_v35 = vld [vmem:[%s2380_s0 + $0xe8] sm:$0xff]   ;;  %v1943_v37 = vld [vmem:[%s2380_s0 + $0xf0] sm:$0xff]   ;;  %v1944_v38 = vld [vmem:[%s2380_s0 + $0x78] sm:$0xff]  }
   0xe   :  { %v1945_v39 = vld [vmem:[%s2380_s0 + $0xf8] sm:$0xff]   ;;  %v2217_v40 = vld [vmem:[%s2381_s2] ss:$0 sm:$0xff] }
   0xf   :  { %1817 = vmatpush3.bf16.msra.mxu0 %v1909_v3  ;;  %1901 = vmatpush3.bf16.msra.mxu1 %v1909_v3 }
  0x10   :  { %1818 = vmatprep.subr.bf16.mxu0 %v1910_v6  ;;  %1894 = vmatprep.subr.bf16.mxu1 %v1910_v6 }
  0x13   :  { %1819 = vmatpush3.bf16.msra.mxu0 %v1910_v6  ;;  %1902 = vmatpush3.bf16.msra.mxu1 %v1910_v6 }
  0x14   :  { %1820 = vmatprep.subr.bf16.mxu0 %v1911_v7  ;;  %1895 = vmatprep.subr.bf16.mxu1 %v1911_v7 }
  0x17   :  { %1821 = vmatpush3.bf16.msra.mxu0 %v1911_v7  ;;  %1903 = vmatpush3.bf16.msra.mxu1 %v1911_v7 }
  0x18   :  { %1822 = vmatprep.subr.bf16.mxu0 %v1912_v8  ;;  %1896 = vmatprep.subr.bf16.mxu1 %v1912_v8 }
  0x1b   :  { %1823 = vmatpush3.bf16.msra.mxu0 %v1912_v8  ;;  %1904 = vmatpush3.bf16.msra.mxu1 %v1912_v8 }
  0x1c   :  { %1824 = vmatprep.subr.bf16.mxu0 %v1913_v9  ;;  %1897 = vmatprep.subr.bf16.mxu1 %v1913_v9 }
  0x1f   :  { %1825 = vmatpush3.bf16.msra.mxu0 %v1913_v9  ;;  %1905 = vmatpush3.bf16.msra.mxu1 %v1913_v9 }
  0x22   :  { %1827 = vmatmul.mubr.bf16.vlgmr.msra.gmra.mrb[0].mxu0 %v1916_v10  ;;  %1859 = vmatmul.mubr.bf16.vlgmr.msra.gmra.mrb[0].mxu1 %v1917_v11 }
  0x23   :  { %1830 = vmatprep.mubr.bf16.mxu0 %v1918_v12  ;;  %1862 = vmatprep.mubr.bf16.mxu1 %v1919_v13 }
  0x2a   :  { %1831 = vmatmul.mubr.bf16.gmra.mrb[4].mxu0 %v1920_v14  ;;  %1863 = vmatmul.mubr.bf16.gmra.mrb[4].mxu1 %v1921_v15 }
  0x2b   :  { %1834 = vmatprep.mubr.bf16.mxu0 %v1922_v16  ;;  %1866 = vmatprep.mubr.bf16.mxu1 %v1923_v17 }
  0x32   :  { %1835 = vmatmul.mubr.bf16.gmra.mrb[8].mxu0 %v1924_v18  ;;  %1867 = vmatmul.mubr.bf16.gmra.mrb[8].mxu1 %v1925_v19 }
  0x33   :  { %1838 = vmatprep.mubr.bf16.mxu0 %v1926_v20  ;;  %1870 = vmatprep.mubr.bf16.mxu1 %v1927_v21 }
  0x3a   :  { %1839 = vmatmul.mubr.bf16.gmra.mrb[12].mxu0 %v1928_v22  ;;  %1871 = vmatmul.mubr.bf16.gmra.mrb[12].mxu1 %v1929_v23 }
  0x3b   :  { %1842 = vmatprep.mubr.bf16.mxu0 %v1930_v24  ;;  %1874 = vmatprep.mubr.bf16.mxu1 %v1931_v25 }
  0x42   :  { %1843 = vmatmul.mubr.bf16.gmra.mrb[16].mxu0 %v1932_v26  ;;  %1875 = vmatmul.mubr.bf16.gmra.mrb[16].mxu1 %v1933_v27 }
  0x43   :  { %1846 = vmatprep.mubr.bf16.mxu0 %v1934_v28  ;;  %1878 = vmatprep.mubr.bf16.mxu1 %v1935_v29 }
  0x4a   :  { %1847 = vmatmul.mubr.bf16.gmra.mrb[20].mxu0 %v1936_v30  ;;  %1879 = vmatmul.mubr.bf16.gmra.mrb[20].mxu1 %v1937_v31 }
  0x4b   :  { %1850 = vmatprep.mubr.bf16.mxu0 %v1938_v32  ;;  %1882 = vmatprep.mubr.bf16.mxu1 %v1939_v33 }
  0x52   :  { %1851 = vmatmul.mubr.bf16.gmra.mrb[24].mxu0 %v1940_v34  ;;  %1883 = vmatmul.mubr.bf16.gmra.mrb[24].mxu1 %v1941_v35 }
  0x53   :  { %1854 = vmatprep.mubr.bf16.mxu0 %v1942_v36  ;;  %1886 = vmatprep.mubr.bf16.mxu1 %v1943_v37 }
  0x5a   :  { %1855 = vmatmul.mubr.bf16.gmra.mrb[28].mxu0 %v1944_v38  ;;  %1887 = vmatmul.mubr.bf16.gmra.mrb[28].mxu1 %v1945_v39 }
  0xf5   :  { %v1828_v41 = vpop.f32.mrb[0].mxu0  ;;  %v1860_v42 = vpop.f32.mrb[0].mxu1 }
  0xf6   :  { %v960_v43 = vadd.f32 %v1828_v41, %v2217_v40  ;;  %v992_v44 = vadd.f32 %v1860_v42, %v2217_v40  ;;  %v501_v45 = vpop.f32.mrb[1].mxu0  ;;  %v629_v46 = vpop.f32.mrb[1].mxu1 }
  0xf7   :  { %v958_v47 = vadd.f32 %v2217_v40, %v501_v45  ;;  %v990_v48 = vadd.f32 %v2217_v40, %v629_v46  ;;  %v1829_v49 = vpop.f32.mrb[2].mxu0  ;;  %v1861_v50 = vpop.f32.mrb[2].mxu1 }
  0xf8   :  { %1946 = vtanh.f32 %v960_v43  ;;  %v961_v51 = vadd.f32 %v1829_v49, %v2217_v40  ;;  %v504_v52 = vpop.f32.mrb[3].mxu0  ;;  %v632_v53 = vpop.f32.mrb[3].mxu1  ;;  %v993_v54 = vadd.f32 %v1861_v50, %v2217_v40 }
  0xf9   :  { %1948 = vtanh.f32 %v992_v44  ;;  %v959_v55 = vadd.f32 %v2217_v40, %v504_v52  ;;  %v991_v56 = vadd.f32 %v2217_v40, %v632_v53 }
  0xfa   :  { %1950 = vtanh.f32 %v958_v47 }
  0xfb   :  { %1952 = vtanh.f32 %v990_v48 }
  0xfc   :  { %1954 = vtanh.f32 %v961_v51 }
  0xfd   :  { %1956 = vtanh.f32 %v993_v54  ;;  %v1832_v57 = vpop.f32.mrb[4].mxu0  ;;  %v1864_v58 = vpop.f32.mrb[4].mxu1 }
  0xfe   :  { %1958 = vtanh.f32 %v959_v55  ;;  %v964_v59 = vadd.f32 %v1832_v57, %v2217_v40  ;;  %v996_v60 = vadd.f32 %v1864_v58, %v2217_v40  ;;  %v517_v61 = vpop.f32.mrb[5].mxu0  ;;  %v645_v62 = vpop.f32.mrb[5].mxu1 }
  0xff   :  { %1960 = vtanh.f32 %v991_v56  ;;  %v962_v63 = vadd.f32 %v2217_v40, %v517_v61  ;;  %v994_v0 = vadd.f32 %v2217_v40, %v645_v62  ;;  %v1833_v1 = vpop.f32.mrb[6].mxu0  ;;  %v1865_v2 = vpop.f32.mrb[6].mxu1 }
 0x100   :  { %1962 = vtanh.f32 %v964_v59  ;;  %v965_v3 = vadd.f32 %v1833_v1, %v2217_v40  ;;  %v520_v4 = vpop.f32.mrb[7].mxu0  ;;  %v648_v5 = vpop.f32.mrb[7].mxu1  ;;  %v997_v6 = vadd.f32 %v1865_v2, %v2217_v40 }
 0x101   :  { %1964 = vtanh.f32 %v996_v60  ;;  %v963_v8 = vadd.f32 %v2217_v40, %v520_v4  ;;  %v995_v10 = vadd.f32 %v2217_v40, %v648_v5 }
 0x102   :  { %v1947_v7 = vpop.eup %1946  ;;  %1966 = vtanh.f32 %v962_v63 }
 0x103   :  { %v1949_v9 = vpop.eup %1948  ;;  %1968 = vtanh.f32 %v994_v0 }
 0x104   :  { %v1951_v11 = vpop.eup %1950  ;;  %1970 = vtanh.f32 %v965_v3 }
 0x105   :  { %v1953_v12 = vpop.eup %1952  ;;  %1972 = vtanh.f32 %v997_v6  ;;  %v1836_v13 = vpop.f32.mrb[8].mxu0 }
 0x106   :  { %v1868_v14 = vpop.f32.mrb[8].mxu1  ;;  %v1955_v15 = vpop.eup %1954  ;;  %1974 = vtanh.f32 %v963_v8  ;;  %v968_v16 = vadd.f32 %v1836_v13, %v2217_v40 }
 0x107   :  { %v1000_v17 = vadd.f32 %v1868_v14, %v2217_v40  ;;  %v533_v18 = vpop.f32.mrb[9].mxu0  ;;  %v661_v19 = vpop.f32.mrb[9].mxu1  ;;  %v1587_v21 = vpack.c.bf16 %v1955_v15, %v1947_v7  ;;  %1976 = vtanh.f32 %v995_v10 }
 0x108   :  { %v1957_v20 = vpop.eup %1956  ;;  %v966_v22 = vadd.f32 %v2217_v40, %v533_v18  ;;  %v998_v23 = vadd.f32 %v2217_v40, %v661_v19  ;;  %v1837_v24 = vpop.f32.mrb[10].mxu0  ;;  %1978 = vtanh.f32 %v968_v16 }
 0x109   :  { %v1869_v25 = vpop.f32.mrb[10].mxu1  ;;  %v1959_v26 = vpop.eup %1958  ;;  %v1667_v27 = vpack.c.bf16 %v1957_v20, %v1949_v9  ;;  %v969_v28 = vadd.f32 %v1837_v24, %v2217_v40  ;;  %1739 = vst [vmem:[%s2382_s3 + $0x8] sm:$0xff] %v1587_v21   ;;  %1980 = vtanh.f32 %v1000_v17 }
 0x10a   :  { %v536_v29 = vpop.f32.mrb[11].mxu0  ;;  %v664_v30 = vpop.f32.mrb[11].mxu1  ;;  %v1582_v32 = vpack.c.bf16 %v1959_v26, %v1951_v11  ;;  %v1001_v33 = vadd.f32 %v1869_v25, %v2217_v40  ;;  %1982 = vtanh.f32 %v966_v22 }
 0x10b   :  { %v1961_v31 = vpop.eup %1960  ;;  %1755 = vst [vmem:[%s2382_s3 + $0x88] sm:$0xff] %v1667_v27   ;;  %v967_v36 = vadd.f32 %v2217_v40, %v536_v29  ;;  %1984 = vtanh.f32 %v998_v23  ;;  %v999_v38 = vadd.f32 %v2217_v40, %v664_v30 }
 0x10c   :  { %v1963_v34 = vpop.eup %1962  ;;  %v1662_v35 = vpack.c.bf16 %v1961_v31, %v1953_v12  ;;  %1583 = vst [vmem:[%s2382_s3] sm:$0xff] %v1582_v32   ;;  %1986 = vtanh.f32 %v969_v28 }
 0x10d   :  { %v1965_v37 = vpop.eup %1964  ;;  %1988 = vtanh.f32 %v1001_v33  ;;  %v1840_v42 = vpop.f32.mrb[12].mxu0 }
 0x10e   :  { %v1967_v39 = vpop.eup %1966  ;;  %1754 = vst [vmem:[%s2382_s3 + $0x80] sm:$0xff] %v1662_v35   ;;  %v1872_v43 = vpop.f32.mrb[12].mxu1  ;;  %1990 = vtanh.f32 %v967_v36  ;;  %v972_v45 = vadd.f32 %v1840_v42, %v2217_v40 }
 0x10f   :  { %v1969_v41 = vpop.eup %1968  ;;  %v1004_v46 = vadd.f32 %v1872_v43, %v2217_v40  ;;  %v549_v47 = vpop.f32.mrb[13].mxu0  ;;  %1992 = vtanh.f32 %v999_v38 }
 0x110   :  { %v1971_v44 = vpop.eup %1970  ;;  %v677_v48 = vpop.f32.mrb[13].mxu1  ;;  %v970_v51 = vadd.f32 %v2217_v40, %v549_v47  ;;  %1994 = vtanh.f32 %v972_v45 }
 0x111   :  { %v1973_v49 = vpop.eup %1972  ;;  %v1597_v50 = vpack.c.bf16 %v1971_v44, %v1963_v34  ;;  %v1002_v52 = vadd.f32 %v2217_v40, %v677_v48  ;;  %v1841_v53 = vpop.f32.mrb[14].mxu0  ;;  %1996 = vtanh.f32 %v1004_v46 }
 0x112   :  { %v1873_v54 = vpop.f32.mrb[14].mxu1  ;;  %v1975_v55 = vpop.eup %1974  ;;  %v1677_v56 = vpack.c.bf16 %v1973_v49, %v1965_v37  ;;  %v973_v57 = vadd.f32 %v1841_v53, %v2217_v40  ;;  %1998 = vtanh.f32 %v970_v51 }
 0x113   :  { %v552_v58 = vpop.f32.mrb[15].mxu0  ;;  %v680_v59 = vpop.f32.mrb[15].mxu1  ;;  %1741 = vst [vmem:[%s2382_s3 + $0x18] sm:$0xff] %v1597_v50   ;;  %v1592_v61 = vpack.c.bf16 %v1975_v55, %v1967_v39  ;;  %v1005_v62 = vadd.f32 %v1873_v54, %v2217_v40  ;;  %2000 = vtanh.f32 %v1002_v52 }
 0x114   :  { %v1977_v60 = vpop.eup %1976  ;;  %1757 = vst [vmem:[%s2382_s3 + $0x98] sm:$0xff] %v1677_v56   ;;  %v971_v1 = vadd.f32 %v2217_v40, %v552_v58  ;;  %v1003_v3 = vadd.f32 %v2217_v40, %v680_v59  ;;  %2002 = vtanh.f32 %v973_v57 }
 0x115   :  { %v1979_v63 = vpop.eup %1978  ;;  %v1672_v0 = vpack.c.bf16 %v1977_v60, %v1969_v41  ;;  %1740 = vst [vmem:[%s2382_s3 + $0x10] sm:$0xff] %v1592_v61   ;;  %2004 = vtanh.f32 %v1005_v62  ;;  %v1844_v6 = vpop.f32.mrb[16].mxu0 }
 0x116   :  { %v1981_v2 = vpop.eup %1980  ;;  %v1876_v7 = vpop.f32.mrb[16].mxu1  ;;  %2006 = vtanh.f32 %v971_v1  ;;  %v976_v9 = vadd.f32 %v1844_v6, %v2217_v40 }
 0x117   :  { %v1983_v4 = vpop.eup %1982  ;;  %1756 = vst [vmem:[%s2382_s3 + $0x90] sm:$0xff] %v1672_v0   ;;  %v1008_v10 = vadd.f32 %v1876_v7, %v2217_v40  ;;  %v565_v11 = vpop.f32.mrb[17].mxu0  ;;  %2008 = vtanh.f32 %v1003_v3 }
 0x118   :  { %v1985_v5 = vpop.eup %1984  ;;  %v693_v12 = vpop.f32.mrb[17].mxu1  ;;  %v974_v15 = vadd.f32 %v2217_v40, %v565_v11  ;;  %2010 = vtanh.f32 %v976_v9 }
 0x119   :  { %v1987_v8 = vpop.eup %1986  ;;  %v1006_v16 = vadd.f32 %v2217_v40, %v693_v12  ;;  %v1845_v17 = vpop.f32.mrb[18].mxu0  ;;  %2012 = vtanh.f32 %v1008_v10 }
 0x11a   :  { %v1989_v13 = vpop.eup %1988  ;;  %v1607_v14 = vpack.c.bf16 %v1987_v8, %v1979_v63  ;;  %v1877_v18 = vpop.f32.mrb[18].mxu1  ;;  %v977_v21 = vadd.f32 %v1845_v17, %v2217_v40  ;;  %2014 = vtanh.f32 %v974_v15 }
 0x11b   :  { %v1991_v19 = vpop.eup %1990  ;;  %v1687_v20 = vpack.c.bf16 %v1989_v13, %v1981_v2  ;;  %v568_v22 = vpop.f32.mrb[19].mxu0  ;;  %v1009_v26 = vadd.f32 %v1877_v18, %v2217_v40  ;;  %2016 = vtanh.f32 %v1006_v16 }
 0x11c   :  { %v696_v23 = vpop.f32.mrb[19].mxu1  ;;  %v1993_v24 = vpop.eup %1992  ;;  %1743 = vst [vmem:[%s2382_s3 + $0x28] sm:$0xff] %v1607_v14   ;;  %v1602_v25 = vpack.c.bf16 %v1991_v19, %v1983_v4  ;;  %v975_v29 = vadd.f32 %v2217_v40, %v568_v22  ;;  %2018 = vtanh.f32 %v977_v21 }
 0x11d   :  { %v1995_v27 = vpop.eup %1994  ;;  %1759 = vst [vmem:[%s2382_s3 + $0xa8] sm:$0xff] %v1687_v20   ;;  %v1682_v28 = vpack.c.bf16 %v1993_v24, %v1985_v5  ;;  %v1007_v31 = vadd.f32 %v2217_v40, %v696_v23  ;;  %2020 = vtanh.f32 %v1009_v26  ;;  %v1848_v34 = vpop.f32.mrb[20].mxu0 }
 0x11e   :  { %v1997_v30 = vpop.eup %1996  ;;  %1742 = vst [vmem:[%s2382_s3 + $0x20] sm:$0xff] %v1602_v25   ;;  %v1880_v35 = vpop.f32.mrb[20].mxu1  ;;  %2022 = vtanh.f32 %v975_v29  ;;  %v980_v37 = vadd.f32 %v1848_v34, %v2217_v40 }
 0x11f   :  { %v1999_v32 = vpop.eup %1998  ;;  %1758 = vst [vmem:[%s2382_s3 + $0xa0] sm:$0xff] %v1682_v28   ;;  %v1012_v38 = vadd.f32 %v1880_v35, %v2217_v40  ;;  %v581_v39 = vpop.f32.mrb[21].mxu0  ;;  %2024 = vtanh.f32 %v1007_v31 }
 0x120   :  { %v2001_v33 = vpop.eup %2000  ;;  %v709_v41 = vpop.f32.mrb[21].mxu1  ;;  %v978_v44 = vadd.f32 %v2217_v40, %v581_v39  ;;  %2026 = vtanh.f32 %v980_v37 }
 0x121   :  { %v2003_v36 = vpop.eup %2002  ;;  %v1010_v45 = vadd.f32 %v2217_v40, %v709_v41  ;;  %v1849_v46 = vpop.f32.mrb[22].mxu0  ;;  %2028 = vtanh.f32 %v1012_v38 }
 0x122   :  { %v2005_v42 = vpop.eup %2004  ;;  %v1617_v43 = vpack.c.bf16 %v2003_v36, %v1995_v27  ;;  %v1881_v47 = vpop.f32.mrb[22].mxu1  ;;  %v981_v50 = vadd.f32 %v1849_v46, %v2217_v40  ;;  %2030 = vtanh.f32 %v978_v44 }
 0x123   :  { %v2007_v48 = vpop.eup %2006  ;;  %v1697_v49 = vpack.c.bf16 %v2005_v42, %v1997_v30  ;;  %v584_v51 = vpop.f32.mrb[23].mxu0  ;;  %v1013_v55 = vadd.f32 %v1881_v47, %v2217_v40  ;;  %2032 = vtanh.f32 %v1010_v45 }
 0x124   :  { %v712_v52 = vpop.f32.mrb[23].mxu1  ;;  %v2009_v53 = vpop.eup %2008  ;;  %1745 = vst [vmem:[%s2382_s3 + $0x38] sm:$0xff] %v1617_v43   ;;  %v1612_v54 = vpack.c.bf16 %v2007_v48, %v1999_v32  ;;  %v979_v58 = vadd.f32 %v2217_v40, %v584_v51  ;;  %2034 = vtanh.f32 %v981_v50 }
 0x125   :  { %v2011_v56 = vpop.eup %2010  ;;  %1761 = vst [vmem:[%s2382_s3 + $0xb8] sm:$0xff] %v1697_v49   ;;  %v1692_v57 = vpack.c.bf16 %v2009_v53, %v2001_v33  ;;  %v1011_v60 = vadd.f32 %v2217_v40, %v712_v52  ;;  %2036 = vtanh.f32 %v1013_v55  ;;  %v1852_v63 = vpop.f32.mrb[24].mxu0 }
 0x126   :  { %v2013_v59 = vpop.eup %2012  ;;  %1744 = vst [vmem:[%s2382_s3 + $0x30] sm:$0xff] %v1612_v54   ;;  %v1884_v0 = vpop.f32.mrb[24].mxu1  ;;  %2038 = vtanh.f32 %v979_v58  ;;  %v984_v2 = vadd.f32 %v1852_v63, %v2217_v40 }
 0x127   :  { %v2015_v61 = vpop.eup %2014  ;;  %1760 = vst [vmem:[%s2382_s3 + $0xb0] sm:$0xff] %v1692_v57   ;;  %v1016_v3 = vadd.f32 %v1884_v0, %v2217_v40  ;;  %v597_v4 = vpop.f32.mrb[25].mxu0  ;;  %2040 = vtanh.f32 %v1011_v60 }
 0x128   :  { %v2017_v62 = vpop.eup %2016  ;;  %v725_v5 = vpop.f32.mrb[25].mxu1  ;;  %v982_v8 = vadd.f32 %v2217_v40, %v597_v4  ;;  %2042 = vtanh.f32 %v984_v2 }
 0x129   :  { %v2019_v1 = vpop.eup %2018  ;;  %v1014_v9 = vadd.f32 %v2217_v40, %v725_v5  ;;  %v1853_v10 = vpop.f32.mrb[26].mxu0  ;;  %2044 = vtanh.f32 %v1016_v3 }
 0x12a   :  { %v2021_v6 = vpop.eup %2020  ;;  %v1627_v7 = vpack.c.bf16 %v2019_v1, %v2011_v56  ;;  %v1885_v11 = vpop.f32.mrb[26].mxu1  ;;  %v985_v14 = vadd.f32 %v1853_v10, %v2217_v40  ;;  %2046 = vtanh.f32 %v982_v8 }
 0x12b   :  { %v2023_v12 = vpop.eup %2022  ;;  %v1707_v13 = vpack.c.bf16 %v2021_v6, %v2013_v59  ;;  %v600_v15 = vpop.f32.mrb[27].mxu0  ;;  %v1017_v19 = vadd.f32 %v1885_v11, %v2217_v40  ;;  %2048 = vtanh.f32 %v1014_v9 }
 0x12c   :  { %v728_v16 = vpop.f32.mrb[27].mxu1  ;;  %v2025_v17 = vpop.eup %2024  ;;  %1747 = vst [vmem:[%s2382_s3 + $0x48] sm:$0xff] %v1627_v7   ;;  %v1622_v18 = vpack.c.bf16 %v2023_v12, %v2015_v61  ;;  %v983_v22 = vadd.f32 %v2217_v40, %v600_v15  ;;  %2050 = vtanh.f32 %v985_v14 }
 0x12d   :  { %v2027_v20 = vpop.eup %2026  ;;  %1763 = vst [vmem:[%s2382_s3 + $0xc8] sm:$0xff] %v1707_v13   ;;  %v1702_v21 = vpack.c.bf16 %v2025_v17, %v2017_v62  ;;  %v1015_v24 = vadd.f32 %v2217_v40, %v728_v16  ;;  %2052 = vtanh.f32 %v1017_v19  ;;  %v1856_v27 = vpop.f32.mrb[28].mxu0 }
 0x12e   :  { %v2029_v23 = vpop.eup %2028  ;;  %1746 = vst [vmem:[%s2382_s3 + $0x40] sm:$0xff] %v1622_v18   ;;  %v1888_v28 = vpop.f32.mrb[28].mxu1  ;;  %2054 = vtanh.f32 %v983_v22  ;;  %v988_v30 = vadd.f32 %v1856_v27, %v2217_v40 }
 0x12f   :  { %v2031_v25 = vpop.eup %2030  ;;  %1762 = vst [vmem:[%s2382_s3 + $0xc0] sm:$0xff] %v1702_v21   ;;  %v1020_v31 = vadd.f32 %v1888_v28, %v2217_v40  ;;  %v613_v32 = vpop.f32.mrb[29].mxu0  ;;  %2056 = vtanh.f32 %v1015_v24 }
 0x130   :  { %v2033_v26 = vpop.eup %2032  ;;  %v741_v33 = vpop.f32.mrb[29].mxu1  ;;  %v986_v36 = vadd.f32 %v2217_v40, %v613_v32  ;;  %2058 = vtanh.f32 %v988_v30 }
 0x131   :  { %v2035_v29 = vpop.eup %2034  ;;  %v1018_v37 = vadd.f32 %v2217_v40, %v741_v33  ;;  %v1857_v38 = vpop.f32.mrb[30].mxu0  ;;  %2060 = vtanh.f32 %v1020_v31 }
 0x132   :  { %v2037_v34 = vpop.eup %2036  ;;  %v1637_v35 = vpack.c.bf16 %v2035_v29, %v2027_v20  ;;  %v1889_v39 = vpop.f32.mrb[30].mxu1  ;;  %v989_v43 = vadd.f32 %v1857_v38, %v2217_v40  ;;  %2062 = vtanh.f32 %v986_v36 }
 0x133   :  { %v2039_v41 = vpop.eup %2038  ;;  %v1717_v42 = vpack.c.bf16 %v2037_v34, %v2029_v23  ;;  %v616_v44 = vpop.f32.mrb[31].mxu0  ;;  %v1021_v48 = vadd.f32 %v1889_v39, %v2217_v40  ;;  %2064 = vtanh.f32 %v1018_v37 }
 0x134   :  { %v744_v45 = vpop.f32.mrb[31].mxu1  ;;  %v2041_v46 = vpop.eup %2040  ;;  %1749 = vst [vmem:[%s2382_s3 + $0x58] sm:$0xff] %v1637_v35   ;;  %v1632_v47 = vpack.c.bf16 %v2039_v41, %v2031_v25  ;;  %v987_v51 = vadd.f32 %v2217_v40, %v616_v44  ;;  %2066 = vtanh.f32 %v989_v43 }
 0x135   :  { %v2043_v49 = vpop.eup %2042  ;;  %1765 = vst [vmem:[%s2382_s3 + $0xd8] sm:$0xff] %v1717_v42   ;;  %v1712_v50 = vpack.c.bf16 %v2041_v46, %v2033_v26  ;;  %v1019_v53 = vadd.f32 %v2217_v40, %v744_v45  ;;  %2068 = vtanh.f32 %v1021_v48 }
 0x136   :  { %v2045_v52 = vpop.eup %2044  ;;  %1748 = vst [vmem:[%s2382_s3 + $0x50] sm:$0xff] %v1632_v47   ;;  %2070 = vtanh.f32 %v987_v51 }
 0x137   :  { %v2047_v54 = vpop.eup %2046  ;;  %1764 = vst [vmem:[%s2382_s3 + $0xd0] sm:$0xff] %v1712_v50   ;;  %2072 = vtanh.f32 %v1019_v53 }
 0x138   :  { %v2049_v55 = vpop.eup %2048 }
 0x139   :  { %v2051_v56 = vpop.eup %2050 }
 0x13a   :  { %v2053_v57 = vpop.eup %2052  ;;  %v1647_v58 = vpack.c.bf16 %v2051_v56, %v2043_v49 }
 0x13b   :  { %v2055_v59 = vpop.eup %2054  ;;  %v1727_v60 = vpack.c.bf16 %v2053_v57, %v2045_v52 }
 0x13c   :  { %v2057_v61 = vpop.eup %2056  ;;  %1751 = vst [vmem:[%s2382_s3 + $0x68] sm:$0xff] %v1647_v58   ;;  %v1642_v40 = vpack.c.bf16 %v2055_v59, %v2047_v54 }
 0x13d   :  { %v2059_v62 = vpop.eup %2058  ;;  %1767 = vst [vmem:[%s2382_s3 + $0xe8] sm:$0xff] %v1727_v60   ;;  %v1722_v63 = vpack.c.bf16 %v2057_v61, %v2049_v55 }
 0x13e   :  { %v2061_v0 = vpop.eup %2060  ;;  %1750 = vst [vmem:[%s2382_s3 + $0x60] sm:$0xff] %v1642_v40  }
 0x13f   :  { %v2063_v1 = vpop.eup %2062  ;;  %1766 = vst [vmem:[%s2382_s3 + $0xe0] sm:$0xff] %v1722_v63  }
 0x140   :  { %v2065_v2 = vpop.eup %2064 }
 0x141   :  { %v2067_v3 = vpop.eup %2066 }
 0x142   :  { %v2069_v4 = vpop.eup %2068  ;;  %v1657_v5 = vpack.c.bf16 %v2067_v3, %v2059_v62 }
 0x143   :  { %v2071_v6 = vpop.eup %2070  ;;  %v1737_v7 = vpack.c.bf16 %v2069_v4, %v2061_v0 }
 0x144   :  { %v2073_v8 = vpop.eup %2072  ;;  %1753 = vst [vmem:[%s2382_s3 + $0x78] sm:$0xff] %v1657_v5   ;;  %v1652_v9 = vpack.c.bf16 %v2071_v6, %v2063_v1 }
 0x145   :  { %1769 = vst [vmem:[%s2382_s3 + $0xf8] sm:$0xff] %v1737_v7   ;;  %v1732_v10 = vpack.c.bf16 %v2073_v8, %v2065_v2 }
 0x146   :  { %1752 = vst [vmem:[%s2382_s3 + $0x70] sm:$0xff] %v1652_v9  }
 0x147   :  { %1768 = vst [vmem:[%s2382_s3 + $0xf0] sm:$0xff] %v1732_v10  }

</bundles_post_ra>
